<compile_context>
chip_gen: v5e
topology: v5e:2x2
jax: 0.10.0
libtpu: 0.0.40
codegen_flags: <defaults>
</compile_context>

<pallas_src>
import numpy as np
import jax
import jax.numpy as jnp
from jax.experimental import pallas as pl
from jax.experimental.pallas import tpu as pltpu  # noqa: F401  (kept for TPU-specific params)

# ----------------------------- configuration (small) -----------------------------
N_LABELS   = 10          # unused in forward
LAT_SIZE   = 32
IMAGE_SIZE = 16
CHANNELS   = 3           # out_chan
N_FILTER   = 8
N_CALLS    = 2
BATCH      = 2

KERNEL_SIZES = [2 ** i + 1 for i in range(1, int(np.log2(IMAGE_SIZE) - 1))]    # [3, 5]
PADDINGS     = [2 ** (i - 1) for i in range(1, int(np.log2(IMAGE_SIZE) - 1))]  # [1, 2]
N_SCALES   = len(KERNEL_SIZES)
C_FACTOR   = 3 * N_SCALES            # (identity, grad_x, grad_y) per scale
GROUPS     = C_FACTOR // 3           # one conv group per scale
C_BIG      = N_FILTER * C_FACTOR     # 48
C_GRP      = C_BIG // GROUPS         # 24
HW         = IMAGE_SIZE * IMAGE_SIZE # 256
EPS        = 1e-5
N_SOB      = 2 * N_SCALES            # gx, gy per scale


# ----------------------------- SinSobel filter bank ------------------------------
def _sin_sobel_kernels(k):
    p = np.linspace(-np.pi / 2.0, np.pi / 2.0, k)
    win, grad = np.cos(p), np.sin(p)
    kx = np.outer(win, grad)
    kx = kx / (np.abs(kx).sum() + 1e-8)
    ky = kx.T.copy()
    return kx.astype(np.float32), ky.astype(np.float32)


def _conv_matrix(kern, pad):
    """[HW, HW] matrix S with S[q, p] = kernel tap mapping input pixel p to output q
    (zero padding folded in)."""
    k = kern.shape[0]
    S = np.zeros((HW, HW), np.float32)
    for h in range(IMAGE_SIZE):
        for w in range(IMAGE_SIZE):
            for dy in range(k):
                for dx in range(k):
                    hh, ww = h + dy - pad, w + dx - pad
                    if 0 <= hh < IMAGE_SIZE and 0 <= ww < IMAGE_SIZE:
                        S[h * IMAGE_SIZE + w, hh * IMAGE_SIZE + ww] = kern[dy, dx]
    return S


def _build_sobel_matmul():
    mats = []
    for (k, pad) in zip(KERNEL_SIZES, PADDINGS):
        kx, ky = _sin_sobel_kernels(k)
        mats.append(_conv_matrix(kx, pad).T)   # gx (right-multiply form)
        mats.append(_conv_matrix(ky, pad).T)   # gy
    return np.concatenate(mats, axis=1)        # [HW, N_SOB*HW]


# bf16 constant: halves the only non-trivial DMA and enables single-pass bf16 MXU matmul
SOB_MAT = jnp.asarray(_build_sobel_matmul()).astype(jnp.bfloat16)   # [256, 1024]


# ----------------------------- the fused Pallas kernel ------------------------------
def _decoder_kernel(sob_ref, state0_ref,
                    dynA_ref, dynAb_ref, dynW2_ref, dynW2b_ref,
                    fcA_ref, fcAb_ref, fcW2_ref, fcW2b_ref,
                    outW_ref, outB_ref, noise_ref,
                    embs_ref, out_ref, raw_ref):
    s = state0_ref[...]                        # [B*F, HW]  merged-batch CA state (lane-dense)
    embs_ref[0] = s

    sob_mat = sob_ref[...]                     # bf16 [HW, N_SOB*HW]
    fcA, fcAb = fcA_ref[...], fcAb_ref[...]
    fcW2, fcW2b = fcW2_ref[...], fcW2b_ref[...]

    for c in range(N_CALLS):
        # --- frac_sobel (split_out): one bf16 MXU matmul for the whole batch
        sob = jnp.dot(s.astype(jnp.bfloat16), sob_mat,
                      preferred_element_type=jnp.float32)              # [B*F, N_SOB*HW] f32

        # build [B*C_BIG, HW]: per sample, per scale -> (identity, gx, gy)
        feats = []
        for b in range(BATCH):
            s_b = s[b * N_FILTER:(b + 1) * N_FILTER]
            sb_b = sob[b * N_FILTER:(b + 1) * N_FILTER]
            for si in range(N_SCALES):
                gx = sb_b[:, (2 * si + 0) * HW:(2 * si + 1) * HW]
                gy = sb_b[:, (2 * si + 1) * HW:(2 * si + 2) * HW]
                feats += [s_b, gx, gy]
        x = jnp.concatenate(feats, axis=0)                             # [B*C_BIG, HW]

        # --- frac_norm: InstanceNorm2d (affine=False, biased var), single reduction pass
        mean = jnp.mean(x, axis=1, keepdims=True)
        m2 = jnp.mean(x * x, axis=1, keepdims=True)
        xn = (x - mean) * jax.lax.rsqrt(m2 - mean * mean + EPS)

        y_rows = []
        for b in range(BATCH):
            xn_b = xn[b * C_BIG:(b + 1) * C_BIG]                       # [C_BIG, HW]

            # --- frac_dyna_conv: per-sample grouped 1x1 residual convs (block-diag weights)
            sc_h = (jnp.dot(dynA_ref[b, c], xn_b,
                            preferred_element_type=jnp.float32)
                    + dynAb_ref[b, c])                                 # [2*C_BIG, HW]
            skip_d = sc_h[:C_BIG]
            h_d = jnp.maximum(sc_h[C_BIG:], 0.0)
            gate = (skip_d
                    + jnp.dot(dynW2_ref[b, c], h_d,
                              preferred_element_type=jnp.float32)
                    + dynW2b_ref[b, c])                                # [C_BIG, HW]
            x2_b = xn_b * (1.0 / (1.0 + jnp.exp(-gate)))               # sigmoid gate

            # --- frac_conv: ResidualBlock (1x1) C_BIG -> N_FILTER (skip/body fused LHS)
            sk_h = (jnp.dot(fcA, x2_b, preferred_element_type=jnp.float32)
                    + fcAb)                                            # [2*F, HW]
            skip_f = sk_h[:N_FILTER]
            h_f = jnp.maximum(sk_h[N_FILTER:], 0.0)
            y_b = (skip_f
                   + jnp.dot(fcW2, h_f, preferred_element_type=jnp.float32)
                   + fcW2b)                                            # [F, HW]

            # --- frac_noise: add the pre-scaled noise map (per-channel weight * N(0,1))
            y_b = y_b + noise_ref[c, b * N_FILTER:(b + 1) * N_FILTER]
            y_rows.append(y_b)

        y = jnp.concatenate(y_rows, axis=0)                            # [B*F, HW]

        # --- CA residual update
        s = s + 0.1 * y
        embs_ref[c + 1] = s

    # --- out_conv (1x1, F -> CHANNELS) + clamp
    outW, outB = outW_ref[...], outB_ref[...]
    for b in range(BATCH):
        s_b = s[b * N_FILTER:(b + 1) * N_FILTER]
        o_b = jnp.dot(outW, s_b, preferred_element_type=jnp.float32) + outB   # [CHANNELS, HW]
        raw_ref[b] = o_b
        out_ref[b] = jnp.clip(o_b, -1.0, 1.0)


def _decoder_pallas(dynA, dynAb, dynW2, dynW2b, state0,
                    fcA, fcAb, fcW2, fcW2b, outW, outB, sc_noise):
    cost = pl.CostEstimate(flops=33_000_000, transcendentals=50_000,
                           bytes_accessed=1_000_000)
    return pl.pallas_call(
        _decoder_kernel,
        out_shape=(
            jax.ShapeDtypeStruct((N_CALLS + 1, BATCH * N_FILTER, HW), jnp.float32),
            jax.ShapeDtypeStruct((BATCH, CHANNELS, HW), jnp.float32),
            jax.ShapeDtypeStruct((BATCH, CHANNELS, HW), jnp.float32),
        ),
        cost_estimate=cost,
    )(SOB_MAT, state0, dynA, dynAb, dynW2, dynW2b,
      fcA, fcAb, fcW2, fcW2b, outW, outB, sc_noise)


# ----------------------------- parameter setup (deterministic) ---------------------
def _orth_row(key, n):
    v = jax.random.normal(key, (n,), jnp.float32)
    return v / jnp.linalg.norm(v)


def _dense(key, fan_in, shape, scale=1.0):
    return scale * jax.random.normal(key, shape, jnp.float32) / np.sqrt(fan_in)


P_DYN = 3 * GROUPS * C_GRP * C_GRP + 3 * C_BIG


def init_params(key):
    ki = iter(jax.random.split(key, 64))
    p = {}
    p['seed'] = _orth_row(next(ki), N_FILTER)                 # per-channel seed value
    p['in_proj'] = _orth_row(next(ki), N_FILTER)              # unused (ca_init=None)
    p['frac_lat'] = []
    for _ in range(N_CALLS):
        p['frac_lat'].append(dict(
            ws=_dense(next(ki), LAT_SIZE, (LAT_SIZE, LAT_SIZE)), bs=jnp.zeros((1, LAT_SIZE)),
            w1=_dense(next(ki), LAT_SIZE, (LAT_SIZE, LAT_SIZE)), b1=jnp.zeros((1, LAT_SIZE)),
            w2=_dense(next(ki), LAT_SIZE, (LAT_SIZE, LAT_SIZE)), b2=jnp.zeros((1, LAT_SIZE)),
        ))
    # DynaResidualBlock hyper-network (lat_factor=2)
    p['hyper_w1'] = _dense(next(ki), LAT_SIZE, (LAT_SIZE, 2 * LAT_SIZE))
    p['hyper_b1'] = jnp.zeros((1, 2 * LAT_SIZE))
    p['hyper_w2'] = _dense(next(ki), 2 * LAT_SIZE, (2 * LAT_SIZE, P_DYN), scale=0.1)
    p['hyper_b2'] = jnp.zeros((1, P_DYN))
    # frac_conv (ResidualBlock C_BIG -> N_FILTER, 1x1 convs)
    p['fc_wskip'] = _dense(next(ki), C_BIG, (C_BIG, N_FILTER)); p['fc_bskip'] = jnp.zeros((N_FILTER,))
    p['fc_w1'] = _dense(next(ki), C_BIG, (C_BIG, N_FILTER));    p['fc_b1'] = jnp.zeros((N_FILTER,))
    p['fc_w2'] = _dense(next(ki), N_FILTER, (N_FILTER, N_FILTER)); p['fc_b2'] = jnp.zeros((N_FILTER,))
    # NoiseInjection weights (zero init, per standard impl)
    p['noise_w'] = [jnp.zeros((N_FILTER,)) for _ in range(N_CALLS)]
    # out_conv 1x1: N_FILTER -> CHANNELS
    p['out_w'] = _dense(next(ki), N_FILTER, (N_FILTER, CHANNELS)); p['out_b'] = jnp.zeros((CHANNELS,))
    return p


# ----------------------------- wrapper-side (tiny XLA) glue -------------------------
def _lat_residual(lat, blk):
    skip = lat @ blk['ws'] + blk['bs']
    h = jnp.maximum(lat @ blk['w1'] + blk['b1'], 0.0)
    h = h @ blk['w2'] + blk['b2']
    return lat + 0.1 * (skip + h)


def _gen_dyna_params(lat, p):
    h = jnp.maximum(lat @ p['hyper_w1'] + p['hyper_b1'], 0.0)
    w = h @ p['hyper_w2'] + p['hyper_b2']
    wsz = GROUPS * C_GRP * C_GRP
    B = lat.shape[0]
    dw1 = w[:, 0 * wsz:1 * wsz].reshape(B, GROUPS, C_GRP, C_GRP)
    dw2 = w[:, 1 * wsz:2 * wsz].reshape(B, GROUPS, C_GRP, C_GRP)
    dws = w[:, 2 * wsz:3 * wsz].reshape(B, GROUPS, C_GRP, C_GRP)
    o = 3 * wsz
    db1 = w[:, o + 0 * C_BIG:o + 1 * C_BIG]
    db2 = w[:, o + 1 * C_BIG:o + 2 * C_BIG]
    dbs = w[:, o + 2 * C_BIG:o + 3 * C_BIG]
    return dw1, db1, dw2, db2, dws, dbs


def _block_diag_t(w):
    # w: [B, GROUPS, C_GRP(in), C_GRP(out)] -> [B, C_BIG, C_BIG] with w[b,g].T on the diagonal
    wt = jnp.swapaxes(w, -1, -2)                     # [B, G, out, in]
    eye = jnp.eye(GROUPS, dtype=w.dtype)
    bd = jnp.einsum('bgoi,gh->bgohi', wt, eye)
    return bd.reshape(w.shape[0], C_BIG, C_BIG)


def _pack_dyna(dw1, db1, dw2, db2, dws, dbs):
    bd_ws = _block_diag_t(dws)
    bd_w1 = _block_diag_t(dw1)
    bd_w2 = _block_diag_t(dw2)
    dynA_c = jnp.concatenate([bd_ws, bd_w1], axis=1)                 # [B, 2*C_BIG, C_BIG]
    dynAb_c = jnp.concatenate([dbs, db1], axis=1)[..., None]         # [B, 2*C_BIG, 1]
    dynW2_c = bd_w2                                                  # [B, C_BIG, C_BIG]
    dynW2b_c = db2[..., None]                                        # [B, C_BIG, 1]
    return dynA_c, dynAb_c, dynW2_c, dynW2b_c


def _pack_static(p):
    state0 = jnp.broadcast_to(p['seed'][None, :, None],
                              (BATCH, N_FILTER, HW)).reshape(BATCH * N_FILTER, HW)
    fcA = jnp.concatenate([p['fc_wskip'].T, p['fc_w1'].T], axis=0)          # [2F, C_BIG]
    fcAb = jnp.concatenate([p['fc_bskip'], p['fc_b1']], axis=0)[:, None]    # [2F, 1]
    fcW2 = p['fc_w2'].T                                                     # [F, F]
    fcW2b = p['fc_b2'][:, None]                                             # [F, 1]
    outW = p['out_w'].T                                                     # [C, F]
    outB = p['out_b'][:, None]                                              # [C, 1]
    return state0, fcA, fcAb, fcW2, fcW2b, outW, outB


# ----------------------------- Decoder.forward -------------------------------------
def decoder_forward(lat, params, noise_key):
    """Returns (out, out_embs, out_raw) in NCHW, matching the PyTorch module
    with ca_init=None, log_mix_out=False, ce_out=False."""
    # lat chain + hyper-network (state-independent, tiny) -> per-call dyna weights.
    dynA_cs, dynAb_cs, dynW2_cs, dynW2b_cs = [], [], [], []
    lat_c = lat
    for c in range(N_CALLS):
        lat_c = _lat_residual(lat_c, params['frac_lat'][c])
        a, ab, w2, w2b = _pack_dyna(*_gen_dyna_params(lat_c, params))
        dynA_cs.append(a); dynAb_cs.append(ab); dynW2_cs.append(w2); dynW2b_cs.append(w2b)
    dynA = jnp.stack(dynA_cs, axis=1)       # [B, N_CALLS, 2*C_BIG, C_BIG]
    dynAb = jnp.stack(dynAb_cs, axis=1)     # [B, N_CALLS, 2*C_BIG, 1]
    dynW2 = jnp.stack(dynW2_cs, axis=1)     # [B, N_CALLS, C_BIG, C_BIG]
    dynW2b = jnp.stack(dynW2b_cs, axis=1)   # [B, N_CALLS, C_BIG, 1]

    state0, fcA, fcAb, fcW2, fcW2b, outW, outB = _pack_static(params)

    # NoiseInjection: one N(0,1) map per (call, sample), shared across channels,
    # pre-scaled by the per-channel noise weight (zero-initialised as in PyTorch).
    noise = jax.random.normal(noise_key, (N_CALLS, BATCH, HW), jnp.float32)
    nw = jnp.stack(params['noise_w'], axis=0)                          # [N_CALLS, F]
    sc_noise = (nw[:, None, :, None] * noise[:, :, None, :]).reshape(
        N_CALLS, BATCH * N_FILTER, HW)

    embs, out_c, out_raw = _decoder_pallas(
        dynA, dynAb, dynW2, dynW2b, state0, fcA, fcAb, fcW2, fcW2b, outW, outB, sc_noise)

    embs = embs.reshape(N_CALLS + 1, BATCH, N_FILTER, IMAGE_SIZE, IMAGE_SIZE)
    out_c = out_c.reshape(BATCH, CHANNELS, IMAGE_SIZE, IMAGE_SIZE)
    out_raw = out_raw.reshape(BATCH, CHANNELS, IMAGE_SIZE, IMAGE_SIZE)
    return out_c, [embs[i] for i in range(N_CALLS + 1)], out_raw


if __name__ == "__main__":
    key = jax.random.PRNGKey(0)
    params = init_params(key)
    lat = jax.random.normal(jax.random.fold_in(key, 999), (BATCH, LAT_SIZE), jnp.float32)
    noise_key = jax.random.fold_in(key, 1234)

    fwd = jax.jit(decoder_forward)
    out, out_embs, out_raw = fwd(lat, params, noise_key)
    jax.block_until_ready(out)
    jax.block_until_ready(out_raw)
    for e in out_embs:
        jax.block_until_ready(e)

    assert out.shape == (BATCH, CHANNELS, IMAGE_SIZE, IMAGE_SIZE)
    assert out_raw.shape == (BATCH, CHANNELS, IMAGE_SIZE, IMAGE_SIZE)
    assert len(out_embs) == N_CALLS + 1
    assert all(e.shape == (BATCH, N_FILTER, IMAGE_SIZE, IMAGE_SIZE) for e in out_embs)
    assert bool(jnp.all(jnp.isfinite(out)))
    print("KERNEL_OK")
</pallas_src>

<mosaic_0001>
module attributes {stable_mosaic.version = 11 : i64} {
  func.func @_decoder_kernel(%arg0: memref<256x1024xbf16, #tpu.memory_space<vmem>>, %arg1: memref<16x256xf32, #tpu.memory_space<vmem>>, %arg2: memref<2x2x96x48xf32, #tpu.memory_space<vmem>>, %arg3: memref<2x2x96x1xf32, #tpu.memory_space<vmem>>, %arg4: memref<2x2x48x48xf32, #tpu.memory_space<vmem>>, %arg5: memref<2x2x48x1xf32, #tpu.memory_space<vmem>>, %arg6: memref<16x48xf32, #tpu.memory_space<vmem>>, %arg7: memref<16x1xf32, #tpu.memory_space<vmem>>, %arg8: memref<8x8xf32, #tpu.memory_space<vmem>>, %arg9: memref<8x1xf32, #tpu.memory_space<vmem>>, %arg10: memref<3x8xf32, #tpu.memory_space<vmem>>, %arg11: memref<3x1xf32, #tpu.memory_space<vmem>>, %arg12: memref<2x16x256xf32, #tpu.memory_space<vmem>>, %arg13: memref<3x16x256xf32, #tpu.memory_space<vmem>>, %arg14: memref<2x3x256xf32, #tpu.memory_space<vmem>>, %arg15: memref<2x3x256xf32, #tpu.memory_space<vmem>>) attributes {dimension_semantics = [], scalar_prefetch = 0 : i64, scratch_operands = 0 : i64, tpu.core_type = #tpu.core_type<tc>} {
    %c0 = arith.constant 0 : index
    %c0_0 = arith.constant 0 : index
    %0 = vector.load %arg1[%c0, %c0_0] : memref<16x256xf32, #tpu.memory_space<vmem>>, vector<16x256xf32>
    %c0_1 = arith.constant 0 : index
    %c0_2 = arith.constant 0 : index
    %c0_3 = arith.constant 0 : index
    %1 = vector.load %arg13[%c0_1, %c0_2, %c0_3] : memref<3x16x256xf32, #tpu.memory_space<vmem>>, vector<1x16x256xf32>
    %2 = vector.shape_cast %1 : vector<1x16x256xf32> to vector<16x256xf32>
    %3 = vector.shape_cast %0 : vector<16x256xf32> to vector<1x16x256xf32>
    tpu.vector_store %arg13[%c0_1, %c0_2, %c0_3], %3 {strides = array<i32>} : memref<3x16x256xf32, #tpu.memory_space<vmem>>, vector<1x16x256xf32>,
    %c0_4 = arith.constant 0 : index
    %c0_5 = arith.constant 0 : index
    %4 = vector.load %arg0[%c0_4, %c0_5] : memref<256x1024xbf16, #tpu.memory_space<vmem>>, vector<256x1024xbf16>
    %c0_6 = arith.constant 0 : index
    %c0_7 = arith.constant 0 : index
    %5 = vector.load %arg6[%c0_6, %c0_7] : memref<16x48xf32, #tpu.memory_space<vmem>>, vector<16x48xf32>
    %c0_8 = arith.constant 0 : index
    %c0_9 = arith.constant 0 : index
    %6 = vector.load %arg7[%c0_8, %c0_9] : memref<16x1xf32, #tpu.memory_space<vmem>>, vector<16x1xf32>
    %c0_10 = arith.constant 0 : index
    %c0_11 = arith.constant 0 : index
    %7 = vector.load %arg8[%c0_10, %c0_11] : memref<8x8xf32, #tpu.memory_space<vmem>>, vector<8x8xf32>
    %c0_12 = arith.constant 0 : index
    %c0_13 = arith.constant 0 : index
    %8 = vector.load %arg9[%c0_12, %c0_13] : memref<8x1xf32, #tpu.memory_space<vmem>>, vector<8x1xf32>
    %9 = arith.truncf %0 : vector<16x256xf32> to vector<16x256xbf16>
    %cst = arith.constant dense<0.000000e+00> : vector<16x1024xf32>
    %10 = tpu.matmul %9, %4, %cst {dimension_numbers = #tpu.dot_dimension_numbers<[1], [0], [0], [1], [0, 0, 1, 1], [], []>} : vector<16x256xbf16>, vector<256x1024xbf16>, vector<16x1024xf32> -> vector<16x1024xf32>
    %11 = vector.extract_strided_slice %0 {offsets = [0, 0], sizes = [8, 256], strides = [1, 1]} : vector<16x256xf32> to vector<8x256xf32>
    %12 = vector.extract_strided_slice %10 {offsets = [0, 0], sizes = [8, 1024], strides = [1, 1]} : vector<16x1024xf32> to vector<8x1024xf32>
    %13 = vector.extract_strided_slice %12 {offsets = [0, 0], sizes = [8, 256], strides = [1, 1]} : vector<8x1024xf32> to vector<8x256xf32>
    %14 = vector.extract_strided_slice %12 {offsets = [0, 256], sizes = [8, 256], strides = [1, 1]} : vector<8x1024xf32> to vector<8x256xf32>
    %15 = vector.extract_strided_slice %12 {offsets = [0, 512], sizes = [8, 256], strides = [1, 1]} : vector<8x1024xf32> to vector<8x256xf32>
    %16 = vector.extract_strided_slice %12 {offsets = [0, 768], sizes = [8, 256], strides = [1, 1]} : vector<8x1024xf32> to vector<8x256xf32>
    %17 = vector.extract_strided_slice %0 {offsets = [8, 0], sizes = [8, 256], strides = [1, 1]} : vector<16x256xf32> to vector<8x256xf32>
    %18 = vector.extract_strided_slice %10 {offsets = [8, 0], sizes = [8, 1024], strides = [1, 1]} : vector<16x1024xf32> to vector<8x1024xf32>
    %19 = vector.extract_strided_slice %18 {offsets = [0, 0], sizes = [8, 256], strides = [1, 1]} : vector<8x1024xf32> to vector<8x256xf32>
    %20 = vector.extract_strided_slice %18 {offsets = [0, 256], sizes = [8, 256], strides = [1, 1]} : vector<8x1024xf32> to vector<8x256xf32>
    %21 = vector.extract_strided_slice %18 {offsets = [0, 512], sizes = [8, 256], strides = [1, 1]} : vector<8x1024xf32> to vector<8x256xf32>
    %22 = vector.extract_strided_slice %18 {offsets = [0, 768], sizes = [8, 256], strides = [1, 1]} : vector<8x1024xf32> to vector<8x256xf32>
    %23 = tpu.concatenate %11, %13, %14, %11, %15, %16, %17, %19, %20, %17, %21, %22 in 0 : vector<8x256xf32>, vector<8x256xf32>, vector<8x256xf32>, vector<8x256xf32>, vector<8x256xf32>, vector<8x256xf32>, vector<8x256xf32>, vector<8x256xf32>, vector<8x256xf32>, vector<8x256xf32>, vector<8x256xf32>, vector<8x256xf32> -> vector<96x256xf32>
    %cst_14 = arith.constant dense<0.000000e+00> : vector<96xf32>
    %24 = vector.multi_reduction <add>, %23, %cst_14 [1] : vector<96x256xf32> to vector<96xf32>
    %25 = vector.shape_cast %24 : vector<96xf32> to vector<96x1xf32>
    %cst_15 = arith.constant 2.560000e+02 : f32
    %26 = vector.broadcast %cst_15 : f32 to vector<96x1xf32>
    %27 = arith.divf %25, %26 : vector<96x1xf32>
    %28 = arith.mulf %23, %23 : vector<96x256xf32>
    %cst_16 = arith.constant dense<0.000000e+00> : vector<96xf32>
    %29 = vector.multi_reduction <add>, %28, %cst_16 [1] : vector<96x256xf32> to vector<96xf32>
    %30 = vector.shape_cast %29 : vector<96xf32> to vector<96x1xf32>
    %cst_17 = arith.constant 2.560000e+02 : f32
    %31 = vector.broadcast %cst_17 : f32 to vector<96x1xf32>
    %32 = arith.divf %30, %31 : vector<96x1xf32>
    %33 = vector.broadcast %27 : vector<96x1xf32> to vector<96x256xf32>
    %34 = arith.subf %23, %33 : vector<96x256xf32>
    %35 = arith.mulf %27, %27 : vector<96x1xf32>
    %36 = arith.subf %32, %35 : vector<96x1xf32>
    %cst_18 = arith.constant 9.99999974E-6 : f32
    %37 = vector.broadcast %cst_18 : f32 to vector<96x1xf32>
    %38 = arith.addf %36, %37 : vector<96x1xf32>
    %39 = math.rsqrt %38 : vector<96x1xf32>
    %40 = vector.broadcast %39 : vector<96x1xf32> to vector<96x256xf32>
    %41 = arith.mulf %34, %40 : vector<96x256xf32>
    %42 = vector.extract_strided_slice %41 {offsets = [0, 0], sizes = [48, 256], strides = [1, 1]} : vector<96x256xf32> to vector<48x256xf32>
    %c0_19 = arith.constant 0 : index
    %c0_20 = arith.constant 0 : index
    %c0_21 = arith.constant 0 : index
    %c0_22 = arith.constant 0 : index
    %43 = vector.load %arg2[%c0_19, %c0_20, %c0_21, %c0_22] : memref<2x2x96x48xf32, #tpu.memory_space<vmem>>, vector<1x1x96x48xf32>
    %44 = vector.shape_cast %43 : vector<1x1x96x48xf32> to vector<96x48xf32>
    %cst_23 = arith.constant dense<0.000000e+00> : vector<96x256xf32>
    %45 = tpu.matmul %44, %42, %cst_23 {dimension_numbers = #tpu.dot_dimension_numbers<[1], [0], [0], [1], [0, 0, 1, 1], [], []>} : vector<96x48xf32>, vector<48x256xf32>, vector<96x256xf32> -> vector<96x256xf32>
    %c0_24 = arith.constant 0 : index
    %c0_25 = arith.constant 0 : index
    %c0_26 = arith.constant 0 : index
    %c0_27 = arith.constant 0 : index
    %46 = vector.load %arg3[%c0_24, %c0_25, %c0_26, %c0_27] : memref<2x2x96x1xf32, #tpu.memory_space<vmem>>, vector<1x1x96x1xf32>
    %47 = vector.shape_cast %46 : vector<1x1x96x1xf32> to vector<96x1xf32>
    %48 = vector.broadcast %47 : vector<96x1xf32> to vector<96x256xf32>
    %49 = arith.addf %45, %48 : vector<96x256xf32>
    %50 = vector.extract_strided_slice %49 {offsets = [0, 0], sizes = [48, 256], strides = [1, 1]} : vector<96x256xf32> to vector<48x256xf32>
    %51 = vector.extract_strided_slice %49 {offsets = [48, 0], sizes = [48, 256], strides = [1, 1]} : vector<96x256xf32> to vector<48x256xf32>
    %cst_28 = arith.constant 0.000000e+00 : f32
    %52 = vector.broadcast %cst_28 : f32 to vector<48x256xf32>
    %53 = arith.maximumf %51, %52 : vector<48x256xf32>
    %c0_29 = arith.constant 0 : index
    %c0_30 = arith.constant 0 : index
    %c0_31 = arith.constant 0 : index
    %c0_32 = arith.constant 0 : index
    %54 = vector.load %arg4[%c0_29, %c0_30, %c0_31, %c0_32] : memref<2x2x48x48xf32, #tpu.memory_space<vmem>>, vector<1x1x48x48xf32>
    %55 = vector.shape_cast %54 : vector<1x1x48x48xf32> to vector<48x48xf32>
    %cst_33 = arith.constant dense<0.000000e+00> : vector<48x256xf32>
    %56 = tpu.matmul %55, %53, %cst_33 {dimension_numbers = #tpu.dot_dimension_numbers<[1], [0], [0], [1], [0, 0, 1, 1], [], []>} : vector<48x48xf32>, vector<48x256xf32>, vector<48x256xf32> -> vector<48x256xf32>
    %57 = arith.addf %50, %56 : vector<48x256xf32>
    %c0_34 = arith.constant 0 : index
    %c0_35 = arith.constant 0 : index
    %c0_36 = arith.constant 0 : index
    %c0_37 = arith.constant 0 : index
    %58 = vector.load %arg5[%c0_34, %c0_35, %c0_36, %c0_37] : memref<2x2x48x1xf32, #tpu.memory_space<vmem>>, vector<1x1x48x1xf32>
    %59 = vector.shape_cast %58 : vector<1x1x48x1xf32> to vector<48x1xf32>
    %60 = vector.broadcast %59 : vector<48x1xf32> to vector<48x256xf32>
    %61 = arith.addf %57, %60 : vector<48x256xf32>
    %cst_38 = arith.constant 0.000000e+00 : f32
    %62 = vector.broadcast %cst_38 : f32 to vector<48x256xf32>
    %63 = arith.subf %62, %61 : vector<48x256xf32>
    %64 = math.exp %63 : vector<48x256xf32>
    %cst_39 = arith.constant 1.000000e+00 : f32
    %65 = vector.broadcast %cst_39 : f32 to vector<48x256xf32>
    %66 = arith.addf %65, %64 : vector<48x256xf32>
    %cst_40 = arith.constant 1.000000e+00 : f32
    %67 = vector.broadcast %cst_40 : f32 to vector<48x256xf32>
    %68 = arith.divf %67, %66 : vector<48x256xf32>
    %69 = arith.mulf %42, %68 : vector<48x256xf32>
    %cst_41 = arith.constant dense<0.000000e+00> : vector<16x256xf32>
    %70 = tpu.matmul %5, %69, %cst_41 {dimension_numbers = #tpu.dot_dimension_numbers<[1], [0], [0], [1], [0, 0, 1, 1], [], []>} : vector<16x48xf32>, vector<48x256xf32>, vector<16x256xf32> -> vector<16x256xf32>
    %71 = vector.broadcast %6 : vector<16x1xf32> to vector<16x256xf32>
    %72 = arith.addf %70, %71 : vector<16x256xf32>
    %73 = vector.extract_strided_slice %72 {offsets = [0, 0], sizes = [8, 256], strides = [1, 1]} : vector<16x256xf32> to vector<8x256xf32>
    %74 = vector.extract_strided_slice %72 {offsets = [8, 0], sizes = [8, 256], strides = [1, 1]} : vector<16x256xf32> to vector<8x256xf32>
    %cst_42 = arith.constant 0.000000e+00 : f32
    %75 = vector.broadcast %cst_42 : f32 to vector<8x256xf32>
    %76 = arith.maximumf %74, %75 : vector<8x256xf32>
    %cst_43 = arith.constant dense<0.000000e+00> : vector<8x256xf32>
    %77 = tpu.matmul %7, %76, %cst_43 {dimension_numbers = #tpu.dot_dimension_numbers<[1], [0], [0], [1], [0, 0, 1, 1], [], []>} : vector<8x8xf32>, vector<8x256xf32>, vector<8x256xf32> -> vector<8x256xf32>
    %78 = arith.addf %73, %77 : vector<8x256xf32>
    %79 = vector.broadcast %8 : vector<8x1xf32> to vector<8x256xf32>
    %80 = arith.addf %78, %79 : vector<8x256xf32>
    %c0_44 = arith.constant 0 : index
    %c0_45 = arith.constant 0 : index
    %c0_46 = arith.constant 0 : index
    %81 = vector.load %arg12[%c0_44, %c0_45, %c0_46] : memref<2x16x256xf32, #tpu.memory_space<vmem>>, vector<1x8x256xf32>
    %82 = vector.shape_cast %81 : vector<1x8x256xf32> to vector<8x256xf32>
    %83 = arith.addf %80, %82 : vector<8x256xf32>
    %84 = vector.extract_strided_slice %41 {offsets = [48, 0], sizes = [48, 256], strides = [1, 1]} : vector<96x256xf32> to vector<48x256xf32>
    %c1 = arith.constant 1 : index
    %c0_47 = arith.constant 0 : index
    %c0_48 = arith.constant 0 : index
    %c0_49 = arith.constant 0 : index
    %85 = vector.load %arg2[%c1, %c0_47, %c0_48, %c0_49] : memref<2x2x96x48xf32, #tpu.memory_space<vmem>>, vector<1x1x96x48xf32>
    %86 = vector.shape_cast %85 : vector<1x1x96x48xf32> to vector<96x48xf32>
    %cst_50 = arith.constant dense<0.000000e+00> : vector<96x256xf32>
    %87 = tpu.matmul %86, %84, %cst_50 {dimension_numbers = #tpu.dot_dimension_numbers<[1], [0], [0], [1], [0, 0, 1, 1], [], []>} : vector<96x48xf32>, vector<48x256xf32>, vector<96x256xf32> -> vector<96x256xf32>
    %c1_51 = arith.constant 1 : index
    %c0_52 = arith.constant 0 : index
    %c0_53 = arith.constant 0 : index
    %c0_54 = arith.constant 0 : index
    %88 = vector.load %arg3[%c1_51, %c0_52, %c0_53, %c0_54] : memref<2x2x96x1xf32, #tpu.memory_space<vmem>>, vector<1x1x96x1xf32>
    %89 = vector.shape_cast %88 : vector<1x1x96x1xf32> to vector<96x1xf32>
    %90 = vector.broadcast %89 : vector<96x1xf32> to vector<96x256xf32>
    %91 = arith.addf %87, %90 : vector<96x256xf32>
    %92 = vector.extract_strided_slice %91 {offsets = [0, 0], sizes = [48, 256], strides = [1, 1]} : vector<96x256xf32> to vector<48x256xf32>
    %93 = vector.extract_strided_slice %91 {offsets = [48, 0], sizes = [48, 256], strides = [1, 1]} : vector<96x256xf32> to vector<48x256xf32>
    %cst_55 = arith.constant 0.000000e+00 : f32
    %94 = vector.broadcast %cst_55 : f32 to vector<48x256xf32>
    %95 = arith.maximumf %93, %94 : vector<48x256xf32>
    %c1_56 = arith.constant 1 : index
    %c0_57 = arith.constant 0 : index
    %c0_58 = arith.constant 0 : index
    %c0_59 = arith.constant 0 : index
    %96 = vector.load %arg4[%c1_56, %c0_57, %c0_58, %c0_59] : memref<2x2x48x48xf32, #tpu.memory_space<vmem>>, vector<1x1x48x48xf32>
    %97 = vector.shape_cast %96 : vector<1x1x48x48xf32> to vector<48x48xf32>
    %cst_60 = arith.constant dense<0.000000e+00> : vector<48x256xf32>
    %98 = tpu.matmul %97, %95, %cst_60 {dimension_numbers = #tpu.dot_dimension_numbers<[1], [0], [0], [1], [0, 0, 1, 1], [], []>} : vector<48x48xf32>, vector<48x256xf32>, vector<48x256xf32> -> vector<48x256xf32>
    %99 = arith.addf %92, %98 : vector<48x256xf32>
    %c1_61 = arith.constant 1 : index
    %c0_62 = arith.constant 0 : index
    %c0_63 = arith.constant 0 : index
    %c0_64 = arith.constant 0 : index
    %100 = vector.load %arg5[%c1_61, %c0_62, %c0_63, %c0_64] : memref<2x2x48x1xf32, #tpu.memory_space<vmem>>, vector<1x1x48x1xf32>
    %101 = vector.shape_cast %100 : vector<1x1x48x1xf32> to vector<48x1xf32>
    %102 = vector.broadcast %101 : vector<48x1xf32> to vector<48x256xf32>
    %103 = arith.addf %99, %102 : vector<48x256xf32>
    %cst_65 = arith.constant 0.000000e+00 : f32
    %104 = vector.broadcast %cst_65 : f32 to vector<48x256xf32>
    %105 = arith.subf %104, %103 : vector<48x256xf32>
    %106 = math.exp %105 : vector<48x256xf32>
    %cst_66 = arith.constant 1.000000e+00 : f32
    %107 = vector.broadcast %cst_66 : f32 to vector<48x256xf32>
    %108 = arith.addf %107, %106 : vector<48x256xf32>
    %cst_67 = arith.constant 1.000000e+00 : f32
    %109 = vector.broadcast %cst_67 : f32 to vector<48x256xf32>
    %110 = arith.divf %109, %108 : vector<48x256xf32>
    %111 = arith.mulf %84, %110 : vector<48x256xf32>
    %cst_68 = arith.constant dense<0.000000e+00> : vector<16x256xf32>
    %112 = tpu.matmul %5, %111, %cst_68 {dimension_numbers = #tpu.dot_dimension_numbers<[1], [0], [0], [1], [0, 0, 1, 1], [], []>} : vector<16x48xf32>, vector<48x256xf32>, vector<16x256xf32> -> vector<16x256xf32>
    %113 = vector.broadcast %6 : vector<16x1xf32> to vector<16x256xf32>
    %114 = arith.addf %112, %113 : vector<16x256xf32>
    %115 = vector.extract_strided_slice %114 {offsets = [0, 0], sizes = [8, 256], strides = [1, 1]} : vector<16x256xf32> to vector<8x256xf32>
    %116 = vector.extract_strided_slice %114 {offsets = [8, 0], sizes = [8, 256], strides = [1, 1]} : vector<16x256xf32> to vector<8x256xf32>
    %cst_69 = arith.constant 0.000000e+00 : f32
    %117 = vector.broadcast %cst_69 : f32 to vector<8x256xf32>
    %118 = arith.maximumf %116, %117 : vector<8x256xf32>
    %cst_70 = arith.constant dense<0.000000e+00> : vector<8x256xf32>
    %119 = tpu.matmul %7, %118, %cst_70 {dimension_numbers = #tpu.dot_dimension_numbers<[1], [0], [0], [1], [0, 0, 1, 1], [], []>} : vector<8x8xf32>, vector<8x256xf32>, vector<8x256xf32> -> vector<8x256xf32>
    %120 = arith.addf %115, %119 : vector<8x256xf32>
    %121 = vector.broadcast %8 : vector<8x1xf32> to vector<8x256xf32>
    %122 = arith.addf %120, %121 : vector<8x256xf32>
    %c0_71 = arith.constant 0 : index
    %c8 = arith.constant 8 : index
    %c0_72 = arith.constant 0 : index
    %123 = vector.load %arg12[%c0_71, %c8, %c0_72] : memref<2x16x256xf32, #tpu.memory_space<vmem>>, vector<1x8x256xf32>
    %124 = vector.shape_cast %123 : vector<1x8x256xf32> to vector<8x256xf32>
    %125 = arith.addf %122, %124 : vector<8x256xf32>
    %126 = tpu.concatenate %83, %125 in 0 : vector<8x256xf32>, vector<8x256xf32> -> vector<16x256xf32>
    %cst_73 = arith.constant 1.000000e-01 : f32
    %127 = vector.broadcast %cst_73 : f32 to vector<16x256xf32>
    %128 = arith.mulf %127, %126 : vector<16x256xf32>
    %129 = arith.addf %0, %128 : vector<16x256xf32>
    %c1_74 = arith.constant 1 : index
    %c0_75 = arith.constant 0 : index
    %c0_76 = arith.constant 0 : index
    %130 = vector.load %arg13[%c1_74, %c0_75, %c0_76] : memref<3x16x256xf32, #tpu.memory_space<vmem>>, vector<1x16x256xf32>
    %131 = vector.shape_cast %130 : vector<1x16x256xf32> to vector<16x256xf32>
    %132 = vector.shape_cast %129 : vector<16x256xf32> to vector<1x16x256xf32>
    tpu.vector_store %arg13[%c1_74, %c0_75, %c0_76], %132 {strides = array<i32>} : memref<3x16x256xf32, #tpu.memory_space<vmem>>, vector<1x16x256xf32>,
    %133 = arith.truncf %129 : vector<16x256xf32> to vector<16x256xbf16>
    %cst_77 = arith.constant dense<0.000000e+00> : vector<16x1024xf32>
    %134 = tpu.matmul %133, %4, %cst_77 {dimension_numbers = #tpu.dot_dimension_numbers<[1], [0], [0], [1], [0, 0, 1, 1], [], []>} : vector<16x256xbf16>, vector<256x1024xbf16>, vector<16x1024xf32> -> vector<16x1024xf32>
    %135 = vector.extract_strided_slice %129 {offsets = [0, 0], sizes = [8, 256], strides = [1, 1]} : vector<16x256xf32> to vector<8x256xf32>
    %136 = vector.extract_strided_slice %134 {offsets = [0, 0], sizes = [8, 1024], strides = [1, 1]} : vector<16x1024xf32> to vector<8x1024xf32>
    %137 = vector.extract_strided_slice %136 {offsets = [0, 0], sizes = [8, 256], strides = [1, 1]} : vector<8x1024xf32> to vector<8x256xf32>
    %138 = vector.extract_strided_slice %136 {offsets = [0, 256], sizes = [8, 256], strides = [1, 1]} : vector<8x1024xf32> to vector<8x256xf32>
    %139 = vector.extract_strided_slice %136 {offsets = [0, 512], sizes = [8, 256], strides = [1, 1]} : vector<8x1024xf32> to vector<8x256xf32>
    %140 = vector.extract_strided_slice %136 {offsets = [0, 768], sizes = [8, 256], strides = [1, 1]} : vector<8x1024xf32> to vector<8x256xf32>
    %141 = vector.extract_strided_slice %129 {offsets = [8, 0], sizes = [8, 256], strides = [1, 1]} : vector<16x256xf32> to vector<8x256xf32>
    %142 = vector.extract_strided_slice %134 {offsets = [8, 0], sizes = [8, 1024], strides = [1, 1]} : vector<16x1024xf32> to vector<8x1024xf32>
    %143 = vector.extract_strided_slice %142 {offsets = [0, 0], sizes = [8, 256], strides = [1, 1]} : vector<8x1024xf32> to vector<8x256xf32>
    %144 = vector.extract_strided_slice %142 {offsets = [0, 256], sizes = [8, 256], strides = [1, 1]} : vector<8x1024xf32> to vector<8x256xf32>
    %145 = vector.extract_strided_slice %142 {offsets = [0, 512], sizes = [8, 256], strides = [1, 1]} : vector<8x1024xf32> to vector<8x256xf32>
    %146 = vector.extract_strided_slice %142 {offsets = [0, 768], sizes = [8, 256], strides = [1, 1]} : vector<8x1024xf32> to vector<8x256xf32>
    %147 = tpu.concatenate %135, %137, %138, %135, %139, %140, %141, %143, %144, %141, %145, %146 in 0 : vector<8x256xf32>, vector<8x256xf32>, vector<8x256xf32>, vector<8x256xf32>, vector<8x256xf32>, vector<8x256xf32>, vector<8x256xf32>, vector<8x256xf32>, vector<8x256xf32>, vector<8x256xf32>, vector<8x256xf32>, vector<8x256xf32> -> vector<96x256xf32>
    %cst_78 = arith.constant dense<0.000000e+00> : vector<96xf32>
    %148 = vector.multi_reduction <add>, %147, %cst_78 [1] : vector<96x256xf32> to vector<96xf32>
    %149 = vector.shape_cast %148 : vector<96xf32> to vector<96x1xf32>
    %cst_79 = arith.constant 2.560000e+02 : f32
    %150 = vector.broadcast %cst_79 : f32 to vector<96x1xf32>
    %151 = arith.divf %149, %150 : vector<96x1xf32>
    %152 = arith.mulf %147, %147 : vector<96x256xf32>
    %cst_80 = arith.constant dense<0.000000e+00> : vector<96xf32>
    %153 = vector.multi_reduction <add>, %152, %cst_80 [1] : vector<96x256xf32> to vector<96xf32>
    %154 = vector.shape_cast %153 : vector<96xf32> to vector<96x1xf32>
    %cst_81 = arith.constant 2.560000e+02 : f32
    %155 = vector.broadcast %cst_81 : f32 to vector<96x1xf32>
    %156 = arith.divf %154, %155 : vector<96x1xf32>
    %157 = vector.broadcast %151 : vector<96x1xf32> to vector<96x256xf32>
    %158 = arith.subf %147, %157 : vector<96x256xf32>
    %159 = arith.mulf %151, %151 : vector<96x1xf32>
    %160 = arith.subf %156, %159 : vector<96x1xf32>
    %cst_82 = arith.constant 9.99999974E-6 : f32
    %161 = vector.broadcast %cst_82 : f32 to vector<96x1xf32>
    %162 = arith.addf %160, %161 : vector<96x1xf32>
    %163 = math.rsqrt %162 : vector<96x1xf32>
    %164 = vector.broadcast %163 : vector<96x1xf32> to vector<96x256xf32>
    %165 = arith.mulf %158, %164 : vector<96x256xf32>
    %166 = vector.extract_strided_slice %165 {offsets = [0, 0], sizes = [48, 256], strides = [1, 1]} : vector<96x256xf32> to vector<48x256xf32>
    %c0_83 = arith.constant 0 : index
    %c1_84 = arith.constant 1 : index
    %c0_85 = arith.constant 0 : index
    %c0_86 = arith.constant 0 : index
    %167 = vector.load %arg2[%c0_83, %c1_84, %c0_85, %c0_86] : memref<2x2x96x48xf32, #tpu.memory_space<vmem>>, vector<1x1x96x48xf32>
    %168 = vector.shape_cast %167 : vector<1x1x96x48xf32> to vector<96x48xf32>
    %cst_87 = arith.constant dense<0.000000e+00> : vector<96x256xf32>
    %169 = tpu.matmul %168, %166, %cst_87 {dimension_numbers = #tpu.dot_dimension_numbers<[1], [0], [0], [1], [0, 0, 1, 1], [], []>} : vector<96x48xf32>, vector<48x256xf32>, vector<96x256xf32> -> vector<96x256xf32>
    %c0_88 = arith.constant 0 : index
    %c1_89 = arith.constant 1 : index
    %c0_90 = arith.constant 0 : index
    %c0_91 = arith.constant 0 : index
    %170 = vector.load %arg3[%c0_88, %c1_89, %c0_90, %c0_91] : memref<2x2x96x1xf32, #tpu.memory_space<vmem>>, vector<1x1x96x1xf32>
    %171 = vector.shape_cast %170 : vector<1x1x96x1xf32> to vector<96x1xf32>
    %172 = vector.broadcast %171 : vector<96x1xf32> to vector<96x256xf32>
    %173 = arith.addf %169, %172 : vector<96x256xf32>
    %174 = vector.extract_strided_slice %173 {offsets = [0, 0], sizes = [48, 256], strides = [1, 1]} : vector<96x256xf32> to vector<48x256xf32>
    %175 = vector.extract_strided_slice %173 {offsets = [48, 0], sizes = [48, 256], strides = [1, 1]} : vector<96x256xf32> to vector<48x256xf32>
    %cst_92 = arith.constant 0.000000e+00 : f32
    %176 = vector.broadcast %cst_92 : f32 to vector<48x256xf32>
    %177 = arith.maximumf %175, %176 : vector<48x256xf32>
    %c0_93 = arith.constant 0 : index
    %c1_94 = arith.constant 1 : index
    %c0_95 = arith.constant 0 : index
    %c0_96 = arith.constant 0 : index
    %178 = vector.load %arg4[%c0_93, %c1_94, %c0_95, %c0_96] : memref<2x2x48x48xf32, #tpu.memory_space<vmem>>, vector<1x1x48x48xf32>
    %179 = vector.shape_cast %178 : vector<1x1x48x48xf32> to vector<48x48xf32>
    %cst_97 = arith.constant dense<0.000000e+00> : vector<48x256xf32>
    %180 = tpu.matmul %179, %177, %cst_97 {dimension_numbers = #tpu.dot_dimension_numbers<[1], [0], [0], [1], [0, 0, 1, 1], [], []>} : vector<48x48xf32>, vector<48x256xf32>, vector<48x256xf32> -> vector<48x256xf32>
    %181 = arith.addf %174, %180 : vector<48x256xf32>
    %c0_98 = arith.constant 0 : index
    %c1_99 = arith.constant 1 : index
    %c0_100 = arith.constant 0 : index
    %c0_101 = arith.constant 0 : index
    %182 = vector.load %arg5[%c0_98, %c1_99, %c0_100, %c0_101] : memref<2x2x48x1xf32, #tpu.memory_space<vmem>>, vector<1x1x48x1xf32>
    %183 = vector.shape_cast %182 : vector<1x1x48x1xf32> to vector<48x1xf32>
    %184 = vector.broadcast %183 : vector<48x1xf32> to vector<48x256xf32>
    %185 = arith.addf %181, %184 : vector<48x256xf32>
    %cst_102 = arith.constant 0.000000e+00 : f32
    %186 = vector.broadcast %cst_102 : f32 to vector<48x256xf32>
    %187 = arith.subf %186, %185 : vector<48x256xf32>
    %188 = math.exp %187 : vector<48x256xf32>
    %cst_103 = arith.constant 1.000000e+00 : f32
    %189 = vector.broadcast %cst_103 : f32 to vector<48x256xf32>
    %190 = arith.addf %189, %188 : vector<48x256xf32>
    %cst_104 = arith.constant 1.000000e+00 : f32
    %191 = vector.broadcast %cst_104 : f32 to vector<48x256xf32>
    %192 = arith.divf %191, %190 : vector<48x256xf32>
    %193 = arith.mulf %166, %192 : vector<48x256xf32>
    %cst_105 = arith.constant dense<0.000000e+00> : vector<16x256xf32>
    %194 = tpu.matmul %5, %193, %cst_105 {dimension_numbers = #tpu.dot_dimension_numbers<[1], [0], [0], [1], [0, 0, 1, 1], [], []>} : vector<16x48xf32>, vector<48x256xf32>, vector<16x256xf32> -> vector<16x256xf32>
    %195 = vector.broadcast %6 : vector<16x1xf32> to vector<16x256xf32>
    %196 = arith.addf %194, %195 : vector<16x256xf32>
    %197 = vector.extract_strided_slice %196 {offsets = [0, 0], sizes = [8, 256], strides = [1, 1]} : vector<16x256xf32> to vector<8x256xf32>
    %198 = vector.extract_strided_slice %196 {offsets = [8, 0], sizes = [8, 256], strides = [1, 1]} : vector<16x256xf32> to vector<8x256xf32>
    %cst_106 = arith.constant 0.000000e+00 : f32
    %199 = vector.broadcast %cst_106 : f32 to vector<8x256xf32>
    %200 = arith.maximumf %198, %199 : vector<8x256xf32>
    %cst_107 = arith.constant dense<0.000000e+00> : vector<8x256xf32>
    %201 = tpu.matmul %7, %200, %cst_107 {dimension_numbers = #tpu.dot_dimension_numbers<[1], [0], [0], [1], [0, 0, 1, 1], [], []>} : vector<8x8xf32>, vector<8x256xf32>, vector<8x256xf32> -> vector<8x256xf32>
    %202 = arith.addf %197, %201 : vector<8x256xf32>
    %203 = vector.broadcast %8 : vector<8x1xf32> to vector<8x256xf32>
    %204 = arith.addf %202, %203 : vector<8x256xf32>
    %c1_108 = arith.constant 1 : index
    %c0_109 = arith.constant 0 : index
    %c0_110 = arith.constant 0 : index
    %205 = vector.load %arg12[%c1_108, %c0_109, %c0_110] : memref<2x16x256xf32, #tpu.memory_space<vmem>>, vector<1x8x256xf32>
    %206 = vector.shape_cast %205 : vector<1x8x256xf32> to vector<8x256xf32>
    %207 = arith.addf %204, %206 : vector<8x256xf32>
    %208 = vector.extract_strided_slice %165 {offsets = [48, 0], sizes = [48, 256], strides = [1, 1]} : vector<96x256xf32> to vector<48x256xf32>
    %c1_111 = arith.constant 1 : index
    %c1_112 = arith.constant 1 : index
    %c0_113 = arith.constant 0 : index
    %c0_114 = arith.constant 0 : index
    %209 = vector.load %arg2[%c1_111, %c1_112, %c0_113, %c0_114] : memref<2x2x96x48xf32, #tpu.memory_space<vmem>>, vector<1x1x96x48xf32>
    %210 = vector.shape_cast %209 : vector<1x1x96x48xf32> to vector<96x48xf32>
    %cst_115 = arith.constant dense<0.000000e+00> : vector<96x256xf32>
    %211 = tpu.matmul %210, %208, %cst_115 {dimension_numbers = #tpu.dot_dimension_numbers<[1], [0], [0], [1], [0, 0, 1, 1], [], []>} : vector<96x48xf32>, vector<48x256xf32>, vector<96x256xf32> -> vector<96x256xf32>
    %c1_116 = arith.constant 1 : index
    %c1_117 = arith.constant 1 : index
    %c0_118 = arith.constant 0 : index
    %c0_119 = arith.constant 0 : index
    %212 = vector.load %arg3[%c1_116, %c1_117, %c0_118, %c0_119] : memref<2x2x96x1xf32, #tpu.memory_space<vmem>>, vector<1x1x96x1xf32>
    %213 = vector.shape_cast %212 : vector<1x1x96x1xf32> to vector<96x1xf32>
    %214 = vector.broadcast %213 : vector<96x1xf32> to vector<96x256xf32>
    %215 = arith.addf %211, %214 : vector<96x256xf32>
    %216 = vector.extract_strided_slice %215 {offsets = [0, 0], sizes = [48, 256], strides = [1, 1]} : vector<96x256xf32> to vector<48x256xf32>
    %217 = vector.extract_strided_slice %215 {offsets = [48, 0], sizes = [48, 256], strides = [1, 1]} : vector<96x256xf32> to vector<48x256xf32>
    %cst_120 = arith.constant 0.000000e+00 : f32
    %218 = vector.broadcast %cst_120 : f32 to vector<48x256xf32>
    %219 = arith.maximumf %217, %218 : vector<48x256xf32>
    %c1_121 = arith.constant 1 : index
    %c1_122 = arith.constant 1 : index
    %c0_123 = arith.constant 0 : index
    %c0_124 = arith.constant 0 : index
    %220 = vector.load %arg4[%c1_121, %c1_122, %c0_123, %c0_124] : memref<2x2x48x48xf32, #tpu.memory_space<vmem>>, vector<1x1x48x48xf32>
    %221 = vector.shape_cast %220 : vector<1x1x48x48xf32> to vector<48x48xf32>
    %cst_125 = arith.constant dense<0.000000e+00> : vector<48x256xf32>
    %222 = tpu.matmul %221, %219, %cst_125 {dimension_numbers = #tpu.dot_dimension_numbers<[1], [0], [0], [1], [0, 0, 1, 1], [], []>} : vector<48x48xf32>, vector<48x256xf32>, vector<48x256xf32> -> vector<48x256xf32>
    %223 = arith.addf %216, %222 : vector<48x256xf32>
    %c1_126 = arith.constant 1 : index
    %c1_127 = arith.constant 1 : index
    %c0_128 = arith.constant 0 : index
    %c0_129 = arith.constant 0 : index
    %224 = vector.load %arg5[%c1_126, %c1_127, %c0_128, %c0_129] : memref<2x2x48x1xf32, #tpu.memory_space<vmem>>, vector<1x1x48x1xf32>
    %225 = vector.shape_cast %224 : vector<1x1x48x1xf32> to vector<48x1xf32>
    %226 = vector.broadcast %225 : vector<48x1xf32> to vector<48x256xf32>
    %227 = arith.addf %223, %226 : vector<48x256xf32>
    %cst_130 = arith.constant 0.000000e+00 : f32
    %228 = vector.broadcast %cst_130 : f32 to vector<48x256xf32>
    %229 = arith.subf %228, %227 : vector<48x256xf32>
    %230 = math.exp %229 : vector<48x256xf32>
    %cst_131 = arith.constant 1.000000e+00 : f32
    %231 = vector.broadcast %cst_131 : f32 to vector<48x256xf32>
    %232 = arith.addf %231, %230 : vector<48x256xf32>
    %cst_132 = arith.constant 1.000000e+00 : f32
    %233 = vector.broadcast %cst_132 : f32 to vector<48x256xf32>
    %234 = arith.divf %233, %232 : vector<48x256xf32>
    %235 = arith.mulf %208, %234 : vector<48x256xf32>
    %cst_133 = arith.constant dense<0.000000e+00> : vector<16x256xf32>
    %236 = tpu.matmul %5, %235, %cst_133 {dimension_numbers = #tpu.dot_dimension_numbers<[1], [0], [0], [1], [0, 0, 1, 1], [], []>} : vector<16x48xf32>, vector<48x256xf32>, vector<16x256xf32> -> vector<16x256xf32>
    %237 = vector.broadcast %6 : vector<16x1xf32> to vector<16x256xf32>
    %238 = arith.addf %236, %237 : vector<16x256xf32>
    %239 = vector.extract_strided_slice %238 {offsets = [0, 0], sizes = [8, 256], strides = [1, 1]} : vector<16x256xf32> to vector<8x256xf32>
    %240 = vector.extract_strided_slice %238 {offsets = [8, 0], sizes = [8, 256], strides = [1, 1]} : vector<16x256xf32> to vector<8x256xf32>
    %cst_134 = arith.constant 0.000000e+00 : f32
    %241 = vector.broadcast %cst_134 : f32 to vector<8x256xf32>
    %242 = arith.maximumf %240, %241 : vector<8x256xf32>
    %cst_135 = arith.constant dense<0.000000e+00> : vector<8x256xf32>
    %243 = tpu.matmul %7, %242, %cst_135 {dimension_numbers = #tpu.dot_dimension_numbers<[1], [0], [0], [1], [0, 0, 1, 1], [], []>} : vector<8x8xf32>, vector<8x256xf32>, vector<8x256xf32> -> vector<8x256xf32>
    %244 = arith.addf %239, %243 : vector<8x256xf32>
    %245 = vector.broadcast %8 : vector<8x1xf32> to vector<8x256xf32>
    %246 = arith.addf %244, %245 : vector<8x256xf32>
    %c1_136 = arith.constant 1 : index
    %c8_137 = arith.constant 8 : index
    %c0_138 = arith.constant 0 : index
    %247 = vector.load %arg12[%c1_136, %c8_137, %c0_138] : memref<2x16x256xf32, #tpu.memory_space<vmem>>, vector<1x8x256xf32>
    %248 = vector.shape_cast %247 : vector<1x8x256xf32> to vector<8x256xf32>
    %249 = arith.addf %246, %248 : vector<8x256xf32>
    %250 = tpu.concatenate %207, %249 in 0 : vector<8x256xf32>, vector<8x256xf32> -> vector<16x256xf32>
    %cst_139 = arith.constant 1.000000e-01 : f32
    %251 = vector.broadcast %cst_139 : f32 to vector<16x256xf32>
    %252 = arith.mulf %251, %250 : vector<16x256xf32>
    %253 = arith.addf %129, %252 : vector<16x256xf32>
    %c2 = arith.constant 2 : index
    %c0_140 = arith.constant 0 : index
    %c0_141 = arith.constant 0 : index
    %254 = vector.load %arg13[%c2, %c0_140, %c0_141] : memref<3x16x256xf32, #tpu.memory_space<vmem>>, vector<1x16x256xf32>
    %255 = vector.shape_cast %254 : vector<1x16x256xf32> to vector<16x256xf32>
    %256 = vector.shape_cast %253 : vector<16x256xf32> to vector<1x16x256xf32>
    tpu.vector_store %arg13[%c2, %c0_140, %c0_141], %256 {strides = array<i32>} : memref<3x16x256xf32, #tpu.memory_space<vmem>>, vector<1x16x256xf32>,
    %c0_142 = arith.constant 0 : index
    %c0_143 = arith.constant 0 : index
    %257 = vector.load %arg10[%c0_142, %c0_143] : memref<3x8xf32, #tpu.memory_space<vmem>>, vector<3x8xf32>
    %c0_144 = arith.constant 0 : index
    %c0_145 = arith.constant 0 : index
    %258 = vector.load %arg11[%c0_144, %c0_145] : memref<3x1xf32, #tpu.memory_space<vmem>>, vector<3x1xf32>
    %259 = vector.extract_strided_slice %253 {offsets = [0, 0], sizes = [8, 256], strides = [1, 1]} : vector<16x256xf32> to vector<8x256xf32>
    %cst_146 = arith.constant dense<0.000000e+00> : vector<3x256xf32>
    %260 = tpu.matmul %257, %259, %cst_146 {dimension_numbers = #tpu.dot_dimension_numbers<[1], [0], [0], [1], [0, 0, 1, 1], [], []>} : vector<3x8xf32>, vector<8x256xf32>, vector<3x256xf32> -> vector<3x256xf32>
    %261 = vector.broadcast %258 : vector<3x1xf32> to vector<3x256xf32>
    %262 = arith.addf %260, %261 : vector<3x256xf32>
    %c0_147 = arith.constant 0 : index
    %c0_148 = arith.constant 0 : index
    %c0_149 = arith.constant 0 : index
    %263 = vector.load %arg15[%c0_147, %c0_148, %c0_149] : memref<2x3x256xf32, #tpu.memory_space<vmem>>, vector<1x3x256xf32>
    %264 = vector.shape_cast %263 : vector<1x3x256xf32> to vector<3x256xf32>
    %265 = vector.shape_cast %262 : vector<3x256xf32> to vector<1x3x256xf32>
    tpu.vector_store %arg15[%c0_147, %c0_148, %c0_149], %265 {strides = array<i32>} : memref<2x3x256xf32, #tpu.memory_space<vmem>>, vector<1x3x256xf32>,
    %cst_150 = arith.constant -1.000000e+00 : f32
    %cst_151 = arith.constant 1.000000e+00 : f32
    %266 = vector.broadcast %cst_150 : f32 to vector<3x256xf32>
    %267 = arith.maximumf %266, %262 : vector<3x256xf32>
    %268 = vector.broadcast %cst_151 : f32 to vector<3x256xf32>
    %269 = arith.minimumf %268, %267 : vector<3x256xf32>
    %c0_152 = arith.constant 0 : index
    %c0_153 = arith.constant 0 : index
    %c0_154 = arith.constant 0 : index
    %270 = vector.load %arg14[%c0_152, %c0_153, %c0_154] : memref<2x3x256xf32, #tpu.memory_space<vmem>>, vector<1x3x256xf32>
    %271 = vector.shape_cast %270 : vector<1x3x256xf32> to vector<3x256xf32>
    %272 = vector.shape_cast %269 : vector<3x256xf32> to vector<1x3x256xf32>
    tpu.vector_store %arg14[%c0_152, %c0_153, %c0_154], %272 {strides = array<i32>} : memref<2x3x256xf32, #tpu.memory_space<vmem>>, vector<1x3x256xf32>,
    %273 = vector.extract_strided_slice %253 {offsets = [8, 0], sizes = [8, 256], strides = [1, 1]} : vector<16x256xf32> to vector<8x256xf32>
    %cst_155 = arith.constant dense<0.000000e+00> : vector<3x256xf32>
    %274 = tpu.matmul %257, %273, %cst_155 {dimension_numbers = #tpu.dot_dimension_numbers<[1], [0], [0], [1], [0, 0, 1, 1], [], []>} : vector<3x8xf32>, vector<8x256xf32>, vector<3x256xf32> -> vector<3x256xf32>
    %275 = vector.broadcast %258 : vector<3x1xf32> to vector<3x256xf32>
    %276 = arith.addf %274, %275 : vector<3x256xf32>
    %c1_156 = arith.constant 1 : index
    %c0_157 = arith.constant 0 : index
    %c0_158 = arith.constant 0 : index
    %277 = vector.load %arg15[%c1_156, %c0_157, %c0_158] : memref<2x3x256xf32, #tpu.memory_space<vmem>>, vector<1x3x256xf32>
    %278 = vector.shape_cast %277 : vector<1x3x256xf32> to vector<3x256xf32>
    %279 = vector.shape_cast %276 : vector<3x256xf32> to vector<1x3x256xf32>
    tpu.vector_store %arg15[%c1_156, %c0_157, %c0_158], %279 {strides = array<i32>} : memref<2x3x256xf32, #tpu.memory_space<vmem>>, vector<1x3x256xf32>,
    %cst_159 = arith.constant -1.000000e+00 : f32
    %cst_160 = arith.constant 1.000000e+00 : f32
    %280 = vector.broadcast %cst_159 : f32 to vector<3x256xf32>
    %281 = arith.maximumf %280, %276 : vector<3x256xf32>
    %282 = vector.broadcast %cst_160 : f32 to vector<3x256xf32>
    %283 = arith.minimumf %282, %281 : vector<3x256xf32>
    %c1_161 = arith.constant 1 : index
    %c0_162 = arith.constant 0 : index
    %c0_163 = arith.constant 0 : index
    %284 = vector.load %arg14[%c1_161, %c0_162, %c0_163] : memref<2x3x256xf32, #tpu.memory_space<vmem>>, vector<1x3x256xf32>
    %285 = vector.shape_cast %284 : vector<1x3x256xf32> to vector<3x256xf32>
    %286 = vector.shape_cast %283 : vector<3x256xf32> to vector<1x3x256xf32>
    tpu.vector_store %arg14[%c1_161, %c0_162, %c0_163], %286 {strides = array<i32>} : memref<2x3x256xf32, #tpu.memory_space<vmem>>, vector<1x3x256xf32>,
    return
  }
}

</mosaic_0001>

<bundles_post_ra>
// kernel: squeeze.7
= control target key start
LH: loop header
LB: loop body
LE: loop exit
PB: predicated region body
PF: predicated region fallthrough
CT: control target
= control target key end

     0   :  { %s357_s8 = smov 112   ;;  %s358_s11 = smov 96   ;;  %s474_s0 = inlined_call_operand.vmem [shape: f32[1,16,256], index: 0, kind: input, shape index: {}]   ;;  %s475_s1 = inlined_call_operand.hbm [shape: f32[2,8,16,16], index: 1, kind: output, shape index: {}]  }
   0x1   :  { %v42_v0 = vld.sshfl [vmem:[%s474_s0] sm:$0xff pattern:$0xb3a29180]   ;;  %v303_v1 = vld.sshfl [vmem:[%s474_s0 + $0x10] sm:$0xff pattern:$0xb3a29180]  }
   0x2   :  { %43 = vrot.lane.b32.xlu0 %v42_v0, %s357_s8  ;;  %78 = vrot.lane.b32.xlu2 %v42_v0, %s358_s11 }
   0x3   :  { %61 = vrot.lane.b32.xlu1 %v303_v1, %s357_s8 }
   0x4   :  { %2 = vsyncpa [#allocation1], 0  ;;  %v302_v2 = vld.sshfl [vmem:[%s474_s0 + $0x4] sm:$0xff pattern:$0xb3a29180]   ;;  %s359_s16 = smov 80  }
   0x5   :  { %v304_v3 = vld.sshfl [vmem:[%s474_s0 + $0x14] sm:$0xff pattern:$0xb3a29180]   ;;  %s360_s17 = smov 64   ;;  %s361_s18 = smov 48   ;;  %vm4_vm0 = vcmask 130048  }
   0x6   :  { %s362_s19 = smov 32   ;;  %s363_s20 = smov 16   ;;  %v3_v25 = vld [vmem:[%s474_s0] sm:$0xff]   ;;  %v299_v28 = vld [vmem:[%s474_s0 + $0x8] sm:$0xff]   ;;  %v300_v31 = vld [vmem:[%s474_s0 + $0x10] sm:$0xff]  }
   0x7   :  { %5 = vst.msk [vmem:[#allocation0] ss:$16 sm:$0x3] %vm4_vm0, %v3_v25   ;;  %v301_v34 = vld [vmem:[%s474_s0 + $0x18] sm:$0xff]   ;;  %s364_s0 = smov [#allocation0]   ;;  %s292_s1 = sshll.u32 %s475_s1, 4  ;;  %s293_s1 = int_to_ptr.hbm [resolvable:$true] %s292_s1 }
   0x8   :  { %6 = vst.msk [vmem:[#allocation0] ss:$16 sm:$0xc] %vm4_vm0, %v3_v25   ;;  %s290_s29 = sshll.u32 %s364_s0, 4  ;;  %s291_s29 = int_to_ptr.vmem [resolvable:$true] %s290_s29 }
   0x9   :  { %7 = vst.msk [vmem:[#allocation0] ss:$16 sm:$0x30] %vm4_vm0, %v3_v25  }
   0xa   :  { %52 = vrot.lane.b32.xlu0 %v302_v2, %s357_s8  ;;  %87 = vrot.lane.b32.xlu2 %v302_v2, %s358_s11  ;;  %8 = vst.msk [vmem:[#allocation0] ss:$16 sm:$0xc0] %vm4_vm0, %v3_v25  }
   0xb   :  { %70 = vrot.lane.b32.xlu1 %v304_v3, %s357_s8  ;;  %13 = vst.msk [vmem:[#allocation0 + $0x8] ss:$16 sm:$0x3] %vm4_vm0, %v299_v28  }
   0xc   :  { %15 = vst.msk [vmem:[#allocation0 + $0x8] ss:$16 sm:$0xc] %vm4_vm0, %v299_v28  }
   0xd   :  { %17 = vst.msk [vmem:[#allocation0 + $0x8] ss:$16 sm:$0x30] %vm4_vm0, %v299_v28  }
   0xe   :  { %19 = vst.msk [vmem:[#allocation0 + $0x8] ss:$16 sm:$0xc0] %vm4_vm0, %v299_v28  }
   0xf   :  { %24 = vst.msk [vmem:[#allocation0 + $0x80] ss:$16 sm:$0x3] %vm4_vm0, %v300_v31  }
  0x10   :  { %26 = vst.msk [vmem:[#allocation0 + $0x80] ss:$16 sm:$0xc] %vm4_vm0, %v300_v31  }
  0x11   :  { %28 = vst.msk [vmem:[#allocation0 + $0x80] ss:$16 sm:$0x30] %vm4_vm0, %v300_v31  }
  0x12   :  { %96 = vrot.lane.b32.xlu0 %v303_v1, %s358_s11  ;;  %113 = vrot.lane.b32.xlu2 %v42_v0, %s359_s16  ;;  %30 = vst.msk [vmem:[#allocation0 + $0x80] ss:$16 sm:$0xc0] %vm4_vm0, %v300_v31  }
  0x13   :  { %105 = vrot.lane.b32.xlu1 %v304_v3, %s358_s11  ;;  %35 = vst.msk [vmem:[#allocation0 + $0x88] ss:$16 sm:$0x3] %vm4_vm0, %v301_v34  }
  0x14   :  { %37 = vst.msk [vmem:[#allocation0 + $0x88] ss:$16 sm:$0xc] %vm4_vm0, %v301_v34  }
  0x15   :  { %39 = vst.msk [vmem:[#allocation0 + $0x88] ss:$16 sm:$0x30] %vm4_vm0, %v301_v34  }
  0x16   :  { %41 = vst.msk [vmem:[#allocation0 + $0x88] ss:$16 sm:$0xc0] %vm4_vm0, %v301_v34  }
  0x1a   :  { %122 = vrot.lane.b32.xlu0 %v302_v2, %s359_s16  ;;  %140 = vrot.lane.b32.xlu2 %v304_v3, %s359_s16 }
  0x1b   :  { %131 = vrot.lane.b32.xlu1 %v303_v1, %s359_s16 }
  0x22   :  { %148 = vrot.lane.b32.xlu0 %v42_v0, %s360_s17  ;;  %166 = vrot.lane.b32.xlu2 %v303_v1, %s360_s17 }
  0x23   :  { %157 = vrot.lane.b32.xlu1 %v302_v2, %s360_s17 }
  0x2a   :  { %175 = vrot.lane.b32.xlu0 %v304_v3, %s360_s17  ;;  %192 = vrot.lane.b32.xlu2 %v302_v2, %s361_s18 }
  0x2b   :  { %183 = vrot.lane.b32.xlu1 %v42_v0, %s361_s18 }
  0x32   :  { %201 = vrot.lane.b32.xlu0 %v303_v1, %s361_s18  ;;  %218 = vrot.lane.b32.xlu2 %v42_v0, %s362_s19 }
  0x33   :  { %210 = vrot.lane.b32.xlu1 %v304_v3, %s361_s18 }
  0x3a   :  { %227 = vrot.lane.b32.xlu0 %v302_v2, %s362_s19  ;;  %245 = vrot.lane.b32.xlu2 %v304_v3, %s362_s19 }
  0x3b   :  { %236 = vrot.lane.b32.xlu1 %v303_v1, %s362_s19 }
  0x42   :  { %253 = vrot.lane.b32.xlu0 %v42_v0, %s363_s20  ;;  %271 = vrot.lane.b32.xlu2 %v303_v1, %s363_s20 }
  0x43   :  { %262 = vrot.lane.b32.xlu1 %v302_v2, %s363_s20 }
  0x4a   :  { %280 = vrot.lane.b32.xlu0 %v304_v3, %s363_s20 }
  0x5c   :  { %v79_v4 = vpop.permute.xlu2 %78  }
  0x5d   :  { %82 = vst.msk [vmem:[#allocation0 + $0x2] ss:$8 sm:$0xf] %vm4_vm0, %v79_v4  }
  0x5e   :  { %84 = vst.msk [vmem:[#allocation0 + $0x2] ss:$8 sm:$0xf0] %vm4_vm0, %v79_v4  }
  0x64   :  { %v88_v5 = vpop.permute.xlu2 %87  }
  0x65   :  { %91 = vst.msk [vmem:[#allocation0 + $0x42] ss:$8 sm:$0xf] %vm4_vm0, %v88_v5  }
  0x66   :  { %93 = vst.msk [vmem:[#allocation0 + $0x42] ss:$8 sm:$0xf0] %vm4_vm0, %v88_v5  }
  0x6c   :  { %v114_v6 = vpop.permute.xlu2 %113  }
  0x6d   :  { %117 = vst.msk [vmem:[#allocation0 + $0x3] ss:$8 sm:$0xf] %vm4_vm0, %v114_v6  }
  0x6e   :  { %119 = vst.msk [vmem:[#allocation0 + $0x3] ss:$8 sm:$0xf0] %vm4_vm0, %v114_v6  }
  0x74   :  { %v44_v7 = vpop.permute.xlu0 %43   ;;  %v141_v8 = vpop.permute.xlu2 %140  }
  0x75   :  { %47 = vst.msk [vmem:[#allocation0 + $0x1] ss:$8 sm:$0xf] %vm4_vm0, %v44_v7   ;;  %v62_v9 = vpop.permute.xlu1 %61  }
  0x76   :  { %49 = vst.msk [vmem:[#allocation0 + $0x1] ss:$8 sm:$0xf0] %vm4_vm0, %v44_v7  }
  0x77   :  { %65 = vst.msk [vmem:[#allocation0 + $0x81] ss:$8 sm:$0xf] %vm4_vm0, %v62_v9  }
  0x78   :  { %67 = vst.msk [vmem:[#allocation0 + $0x81] ss:$8 sm:$0xf0] %vm4_vm0, %v62_v9  }
  0x79   :  { %144 = vst.msk [vmem:[#allocation0 + $0xc3] ss:$8 sm:$0xf] %vm4_vm0, %v141_v8  }
  0x7a   :  { %146 = vst.msk [vmem:[#allocation0 + $0xc3] ss:$8 sm:$0xf0] %vm4_vm0, %v141_v8  }
  0x7c   :  { %v53_v10 = vpop.permute.xlu0 %52   ;;  %v167_v11 = vpop.permute.xlu2 %166  }
  0x7d   :  { %56 = vst.msk [vmem:[#allocation0 + $0x41] ss:$8 sm:$0xf] %vm4_vm0, %v53_v10   ;;  %v71_v12 = vpop.permute.xlu1 %70  }
  0x7e   :  { %58 = vst.msk [vmem:[#allocation0 + $0x41] ss:$8 sm:$0xf0] %vm4_vm0, %v53_v10  }
  0x7f   :  { %74 = vst.msk [vmem:[#allocation0 + $0xc1] ss:$8 sm:$0xf] %vm4_vm0, %v71_v12  }
  0x80   :  { %76 = vst.msk [vmem:[#allocation0 + $0xc1] ss:$8 sm:$0xf0] %vm4_vm0, %v71_v12  }
  0x81   :  { %170 = vst.msk [vmem:[#allocation0 + $0x84] ss:$8 sm:$0xf] %vm4_vm0, %v167_v11  }
  0x82   :  { %172 = vst.msk [vmem:[#allocation0 + $0x84] ss:$8 sm:$0xf0] %vm4_vm0, %v167_v11  }
  0x84   :  { %v97_v13 = vpop.permute.xlu0 %96   ;;  %v193_v14 = vpop.permute.xlu2 %192  }
  0x85   :  { %100 = vst.msk [vmem:[#allocation0 + $0x82] ss:$8 sm:$0xf] %vm4_vm0, %v97_v13   ;;  %v106_v15 = vpop.permute.xlu1 %105  }
  0x86   :  { %102 = vst.msk [vmem:[#allocation0 + $0x82] ss:$8 sm:$0xf0] %vm4_vm0, %v97_v13  }
  0x87   :  { %109 = vst.msk [vmem:[#allocation0 + $0xc2] ss:$8 sm:$0xf] %vm4_vm0, %v106_v15  }
  0x88   :  { %111 = vst.msk [vmem:[#allocation0 + $0xc2] ss:$8 sm:$0xf0] %vm4_vm0, %v106_v15  }
  0x89   :  { %196 = vst.msk [vmem:[#allocation0 + $0x45] ss:$8 sm:$0xf] %vm4_vm0, %v193_v14  }
  0x8a   :  { %198 = vst.msk [vmem:[#allocation0 + $0x45] ss:$8 sm:$0xf0] %vm4_vm0, %v193_v14  }
  0x8c   :  { %v123_v16 = vpop.permute.xlu0 %122   ;;  %v219_v17 = vpop.permute.xlu2 %218  }
  0x8d   :  { %126 = vst.msk [vmem:[#allocation0 + $0x43] ss:$8 sm:$0xf] %vm4_vm0, %v123_v16   ;;  %v132_v18 = vpop.permute.xlu1 %131  }
  0x8e   :  { %128 = vst.msk [vmem:[#allocation0 + $0x43] ss:$8 sm:$0xf0] %vm4_vm0, %v123_v16  }
  0x8f   :  { %135 = vst.msk [vmem:[#allocation0 + $0x83] ss:$8 sm:$0xf] %vm4_vm0, %v132_v18  }
  0x90   :  { %137 = vst.msk [vmem:[#allocation0 + $0x83] ss:$8 sm:$0xf0] %vm4_vm0, %v132_v18  }
  0x91   :  { %222 = vst.msk [vmem:[#allocation0 + $0x6] ss:$8 sm:$0xf] %vm4_vm0, %v219_v17  }
  0x92   :  { %224 = vst.msk [vmem:[#allocation0 + $0x6] ss:$8 sm:$0xf0] %vm4_vm0, %v219_v17  }
  0x94   :  { %v149_v19 = vpop.permute.xlu0 %148   ;;  %v246_v20 = vpop.permute.xlu2 %245  }
  0x95   :  { %152 = vst.msk [vmem:[#allocation0 + $0x4] ss:$8 sm:$0xf] %vm4_vm0, %v149_v19   ;;  %v158_v21 = vpop.permute.xlu1 %157  }
  0x96   :  { %154 = vst.msk [vmem:[#allocation0 + $0x4] ss:$8 sm:$0xf0] %vm4_vm0, %v149_v19  }
  0x97   :  { %161 = vst.msk [vmem:[#allocation0 + $0x44] ss:$8 sm:$0xf] %vm4_vm0, %v158_v21  }
  0x98   :  { %163 = vst.msk [vmem:[#allocation0 + $0x44] ss:$8 sm:$0xf0] %vm4_vm0, %v158_v21  }
  0x99   :  { %249 = vst.msk [vmem:[#allocation0 + $0xc6] ss:$8 sm:$0xf] %vm4_vm0, %v246_v20  }
  0x9a   :  { %251 = vst.msk [vmem:[#allocation0 + $0xc6] ss:$8 sm:$0xf0] %vm4_vm0, %v246_v20  }
  0x9c   :  { %v176_v22 = vpop.permute.xlu0 %175   ;;  %v272_v23 = vpop.permute.xlu2 %271  }
  0x9d   :  { %179 = vst.msk [vmem:[#allocation0 + $0xc4] ss:$8 sm:$0xf] %vm4_vm0, %v176_v22   ;;  %v184_v24 = vpop.permute.xlu1 %183  }
  0x9e   :  { %181 = vst.msk [vmem:[#allocation0 + $0xc4] ss:$8 sm:$0xf0] %vm4_vm0, %v176_v22  }
  0x9f   :  { %187 = vst.msk [vmem:[#allocation0 + $0x5] ss:$8 sm:$0xf] %vm4_vm0, %v184_v24  }
  0xa0   :  { %189 = vst.msk [vmem:[#allocation0 + $0x5] ss:$8 sm:$0xf0] %vm4_vm0, %v184_v24  }
  0xa1   :  { %275 = vst.msk [vmem:[#allocation0 + $0x87] ss:$8 sm:$0xf] %vm4_vm0, %v272_v23  }
  0xa2   :  { %277 = vst.msk [vmem:[#allocation0 + $0x87] ss:$8 sm:$0xf0] %vm4_vm0, %v272_v23  }
  0xa4   :  { %v202_v26 = vpop.permute.xlu0 %201  }
  0xa5   :  { %205 = vst.msk [vmem:[#allocation0 + $0x85] ss:$8 sm:$0xf] %vm4_vm0, %v202_v26   ;;  %v211_v27 = vpop.permute.xlu1 %210  }
  0xa6   :  { %207 = vst.msk [vmem:[#allocation0 + $0x85] ss:$8 sm:$0xf0] %vm4_vm0, %v202_v26  }
  0xa7   :  { %214 = vst.msk [vmem:[#allocation0 + $0xc5] ss:$8 sm:$0xf] %vm4_vm0, %v211_v27  }
  0xa8   :  { %216 = vst.msk [vmem:[#allocation0 + $0xc5] ss:$8 sm:$0xf0] %vm4_vm0, %v211_v27  }
  0xac   :  { %v228_v29 = vpop.permute.xlu0 %227  }
  0xad   :  { %231 = vst.msk [vmem:[#allocation0 + $0x46] ss:$8 sm:$0xf] %vm4_vm0, %v228_v29   ;;  %v237_v30 = vpop.permute.xlu1 %236  }
  0xae   :  { %233 = vst.msk [vmem:[#allocation0 + $0x46] ss:$8 sm:$0xf0] %vm4_vm0, %v228_v29  }
  0xaf   :  { %240 = vst.msk [vmem:[#allocation0 + $0x86] ss:$8 sm:$0xf] %vm4_vm0, %v237_v30  }
  0xb0   :  { %242 = vst.msk [vmem:[#allocation0 + $0x86] ss:$8 sm:$0xf0] %vm4_vm0, %v237_v30  }
  0xb4   :  { %v254_v32 = vpop.permute.xlu0 %253  }
  0xb5   :  { %257 = vst.msk [vmem:[#allocation0 + $0x7] ss:$8 sm:$0xf] %vm4_vm0, %v254_v32   ;;  %v263_v33 = vpop.permute.xlu1 %262  }
  0xb6   :  { %259 = vst.msk [vmem:[#allocation0 + $0x7] ss:$8 sm:$0xf0] %vm4_vm0, %v254_v32  }
  0xb7   :  { %266 = vst.msk [vmem:[#allocation0 + $0x47] ss:$8 sm:$0xf] %vm4_vm0, %v263_v33  }
  0xb8   :  { %268 = vst.msk [vmem:[#allocation0 + $0x47] ss:$8 sm:$0xf0] %vm4_vm0, %v263_v33  }
  0xbc   :  { %v281_v35 = vpop.permute.xlu0 %280  }
  0xbd   :  { %284 = vst.msk [vmem:[#allocation0 + $0xc7] ss:$8 sm:$0xf] %vm4_vm0, %v281_v35  }
  0xbe   :  { %286 = vst.msk [vmem:[#allocation0 + $0xc7] ss:$8 sm:$0xf0] %vm4_vm0, %v281_v35  }
  0xbf   :  { %295 = dma.vmem_to_hbm [thread:$0]  %s291_s29, 4096, %s293_s1, [#allocation1]  }
  0xc0   :  { %355 = dma.done.wait [#allocation1], 4096  }
  0xc1   :  { %356 = vsyncadd [#allocation1], 4294963200 }
  0xc2   :  { %298 = vsyncpa [#allocation1], 1 }

// kernel: decoder_forward.1
= control target key start
LH: loop header
LB: loop body
LE: loop exit
PB: predicated region body
PF: predicated region fallthrough
CT: control target
= control target key end

     0   :  { %s10752_s0 = inlined_call_operand.vmem [shape: bf16[256,1024], index: 0, kind: input, shape index: {}]   ;;  %s10753_s1 = inlined_call_operand.vmem [shape: f32[16,256], index: 1, kind: input, shape index: {}]   ;;  %s10754_s3 = inlined_call_operand.vmem [shape: f32[2,2,96,1], index: 3, kind: input, shape index: {}]   ;;  %s10755_s5 = inlined_call_operand.vmem [shape: f32[2,2,48,1], index: 5, kind: input, shape index: {}]   ;;  %s10756_s2 = inlined_call_operand.vmem [shape: f32[2,2,96,48], index: 2, kind: input, shape index: {}]   ;;  %s10757_s7 = inlined_call_operand.vmem [shape: f32[16,1], index: 7, kind: input, shape index: {}]   ;;  %s10758_s9 = inlined_call_operand.vmem [shape: f32[8,1], index: 9, kind: input, shape index: {}]   ;;  %s10759_s4 = inlined_call_operand.vmem [shape: f32[2,2,48,48], index: 4, kind: input, shape index: {}]   ;;  %s10760_s6 = inlined_call_operand.vmem [shape: f32[16,48], index: 6, kind: input, shape index: {}]   ;;  %s10761_s13 = inlined_call_operand.vmem [shape: f32[3,16,256], index: 13, kind: output, shape index: {0}]   ;;  %s10762_s8 = inlined_call_operand.vmem [shape: f32[8,8], index: 8, kind: input, shape index: {}]   ;;  %s10763_s12 = inlined_call_operand.vmem [shape: f32[2,16,256], index: 12, kind: input, shape index: {}]   ;;  %s10764_s11 = inlined_call_operand.vmem [shape: f32[3,1], index: 11, kind: input, shape index: {}]   ;;  %s10765_s10 = inlined_call_operand.vmem [shape: f32[3,8], index: 10, kind: input, shape index: {}]   ;;  %s10766_s15 = inlined_call_operand.vmem [shape: f32[2,3,256], index: 15, kind: output, shape index: {2}]   ;;  %s10767_s14 = inlined_call_operand.vmem [shape: f32[2,3,256], index: 14, kind: output, shape index: {1}]  }
   0x1   :  { %v5168_v0 = vld [vmem:[%s10752_s0 + $0x1c0] sm:$0xf]  ;;  %v5808_v5 = vld [vmem:[%s10752_s0 + $0x1c4] sm:$0xf] }
   0x2   :  { %v5812_v1 = vld [vmem:[%s10752_s0 + $0x1dc] sm:$0xf0]  ;;  %v5170_v6 = vld [vmem:[%s10752_s0 + $0x1e0] sm:$0xf0] }
   0x3   :  { %v5424_v2 = vld [vmem:[%s10752_s0 + $0x3c0] sm:$0xf]  ;;  %v6233_v3 = vor.u32 %v5812_v1, %v5168_v0  ;;  %v6246_v8 = vor.u32 %v5808_v5, %v5170_v6  ;;  %v5872_v9 = vld [vmem:[%s10752_s0 + $0x3c4] sm:$0xf] }
   0x4   :  { %v5876_v4 = vld [vmem:[%s10752_s0 + $0x3dc] sm:$0xf0]  ;;  %v5426_v10 = vld [vmem:[%s10752_s0 + $0x3e0] sm:$0xf0] }
   0x5   :  { %10942 = vst [vmem:[#allocation2_spill] sm:$0xff] %v6233_v3  ;;  %v6244_v7 = vor.u32 %v5876_v4, %v5424_v2  ;;  %v5136_v11 = vld [vmem:[%s10752_s0 + $0x180] sm:$0xf]  ;;  %831 = vmatpush.bf16.msra.mxu0 %v6233_v3  ;;  %v6258_v12 = vor.u32 %v5872_v9, %v5426_v10  ;;  %859 = vmatpush.bf16.msra.mxu2 %v6246_v8  ;;  %v5800_v18 = vld [vmem:[%s10752_s0 + $0x184] sm:$0xf] }
   0x6   :  { %10944 = vst [vmem:[#allocation4_spill] sm:$0xff] %v6246_v8  ;;  %v5804_v13 = vld [vmem:[%s10752_s0 + $0x19c] sm:$0xf0]  ;;  %v5138_v19 = vld [vmem:[%s10752_s0 + $0x1a0] sm:$0xf0] }
   0x7   :  { %10943 = vst [vmem:[#allocation3_spill] sm:$0xff] %v6244_v7  ;;  %v5392_v14 = vld [vmem:[%s10752_s0 + $0x380] sm:$0xf]  ;;  %845 = vmatpush.bf16.msra.mxu1 %v6244_v7  ;;  %v6271_v16 = vor.u32 %v5804_v13, %v5136_v11  ;;  %v5864_v20 = vld [vmem:[%s10752_s0 + $0x384] sm:$0xf]  ;;  %873 = vmatpush.bf16.msra.mxu3 %v6258_v12  ;;  %v6285_v21 = vor.u32 %v5800_v18, %v5138_v19 }
   0x8   :  { %10945 = vst [vmem:[#allocation5_spill] sm:$0xff] %v6258_v12  ;;  %v5868_v15 = vld [vmem:[%s10752_s0 + $0x39c] sm:$0xf0]  ;;  %v5394_v22 = vld [vmem:[%s10752_s0 + $0x3a0] sm:$0xf0] }
   0x9   :  { %10946 = vst [vmem:[#allocation6_spill] sm:$0xff] %v6271_v16  ;;  %v6273_v17 = vor.u32 %v5868_v15, %v5392_v14  ;;  %v5104_v23 = vld [vmem:[%s10752_s0 + $0x140] sm:$0xf]  ;;  %v6296_v25 = vor.u32 %v5864_v20, %v5394_v22  ;;  %v5792_v28 = vld [vmem:[%s10752_s0 + $0x144] sm:$0xf]  ;;  %832 = vmatpush.bf16.msra.mxu0 %v6271_v16  ;;  %860 = vmatpush.bf16.msra.mxu2 %v6285_v21 }
   0xa   :  { %10948 = vst [vmem:[#allocation8_spill] sm:$0xff] %v6285_v21  ;;  %v5796_v24 = vld [vmem:[%s10752_s0 + $0x15c] sm:$0xf0]  ;;  %v5106_v30 = vld [vmem:[%s10752_s0 + $0x160] sm:$0xf0] }
   0xb   :  { %10947 = vst [vmem:[#allocation7_spill] sm:$0xff] %v6273_v17  ;;  %v5360_v26 = vld [vmem:[%s10752_s0 + $0x340] sm:$0xf]  ;;  %v6308_v29 = vor.u32 %v5796_v24, %v5104_v23  ;;  %v5856_v31 = vld [vmem:[%s10752_s0 + $0x344] sm:$0xf]  ;;  %846 = vmatpush.bf16.msra.mxu1 %v6273_v17  ;;  %v6323_v34 = vor.u32 %v5792_v28, %v5106_v30  ;;  %874 = vmatpush.bf16.msra.mxu3 %v6296_v25 }
   0xc   :  { %10949 = vst [vmem:[#allocation9_spill] sm:$0xff] %v6296_v25  ;;  %v5860_v27 = vld [vmem:[%s10752_s0 + $0x35c] sm:$0xf0]  ;;  %v5362_v32 = vld [vmem:[%s10752_s0 + $0x360] sm:$0xf0] }
   0xd   :  { %10950 = vst [vmem:[#allocation10_spill] sm:$0xff] %v6308_v29  ;;  %v6321_v33 = vor.u32 %v5860_v27, %v5360_v26  ;;  %v5072_v35 = vld [vmem:[%s10752_s0 + $0x100] sm:$0xf]  ;;  %v6335_v38 = vor.u32 %v5856_v31, %v5362_v32  ;;  %v5784_v40 = vld [vmem:[%s10752_s0 + $0x104] sm:$0xf]  ;;  %833 = vmatpush.bf16.msra.mxu0 %v6308_v29  ;;  %861 = vmatpush.bf16.msra.mxu2 %v6323_v34 }
   0xe   :  { %10952 = vst [vmem:[#allocation12_spill] sm:$0xff] %v6323_v34  ;;  %v5788_v36 = vld [vmem:[%s10752_s0 + $0x11c] sm:$0xf0]  ;;  %v5074_v41 = vld [vmem:[%s10752_s0 + $0x120] sm:$0xf0] }
   0xf   :  { %10951 = vst [vmem:[#allocation11_spill] sm:$0xff] %v6321_v33  ;;  %v5328_v37 = vld [vmem:[%s10752_s0 + $0x300] sm:$0xf]  ;;  %v5848_v42 = vld [vmem:[%s10752_s0 + $0x304] sm:$0xf]  ;;  %v6353_v44 = vor.u32 %v5788_v36, %v5072_v35  ;;  %847 = vmatpush.bf16.msra.mxu1 %v6321_v33  ;;  %v6359_v46 = vor.u32 %v5784_v40, %v5074_v41  ;;  %875 = vmatpush.bf16.msra.mxu3 %v6335_v38 }
  0x10   :  { %10953 = vst [vmem:[#allocation13_spill] sm:$0xff] %v6335_v38  ;;  %v5852_v39 = vld [vmem:[%s10752_s0 + $0x31c] sm:$0xf0]  ;;  %v5330_v43 = vld [vmem:[%s10752_s0 + $0x320] sm:$0xf0] }
  0x11   :  { %10954 = vst [vmem:[#allocation14_spill] sm:$0xff] %v6353_v44  ;;  %v6357_v45 = vor.u32 %v5852_v39, %v5328_v37  ;;  %v5040_v47 = vld [vmem:[%s10752_s0 + $0xc0] sm:$0xf]  ;;  %v6371_v50 = vor.u32 %v5848_v42, %v5330_v43  ;;  %v5776_v52 = vld [vmem:[%s10752_s0 + $0xc4] sm:$0xf]  ;;  %834 = vmatpush.bf16.msra.mxu0 %v6353_v44  ;;  %862 = vmatpush.bf16.msra.mxu2 %v6359_v46 }
  0x12   :  { %10956 = vst [vmem:[#allocation16_spill] sm:$0xff] %v6359_v46  ;;  %v5780_v48 = vld [vmem:[%s10752_s0 + $0xdc] sm:$0xf0]  ;;  %v5042_v53 = vld [vmem:[%s10752_s0 + $0xe0] sm:$0xf0] }
  0x13   :  { %10955 = vst [vmem:[#allocation15_spill] sm:$0xff] %v6357_v45  ;;  %v5296_v49 = vld [vmem:[%s10752_s0 + $0x2c0] sm:$0xf]  ;;  %v5840_v54 = vld [vmem:[%s10752_s0 + $0x2c4] sm:$0xf]  ;;  %v6389_v56 = vor.u32 %v5780_v48, %v5040_v47  ;;  %848 = vmatpush.bf16.msra.mxu1 %v6357_v45  ;;  %v6395_v58 = vor.u32 %v5776_v52, %v5042_v53  ;;  %876 = vmatpush.bf16.msra.mxu3 %v6371_v50 }
  0x14   :  { %10957 = vst [vmem:[#allocation17_spill] sm:$0xff] %v6371_v50  ;;  %v5844_v51 = vld [vmem:[%s10752_s0 + $0x2dc] sm:$0xf0]  ;;  %v5298_v55 = vld [vmem:[%s10752_s0 + $0x2e0] sm:$0xf0] }
  0x15   :  { %10958 = vst [vmem:[#allocation18_spill] sm:$0xff] %v6389_v56  ;;  %v6393_v57 = vor.u32 %v5844_v51, %v5296_v49  ;;  %v5008_v59 = vld [vmem:[%s10752_s0 + $0x80] sm:$0xf]  ;;  %v6407_v62 = vor.u32 %v5840_v54, %v5298_v55  ;;  %v5768_v0 = vld [vmem:[%s10752_s0 + $0x84] sm:$0xf]  ;;  %835 = vmatpush.bf16.msra.mxu0 %v6389_v56  ;;  %863 = vmatpush.bf16.msra.mxu2 %v6395_v58 }
  0x16   :  { %10960 = vst [vmem:[#allocation20_spill] sm:$0xff] %v6395_v58  ;;  %v5772_v60 = vld [vmem:[%s10752_s0 + $0x9c] sm:$0xf0]  ;;  %v5010_v1 = vld [vmem:[%s10752_s0 + $0xa0] sm:$0xf0] }
  0x17   :  { %10959 = vst [vmem:[#allocation19_spill] sm:$0xff] %v6393_v57  ;;  %v5264_v61 = vld [vmem:[%s10752_s0 + $0x280] sm:$0xf]  ;;  %v5832_v2 = vld [vmem:[%s10752_s0 + $0x284] sm:$0xf]  ;;  %v6425_v5 = vor.u32 %v5772_v60, %v5008_v59  ;;  %849 = vmatpush.bf16.msra.mxu1 %v6393_v57  ;;  %v6431_v9 = vor.u32 %v5768_v0, %v5010_v1  ;;  %877 = vmatpush.bf16.msra.mxu3 %v6407_v62 }
  0x18   :  { %10961 = vst [vmem:[#allocation21_spill] sm:$0xff] %v6407_v62  ;;  %v5836_v63 = vld [vmem:[%s10752_s0 + $0x29c] sm:$0xf0]  ;;  %v5266_v4 = vld [vmem:[%s10752_s0 + $0x2a0] sm:$0xf0] }
  0x19   :  { %10962 = vst [vmem:[#allocation22_spill] sm:$0xff] %v6425_v5  ;;  %v6429_v6 = vor.u32 %v5836_v63, %v5264_v61  ;;  %v4976_v10 = vld [vmem:[%s10752_s0 + $0x40] sm:$0xf]  ;;  %v6443_v14 = vor.u32 %v5832_v2, %v5266_v4  ;;  %v5760_v18 = vld [vmem:[%s10752_s0 + $0x44] sm:$0xf]  ;;  %836 = vmatpush.bf16.msra.mxu0 %v6425_v5  ;;  %864 = vmatpush.bf16.msra.mxu2 %v6431_v9 }
  0x1a   :  { %10964 = vst [vmem:[#allocation24_spill] sm:$0xff] %v6431_v9  ;;  %v5764_v11 = vld [vmem:[%s10752_s0 + $0x5c] sm:$0xf0]  ;;  %v4978_v19 = vld [vmem:[%s10752_s0 + $0x60] sm:$0xf0] }
  0x1b   :  { %10963 = vst [vmem:[#allocation23_spill] sm:$0xff] %v6429_v6  ;;  %v5232_v13 = vld [vmem:[%s10752_s0 + $0x240] sm:$0xf]  ;;  %v5824_v20 = vld [vmem:[%s10752_s0 + $0x244] sm:$0xf]  ;;  %v6461_v23 = vor.u32 %v5764_v11, %v4976_v10  ;;  %850 = vmatpush.bf16.msra.mxu1 %v6429_v6  ;;  %v6473_v28 = vor.u32 %v5760_v18, %v4978_v19  ;;  %878 = vmatpush.bf16.msra.mxu3 %v6443_v14  ;;  %v49_v19 = vld [vmem:[%s10753_s1 + $0x10] sm:$0xff] }
  0x1c   :  { %10965 = vst [vmem:[#allocation25_spill] sm:$0xff] %v6443_v14  ;;  %v5828_v15 = vld [vmem:[%s10752_s0 + $0x25c] sm:$0xf0]  ;;  %v5234_v22 = vld [vmem:[%s10752_s0 + $0x260] sm:$0xf0] }
  0x1d   :  { %10966 = vst [vmem:[#allocation26_spill] sm:$0xff] %v6461_v23  ;;  %v4944_v24 = vld [vmem:[%s10752_s0] sm:$0xf]  ;;  %v6471_v27 = vor.u32 %v5828_v15, %v5232_v13  ;;  %v5752_v32 = vld [vmem:[%s10752_s0 + $0x4] sm:$0xf]  ;;  %v6485_v35 = vor.u32 %v5824_v20, %v5234_v22  ;;  %837 = vmatpush.bf16.msra.mxu0 %v6461_v23  ;;  %865 = vmatpush.bf16.msra.mxu2 %v6473_v28  ;;  %v6578_v20 = vld [vmem:[%s10753_s1 + $0x8] sm:$0xff] }
  0x1e   :  { %v5756_v26 = vld [vmem:[%s10752_s0 + $0x1c] sm:$0xf0]  ;;  %10968 = vst [vmem:[#allocation28_spill] sm:$0xff] %v6473_v28  ;;  %v4946_v36 = vld [vmem:[%s10752_s0 + $0x20] sm:$0xf0] }
  0x1f   :  { %10967 = vst [vmem:[#allocation27_spill] sm:$0xff] %v6471_v27  ;;  %v5200_v30 = vld [vmem:[%s10752_s0 + $0x200] sm:$0xf]  ;;  %v5816_v37 = vld [vmem:[%s10752_s0 + $0x204] sm:$0xf]  ;;  %v6506_v43 = vor.u32 %v5756_v26, %v4944_v24  ;;  %851 = vmatpush.bf16.msra.mxu1 %v6471_v27  ;;  %v6521_v52 = vor.u32 %v5752_v32, %v4946_v36  ;;  %879 = vmatpush.bf16.msra.mxu3 %v6485_v35  ;;  %v6590_v26 = vld [vmem:[%s10753_s1 + $0x18] sm:$0xff] }
  0x20   :  { %v5820_v31 = vld [vmem:[%s10752_s0 + $0x21c] sm:$0xf0]  ;;  %10969 = vst [vmem:[#allocation29_spill] sm:$0xff] %v6485_v35  ;;  %v5202_v39 = vld [vmem:[%s10752_s0 + $0x220] sm:$0xf0] }
  0x21   :  { %v5176_v40 = vld [vmem:[%s10752_s0 + $0x1c8] sm:$0xf]  ;;  %10970 = vst [vmem:[#allocation30_spill] sm:$0xff] %v6506_v43  ;;  %v5809_v48 = vld [vmem:[%s10752_s0 + $0x1cc] sm:$0xf]  ;;  %v6519_v51 = vor.u32 %v5820_v31, %v5200_v30  ;;  %v6530_v55 = vor.u32 %v5816_v37, %v5202_v39  ;;  %838 = vmatpush.bf16.msra.mxu0 %v6506_v43  ;;  %866 = vmatpush.bf16.msra.mxu2 %v6521_v52  ;;  %v6570_v18 = vld [vmem:[%s10753_s1] sm:$0xff] }
  0x22   :  { %v5813_v41 = vld [vmem:[%s10752_s0 + $0x1e4] sm:$0xf0]  ;;  %v5178_v49 = vld [vmem:[%s10752_s0 + $0x1e8] sm:$0xf0]  ;;  %10972 = vst [vmem:[#allocation32_spill] sm:$0xff] %v6521_v52  ;;  %v6585_v24 = vpack.c.bf16 %v49_v19, %v6570_v18  ;;  %v6609_v39 = vpack.c.bf16 %v6590_v26, %v6578_v20 }
  0x23   :  { %v5432_v42 = vld [vmem:[%s10752_s0 + $0x3c8] sm:$0xf]  ;;  %10971 = vst [vmem:[#allocation31_spill] sm:$0xff] %v6519_v51  ;;  %v5873_v53 = vld [vmem:[%s10752_s0 + $0x3cc] sm:$0xf]  ;;  %v6532_v59 = vor.u32 %v5813_v41, %v5176_v40  ;;  %v6542_v0 = vor.u32 %v5809_v48, %v5178_v49  ;;  %852 = vmatpush.bf16.msra.mxu1 %v6519_v51  ;;  %880 = vmatpush.bf16.msra.mxu3 %v6530_v55 }
  0x24   :  { %v5877_v47 = vld [vmem:[%s10752_s0 + $0x3e4] sm:$0xf0]  ;;  %v5434_v54 = vld [vmem:[%s10752_s0 + $0x3e8] sm:$0xf0]  ;;  %10973 = vst [vmem:[#allocation33_spill] sm:$0xff] %v6530_v55  ;;  %867 = vmatmul.bf16.vlgmr.msra.gmra.mxu2 %v6585_v24  ;;  %839 = vmatmul.bf16.vlgmr.msra.gmra.mxu0 %v6585_v24 }
  0x25   :  { %10974 = vst [vmem:[#allocation34_spill] sm:$0xff] %v6532_v59  ;;  %v5144_v60 = vld [vmem:[%s10752_s0 + $0x188] sm:$0xf]  ;;  %v6540_v63 = vor.u32 %v5877_v47, %v5432_v42  ;;  %v5801_v4 = vld [vmem:[%s10752_s0 + $0x18c] sm:$0xf]  ;;  %v6554_v10 = vor.u32 %v5873_v53, %v5434_v54  ;;  %887 = vmatpush.bf16.msrb.mxu0 %v6532_v59  ;;  %915 = vmatpush.bf16.msrb.mxu2 %v6542_v0 }
  0x26   :  { %v5805_v61 = vld [vmem:[%s10752_s0 + $0x1a4] sm:$0xf0]  ;;  %10976 = vst [vmem:[#allocation36_spill] sm:$0xff] %v6542_v0  ;;  %v5146_v11 = vld [vmem:[%s10752_s0 + $0x1a8] sm:$0xf0]  ;;  %881 = vmatmul.bf16.vlgmr.msra.gmra.mxu3 %v6609_v39  ;;  %853 = vmatmul.bf16.vlgmr.msra.gmra.mxu1 %v6609_v39 }
  0x27   :  { %10975 = vst [vmem:[#allocation35_spill] sm:$0xff] %v6540_v63  ;;  %v5400_v1 = vld [vmem:[%s10752_s0 + $0x388] sm:$0xf]  ;;  %v5865_v13 = vld [vmem:[%s10752_s0 + $0x38c] sm:$0xf]  ;;  %v6582_v22 = vor.u32 %v5805_v61, %v5144_v60  ;;  %901 = vmatpush.bf16.msrb.mxu1 %v6540_v63  ;;  %v6596_v31 = vor.u32 %v5801_v4, %v5146_v11  ;;  %929 = vmatpush.bf16.msrb.mxu3 %v6554_v10 }
  0x28   :  { %v5869_v2 = vld [vmem:[%s10752_s0 + $0x3a4] sm:$0xf0]  ;;  %10977 = vst [vmem:[#allocation37_spill] sm:$0xff] %v6554_v10  ;;  %v5402_v15 = vld [vmem:[%s10752_s0 + $0x3a8] sm:$0xf0] }
  0x29   :  { %10978 = vst [vmem:[#allocation38_spill] sm:$0xff] %v6582_v22  ;;  %v6594_v30 = vor.u32 %v5869_v2, %v5400_v1  ;;  %v5112_v32 = vld [vmem:[%s10752_s0 + $0x148] sm:$0xf]  ;;  %v6612_v40 = vor.u32 %v5865_v13, %v5402_v15  ;;  %v5793_v42 = vld [vmem:[%s10752_s0 + $0x14c] sm:$0xf]  ;;  %888 = vmatpush.bf16.msrb.mxu0 %v6582_v22  ;;  %916 = vmatpush.bf16.msrb.mxu2 %v6596_v31 }
  0x2a   :  { %10980 = vst [vmem:[#allocation40_spill] sm:$0xff] %v6596_v31  ;;  %v5797_v36 = vld [vmem:[%s10752_s0 + $0x164] sm:$0xf0]  ;;  %v5114_v47 = vld [vmem:[%s10752_s0 + $0x168] sm:$0xf0] }
  0x2b   :  { %10979 = vst [vmem:[#allocation39_spill] sm:$0xff] %v6594_v30  ;;  %v5368_v37 = vld [vmem:[%s10752_s0 + $0x348] sm:$0xf]  ;;  %v5857_v48 = vld [vmem:[%s10752_s0 + $0x34c] sm:$0xf]  ;;  %v6633_v53 = vor.u32 %v5797_v36, %v5112_v32  ;;  %902 = vmatpush.bf16.msrb.mxu1 %v6594_v30  ;;  %v6640_v60 = vor.u32 %v5793_v42, %v5114_v47  ;;  %930 = vmatpush.bf16.msrb.mxu3 %v6612_v40 }
  0x2c   :  { %10981 = vst [vmem:[#allocation41_spill] sm:$0xff] %v6612_v40  ;;  %v5861_v41 = vld [vmem:[%s10752_s0 + $0x364] sm:$0xf0]  ;;  %v5370_v49 = vld [vmem:[%s10752_s0 + $0x368] sm:$0xf0] }
  0x2d   :  { %10982 = vst [vmem:[#allocation42_spill] sm:$0xff] %v6633_v53  ;;  %v6638_v54 = vor.u32 %v5861_v41, %v5368_v37  ;;  %v5080_v61 = vld [vmem:[%s10752_s0 + $0x108] sm:$0xf]  ;;  %v6652_v4 = vor.u32 %v5857_v48, %v5370_v49  ;;  %v5785_v13 = vld [vmem:[%s10752_s0 + $0x10c] sm:$0xf]  ;;  %889 = vmatpush.bf16.msrb.mxu0 %v6633_v53  ;;  %917 = vmatpush.bf16.msrb.mxu2 %v6640_v60 }
  0x2e   :  { %10984 = vst [vmem:[#allocation44_spill] sm:$0xff] %v6640_v60  ;;  %v5789_v1 = vld [vmem:[%s10752_s0 + $0x124] sm:$0xf0]  ;;  %v5082_v15 = vld [vmem:[%s10752_s0 + $0x128] sm:$0xf0] }
  0x2f   :  { %10983 = vst [vmem:[#allocation43_spill] sm:$0xff] %v6638_v54  ;;  %v5336_v2 = vld [vmem:[%s10752_s0 + $0x308] sm:$0xf]  ;;  %v5849_v19 = vld [vmem:[%s10752_s0 + $0x30c] sm:$0xf]  ;;  %v6670_v36 = vor.u32 %v5789_v1, %v5080_v61  ;;  %903 = vmatpush.bf16.msrb.mxu1 %v6638_v54  ;;  %v6676_v41 = vor.u32 %v5785_v13, %v5082_v15  ;;  %931 = vmatpush.bf16.msrb.mxu3 %v6652_v4 }
  0x30   :  { %10985 = vst [vmem:[#allocation45_spill] sm:$0xff] %v6652_v4  ;;  %v5853_v11 = vld [vmem:[%s10752_s0 + $0x324] sm:$0xf0]  ;;  %v5338_v32 = vld [vmem:[%s10752_s0 + $0x328] sm:$0xf0] }
  0x31   :  { %10986 = vst [vmem:[#allocation46_spill] sm:$0xff] %v6670_v36  ;;  %v6674_v37 = vor.u32 %v5853_v11, %v5336_v2  ;;  %v5048_v42 = vld [vmem:[%s10752_s0 + $0xc8] sm:$0xf]  ;;  %v6688_v49 = vor.u32 %v5849_v19, %v5338_v32  ;;  %v5777_v1 = vld [vmem:[%s10752_s0 + $0xcc] sm:$0xf]  ;;  %890 = vmatpush.bf16.msrb.mxu0 %v6670_v36  ;;  %918 = vmatpush.bf16.msrb.mxu2 %v6676_v41 }
  0x32   :  { %10988 = vst [vmem:[#allocation48_spill] sm:$0xff] %v6676_v41  ;;  %v5781_v47 = vld [vmem:[%s10752_s0 + $0xe4] sm:$0xf0]  ;;  %v5050_v2 = vld [vmem:[%s10752_s0 + $0xe8] sm:$0xf0] }
  0x33   :  { %10987 = vst [vmem:[#allocation47_spill] sm:$0xff] %v6674_v37  ;;  %v5304_v48 = vld [vmem:[%s10752_s0 + $0x2c8] sm:$0xf]  ;;  %v5841_v11 = vld [vmem:[%s10752_s0 + $0x2cc] sm:$0xf]  ;;  %v6706_v15 = vor.u32 %v5781_v47, %v5048_v42  ;;  %904 = vmatpush.bf16.msrb.mxu1 %v6674_v37  ;;  %v6712_v32 = vor.u32 %v5777_v1, %v5050_v2  ;;  %932 = vmatpush.bf16.msrb.mxu3 %v6688_v49 }
  0x34   :  { %10989 = vst [vmem:[#allocation49_spill] sm:$0xff] %v6688_v49  ;;  %v5845_v61 = vld [vmem:[%s10752_s0 + $0x2e4] sm:$0xf0]  ;;  %v5306_v13 = vld [vmem:[%s10752_s0 + $0x2e8] sm:$0xf0] }
  0x35   :  { %10990 = vst [vmem:[#allocation50_spill] sm:$0xff] %v6706_v15  ;;  %v6710_v19 = vor.u32 %v5845_v61, %v5304_v48  ;;  %v5016_v4 = vld [vmem:[%s10752_s0 + $0x88] sm:$0xf]  ;;  %v6724_v47 = vor.u32 %v5841_v11, %v5306_v13  ;;  %v5769_v61 = vld [vmem:[%s10752_s0 + $0x8c] sm:$0xf]  ;;  %891 = vmatpush.bf16.msrb.mxu0 %v6706_v15  ;;  %919 = vmatpush.bf16.msrb.mxu2 %v6712_v32 }
  0x36   :  { %10992 = vst [vmem:[#allocation52_spill] sm:$0xff] %v6712_v32  ;;  %v5773_v60 = vld [vmem:[%s10752_s0 + $0xa4] sm:$0xf0]  ;;  %v5018_v1 = vld [vmem:[%s10752_s0 + $0xa8] sm:$0xf0] }
  0x37   :  { %10991 = vst [vmem:[#allocation51_spill] sm:$0xff] %v6710_v19  ;;  %v5272_v42 = vld [vmem:[%s10752_s0 + $0x288] sm:$0xf]  ;;  %v5833_v2 = vld [vmem:[%s10752_s0 + $0x28c] sm:$0xf]  ;;  %v6742_v13 = vor.u32 %v5773_v60, %v5016_v4  ;;  %905 = vmatpush.bf16.msrb.mxu1 %v6710_v19  ;;  %v6748_v41 = vor.u32 %v5769_v61, %v5018_v1  ;;  %933 = vmatpush.bf16.msrb.mxu3 %v6724_v47 }
  0x38   :  { %10993 = vst [vmem:[#allocation53_spill] sm:$0xff] %v6724_v47  ;;  %v5837_v48 = vld [vmem:[%s10752_s0 + $0x2a4] sm:$0xf0]  ;;  %v5274_v11 = vld [vmem:[%s10752_s0 + $0x2a8] sm:$0xf0] }
  0x39   :  { %10994 = vst [vmem:[#allocation54_spill] sm:$0xff] %v6742_v13  ;;  %v6746_v49 = vor.u32 %v5837_v48, %v5272_v42  ;;  %v4984_v40 = vld [vmem:[%s10752_s0 + $0x48] sm:$0xf]  ;;  %v6760_v4 = vor.u32 %v5833_v2, %v5274_v11  ;;  %v5761_v48 = vld [vmem:[%s10752_s0 + $0x4c] sm:$0xf]  ;;  %892 = vmatpush.bf16.msrb.mxu0 %v6742_v13  ;;  %920 = vmatpush.bf16.msrb.mxu2 %v6748_v41 }
  0x3a   :  { %10996 = vst [vmem:[#allocation56_spill] sm:$0xff] %v6748_v41  ;;  %v5765_v31 = vld [vmem:[%s10752_s0 + $0x64] sm:$0xf0]  ;;  %v4986_v61 = vld [vmem:[%s10752_s0 + $0x68] sm:$0xf0] }
  0x3b   :  { %10995 = vst [vmem:[#allocation55_spill] sm:$0xff] %v6746_v49  ;;  %v5240_v60 = vld [vmem:[%s10752_s0 + $0x248] sm:$0xf]  ;;  %v5825_v1 = vld [vmem:[%s10752_s0 + $0x24c] sm:$0xf]  ;;  %v6778_v11 = vor.u32 %v5765_v31, %v4984_v40  ;;  %906 = vmatpush.bf16.msrb.mxu1 %v6746_v49  ;;  %v6790_v55 = vor.u32 %v5761_v48, %v4986_v61  ;;  %934 = vmatpush.bf16.msrb.mxu3 %v6760_v4 }
  0x3c   :  { %10997 = vst [vmem:[#allocation57_spill] sm:$0xff] %v6760_v4  ;;  %v5829_v42 = vld [vmem:[%s10752_s0 + $0x264] sm:$0xf0]  ;;  %v5242_v2 = vld [vmem:[%s10752_s0 + $0x268] sm:$0xf0] }
  0x3d   :  { %10998 = vst [vmem:[#allocation58_spill] sm:$0xff] %v6778_v11  ;;  %v4952_v47 = vld [vmem:[%s10752_s0 + $0x8] sm:$0xf]  ;;  %v6788_v10 = vor.u32 %v5829_v42, %v5240_v60  ;;  %v5753_v0 = vld [vmem:[%s10752_s0 + $0xc] sm:$0xf]  ;;  %v6802_v52 = vor.u32 %v5825_v1, %v5242_v2  ;;  %893 = vmatpush.bf16.msrb.mxu0 %v6778_v11  ;;  %921 = vmatpush.bf16.msrb.mxu2 %v6790_v55 }
  0x3e   :  { %v5757_v32 = vld [vmem:[%s10752_s0 + $0x24] sm:$0xf0]  ;;  %11000 = vst [vmem:[#allocation60_spill] sm:$0xff] %v6790_v55  ;;  %v4954_v60 = vld [vmem:[%s10752_s0 + $0x28] sm:$0xf0] }
  0x3f   :  { %10999 = vst [vmem:[#allocation59_spill] sm:$0xff] %v6788_v10  ;;  %v5208_v31 = vld [vmem:[%s10752_s0 + $0x208] sm:$0xf]  ;;  %v5817_v42 = vld [vmem:[%s10752_s0 + $0x20c] sm:$0xf]  ;;  %v6823_v4 = vor.u32 %v5757_v32, %v4952_v47  ;;  %907 = vmatpush.bf16.msrb.mxu1 %v6788_v10  ;;  %v6838_v32 = vor.u32 %v5753_v0, %v4954_v60  ;;  %935 = vmatpush.bf16.msrb.mxu3 %v6802_v52 }
  0x40   :  { %v5821_v40 = vld [vmem:[%s10752_s0 + $0x224] sm:$0xf0]  ;;  %11001 = vst [vmem:[#allocation61_spill] sm:$0xff] %v6802_v52  ;;  %v5210_v48 = vld [vmem:[%s10752_s0 + $0x228] sm:$0xf0] }
  0x41   :  { %v5184_v61 = vld [vmem:[%s10752_s0 + $0x1d0] sm:$0xf]  ;;  %11002 = vst [vmem:[#allocation62_spill] sm:$0xff] %v6823_v4  ;;  %v5810_v35 = vld [vmem:[%s10752_s0 + $0x1d4] sm:$0xf]  ;;  %v6836_v14 = vor.u32 %v5821_v40, %v5208_v31  ;;  %v6847_v62 = vor.u32 %v5817_v42, %v5210_v48  ;;  %894 = vmatpush.bf16.msrb.mxu0 %v6823_v4  ;;  %922 = vmatpush.bf16.msrb.mxu2 %v6838_v32 }
  0x42   :  { %v5814_v1 = vld [vmem:[%s10752_s0 + $0x1ec] sm:$0xf0]  ;;  %v5186_v28 = vld [vmem:[%s10752_s0 + $0x1f0] sm:$0xf0]  ;;  %11004 = vst [vmem:[#allocation64_spill] sm:$0xff] %v6838_v32 }
  0x43   :  { %v5440_v2 = vld [vmem:[%s10752_s0 + $0x3d0] sm:$0xf]  ;;  %11003 = vst [vmem:[#allocation63_spill] sm:$0xff] %v6836_v14  ;;  %v5874_v47 = vld [vmem:[%s10752_s0 + $0x3d4] sm:$0xf]  ;;  %v6849_v58 = vor.u32 %v5814_v1, %v5184_v61  ;;  %v6853_v31 = vor.u32 %v5810_v35, %v5186_v28  ;;  %908 = vmatpush.bf16.msrb.mxu1 %v6836_v14  ;;  %936 = vmatpush.bf16.msrb.mxu3 %v6847_v62 }
  0x44   :  { %v5878_v41 = vld [vmem:[%s10752_s0 + $0x3ec] sm:$0xf0]  ;;  %v5442_v9 = vld [vmem:[%s10752_s0 + $0x3f0] sm:$0xf0]  ;;  %11005 = vst [vmem:[#allocation65_spill] sm:$0xff] %v6847_v62  ;;  %923 = vmatmul.bf16.vlgmr.msrb.gmra.mxu2 %v6585_v24  ;;  %895 = vmatmul.bf16.vlgmr.msrb.gmra.mxu0 %v6585_v24 }
  0x45   :  { %11006 = vst [vmem:[#allocation66_spill] sm:$0xff] %v6849_v58  ;;  %v6851_v50 = vor.u32 %v5878_v41, %v5440_v2  ;;  %v5152_v0 = vld [vmem:[%s10752_s0 + $0x190] sm:$0xf]  ;;  %v6865_v42 = vor.u32 %v5874_v47, %v5442_v9  ;;  %v5802_v35 = vld [vmem:[%s10752_s0 + $0x194] sm:$0xf]  ;;  %943 = vmatpush.bf16.msra.mxu0 %v6849_v58  ;;  %971 = vmatpush.bf16.msra.mxu2 %v6853_v31 }
  0x46   :  { %11008 = vst [vmem:[#allocation68_spill] sm:$0xff] %v6853_v31  ;;  %v5806_v40 = vld [vmem:[%s10752_s0 + $0x1ac] sm:$0xf0]  ;;  %v5154_v41 = vld [vmem:[%s10752_s0 + $0x1b0] sm:$0xf0]  ;;  %937 = vmatmul.bf16.vlgmr.msrb.gmra.mxu3 %v6609_v39  ;;  %909 = vmatmul.bf16.vlgmr.msrb.gmra.mxu1 %v6609_v39 }
  0x47   :  { %11007 = vst [vmem:[#allocation67_spill] sm:$0xff] %v6851_v50  ;;  %v5408_v60 = vld [vmem:[%s10752_s0 + $0x390] sm:$0xf]  ;;  %v5866_v9 = vld [vmem:[%s10752_s0 + $0x394] sm:$0xf]  ;;  %v6886_v61 = vor.u32 %v5806_v40, %v5152_v0  ;;  %957 = vmatpush.bf16.msra.mxu1 %v6851_v50  ;;  %v6892_v2 = vor.u32 %v5802_v35, %v5154_v41  ;;  %985 = vmatpush.bf16.msra.mxu3 %v6865_v42 }
  0x48   :  { %11009 = vst [vmem:[#allocation69_spill] sm:$0xff] %v6865_v42  ;;  %v5870_v28 = vld [vmem:[%s10752_s0 + $0x3ac] sm:$0xf0]  ;;  %v5410_v48 = vld [vmem:[%s10752_s0 + $0x3b0] sm:$0xf0] }
  0x49   :  { %11010 = vst [vmem:[#allocation70_spill] sm:$0xff] %v6886_v61  ;;  %v6890_v1 = vor.u32 %v5870_v28, %v5408_v60  ;;  %v5120_v47 = vld [vmem:[%s10752_s0 + $0x150] sm:$0xf]  ;;  %v6905_v40 = vor.u32 %v5866_v9, %v5410_v48  ;;  %v5794_v28 = vld [vmem:[%s10752_s0 + $0x154] sm:$0xf]  ;;  %944 = vmatpush.bf16.msra.mxu0 %v6886_v61  ;;  %972 = vmatpush.bf16.msra.mxu2 %v6892_v2 }
  0x4a   :  { %11012 = vst [vmem:[#allocation72_spill] sm:$0xff] %v6892_v2  ;;  %v5798_v62 = vld [vmem:[%s10752_s0 + $0x16c] sm:$0xf0]  ;;  %v5122_v35 = vld [vmem:[%s10752_s0 + $0x170] sm:$0xf0] }
  0x4b   :  { %11011 = vst [vmem:[#allocation71_spill] sm:$0xff] %v6890_v1  ;;  %v5376_v0 = vld [vmem:[%s10752_s0 + $0x350] sm:$0xf]  ;;  %v5858_v41 = vld [vmem:[%s10752_s0 + $0x354] sm:$0xf]  ;;  %v6926_v48 = vor.u32 %v5798_v62, %v5120_v47  ;;  %958 = vmatpush.bf16.msra.mxu1 %v6890_v1  ;;  %v6932_v50 = vor.u32 %v5794_v28, %v5122_v35  ;;  %986 = vmatpush.bf16.msra.mxu3 %v6905_v40 }
  0x4c   :  { %11013 = vst [vmem:[#allocation73_spill] sm:$0xff] %v6905_v40  ;;  %v5862_v60 = vld [vmem:[%s10752_s0 + $0x36c] sm:$0xf0]  ;;  %v5378_v9 = vld [vmem:[%s10752_s0 + $0x370] sm:$0xf0] }
  0x4d   :  { %11014 = vst [vmem:[#allocation74_spill] sm:$0xff] %v6926_v48  ;;  %v6930_v42 = vor.u32 %v5862_v60, %v5376_v0  ;;  %v5088_v31 = vld [vmem:[%s10752_s0 + $0x110] sm:$0xf]  ;;  %v6944_v47 = vor.u32 %v5858_v41, %v5378_v9  ;;  %v5786_v60 = vld [vmem:[%s10752_s0 + $0x114] sm:$0xf]  ;;  %945 = vmatpush.bf16.msra.mxu0 %v6926_v48  ;;  %973 = vmatpush.bf16.msra.mxu2 %v6932_v50 }
  0x4e   :  { %11016 = vst [vmem:[#allocation76_spill] sm:$0xff] %v6932_v50  ;;  %v5790_v61 = vld [vmem:[%s10752_s0 + $0x12c] sm:$0xf0]  ;;  %v5090_v28 = vld [vmem:[%s10752_s0 + $0x130] sm:$0xf0] }
  0x4f   :  { %11015 = vst [vmem:[#allocation75_spill] sm:$0xff] %v6930_v42  ;;  %v5344_v62 = vld [vmem:[%s10752_s0 + $0x310] sm:$0xf]  ;;  %v5850_v35 = vld [vmem:[%s10752_s0 + $0x314] sm:$0xf]  ;;  %v6962_v9 = vor.u32 %v5790_v61, %v5088_v31  ;;  %959 = vmatpush.bf16.msra.mxu1 %v6930_v42  ;;  %v6968_v1 = vor.u32 %v5786_v60, %v5090_v28  ;;  %987 = vmatpush.bf16.msra.mxu3 %v6944_v47 }
  0x50   :  { %11017 = vst [vmem:[#allocation77_spill] sm:$0xff] %v6944_v47  ;;  %v5854_v0 = vld [vmem:[%s10752_s0 + $0x32c] sm:$0xf0]  ;;  %v5346_v41 = vld [vmem:[%s10752_s0 + $0x330] sm:$0xf0] }
  0x51   :  { %11018 = vst [vmem:[#allocation78_spill] sm:$0xff] %v6962_v9  ;;  %v6966_v40 = vor.u32 %v5854_v0, %v5344_v62  ;;  %v5056_v2 = vld [vmem:[%s10752_s0 + $0xd0] sm:$0xf]  ;;  %v6980_v61 = vor.u32 %v5850_v35, %v5346_v41  ;;  %v5778_v0 = vld [vmem:[%s10752_s0 + $0xd4] sm:$0xf]  ;;  %946 = vmatpush.bf16.msra.mxu0 %v6962_v9  ;;  %974 = vmatpush.bf16.msra.mxu2 %v6968_v1 }
  0x52   :  { %11020 = vst [vmem:[#allocation80_spill] sm:$0xff] %v6968_v1  ;;  %v5782_v58 = vld [vmem:[%s10752_s0 + $0xec] sm:$0xf0]  ;;  %v5058_v60 = vld [vmem:[%s10752_s0 + $0xf0] sm:$0xf0] }
  0x53   :  { %11019 = vst [vmem:[#allocation79_spill] sm:$0xff] %v6966_v40  ;;  %v5312_v31 = vld [vmem:[%s10752_s0 + $0x2d0] sm:$0xf]  ;;  %v5842_v28 = vld [vmem:[%s10752_s0 + $0x2d4] sm:$0xf]  ;;  %v6998_v41 = vor.u32 %v5782_v58, %v5056_v2  ;;  %960 = vmatpush.bf16.msra.mxu1 %v6966_v40  ;;  %v7004_v42 = vor.u32 %v5778_v0, %v5058_v60  ;;  %988 = vmatpush.bf16.msra.mxu3 %v6980_v61 }
  0x54   :  { %11021 = vst [vmem:[#allocation81_spill] sm:$0xff] %v6980_v61  ;;  %v5846_v62 = vld [vmem:[%s10752_s0 + $0x2ec] sm:$0xf0]  ;;  %v5314_v35 = vld [vmem:[%s10752_s0 + $0x2f0] sm:$0xf0] }
  0x55   :  { %11022 = vst [vmem:[#allocation82_spill] sm:$0xff] %v6998_v41  ;;  %v7002_v47 = vor.u32 %v5846_v62, %v5312_v31  ;;  %v5024_v50 = vld [vmem:[%s10752_s0 + $0x90] sm:$0xf]  ;;  %v7016_v2 = vor.u32 %v5842_v28, %v5314_v35  ;;  %v5770_v62 = vld [vmem:[%s10752_s0 + $0x94] sm:$0xf]  ;;  %947 = vmatpush.bf16.msra.mxu0 %v6998_v41  ;;  %975 = vmatpush.bf16.msra.mxu2 %v7004_v42 }
  0x56   :  { %11024 = vst [vmem:[#allocation84_spill] sm:$0xff] %v7004_v42  ;;  %v5774_v48 = vld [vmem:[%s10752_s0 + $0xac] sm:$0xf0]  ;;  %v5026_v0 = vld [vmem:[%s10752_s0 + $0xb0] sm:$0xf0] }
  0x57   :  { %11023 = vst [vmem:[#allocation83_spill] sm:$0xff] %v7002_v47  ;;  %v5280_v58 = vld [vmem:[%s10752_s0 + $0x290] sm:$0xf]  ;;  %v5834_v60 = vld [vmem:[%s10752_s0 + $0x294] sm:$0xf]  ;;  %v7034_v35 = vor.u32 %v5774_v48, %v5024_v50  ;;  %961 = vmatpush.bf16.msra.mxu1 %v7002_v47  ;;  %v7040_v40 = vor.u32 %v5770_v62, %v5026_v0  ;;  %989 = vmatpush.bf16.msra.mxu3 %v7016_v2 }
  0x58   :  { %11025 = vst [vmem:[#allocation85_spill] sm:$0xff] %v7016_v2  ;;  %v5838_v31 = vld [vmem:[%s10752_s0 + $0x2ac] sm:$0xf0]  ;;  %v5282_v28 = vld [vmem:[%s10752_s0 + $0x2b0] sm:$0xf0] }
  0x59   :  { %11026 = vst [vmem:[#allocation86_spill] sm:$0xff] %v7034_v35  ;;  %v7038_v61 = vor.u32 %v5838_v31, %v5280_v58  ;;  %v4992_v1 = vld [vmem:[%s10752_s0 + $0x50] sm:$0xf]  ;;  %v7052_v48 = vor.u32 %v5834_v60, %v5282_v28  ;;  %v5762_v31 = vld [vmem:[%s10752_s0 + $0x54] sm:$0xf]  ;;  %948 = vmatpush.bf16.msra.mxu0 %v7034_v35  ;;  %976 = vmatpush.bf16.msra.mxu2 %v7040_v40 }
  0x5a   :  { %11028 = vst [vmem:[#allocation88_spill] sm:$0xff] %v7040_v40  ;;  %v5766_v9 = vld [vmem:[%s10752_s0 + $0x6c] sm:$0xf0]  ;;  %v4994_v62 = vld [vmem:[%s10752_s0 + $0x70] sm:$0xf0] }
  0x5b   :  { %11027 = vst [vmem:[#allocation87_spill] sm:$0xff] %v7038_v61  ;;  %v5248_v50 = vld [vmem:[%s10752_s0 + $0x250] sm:$0xf]  ;;  %v5826_v0 = vld [vmem:[%s10752_s0 + $0x254] sm:$0xf]  ;;  %v7070_v28 = vor.u32 %v5766_v9, %v4992_v1  ;;  %962 = vmatpush.bf16.msra.mxu1 %v7038_v61  ;;  %v7082_v41 = vor.u32 %v5762_v31, %v4994_v62  ;;  %990 = vmatpush.bf16.msra.mxu3 %v7052_v48 }
  0x5c   :  { %11029 = vst [vmem:[#allocation89_spill] sm:$0xff] %v7052_v48  ;;  %v5830_v58 = vld [vmem:[%s10752_s0 + $0x26c] sm:$0xf0]  ;;  %v5250_v60 = vld [vmem:[%s10752_s0 + $0x270] sm:$0xf0] }
  0x5d   :  { %11030 = vst [vmem:[#allocation90_spill] sm:$0xff] %v7070_v28  ;;  %v4960_v2 = vld [vmem:[%s10752_s0 + $0x10] sm:$0xf]  ;;  %v7080_v42 = vor.u32 %v5830_v58, %v5248_v50  ;;  %v5754_v35 = vld [vmem:[%s10752_s0 + $0x14] sm:$0xf]  ;;  %v7094_v61 = vor.u32 %v5826_v0, %v5250_v60  ;;  %949 = vmatpush.bf16.msra.mxu0 %v7070_v28  ;;  %977 = vmatpush.bf16.msra.mxu2 %v7082_v41 }
  0x5e   :  { %v5758_v47 = vld [vmem:[%s10752_s0 + $0x2c] sm:$0xf0]  ;;  %11032 = vst [vmem:[#allocation92_spill] sm:$0xff] %v7082_v41  ;;  %v4962_v50 = vld [vmem:[%s10752_s0 + $0x30] sm:$0xf0] }
  0x5f   :  { %11031 = vst [vmem:[#allocation91_spill] sm:$0xff] %v7080_v42  ;;  %v5216_v1 = vld [vmem:[%s10752_s0 + $0x210] sm:$0xf]  ;;  %v5818_v58 = vld [vmem:[%s10752_s0 + $0x214] sm:$0xf]  ;;  %v7115_v48 = vor.u32 %v5758_v47, %v4960_v2  ;;  %963 = vmatpush.bf16.msra.mxu1 %v7080_v42  ;;  %v7130_v47 = vor.u32 %v5754_v35, %v4962_v50  ;;  %991 = vmatpush.bf16.msra.mxu3 %v7094_v61 }
  0x60   :  { %v5822_v9 = vld [vmem:[%s10752_s0 + $0x22c] sm:$0xf0]  ;;  %11033 = vst [vmem:[#allocation93_spill] sm:$0xff] %v7094_v61  ;;  %v5218_v31 = vld [vmem:[%s10752_s0 + $0x230] sm:$0xf0] }
  0x61   :  { %v5192_v62 = vld [vmem:[%s10752_s0 + $0x1d8] sm:$0xf]  ;;  %11034 = vst [vmem:[#allocation94_spill] sm:$0xff] %v7115_v48  ;;  %v5811_v32 = vld [vmem:[%s10752_s0 + $0x1dc] sm:$0xf]  ;;  %v7128_v55 = vor.u32 %v5822_v9, %v5216_v1  ;;  %v7139_v46 = vor.u32 %v5818_v58, %v5218_v31  ;;  %950 = vmatpush.bf16.msra.mxu0 %v7115_v48  ;;  %978 = vmatpush.bf16.msra.mxu2 %v7130_v47 }
  0x62   :  { %v5815_v0 = vld [vmem:[%s10752_s0 + $0x1f4] sm:$0xf0]  ;;  %v5194_v52 = vld [vmem:[%s10752_s0 + $0x1f8] sm:$0xf0]  ;;  %11036 = vst [vmem:[#allocation96_spill] sm:$0xff] %v7130_v47 }
  0x63   :  { %v5448_v60 = vld [vmem:[%s10752_s0 + $0x3d8] sm:$0xf]  ;;  %11035 = vst [vmem:[#allocation95_spill] sm:$0xff] %v7128_v55  ;;  %v5875_v2 = vld [vmem:[%s10752_s0 + $0x3dc] sm:$0xf]  ;;  %v7141_v38 = vor.u32 %v5815_v0, %v5192_v62  ;;  %v7145_v1 = vor.u32 %v5811_v32, %v5194_v52  ;;  %964 = vmatpush.bf16.msra.mxu1 %v7128_v55  ;;  %992 = vmatpush.bf16.msra.mxu3 %v7139_v46 }
  0x64   :  { %v5879_v40 = vld [vmem:[%s10752_s0 + $0x3f4] sm:$0xf0]  ;;  %v5450_v28 = vld [vmem:[%s10752_s0 + $0x3f8] sm:$0xf0]  ;;  %11037 = vst [vmem:[#allocation97_spill] sm:$0xff] %v7139_v46  ;;  %979 = vmatmul.bf16.vlgmr.msra.gmra.mxu2 %v6585_v24  ;;  %951 = vmatmul.bf16.vlgmr.msra.gmra.mxu0 %v6585_v24 }
  0x65   :  { %11038 = vst [vmem:[#allocation98_spill] sm:$0xff] %v7141_v38  ;;  %v7143_v42 = vor.u32 %v5879_v40, %v5448_v60  ;;  %v5160_v35 = vld [vmem:[%s10752_s0 + $0x198] sm:$0xf]  ;;  %v7157_v58 = vor.u32 %v5875_v2, %v5450_v28  ;;  %v5803_v32 = vld [vmem:[%s10752_s0 + $0x19c] sm:$0xf]  ;;  %999 = vmatpush.bf16.msrb.mxu0 %v7141_v38  ;;  %1027 = vmatpush.bf16.msrb.mxu2 %v7145_v1 }
  0x66   :  { %11040 = vst [vmem:[#allocation100_spill] sm:$0xff] %v7145_v1  ;;  %v5807_v9 = vld [vmem:[%s10752_s0 + $0x1b4] sm:$0xf0]  ;;  %v5162_v40 = vld [vmem:[%s10752_s0 + $0x1b8] sm:$0xf0]  ;;  %993 = vmatmul.bf16.vlgmr.msra.gmra.mxu3 %v6609_v39  ;;  %965 = vmatmul.bf16.vlgmr.msra.gmra.mxu1 %v6609_v39 }
  0x67   :  { %11039 = vst [vmem:[#allocation99_spill] sm:$0xff] %v7143_v42  ;;  %v5416_v50 = vld [vmem:[%s10752_s0 + $0x398] sm:$0xf]  ;;  %v5867_v28 = vld [vmem:[%s10752_s0 + $0x39c] sm:$0xf]  ;;  %v7178_v62 = vor.u32 %v5807_v9, %v5160_v35  ;;  %1013 = vmatpush.bf16.msrb.mxu1 %v7143_v42  ;;  %v7184_v60 = vor.u32 %v5803_v32, %v5162_v40  ;;  %1041 = vmatpush.bf16.msrb.mxu3 %v7157_v58 }
  0x68   :  { %11041 = vst [vmem:[#allocation101_spill] sm:$0xff] %v7157_v58  ;;  %v5871_v52 = vld [vmem:[%s10752_s0 + $0x3b4] sm:$0xf0]  ;;  %v5418_v31 = vld [vmem:[%s10752_s0 + $0x3b8] sm:$0xf0] }
  0x69   :  { %11042 = vst [vmem:[#allocation102_spill] sm:$0xff] %v7178_v62  ;;  %v7182_v0 = vor.u32 %v5871_v52, %v5416_v50  ;;  %v5128_v2 = vld [vmem:[%s10752_s0 + $0x158] sm:$0xf]  ;;  %v7197_v9 = vor.u32 %v5867_v28, %v5418_v31  ;;  %v5795_v52 = vld [vmem:[%s10752_s0 + $0x15c] sm:$0xf]  ;;  %1000 = vmatpush.bf16.msrb.mxu0 %v7178_v62  ;;  %1028 = vmatpush.bf16.msrb.mxu2 %v7184_v60 }
  0x6a   :  { %11044 = vst [vmem:[#allocation104_spill] sm:$0xff] %v7184_v60  ;;  %v5799_v46 = vld [vmem:[%s10752_s0 + $0x174] sm:$0xf0]  ;;  %v5130_v32 = vld [vmem:[%s10752_s0 + $0x178] sm:$0xf0] }
  0x6b   :  { %11043 = vst [vmem:[#allocation103_spill] sm:$0xff] %v7182_v0  ;;  %v5384_v35 = vld [vmem:[%s10752_s0 + $0x358] sm:$0xf]  ;;  %v5859_v40 = vld [vmem:[%s10752_s0 + $0x35c] sm:$0xf]  ;;  %v7218_v31 = vor.u32 %v5799_v46, %v5128_v2  ;;  %1014 = vmatpush.bf16.msrb.mxu1 %v7182_v0  ;;  %v7224_v42 = vor.u32 %v5795_v52, %v5130_v32  ;;  %1042 = vmatpush.bf16.msrb.mxu3 %v7197_v9 }
  0x6c   :  { %11045 = vst [vmem:[#allocation105_spill] sm:$0xff] %v7197_v9  ;;  %v5863_v50 = vld [vmem:[%s10752_s0 + $0x374] sm:$0xf0]  ;;  %v5386_v28 = vld [vmem:[%s10752_s0 + $0x378] sm:$0xf0] }
  0x6d   :  { %11046 = vst [vmem:[#allocation106_spill] sm:$0xff] %v7218_v31  ;;  %v7222_v58 = vor.u32 %v5863_v50, %v5384_v35  ;;  %v5096_v55 = vld [vmem:[%s10752_s0 + $0x118] sm:$0xf]  ;;  %v7236_v2 = vor.u32 %v5859_v40, %v5386_v28  ;;  %v5787_v50 = vld [vmem:[%s10752_s0 + $0x11c] sm:$0xf]  ;;  %1001 = vmatpush.bf16.msrb.mxu0 %v7218_v31  ;;  %1029 = vmatpush.bf16.msrb.mxu2 %v7224_v42 }
  0x6e   :  { %11048 = vst [vmem:[#allocation108_spill] sm:$0xff] %v7224_v42  ;;  %v5791_v62 = vld [vmem:[%s10752_s0 + $0x134] sm:$0xf0]  ;;  %v5098_v52 = vld [vmem:[%s10752_s0 + $0x138] sm:$0xf0] }
  0x6f   :  { %11047 = vst [vmem:[#allocation107_spill] sm:$0xff] %v7222_v58  ;;  %v5352_v46 = vld [vmem:[%s10752_s0 + $0x318] sm:$0xf]  ;;  %v5851_v32 = vld [vmem:[%s10752_s0 + $0x31c] sm:$0xf]  ;;  %v7254_v28 = vor.u32 %v5791_v62, %v5096_v55  ;;  %1015 = vmatpush.bf16.msrb.mxu1 %v7222_v58  ;;  %v7260_v0 = vor.u32 %v5787_v50, %v5098_v52  ;;  %1043 = vmatpush.bf16.msrb.mxu3 %v7236_v2 }
  0x70   :  { %11049 = vst [vmem:[#allocation109_spill] sm:$0xff] %v7236_v2  ;;  %v5855_v35 = vld [vmem:[%s10752_s0 + $0x334] sm:$0xf0]  ;;  %v5354_v40 = vld [vmem:[%s10752_s0 + $0x338] sm:$0xf0] }
  0x71   :  { %11050 = vst [vmem:[#allocation110_spill] sm:$0xff] %v7254_v28  ;;  %v7258_v9 = vor.u32 %v5855_v35, %v5352_v46  ;;  %v5064_v60 = vld [vmem:[%s10752_s0 + $0xd8] sm:$0xf]  ;;  %v7272_v62 = vor.u32 %v5851_v32, %v5354_v40  ;;  %v5779_v35 = vld [vmem:[%s10752_s0 + $0xdc] sm:$0xf]  ;;  %1002 = vmatpush.bf16.msrb.mxu0 %v7254_v28  ;;  %1030 = vmatpush.bf16.msrb.mxu2 %v7260_v0 }
  0x72   :  { %11052 = vst [vmem:[#allocation112_spill] sm:$0xff] %v7260_v0  ;;  %v5783_v1 = vld [vmem:[%s10752_s0 + $0xf4] sm:$0xf0]  ;;  %v5066_v50 = vld [vmem:[%s10752_s0 + $0xf8] sm:$0xf0] }
  0x73   :  { %11051 = vst [vmem:[#allocation111_spill] sm:$0xff] %v7258_v9  ;;  %v5320_v55 = vld [vmem:[%s10752_s0 + $0x2d8] sm:$0xf]  ;;  %v5843_v52 = vld [vmem:[%s10752_s0 + $0x2dc] sm:$0xf]  ;;  %v7290_v40 = vor.u32 %v5783_v1, %v5064_v60  ;;  %1016 = vmatpush.bf16.msrb.mxu1 %v7258_v9  ;;  %v7296_v58 = vor.u32 %v5779_v35, %v5066_v50  ;;  %1044 = vmatpush.bf16.msrb.mxu3 %v7272_v62 }
  0x74   :  { %11053 = vst [vmem:[#allocation113_spill] sm:$0xff] %v7272_v62  ;;  %v5847_v46 = vld [vmem:[%s10752_s0 + $0x2f4] sm:$0xf0]  ;;  %v5322_v32 = vld [vmem:[%s10752_s0 + $0x2f8] sm:$0xf0] }
  0x75   :  { %11054 = vst [vmem:[#allocation114_spill] sm:$0xff] %v7290_v40  ;;  %v7294_v2 = vor.u32 %v5847_v46, %v5320_v55  ;;  %v5032_v42 = vld [vmem:[%s10752_s0 + $0x98] sm:$0xf]  ;;  %v7308_v60 = vor.u32 %v5843_v52, %v5322_v32  ;;  %v5771_v46 = vld [vmem:[%s10752_s0 + $0x9c] sm:$0xf]  ;;  %1003 = vmatpush.bf16.msrb.mxu0 %v7290_v40  ;;  %1031 = vmatpush.bf16.msrb.mxu2 %v7296_v58 }
  0x76   :  { %11056 = vst [vmem:[#allocation116_spill] sm:$0xff] %v7296_v58  ;;  %v5775_v31 = vld [vmem:[%s10752_s0 + $0xb4] sm:$0xf0]  ;;  %v5034_v35 = vld [vmem:[%s10752_s0 + $0xb8] sm:$0xf0] }
  0x77   :  { %11055 = vst [vmem:[#allocation115_spill] sm:$0xff] %v7294_v2  ;;  %v5288_v1 = vld [vmem:[%s10752_s0 + $0x298] sm:$0xf]  ;;  %v5835_v50 = vld [vmem:[%s10752_s0 + $0x29c] sm:$0xf]  ;;  %v7326_v32 = vor.u32 %v5775_v31, %v5032_v42  ;;  %1017 = vmatpush.bf16.msrb.mxu1 %v7294_v2  ;;  %v7332_v9 = vor.u32 %v5771_v46, %v5034_v35  ;;  %1045 = vmatpush.bf16.msrb.mxu3 %v7308_v60 }
  0x78   :  { %11057 = vst [vmem:[#allocation117_spill] sm:$0xff] %v7308_v60  ;;  %v5839_v55 = vld [vmem:[%s10752_s0 + $0x2b4] sm:$0xf0]  ;;  %v5290_v52 = vld [vmem:[%s10752_s0 + $0x2b8] sm:$0xf0] }
  0x79   :  { %11058 = vst [vmem:[#allocation118_spill] sm:$0xff] %v7326_v32  ;;  %v7330_v62 = vor.u32 %v5839_v55, %v5288_v1  ;;  %v5000_v0 = vld [vmem:[%s10752_s0 + $0x58] sm:$0xf]  ;;  %v7344_v31 = vor.u32 %v5835_v50, %v5290_v52  ;;  %v5763_v55 = vld [vmem:[%s10752_s0 + $0x5c] sm:$0xf]  ;;  %1004 = vmatpush.bf16.msrb.mxu0 %v7326_v32  ;;  %1032 = vmatpush.bf16.msrb.mxu2 %v7332_v9 }
  0x7a   :  { %11060 = vst [vmem:[#allocation120_spill] sm:$0xff] %v7332_v9  ;;  %v5767_v28 = vld [vmem:[%s10752_s0 + $0x74] sm:$0xf0]  ;;  %v5002_v46 = vld [vmem:[%s10752_s0 + $0x78] sm:$0xf0] }
  0x7b   :  { %11059 = vst [vmem:[#allocation119_spill] sm:$0xff] %v7330_v62  ;;  %v5256_v42 = vld [vmem:[%s10752_s0 + $0x258] sm:$0xf]  ;;  %v5827_v35 = vld [vmem:[%s10752_s0 + $0x25c] sm:$0xf]  ;;  %v7362_v52 = vor.u32 %v5767_v28, %v5000_v0  ;;  %1018 = vmatpush.bf16.msrb.mxu1 %v7330_v62  ;;  %v7368_v2 = vor.u32 %v5763_v55, %v5002_v46  ;;  %1046 = vmatpush.bf16.msrb.mxu3 %v7344_v31 }
  0x7c   :  { %11061 = vst [vmem:[#allocation121_spill] sm:$0xff] %v7344_v31  ;;  %v5831_v1 = vld [vmem:[%s10752_s0 + $0x274] sm:$0xf0]  ;;  %v5258_v50 = vld [vmem:[%s10752_s0 + $0x278] sm:$0xf0] }
  0x7d   :  { %11062 = vst [vmem:[#allocation122_spill] sm:$0xff] %v7362_v52  ;;  %v7366_v60 = vor.u32 %v5831_v1, %v5256_v42  ;;  %v4968_v58 = vld [vmem:[%s10752_s0 + $0x18] sm:$0xf]  ;;  %v7380_v28 = vor.u32 %v5827_v35, %v5258_v50  ;;  %v5755_v1 = vld [vmem:[%s10752_s0 + $0x1c] sm:$0xf]  ;;  %1005 = vmatpush.bf16.msrb.mxu0 %v7362_v52  ;;  %1033 = vmatpush.bf16.msrb.mxu2 %v7368_v2 }
  0x7e   :  { %11064 = vst [vmem:[#allocation124_spill] sm:$0xff] %v7368_v2  ;;  %v5759_v40 = vld [vmem:[%s10752_s0 + $0x34] sm:$0xf0]  ;;  %v4970_v55 = vld [vmem:[%s10752_s0 + $0x38] sm:$0xf0] }
  0x7f   :  { %11063 = vst [vmem:[#allocation123_spill] sm:$0xff] %v7366_v60  ;;  %v5224_v0 = vld [vmem:[%s10752_s0 + $0x218] sm:$0xf]  ;;  %v5819_v46 = vld [vmem:[%s10752_s0 + $0x21c] sm:$0xf]  ;;  %v7398_v50 = vor.u32 %v5759_v40, %v4968_v58  ;;  %1019 = vmatpush.bf16.msrb.mxu1 %v7366_v60  ;;  %v7404_v62 = vor.u32 %v5755_v1, %v4970_v55  ;;  %1047 = vmatpush.bf16.msrb.mxu3 %v7380_v28 }
  0x80   :  { %11065 = vst [vmem:[#allocation125_spill] sm:$0xff] %v7380_v28  ;;  %v5823_v42 = vld [vmem:[%s10752_s0 + $0x234] sm:$0xf0]  ;;  %v5226_v35 = vld [vmem:[%s10752_s0 + $0x238] sm:$0xf0] }
  0x81   :  { %11066 = vst [vmem:[#allocation126_spill] sm:$0xff] %v7398_v50  ;;  %v7402_v31 = vor.u32 %v5823_v42, %v5224_v0  ;;  %v7407_v9 = vor.u32 %v5819_v46, %v5226_v35  ;;  %1006 = vmatpush.bf16.msrb.mxu0 %v7398_v50  ;;  %1034 = vmatpush.bf16.msrb.mxu2 %v7404_v62 }
  0x82   :  { %11068 = vst [vmem:[#allocation128_spill] sm:$0xff] %v7404_v62 }
  0x83   :  { %11067 = vst [vmem:[#allocation127_spill] sm:$0xff] %v7402_v31  ;;  %1020 = vmatpush.bf16.msrb.mxu1 %v7402_v31  ;;  %1048 = vmatpush.bf16.msrb.mxu3 %v7407_v9 }
  0x84   :  { %11069 = vst [vmem:[#allocation129_spill] sm:$0xff] %v7407_v9  ;;  %1007 = vmatmul.bf16.vlgmr.msrb.gmra.mxu0 %v6585_v24  ;;  %1035 = vmatmul.bf16.vlgmr.msrb.gmra.mxu2 %v6585_v24 }
  0x86   :  { %1021 = vmatmul.bf16.vlgmr.msrb.gmra.mxu1 %v6609_v39  ;;  %1049 = vmatmul.bf16.vlgmr.msrb.gmra.mxu3 %v6609_v39 }
  0xa1   :  { %v7417_v58 = vpop.f32.mrf.mxu0 }
  0xa3   :  { %v7419_v40 = vpop.f32.mrf.mxu1 }
  0xa7   :  { %v7421_v0 = vpop.f32.mrf.mxu2 }
  0xa9   :  { %v882_v42 = vpop.f32.mrf.mxu3  ;;  %v7423_v1 = vpop.f32.mrf.mxu0 }
  0xab   :  { %v7425_v55 = vpop.f32.mrf.mxu1 }
  0xaf   :  { %v7427_v46 = vpop.f32.mrf.mxu2 }
  0xb1   :  { %v7429_v35 = vpop.f32.mrf.mxu3 }
  0xc1   :  { %v896_v9 = vpop.f32.mrf.mxu0 }
  0xc3   :  { %v910_v31 = vpop.f32.mrf.mxu1 }
  0xc4   :  { %v7431_v24 = vadd.f32 %v910_v31, %v896_v9  ;;  %v1055_v9 = vadd.f32 %v6578_v20, %v6570_v18 }
  0xc6   :  { %1056 = vadd.xlane.f32.xlu1 %v1055_v9  ;;  %v1106_v12 = vmul.f32 %v7431_v24, %v7431_v24 }
  0xc7   :  { %v924_v39 = vpop.f32.mrf.mxu2 }
  0xc9   :  { %v938_v62 = vpop.f32.mrf.mxu3  ;;  %v7437_v60 = vpop.f32.mrf.mxu0 }
  0xca   :  { %v7433_v50 = vadd.f32 %v938_v62, %v924_v39 }
  0xcb   :  { %v7439_v2 = vpop.f32.mrf.mxu1 }
  0xcc   :  { %v1061_v28 = vadd.f32 %v7433_v50, %v7431_v24  ;;  %v1107_v8 = vmul.f32 %v7433_v50, %v7433_v50 }
  0xce   :  { %1062 = vadd.xlane.f32.xlu2 %v1061_v28  ;;  %v1128_v14 = vadd.f32 %v1107_v8, %v1106_v12  ;;  %v1102_v12 = vmul.f32 %v6570_v18, %v6570_v18 }
  0xcf   :  { %v7441_v52 = vpop.f32.mrf.mxu2 }
  0xd1   :  { %v7443_v32 = vpop.f32.mrf.mxu3 }
  0xe1   :  { %v952_v31 = vpop.f32.mrf.mxu0 }
  0xe3   :  { %v966_v38 = vpop.f32.mrf.mxu1 }
  0xe4   :  { %v7447_v62 = vadd.f32 %v966_v38, %v952_v31  ;;  %v6142_v31 = vmov 0  }
  0xe5   :  { %5882 = vset.pattern.permute.xlu1 %v6142_v31  ;;  %5883 = vset.pattern.permute.xlu2 %v6142_v31 }
  0xe6   :  { %v1108_v28 = vmul.f32 %v7447_v62, %v7447_v62  ;;  %5884 = vset.pattern.permute.xlu0 %v6142_v31 }
  0xe7   :  { %v980_v39 = vpop.f32.mrf.mxu2 }
  0xe9   :  { %v994_v47 = vpop.f32.mrf.mxu3  ;;  %v954_v61 = vpop.f32.mrf.mxu0 }
  0xea   :  { %v7449_v48 = vadd.f32 %v994_v47, %v980_v39 }
  0xeb   :  { %v968_v25 = vpop.f32.mrf.mxu1 }
  0xec   :  { %v1064_v41 = vadd.f32 %v7449_v48, %v7447_v62  ;;  %v1109_v34 = vmul.f32 %v7449_v48, %v7449_v48  ;;  %v7457_v21 = vadd.f32 %v968_v25, %v954_v61 }
  0xee   :  { %11070 = vst [vmem:[#allocation130_spill] sm:$0xff] %v7457_v21  ;;  %1065 = vadd.xlane.f32.xlu0 %v1064_v41  ;;  %v1131_v38 = vadd.f32 %v1109_v34, %v1108_v28 }
  0xef   :  { %v982_v9 = vpop.f32.mrf.mxu2 }
  0xf0   :  { %1132 = vadd.xlane.f32.xlu2 %v1131_v38 }
  0xf1   :  { %v996_v47 = vpop.f32.mrf.mxu3 }
  0xf2   :  { %v7459_v39 = vadd.f32 %v996_v47, %v982_v9 }
  0xf4   :  { %11071 = vst [vmem:[#allocation131_spill] sm:$0xff] %v7459_v39 }
  0xf8   :  { %1129 = vadd.xlane.f32.xlu2 %v1128_v14  ;;  %v1103_v14 = vmul.f32 %v6578_v20, %v6578_v20  ;;  %v1352_v20 = vld [vmem:[%s10754_s3 + $0x40] sm:$0xff] }
 0x101   :  { %v1008_v25 = vpop.f32.mrf.mxu0 }
 0x103   :  { %v1022_v61 = vpop.f32.mrf.mxu1 }
 0x104   :  { %v7465_v34 = vadd.f32 %v1022_v61, %v1008_v25  ;;  %v1354_v25 = vld [vmem:[%s10754_s3 + $0x50] sm:$0xff]  ;;  %v7484_v61 = vadd.f32 %v7419_v40, %v7417_v58 }
 0x106   :  { %v1110_v9 = vmul.f32 %v7465_v34, %v7465_v34 }
 0x107   :  { %v1036_v41 = vpop.f32.mrf.mxu2 }
 0x109   :  { %v1050_v28 = vpop.f32.mrf.mxu3 }
 0x10a   :  { %v7467_v38 = vadd.f32 %v1050_v28, %v1036_v41  ;;  %v7487_v41 = vadd.f32 %v882_v42, %v7421_v0  ;;  %v1122_v28 = vadd.f32 %v1103_v14, %v1102_v12  ;;  %v1350_v0 = vld [vmem:[%s10754_s3 + $0x30] sm:$0xff]  ;;  %v1348_v42 = vld [vmem:[%s10754_s3 + $0x20] sm:$0xff]  ;;  %v1351_v12 = vld [vmem:[%s10754_s3 + $0x38] sm:$0xff] }
 0x10b   :  { %v1682_v14 = vld [vmem:[%s10755_s5 + $0x28] sm:$0xff] }
 0x10c   :  { %v1067_v31 = vadd.f32 %v7467_v38, %v7465_v34  ;;  %v1111_v47 = vmul.f32 %v7467_v38, %v7467_v38  ;;  %v1058_v18 = vadd.f32 %v7487_v41, %v7484_v61  ;;  %v1105_v58 = vmul.f32 %v7487_v41, %v7487_v41 }
 0x10e   :  { %1068 = vadd.xlane.f32.xlu0 %v1067_v31  ;;  %v1134_v8 = vadd.f32 %v1111_v47, %v1110_v9  ;;  %v1104_v9 = vmul.f32 %v7484_v61, %v7484_v61  ;;  %v1355_v31 = vld [vmem:[%s10754_s3 + $0x58] sm:$0xff]  ;;  %v1353_v47 = vld [vmem:[%s10754_s3 + $0x48] sm:$0xff] }
 0x110   :  { %1135 = vadd.xlane.f32.xlu1 %v1134_v8  ;;  %1408 = vperm.xlu2 %5883, %v1354_v25   ;;  %v1125_v40 = vadd.f32 %v1105_v58, %v1104_v9  ;;  %v1346_v8 = vld [vmem:[%s10754_s3 + $0x10] sm:$0xff]  ;;  %v1680_v25 = vld [vmem:[%s10755_s5 + $0x18] sm:$0xff] }
 0x111   :  { %v1347_v9 = vld [vmem:[%s10754_s3 + $0x18] sm:$0xff]  ;;  %v1679_v58 = vld [vmem:[%s10755_s5 + $0x10] sm:$0xff]  ;;  %v1052_v13 = vpop.f32.mrf.mxu3 }
 0x116   :  { %1123 = vadd.xlane.f32.xlu0 %v1122_v28  ;;  %v1349_v28 = vld [vmem:[%s10754_s3 + $0x28] sm:$0xff] }
 0x118   :  { %1059 = vadd.xlane.f32.xlu1 %v1058_v18  ;;  %1398 = vperm.xlu2 %5883, %v1352_v20   ;;  %v1345_v18 = vld [vmem:[%s10754_s3 + $0x8] sm:$0xff] }
 0x119   :  { %v1678_v20 = vld [vmem:[%s10755_s5 + $0x8] sm:$0xff] }
 0x11e   :  { %1126 = vadd.xlane.f32.xlu0 %v1125_v40  ;;  %v1681_v40 = vld [vmem:[%s10755_s5 + $0x20] sm:$0xff] }
 0x120   :  { %1388 = vperm.xlu2 %5883, %v1350_v0   ;;  %v6143_v0 = vmov 256.0  }
 0x121   :  { %5885 = vrcp.f32 %v6143_v0  ;;  %v1118_v0 = vmul.f32 %v7457_v21, %v7457_v21 }
 0x128   :  { %1378 = vperm.xlu2 %5883, %v1348_v42   ;;  %v1344_v42 = vld [vmem:[%s10754_s3] sm:$0xff] }
 0x130   :  { %1368 = vperm.xlu2 %5883, %v1346_v8   ;;  %v1677_v8 = vld [vmem:[%s10755_s5] sm:$0xff] }
 0x131   :  { %1413 = vperm.xlu1 %5882, %v1355_v31   ;;  %v5886_v31 = vpop.eup %5885 }
 0x132   :  { %1403 = vperm.xlu0 %5884, %v1353_v47   ;;  %v1086_v47 = vmul.f32 256.0, %v5886_v31  ;;  %vm1090_vm0 = vweird.f32 %v5886_v31 }
 0x138   :  { %1700 = vperm.xlu2 %5883, %v1680_v25  }
 0x139   :  { %1393 = vperm.xlu1 %5882, %v1351_v12   ;;  %v1087_v12 = vsub.f32 1.0, %v1086_v47  ;;  %v7560_v47 = vld [vmem:[%s10753_s1 + $0x10] sm:$0xff]  ;;  %v1057_v11 = vpop.xlane.xlu1 %1056 }
 0x13a   :  { %1710 = vperm.xlu0 %5884, %v1682_v14   ;;  %11073 = vst [vmem:[#allocation133_spill] sm:$0xff] %v7560_v47 }
 0x13b   :  { %v1088_v25 = vmul.f32 %v5886_v31, %v1087_v12 }
 0x140   :  { %1690 = vperm.xlu2 %5883, %v1678_v20  }
 0x141   :  { %1383 = vperm.xlu1 %5882, %v1349_v28   ;;  %v1063_v14 = vpop.xlane.xlu2 %1062  ;;  %v1089_v28 = vadd.f32 %v5886_v31, %v1088_v25 }
 0x142   :  { %1363 = vperm.xlu0 %5884, %v1345_v18   ;;  %v1079_v18 = vadd.f32 %v7459_v39, %v7457_v21 }
 0x149   :  { %1373 = vperm.xlu1 %5882, %v1347_v9  }
 0x14a   :  { %1695 = vperm.xlu0 %5884, %v1679_v58   ;;  %v7548_v58 = vsel %vm1090_vm0, %v5886_v31, %v1089_v28  ;;  %v1112_v28 = vmul.f32 %v7560_v47, %v7560_v47  ;;  %vm10914_vm0 = vcmask 392192  }
 0x14b   :  { %11072 = vst [vmem:[#allocation132_spill] sm:$0xff] %v7548_v58  ;;  %v7585_v4 = vmul.f32 %v7548_v58, %v1063_v14 }
 0x151   :  { %1705 = vperm.xlu1 %5882, %v1681_v40  }
 0x159   :  { %1358 = vperm.xlu1 %5882, %v1344_v42   ;;  %v1119_v42 = vmul.f32 %v7459_v39, %v7459_v39 }
 0x15b   :  { %v1146_v25 = vadd.f32 %v1119_v42, %v1118_v0  ;;  %v7582_v0 = vadd.f32 %v7429_v35, %v7427_v46  ;;  %v1010_v35 = vpop.f32.mrf.mxu0 }
 0x15d   :  { %11076 = vst [vmem:[#allocation136_spill] sm:$0xff] %v7582_v0 }
 0x161   :  { %1685 = vperm.xlu1 %5882, %v1677_v8   ;;  %v1066_v20 = vpop.xlane.xlu0 %1065  ;;  %v1070_v8 = vadd.f32 %v7560_v47, %v6590_v26 }
 0x162   :  { %v7551_v40 = vmul.f32 %v7548_v58, %v1066_v20 }
 0x163   :  { %v1133_v9 = vpop.xlane.xlu2 %1132 }
 0x164   :  { %v1155_v31 = vmul.f32 %v1133_v9, %v7548_v58  ;;  %v1185_v12 = vmul.f32 %v7551_v40, %v7551_v40  ;;  %v7578_v9 = vadd.f32 %v7425_v55, %v7423_v1  ;;  %v1038_v55 = vpop.f32.mrf.mxu2 }
 0x166   :  { %11075 = vst [vmem:[#allocation135_spill] sm:$0xff] %v7578_v9  ;;  %v1195_v42 = vsub.f32 %v1155_v31, %v1185_v12  ;;  %v1073_v1 = vadd.f32 %v7582_v0, %v7578_v9  ;;  %v1024_v31 = vpop.f32.mrf.mxu1  ;;  %v1114_v14 = vmul.f32 %v7578_v9, %v7578_v9  ;;  %v1115_v12 = vmul.f32 %v7582_v0, %v7582_v0 }
 0x168   :  { %v7588_v49 = vadd.f32 1e-05, %v1195_v42 }
 0x169   :  { %1080 = vadd.xlane.f32.xlu2 %v1079_v18  ;;  %v7572_v18 = vld [vmem:[%s10753_s1 + $0x18] sm:$0xff] }
 0x16a   :  { %11074 = vst [vmem:[#allocation134_spill] sm:$0xff] %v7572_v18  ;;  %v1113_v20 = vmul.f32 %v7572_v18, %v7572_v18  ;;  %5887 = vrsqrt.f32 %v7588_v49  ;;  %vm1248_vm1 = vweird.f32 %v7588_v49 }
 0x16b   :  { %v1130_v26 = vpop.xlane.xlu2 %1129 }
 0x16c   :  { %v1154_v10 = vmul.f32 %v1130_v26, %v7548_v58 }
 0x170   :  { %v7610_v19 = vpop.eup %5887 }
 0x171   :  { %1071 = vadd.xlane.f32.xlu2 %v1070_v8  ;;  %v1137_v8 = vadd.f32 %v1113_v20, %v1112_v28  ;;  %v7598_v28 = vadd.f32 %v1052_v13, %v1038_v55  ;;  %v7601_v20 = vadd.f32 %v1024_v31, %v1010_v35  ;;  %v7622_v35 = vadd.f32 %v7443_v32, %v7441_v52 }
 0x172   :  { %v7625_v31 = vmul.f32 %v7548_v58, %v1057_v11  ;;  %vm1249_vm2 = vweird.f32 %v7610_v19 }
 0x173   :  { %11077 = vst [vmem:[#allocation137_spill] sm:$0xff] %v7598_v28  ;;  %v1117_v22 = vmul.f32 %v7622_v35, %v7622_v35  ;;  %vm1250_vm5 = vmor %vm1248_vm1, %vm1249_vm2 }
 0x174   :  { %1147 = vadd.xlane.f32.xlu0 %v1146_v25  ;;  %v1184_v25 = vmul.f32 %v7585_v4, %v7585_v4  ;;  %11078 = vst [vmem:[#allocation138_spill] sm:$0xff] %v7601_v20 }
 0x175   :  { %11080 = vst [vmem:[#allocation140_spill] sm:$0xff] %v7622_v35 }
 0x176   :  { %v1194_v46 = vsub.f32 %v1154_v10, %v1184_v25  ;;  %v1082_v25 = vadd.f32 %v7598_v28, %v7601_v20 }
 0x178   :  { %v7603_v26 = vadd.f32 1e-05, %v1194_v46  ;;  %v7618_v46 = vadd.f32 %v7439_v2, %v7437_v60  ;;  %v1182_v2 = vmul.f32 %v7625_v31, %v7625_v31 }
 0x179   :  { %1138 = vadd.xlane.f32.xlu2 %v1137_v8  ;;  %v1140_v8 = vadd.f32 %v1115_v12, %v1114_v14  ;;  %v1243_v12 = vmul.f32 %v7610_v19, %v7588_v49 }
 0x17a   :  { %5889 = vrsqrt.f32 %v7603_v26  ;;  %11079 = vst [vmem:[#allocation139_spill] sm:$0xff] %v7618_v46  ;;  %v1116_v30 = vmul.f32 %v7618_v46, %v7618_v46  ;;  %vm1238_vm9 = vweird.f32 %v7603_v26 }
 0x17b   :  { %v1244_v11 = vmul.f32 %v7610_v19, %v1243_v12 }
 0x17c   :  { %1074 = vadd.xlane.f32.xlu0 %v1073_v1 }
 0x17d   :  { %v1245_v37 = vmul.f32 0.5, %v1244_v11 }
 0x17f   :  { %v1246_v53 = vsub.f32 1.5, %v1245_v37 }
 0x181   :  { %v1069_v42 = vpop.xlane.xlu0 %1068  ;;  %1141 = vadd.xlane.f32.xlu2 %v1140_v8 }
 0x182   :  { %v7606_v10 = vmul.f32 %v7548_v58, %v1069_v42 }
 0x183   :  { %v1136_v1 = vpop.xlane.xlu1 %1135 }
 0x184   :  { %v1156_v13 = vmul.f32 %v1136_v1, %v7548_v58  ;;  %v1186_v55 = vmul.f32 %v7606_v10, %v7606_v10  ;;  %1083 = vadd.xlane.f32.xlu0 %v1082_v25  ;;  %v1076_v25 = vadd.f32 %v7622_v35, %v7618_v46  ;;  %v7631_v1 = vpop.eup %5889  ;;  %v1170_v49 = vsub.f32 %v7465_v34, %v7606_v10 }
 0x185   :  { %vm1239_vm7 = vweird.f32 %v7631_v1 }
 0x186   :  { %v1196_v14 = vsub.f32 %v1156_v13, %v1186_v55  ;;  %v1233_v13 = vmul.f32 %v7631_v1, %v7603_v26  ;;  %v1121_v55 = vmul.f32 %v7598_v28, %v7598_v28  ;;  %vm1240_vm11 = vmor %vm1238_vm9, %vm1239_vm7 }
 0x188   :  { %v1206_v42 = vadd.f32 1e-05, %v1196_v14  ;;  %v1234_v12 = vmul.f32 %v7631_v1, %v1233_v13 }
 0x189   :  { %v1124_v8 = vpop.xlane.xlu0 %1123 }
 0x18a   :  { %5891 = vrsqrt.f32 %v1206_v42  ;;  %v1152_v60 = vmul.f32 %v1124_v8, %v7548_v58  ;;  %v1120_v8 = vmul.f32 %v7601_v20, %v7601_v20  ;;  %v1235_v63 = vmul.f32 0.5, %v1234_v12 }
 0x18b   :  { %v1060_v32 = vpop.xlane.xlu1 %1059  ;;  %1077 = vadd.xlane.f32.xlu1 %v1076_v25  ;;  %vm1258_vm4 = vweird.f32 %v1206_v42 }
 0x18c   :  { %v1192_v52 = vsub.f32 %v1152_v60, %v1182_v2  ;;  %v7644_v15 = vmul.f32 %v7548_v58, %v1060_v32  ;;  %v1149_v60 = vadd.f32 %v1121_v55, %v1120_v8 }
 0x18e   :  { %v7641_v14 = vadd.f32 1e-05, %v1192_v52  ;;  %v1183_v54 = vmul.f32 %v7644_v15, %v7644_v15 }
 0x190   :  { %v5892_v36 = vpop.eup %5891  ;;  %5893 = vrsqrt.f32 %v7641_v14  ;;  %vm1218_vm10 = vweird.f32 %v7641_v14 }
 0x191   :  { %v1253_v25 = vmul.f32 %v5892_v36, %v1206_v42  ;;  %v1127_v2 = vpop.xlane.xlu0 %1126  ;;  %vm1259_vm3 = vweird.f32 %v5892_v36 }
 0x192   :  { %v1153_v52 = vmul.f32 %v1127_v2, %v7548_v58  ;;  %v1236_v2 = vsub.f32 1.5, %v1235_v63  ;;  %vm1260_vm6 = vmor %vm1258_vm4, %vm1259_vm3  ;;  %v1169_v63 = vsub.f32 %v7449_v48, %v7551_v40 }
 0x193   :  { %v1254_v32 = vmul.f32 %v5892_v36, %v1253_v25  ;;  %1150 = vadd.xlane.f32.xlu1 %v1149_v60  ;;  %v1143_v25 = vadd.f32 %v1117_v22, %v1116_v30 }
 0x194   :  { %v1193_v11 = vsub.f32 %v1153_v52, %v1183_v54  ;;  %v1247_v54 = vmul.f32 %v7610_v19, %v1246_v53  ;;  %v1171_v52 = vsub.f32 %v7467_v38, %v7606_v10  ;;  %v1237_v38 = vmul.f32 %v7631_v1, %v1236_v2 }
 0x195   :  { %v1255_v13 = vmul.f32 0.5, %v1254_v32  ;;  %v1168_v32 = vsub.f32 %v7447_v62, %v7551_v40  ;;  %v7691_v40 = vld [vmem:[%s10753_s1] sm:$0xff]  ;;  %v1167_v2 = vsub.f32 %v7433_v50, %v7585_v4  ;;  %v1164_v50 = vsub.f32 %v7484_v61, %v7644_v15  ;;  %v186_v61 = vld [vmem:[%s10757_s7 + $0x8] sm:$0xff] }
 0x196   :  { %v5894_v51 = vpop.eup %5893  ;;  %v7658_v55 = vadd.f32 1e-05, %v1193_v11  ;;  %v1251_v22 = vsel %vm1250_vm5, %v7610_v19, %v1247_v54  ;;  %11081 = vst [vmem:[#allocation141_spill] sm:$0xff] %v7691_v40  ;;  %v1162_v26 = vsub.f32 %v7691_v40, %v7625_v31  ;;  %v1241_v54 = vsel %vm1240_vm11, %v7631_v1, %v1237_v38  ;;  %v1336_v38 = vld [vmem:[%s10756_s2 + $0x20] sm:$0xff] }
 0x197   :  { %v1256_v8 = vsub.f32 1.5, %v1255_v13  ;;  %v1213_v37 = vmul.f32 %v5894_v51, %v7641_v14  ;;  %vm1219_vm8 = vweird.f32 %v5894_v51  ;;  %v7684_v19 = vmul.f32 %v1251_v22, %v1169_v63  ;;  %v7698_v13 = vld [vmem:[%s10753_s1 + $0x8] sm:$0xff]  ;;  %v1335_v63 = vld [vmem:[%s10756_s2 + $0x18] sm:$0xff] }
 0x198   :  { %5895 = vrsqrt.f32 %v7658_v55  ;;  %11082 = vst [vmem:[#allocation142_spill] sm:$0xff] %v7698_v13  ;;  %vm1220_vm12 = vmor %vm1218_vm10, %vm1219_vm8  ;;  %vm1228_vm14 = vweird.f32 %v7658_v55  ;;  %1972 = vperm.xlu0 %5884, %v186_v61   ;;  %v1341_v61 = vld [vmem:[%s10756_s2 + $0x48] sm:$0xff] }
 0x199   :  { %v1257_v60 = vmul.f32 %v5892_v36, %v1256_v8  ;;  %v1214_v12 = vmul.f32 %v5894_v51, %v1213_v37  ;;  %v1163_v8 = vsub.f32 %v7698_v13, %v7625_v31 }
 0x19b   :  { %v1215_v11 = vmul.f32 0.5, %v1214_v12  ;;  %1144 = vadd.xlane.f32.xlu1 %v1143_v25  ;;  %v1261_v53 = vsel %vm1260_vm6, %v5892_v36, %v1257_v60  ;;  %v7682_v36 = vmul.f32 %v1251_v22, %v1168_v32  ;;  %v1166_v25 = vsub.f32 %v7431_v24, %v7585_v4  ;;  %v5517_v22 = vld [vmem:[%s10754_s3 + $0x108] sm:$0xff] }
 0x19c   :  { %v7673_v30 = vmul.f32 %v1261_v53, %v1170_v49  ;;  %v7675_v42 = vmul.f32 %v1261_v53, %v1171_v52  ;;  %v1165_v24 = vsub.f32 %v7487_v41, %v7644_v15  ;;  %v1333_v15 = vld [vmem:[%s10756_s2 + $0x8] sm:$0xff]  ;;  %v1334_v41 = vld [vmem:[%s10756_s2 + $0x10] sm:$0xff]  ;;  %v5519_v53 = vld [vmem:[%s10754_s3 + $0x118] sm:$0xff] }
 0x19d   :  { %v1216_v34 = vsub.f32 1.5, %v1215_v11  ;;  %v7716_v49 = vmul.f32 %v1241_v54, %v1166_v25  ;;  %v5509_v25 = vld [vmem:[%s10754_s3 + $0xc8] sm:$0xff] }
 0x19e   :  { %v5896_v10 = vpop.eup %5895  ;;  %1463 = vmatpush.msra.mxu0 %v7673_v30  ;;  %1516 = vmatpush.msra.mxu1 %v7675_v42 }
 0x19f   :  { %v1217_v48 = vmul.f32 %v5894_v51, %v1216_v34  ;;  %v1223_v62 = vmul.f32 %v5896_v10, %v7658_v55  ;;  %11083 = vst [vmem:[#allocation143_spill] sm:$0xff] %v7716_v49  ;;  %vm1229_vm13 = vweird.f32 %v5896_v10  ;;  %v1332_v55 = vld [vmem:[%s10756_s2] sm:$0xff] }
 0x1a0   :  { %1464 = vmatpush.msra.mxu0 %v7682_v36  ;;  %1517 = vmatpush.msra.mxu1 %v7684_v19  ;;  %vm1230_vm15 = vmor %vm1228_vm14, %vm1229_vm13  ;;  %v5516_v34 = vld [vmem:[%s10754_s3 + $0x100] sm:$0xff] }
 0x1a1   :  { %v1224_v14 = vmul.f32 %v5896_v10, %v1223_v62  ;;  %v1221_v37 = vsel %vm1220_vm12, %v5894_v51, %v1217_v48  ;;  %v7718_v51 = vmul.f32 %v1241_v54, %v1167_v2  ;;  %2159 = vperm.xlu0 %5884, %v5517_v22   ;;  %v5513_v48 = vld [vmem:[%s10754_s3 + $0xe8] sm:$0xff]  ;;  %v5510_v54 = vld [vmem:[%s10754_s3 + $0xd0] sm:$0xff] }
 0x1a2   :  { %v7710_v60 = vmul.f32 %v1221_v37, %v1162_v26  ;;  %v7712_v12 = vmul.f32 %v1221_v37, %v1163_v8  ;;  %v1337_v62 = vld [vmem:[%s10756_s2 + $0x28] sm:$0xff]  ;;  %v5512_v26 = vld [vmem:[%s10754_s3 + $0xe0] sm:$0xff]  ;;  %v1338_v37 = vld [vmem:[%s10756_s2 + $0x30] sm:$0xff] }
 0x1a3   :  { %v1225_v31 = vmul.f32 0.5, %v1224_v14  ;;  %11084 = vst [vmem:[#allocation144_spill] sm:$0xff] %v7718_v51  ;;  %v5567_v8 = vld [vmem:[%s10755_s5 + $0x88] sm:$0xff]  ;;  %v5518_v14 = vld [vmem:[%s10754_s3 + $0x110] sm:$0xff] }
 0x1a4   :  { %1465 = vmatpush.msra.mxu0 %v7710_v60  ;;  %1518 = vmatpush.msra.mxu1 %v7712_v12  ;;  %v5514_v2 = vld [vmem:[%s10754_s3 + $0xf0] sm:$0xff]  ;;  %v1404_v57 = vpop.permute.xlu0 %1403 }
 0x1a5   :  { %v1226_v1 = vsub.f32 1.5, %v1225_v31  ;;  %2164 = vperm.xlu2 %5883, %v5518_v14   ;;  %v1339_v31 = vld [vmem:[%s10756_s2 + $0x38] sm:$0xff]  ;;  %v1342_v22 = vld [vmem:[%s10756_s2 + $0x50] sm:$0xff] }
 0x1a6   :  { %1466 = vmatpush.msra.mxu0 %v7716_v49  ;;  %1519 = vmatpush.msra.mxu1 %v7718_v51  ;;  %v11112_v49 = vmov 0 }
 0x1a7   :  { %v1227_v4 = vmul.f32 %v5896_v10, %v1226_v1  ;;  %v5565_v1 = vld [vmem:[%s10755_s5 + $0x78] sm:$0xff] }
 0x1a9   :  { %v1231_v52 = vsel %vm1230_vm15, %v5896_v10, %v1227_v4  ;;  %v5515_v10 = vld [vmem:[%s10754_s3 + $0xf8] sm:$0xff]  ;;  %v5564_v4 = vld [vmem:[%s10755_s5 + $0x70] sm:$0xff] }
 0x1aa   :  { %v7727_v32 = vmul.f32 %v1231_v52, %v1164_v50  ;;  %v7729_v11 = vmul.f32 %v1231_v52, %v1165_v24  ;;  %2149 = vperm.xlu0 %5884, %v5515_v10   ;;  %v5511_v50 = vld [vmem:[%s10754_s3 + $0xd8] sm:$0xff]  ;;  %v1340_v24 = vld [vmem:[%s10756_s2 + $0x40] sm:$0xff]  ;;  %v5563_v52 = vld [vmem:[%s10755_s5 + $0x68] sm:$0xff] }
 0x1ac   :  { %11085 = vst [vmem:[#allocation145_spill] sm:$0xff] %v7727_v32  ;;  %1467 = vmatpush.msra.mxu0 %v7727_v32  ;;  %1520 = vmatpush.msra.mxu1 %v7729_v11 }
 0x1ad   :  { %11086 = vst [vmem:[#allocation146_spill] sm:$0xff] %v7729_v11  ;;  %2144 = vperm.xlu2 %5883, %v5514_v2  }
 0x1ae   :  { %1468 = vmatpush.msra.mxu0 %v7710_v60  ;;  %1521 = vmatpush.msra.mxu1 %v7712_v12 }
 0x1af   :  { %5454 = vmatmul.msk.f32.vlgmr.msra.gmra.mxu0 %vm10914_vm0, %v1332_v55  ;;  %5466 = vmatmul.msk.f32.vlgmr.msra.gmra.mxu1 %vm10914_vm0, %v1332_v55  ;;  %v185_v55 = vld [vmem:[%s10757_s7] sm:$0xff] }
 0x1b2   :  { %2134 = vperm.xlu0 %5884, %v5512_v26  }
 0x1b4   :  { %2169 = vperm.xlu1 %5882, %v5519_v53   ;;  %v5508_v53 = vld [vmem:[%s10754_s3 + $0xc0] sm:$0xff] }
 0x1b5   :  { %2129 = vperm.xlu2 %5883, %v5511_v50  }
 0x1b7   :  { %5455 = vmatmul.msk.f32.gmra.mxu0 %vm10914_vm0, %v1333_v15  ;;  %5467 = vmatmul.msk.f32.gmra.mxu1 %vm10914_vm0, %v1333_v15  ;;  %v5566_v15 = vld [vmem:[%s10755_s5 + $0x80] sm:$0xff] }
 0x1ba   :  { %2124 = vperm.xlu0 %5884, %v5510_v54  }
 0x1bc   :  { %2154 = vperm.xlu1 %5882, %v5516_v34   ;;  %v1343_v34 = vld [vmem:[%s10756_s2 + $0x58] sm:$0xff] }
 0x1bd   :  { %2462 = vperm.xlu2 %5883, %v5566_v15  }
 0x1bf   :  { %5456 = vmatmul.msk.f32.gmra.mxu0 %vm10914_vm0, %v1334_v41  ;;  %5468 = vmatmul.msk.f32.gmra.mxu1 %vm10914_vm0, %v1334_v41  ;;  %v188_v41 = vld [vmem:[%s10758_s9] sm:$0xff] }
 0x1c2   :  { %2457 = vperm.xlu0 %5884, %v5565_v1  }
 0x1c4   :  { %2139 = vperm.xlu1 %5882, %v5513_v48  }
 0x1c5   :  { %2114 = vperm.xlu2 %5883, %v5508_v53  }
 0x1c7   :  { %5457 = vmatmul.msk.f32.gmra.mxu0 %vm10914_vm0, %v1335_v63  ;;  %5469 = vmatmul.msk.f32.gmra.mxu1 %vm10914_vm0, %v1335_v63  ;;  %v5562_v63 = vld [vmem:[%s10755_s5 + $0x60] sm:$0xff] }
 0x1ca   :  { %2447 = vperm.xlu0 %5884, %v5563_v52  }
 0x1cc   :  { %2467 = vperm.xlu1 %5882, %v5567_v8  }
 0x1cd   :  { %2442 = vperm.xlu2 %5883, %v5562_v63   ;;  %v1414_v63 = vpop.permute.xlu1 %1413 }
 0x1cf   :  { %5458 = vmatmul.msk.f32.gmra.mxu0 %vm10914_vm0, %v1336_v38  ;;  %5470 = vmatmul.msk.f32.gmra.mxu1 %vm10914_vm0, %v1336_v38 }
 0x1d2   :  { %2077 = vperm.xlu0 %5884, %v188_v41   ;;  %v1409_v41 = vpop.permute.xlu2 %1408 }
 0x1d4   :  { %2119 = vperm.xlu1 %5882, %v5509_v25  }
 0x1d5   :  { %v1394_v3 = vpop.permute.xlu1 %1393 }
 0x1d7   :  { %5459 = vmatmul.msk.f32.gmra.mxu0 %vm10914_vm0, %v1337_v62  ;;  %5471 = vmatmul.msk.f32.gmra.mxu1 %vm10914_vm0, %v1337_v62 }
 0x1dc   :  { %2452 = vperm.xlu1 %5882, %v5564_v4  }
 0x1df   :  { %5460 = vmatmul.msk.f32.gmra.mxu0 %vm10914_vm0, %v1338_v37  ;;  %5472 = vmatmul.msk.f32.gmra.mxu1 %vm10914_vm0, %v1338_v37 }
 0x1e4   :  { %1967 = vperm.xlu1 %5882, %v185_v55  }
 0x1e7   :  { %5461 = vmatmul.msk.f32.gmra.mxu0 %vm10914_vm0, %v1339_v31  ;;  %5473 = vmatmul.msk.f32.gmra.mxu1 %vm10914_vm0, %v1339_v31 }
 0x1ef   :  { %5462 = vmatmul.msk.f32.gmra.mxu0 %vm10914_vm0, %v1340_v24  ;;  %5474 = vmatmul.msk.f32.gmra.mxu1 %vm10914_vm0, %v1340_v24 }
 0x1f7   :  { %5463 = vmatmul.msk.f32.gmra.mxu0 %vm10914_vm0, %v1341_v61  ;;  %5475 = vmatmul.msk.f32.gmra.mxu1 %vm10914_vm0, %v1341_v61 }
 0x1ff   :  { %5464 = vmatmul.msk.f32.gmra.mxu0 %vm10914_vm0, %v1342_v22  ;;  %5476 = vmatmul.msk.f32.gmra.mxu1 %vm10914_vm0, %v1342_v22 }
 0x207   :  { %5465 = vmatmul.msk.f32.gmra.mxu0 %vm10914_vm0, %v1343_v34  ;;  %5477 = vmatmul.msk.f32.gmra.mxu1 %vm10914_vm0, %v1343_v34  ;;  %v1399_v34 = vpop.permute.xlu2 %1398 }
 0x22c   :  { %v7858_v38 = vpop.f32.mrf.mxu0  ;;  %v7860_v10 = vpop.f32.mrf.mxu1 }
 0x234   :  { %v7862_v48 = vpop.f32.mrf.mxu0  ;;  %v7864_v62 = vpop.f32.mrf.mxu1 }
 0x23c   :  { %v7866_v26 = vpop.f32.mrf.mxu0  ;;  %v7868_v8 = vpop.f32.mrf.mxu1 }
 0x244   :  { %v7870_v14 = vpop.f32.mrf.mxu0  ;;  %v7872_v37 = vpop.f32.mrf.mxu1 }
 0x24c   :  { %v7874_v54 = vpop.f32.mrf.mxu0  ;;  %v7876_v25 = vpop.f32.mrf.mxu1 }
 0x254   :  { %v7878_v2 = vpop.f32.mrf.mxu0  ;;  %v7880_v31 = vpop.f32.mrf.mxu1 }
 0x25c   :  { %v1488_v1 = vpop.f32.mrf.mxu0  ;;  %v1541_v4 = vpop.f32.mrf.mxu1 }
 0x264   :  { %v1491_v50 = vpop.f32.mrf.mxu0  ;;  %v1544_v24 = vpop.f32.mrf.mxu1 }
 0x265   :  { %v1492_v0 = vadd.f32 %v1491_v50, %v1394_v3  ;;  %v1545_v35 = vadd.f32 %v1544_v24, %v1394_v3  ;;  %v1571_v3 = vld [vmem:[%s10759_s4] sm:$0xff] }
 0x26c   :  { %v1494_v52 = vpop.f32.mrf.mxu0  ;;  %v1547_v55 = vpop.f32.mrf.mxu1 }
 0x26d   :  { %v1495_v29 = vadd.f32 %v1494_v52, %v1399_v34  ;;  %v1548_v17 = vadd.f32 %v1547_v55, %v1399_v34 }
 0x274   :  { %v1497_v15 = vpop.f32.mrf.mxu0  ;;  %v1550_v61 = vpop.f32.mrf.mxu1 }
 0x275   :  { %v1498_v56 = vadd.f32 %v1497_v15, %v1404_v57  ;;  %v1551_v45 = vadd.f32 %v1550_v61, %v1404_v57  ;;  %v1563_v15 = vmax.f32 %v1495_v29, 0.0  ;;  %v1564_v57 = vmax.f32 %v1548_v17, 0.0  ;;  %v1574_v17 = vld [vmem:[%s10759_s4 + $0x18] sm:$0xff]  ;;  %v1575_v29 = vld [vmem:[%s10759_s4 + $0x20] sm:$0xff] }
 0x277   :  { %v1565_v9 = vmax.f32 %v1498_v56, 0.0  ;;  %v1566_v46 = vmax.f32 %v1551_v45, 0.0  ;;  %v1576_v45 = vld [vmem:[%s10759_s4 + $0x28] sm:$0xff]  ;;  %v7912_v56 = vpop.permute.xlu1 %1383 }
 0x27c   :  { %v1500_v53 = vpop.f32.mrf.mxu0  ;;  %v1553_v22 = vpop.f32.mrf.mxu1 }
 0x27d   :  { %v1501_v27 = vadd.f32 %v1500_v53, %v1409_v41  ;;  %v1554_v23 = vadd.f32 %v1553_v22, %v1409_v41 }
 0x27f   :  { %v1567_v16 = vmax.f32 %v1501_v27, 0.0  ;;  %v1568_v7 = vmax.f32 %v1554_v23, 0.0  ;;  %v1374_v23 = vpop.permute.xlu1 %1373 }
 0x284   :  { %v1503_v59 = vpop.f32.mrf.mxu0  ;;  %v1556_v43 = vpop.f32.mrf.mxu1 }
 0x285   :  { %v1504_v6 = vadd.f32 %v1503_v59, %v1414_v63  ;;  %v1557_v5 = vadd.f32 %v1556_v43, %v1414_v63  ;;  %v1389_v59 = vpop.permute.xlu2 %1388 }
 0x286   :  { %v1489_v43 = vadd.f32 %v1488_v1, %v1389_v59  ;;  %v1542_v41 = vadd.f32 %v1541_v4, %v1389_v59 }
 0x287   :  { %v1569_v44 = vmax.f32 %v1504_v6, 0.0  ;;  %v1570_v33 = vmax.f32 %v1557_v5, 0.0  ;;  %v1561_v5 = vmax.f32 %v1492_v0, 0.0  ;;  %v1562_v6 = vmax.f32 %v1545_v35, 0.0  ;;  %v7918_v35 = vpop.permute.xlu0 %1710 }
 0x289   :  { %1605 = vmatpush.msra.mxu2 %v1569_v44  ;;  %1640 = vmatpush.msra.mxu3 %v1570_v33  ;;  %v1559_v44 = vmax.f32 %v1489_v43, 0.0  ;;  %v1560_v33 = vmax.f32 %v1542_v41, 0.0 }
 0x28b   :  { %1606 = vmatpush.msra.mxu2 %v1567_v16  ;;  %1641 = vmatpush.msra.mxu3 %v1568_v7  ;;  %v1572_v7 = vld [vmem:[%s10759_s4 + $0x8] sm:$0xff]  ;;  %v1573_v16 = vld [vmem:[%s10759_s4 + $0x10] sm:$0xff] }
 0x28d   :  { %1607 = vmatpush.msra.mxu2 %v1565_v9  ;;  %1642 = vmatpush.msra.mxu3 %v1566_v46  ;;  %v7914_v27 = vpop.permute.xlu2 %1378  ;;  %v7916_v9 = vpop.permute.xlu1 %1705 }
 0x28f   :  { %1608 = vmatpush.msra.mxu2 %v1563_v15  ;;  %1643 = vmatpush.msra.mxu3 %v1564_v57  ;;  %v1364_v22 = vpop.permute.xlu0 %1363 }
 0x290   :  { %v1474_v63 = vadd.f32 %v7862_v48, %v1364_v22  ;;  %v1527_v57 = vadd.f32 %v7864_v62, %v1364_v22 }
 0x291   :  { %1609 = vmatpush.msra.mxu2 %v1561_v5  ;;  %1644 = vmatpush.msra.mxu3 %v1562_v6 }
 0x293   :  { %1610 = vmatpush.msra.mxu2 %v1559_v44  ;;  %1645 = vmatpush.msra.mxu3 %v1560_v33 }
 0x294   :  { %5478 = vmatmul.msk.f32.vlgmr.msra.gmra.mxu2 %vm10914_vm0, %v1571_v3  ;;  %5484 = vmatmul.msk.f32.vlgmr.msra.gmra.mxu3 %vm10914_vm0, %v1571_v3 }
 0x295   :  { %v1369_v0 = vpop.permute.xlu2 %1368  ;;  %v1359_v46 = vpop.permute.xlu1 %1358 }
 0x296   :  { %v1471_v1 = vadd.f32 %v7858_v38, %v1359_v46  ;;  %v1524_v53 = vadd.f32 %v7860_v10, %v1359_v46  ;;  %v1477_v3 = vadd.f32 %v7866_v26, %v1369_v0  ;;  %v1480_v26 = vadd.f32 %v7870_v14, %v1374_v23 }
 0x297   :  { %v1696_v46 = vpop.permute.xlu0 %1695 }
 0x29c   :  { %5479 = vmatmul.msk.f32.gmra.mxu2 %vm10914_vm0, %v1572_v7  ;;  %5485 = vmatmul.msk.f32.gmra.mxu3 %vm10914_vm0, %v1572_v7  ;;  %v1530_v7 = vadd.f32 %v7868_v8, %v1369_v0  ;;  %v1533_v8 = vadd.f32 %v7872_v37, %v1374_v23  ;;  %v1483_v37 = vadd.f32 %v7874_v54, %v7914_v27 }
 0x29d   :  { %v1701_v52 = vpop.permute.xlu2 %1700  ;;  %v1686_v55 = vpop.permute.xlu1 %1685 }
 0x2a4   :  { %5480 = vmatmul.msk.f32.gmra.mxu2 %vm10914_vm0, %v1573_v16  ;;  %5486 = vmatmul.msk.f32.gmra.mxu3 %vm10914_vm0, %v1573_v16 }
 0x2a5   :  { %v1691_v38 = vpop.permute.xlu2 %1690 }
 0x2ac   :  { %5481 = vmatmul.msk.f32.gmra.mxu2 %vm10914_vm0, %v1574_v17  ;;  %5487 = vmatmul.msk.f32.gmra.mxu3 %vm10914_vm0, %v1574_v17 }
 0x2b4   :  { %5482 = vmatmul.msk.f32.gmra.mxu2 %vm10914_vm0, %v1575_v29  ;;  %5488 = vmatmul.msk.f32.gmra.mxu3 %vm10914_vm0, %v1575_v29 }
 0x2bc   :  { %5483 = vmatmul.msk.f32.gmra.mxu2 %vm10914_vm0, %v1576_v45  ;;  %5489 = vmatmul.msk.f32.gmra.mxu3 %vm10914_vm0, %v1576_v45 }
 0x317   :  { %v1612_v4 = vpop.f32.mrf.mxu2  ;;  %v1647_v50 = vpop.f32.mrf.mxu3 }
 0x318   :  { %v1665_v24 = vadd.f32 %v1612_v4, %v1471_v1  ;;  %v1666_v34 = vadd.f32 %v1647_v50, %v1524_v53 }
 0x31a   :  { %v1713_v61 = vadd.f32 %v1686_v55, %v1665_v24  ;;  %v1714_v5 = vadd.f32 %v1686_v55, %v1666_v34 }
 0x31c   :  { %v1725_v41 = vsub.f32 0.0, %v1713_v61  ;;  %v1726_v10 = vsub.f32 0.0, %v1714_v5 }
 0x31e   :  { %v1737_v6 = vmul.f32 1.442695, %v1725_v41  ;;  %v1739_v50 = vmul.f32 1.442695, %v1726_v10 }
 0x31f   :  { %v1615_v59 = vpop.f32.mrf.mxu2  ;;  %v1650_v43 = vpop.f32.mrf.mxu3 }
 0x320   :  { %v1667_v15 = vadd.f32 %v1615_v59, %v1474_v63  ;;  %v1668_v44 = vadd.f32 %v1650_v43, %v1527_v57  ;;  %5897 = vpow2.f32 %v1737_v6 }
 0x321   :  { %5899 = vpow2.f32 %v1739_v50 }
 0x322   :  { %v1715_v33 = vadd.f32 %v1691_v38, %v1667_v15  ;;  %v1716_v48 = vadd.f32 %v1691_v38, %v1668_v44  ;;  %v1536_v44 = vadd.f32 %v7876_v25, %v7914_v27 }
 0x324   :  { %v1727_v1 = vsub.f32 0.0, %v1715_v33  ;;  %v1728_v24 = vsub.f32 0.0, %v1716_v48 }
 0x326   :  { %v1741_v61 = vmul.f32 1.442695, %v1727_v1  ;;  %v5898_v53 = vpop.eup %5897  ;;  %v1743_v59 = vmul.f32 1.442695, %v1728_v24  ;;  %v1486_v24 = vadd.f32 %v7878_v2, %v7912_v56 }
 0x327   :  { %v1618_v16 = vpop.f32.mrf.mxu2  ;;  %v1653_v17 = vpop.f32.mrf.mxu3  ;;  %v7928_v15 = vadd.f32 1.0, %v5898_v53  ;;  %v1539_v53 = vadd.f32 %v7880_v31, %v7912_v56 }
 0x328   :  { %v1669_v29 = vadd.f32 %v1618_v16, %v1477_v3  ;;  %v1670_v45 = vadd.f32 %v1653_v17, %v1530_v7  ;;  %5901 = vpow2.f32 %v1741_v61  ;;  %v5900_v23 = vpop.eup %5899 }
 0x32a   :  { %v1717_v4 = vadd.f32 %v1696_v46, %v1669_v29  ;;  %v1718_v62 = vadd.f32 %v1696_v46, %v1670_v45  ;;  %v7935_v29 = vadd.f32 1.0, %v5900_v23 }
 0x32c   :  { %v1729_v55 = vsub.f32 0.0, %v1717_v4  ;;  %v1730_v22 = vsub.f32 0.0, %v1718_v62 }
 0x32e   :  { %v1745_v0 = vmul.f32 1.442695, %v1729_v55  ;;  %v1747_v57 = vmul.f32 1.442695, %v1730_v22  ;;  %v5902_v7 = vpop.eup %5901 }
 0x32f   :  { %v1621_v63 = vpop.f32.mrf.mxu2  ;;  %v1656_v34 = vpop.f32.mrf.mxu3  ;;  %v7937_v54 = vadd.f32 1.0, %v5902_v7 }
 0x330   :  { %v1671_v43 = vadd.f32 %v1621_v63, %v1480_v26  ;;  %v1672_v41 = vadd.f32 %v1656_v34, %v1533_v8  ;;  %5903 = vpow2.f32 %v1745_v0 }
 0x331   :  { %5905 = vpow2.f32 %v1743_v59  ;;  %vm1808_vm1 = vweird.f32 %v7937_v54 }
 0x332   :  { %v1719_v5 = vadd.f32 %v1701_v52, %v1671_v43  ;;  %v1720_v38 = vadd.f32 %v1701_v52, %v1672_v41  ;;  %5907 = vrcp.f32 %v7928_v15 }
 0x333   :  { %5909 = vpow2.f32 %v1747_v57 }
 0x334   :  { %v1731_v6 = vsub.f32 0.0, %v1719_v5  ;;  %v1732_v14 = vsub.f32 0.0, %v1720_v38 }
 0x336   :  { %v1749_v33 = vmul.f32 1.442695, %v1731_v6  ;;  %v1751_v3 = vmul.f32 1.442695, %v1732_v14  ;;  %v5904_v17 = vpop.eup %5903 }
 0x337   :  { %v1624_v10 = vpop.f32.mrf.mxu2  ;;  %v1659_v16 = vpop.f32.mrf.mxu3  ;;  %v7943_v1 = vadd.f32 1.0, %v5904_v17 }
 0x338   :  { %5911 = vpow2.f32 %v1749_v33  ;;  %v1673_v52 = vadd.f32 %v1624_v10, %v1483_v37  ;;  %v1674_v48 = vadd.f32 %v1659_v16, %v1536_v44  ;;  %v5906_v45 = vpop.eup %5905 }
 0x339   :  { %5913 = vpow2.f32 %v1751_v3  ;;  %v7941_v27 = vpop.eup %5907  ;;  %v7948_v55 = vadd.f32 1.0, %v5906_v45  ;;  %vm1838_vm3 = vweird.f32 %v7943_v1 }
 0x33a   :  { %v1721_v46 = vadd.f32 %v7916_v9, %v1673_v52  ;;  %v1722_v25 = vadd.f32 %v7916_v9, %v1674_v48  ;;  %v5910_v4 = vpop.eup %5909  ;;  %5915 = vrcp.f32 %v7935_v29  ;;  %v1774_v2 = vmul.f32 %v7941_v27, %v7928_v15 }
 0x33b   :  { %5917 = vrcp.f32 %v7937_v54  ;;  %v7954_v8 = vadd.f32 1.0, %v5910_v4 }
 0x33c   :  { %v1733_v62 = vsub.f32 0.0, %v1721_v46  ;;  %v1734_v50 = vsub.f32 0.0, %v1722_v25  ;;  %5919 = vrcp.f32 %v7943_v1  ;;  %v1775_v14 = vsub.f32 1.0, %v1774_v2 }
 0x33e   :  { %v5912_v61 = vpop.eup %5911  ;;  %v1753_v9 = vmul.f32 1.442695, %v1733_v62  ;;  %v1755_v26 = vmul.f32 1.442695, %v1734_v50  ;;  %v1776_v52 = vmul.f32 %v7941_v27, %v1775_v14  ;;  %v1844_v50 = vand.u32 2147483648, %v7943_v1 }
 0x33f   :  { %v1627_v0 = vpop.f32.mrf.mxu2  ;;  %v1662_v22 = vpop.f32.mrf.mxu3  ;;  %v7958_v34 = vadd.f32 1.0, %v5912_v61 }
 0x340   :  { %v5914_v63 = vpop.eup %5913  ;;  %5921 = vpow2.f32 %v1753_v9  ;;  %v1675_v59 = vadd.f32 %v1627_v0, %v1486_v24  ;;  %v1676_v43 = vadd.f32 %v1662_v22, %v1539_v53  ;;  %v1859_v24 = vand.u32 2147483648, %v7954_v8 }
 0x341   :  { %5923 = vrcp.f32 %v7948_v55  ;;  %v7961_v31 = vadd.f32 1.0, %v5914_v63  ;;  %v7965_v57 = vpop.eup %5915  ;;  %v8006_v63 = vadd.f32 %v7941_v27, %v1776_v52  ;;  %v1874_v14 = vand.u32 2147483648, %v7958_v34 }
 0x342   :  { %5925 = vpow2.f32 %v1755_v26  ;;  %v1723_v56 = vadd.f32 %v7918_v35, %v1675_v59  ;;  %v1724_v41 = vadd.f32 %v7918_v35, %v1676_v43  ;;  %v7968_v5 = vpop.eup %5917  ;;  %v1814_v35 = vand.u32 2147483648, %v7937_v54 }
 0x343   :  { %5927 = vrcp.f32 %v7954_v8  ;;  %v7971_v37 = vpop.eup %5919  ;;  %v1804_v10 = vmul.f32 %v7968_v5, %v7937_v54  ;;  %v8010_v59 = vmul.f32 %v7965_v57, %v7935_v29  ;;  %vm1809_vm2 = vweird.f32 %v7968_v5 }
 0x344   :  { %5929 = vrcp.f32 %v7958_v34  ;;  %v1735_v38 = vsub.f32 0.0, %v1723_v56  ;;  %v1736_v6 = vsub.f32 0.0, %v1724_v41  ;;  %v1834_v17 = vmul.f32 %v7971_v37, %v7943_v1  ;;  %vm8083_vm11 = vmor %vm1808_vm1, %vm1809_vm2 }
 0x345   :  { %5931 = vrcp.f32 %v7961_v31  ;;  %v7996_v61 = vor.u32 1.1754944e-38, %v1814_v35  ;;  %v1805_v53 = vsub.f32 1.0, %v1804_v10  ;;  %v1889_v26 = vand.u32 2147483648, %v7961_v31 }
 0x346   :  { %v5922_v23 = vpop.eup %5921  ;;  %v1757_v44 = vmul.f32 1.442695, %v1735_v38  ;;  %v1759_v33 = vmul.f32 1.442695, %v1736_v6  ;;  %v1835_v22 = vsub.f32 1.0, %v1834_v17  ;;  %v8045_v38 = vor.u32 1.1754944e-38, %v1874_v14 }
 0x347   :  { %v7975_v3 = vpop.eup %5923  ;;  %v7977_v7 = vadd.f32 1.0, %v5922_v23  ;;  %v8019_v23 = vor.u32 1.1754944e-38, %v1844_v50  ;;  %v1887_v56 = vand.u32 2147483647, %v7961_v31  ;;  %vm1868_vm4 = vweird.f32 %v7958_v34 }
 0x348   :  { %v5926_v16 = vpop.eup %5925  ;;  %5933 = vpow2.f32 %v1757_v44  ;;  %v1819_v9 = vmul.f32 %v7975_v3, %v7948_v55  ;;  %v8021_v44 = vor.u32 1.1754944e-38, %v1859_v24  ;;  %v1872_v24 = vand.u32 2147483647, %v7958_v34 }
 0x349   :  { %v7985_v45 = vpop.eup %5927  ;;  %5935 = vrcp.f32 %v7977_v7  ;;  %v7988_v46 = vadd.f32 1.0, %v5926_v16  ;;  %v1806_v16 = vmul.f32 %v7968_v5, %v1805_v53  ;;  %v1836_v4 = vmul.f32 %v7971_v37, %v1835_v22 }
 0x34a   :  { %v7992_v62 = vpop.eup %5929  ;;  %5937 = vpow2.f32 %v1759_v33  ;;  %v1849_v41 = vmul.f32 %v7985_v45, %v7954_v8  ;;  %v1820_v17 = vsub.f32 1.0, %v1819_v9  ;;  %v1904_v22 = vand.u32 2147483648, %v7977_v7 }
 0x34b   :  { %5939 = vrcp.f32 %v7988_v46  ;;  %v8002_v0 = vpop.eup %5931  ;;  %v1864_v43 = vmul.f32 %v7992_v62, %v7958_v34  ;;  %vm1839_vm5 = vweird.f32 %v7971_v37  ;;  %v8058_v39 = vadd.f32 %v7971_v37, %v1836_v4 }
 0x34c   :  { %v1879_v10 = vmul.f32 %v8002_v0, %v7961_v31  ;;  %v1850_v25 = vsub.f32 1.0, %v1849_v41  ;;  %v8062_v21 = vadd.f32 %v7968_v5, %v1806_v16  ;;  %v1917_v18 = vand.u32 2147483647, %v7988_v46  ;;  %vm8101_vm14 = vmor %vm1838_vm3, %vm1839_vm5 }
 0x34d   :  { %v1865_v48 = vsub.f32 1.0, %v1864_v43  ;;  %v1902_v43 = vand.u32 2147483647, %v7977_v7  ;;  %vm1869_vm6 = vweird.f32 %v7992_v62  ;;  %vm1898_vm7 = vweird.f32 %v7977_v7 }
 0x34e   :  { %v5934_v6 = vpop.eup %5933  ;;  %v1880_v28 = vsub.f32 1.0, %v1879_v10  ;;  %v1851_v20 = vmul.f32 %v7985_v45, %v1850_v25  ;;  %vm1913_vm8 = vweird.f32 %v7988_v46  ;;  %v11087_v4 = vmov 0  ;;  %vm8148_vm0 = vmor %vm1868_vm4, %vm1869_vm6 }
 0x34f   :  { %v8025_v33 = vpop.eup %5935  ;;  %v8027_v35 = vadd.f32 1.0, %v5934_v6  ;;  %v1866_v14 = vmul.f32 %v7992_v62, %v1865_v48  ;;  %v8073_v48 = vor.u32 1.1754944e-38, %v1904_v22  ;;  %v11088_v4 = vsel %vm8083_vm11, 4294967295, %v11087_v4 }
 0x350   :  { %v5938_v52 = vpop.eup %5937  ;;  %v1894_v50 = vmul.f32 %v8025_v33, %v7977_v7  ;;  %v1881_v25 = vmul.f32 %v8002_v0, %v1880_v28  ;;  %vm8089_vm12 = vcmp.eq.f32.partialorder %v1902_v43, 8.507059e+37  ;;  %vm1899_vm2 = vweird.f32 %v8025_v33 }
 0x351   :  { %v8038_v6 = vpop.eup %5939  ;;  %5941 = vrcp.f32 %v8027_v35  ;;  %v8041_v2 = vadd.f32 1.0, %v5938_v52  ;;  %v1919_v52 = vand.u32 2147483648, %v7988_v46  ;;  %v8108_v43 = vadd.f32 %v7992_v62, %v1866_v14  ;;  %vm8170_vm4 = vmor %vm1898_vm7, %vm1899_vm2 }
 0x352   :  { %v1895_v53 = vsub.f32 1.0, %v1894_v50  ;;  %v1909_v9 = vmul.f32 %v8038_v6, %v7988_v46  ;;  %v8054_v50 = vor.u32 1.1754944e-38, %v1889_v26  ;;  %vm8127_vm3 = vcmp.eq.f32.partialorder %v1917_v18, 8.507059e+37 }
 0x353   :  { %5943 = vrcp.f32 %v8041_v2  ;;  %vm8131_vm5 = vcmp.eq.f32.partialorder %v1872_v24, 8.507059e+37  ;;  %v1932_v13 = vand.u32 2147483647, %v8027_v35  ;;  %v1934_v11 = vand.u32 2147483648, %v8027_v35 }
 0x354   :  { %v1910_v41 = vsub.f32 1.0, %v1909_v9  ;;  %v1896_v10 = vmul.f32 %v8025_v33, %v1895_v53  ;;  %v8068_v9 = vmul.f32 %v7975_v3, %v1820_v17  ;;  %v8094_v53 = vor.u32 1.1754944e-38, %v1919_v52 }
 0x355   :  { %v8115_v52 = vadd.f32 %v7985_v45, %v1851_v20  ;;  %vm1914_vm1 = vweird.f32 %v8038_v6  ;;  %vm8152_vm9 = vcmp.eq.f32.partialorder %v1887_v56, 8.507059e+37  ;;  %vm1928_vm10 = vweird.f32 %v8027_v35 }
 0x356   :  { %v1911_v28 = vmul.f32 %v8038_v6, %v1910_v41  ;;  %v1897_v58 = vadd.f32 %v8025_v33, %v1896_v10  ;;  %v1882_v10 = vadd.f32 %v8002_v0, %v1881_v25  ;;  %v11101_v25 = vand.u32 2147483647, %v7943_v1  ;;  %vm8185_vm7 = vmor %vm1913_vm8, %vm1914_vm1 }
 0x357   :  { %v8070_v26 = vpop.eup %5941  ;;  %v1947_v34 = vand.u32 2147483647, %v8041_v2  ;;  %v1790_v1 = vsub.f32 1.0, %v8010_v59  ;;  %v11108_v59 = vand.u32 2147483647, %v7954_v8  ;;  %vm1933_vm1 = vcmp.eq.f32.partialorder %v1932_v13, 8.507059e+37 }
 0x358   :  { %v1924_v16 = vmul.f32 %v8070_v26, %v8027_v35  ;;  %vm8158_vm15 = vcmp.eq.f32.partialorder %v11101_v25, 8.507059e+37  ;;  %v1901_v35 = vsel %vm8170_vm4, %v8025_v33, %v1897_v58  ;;  %vm11114_vm6 = vweird.f32 %v8070_v26 }
 0x359   :  { %v8105_v47 = vpop.eup %5943  ;;  %vm8191_vm2 = vcmp.eq.f32.partialorder %v11108_v59, 8.507059e+37  ;;  %vm1930_vm8 = vmor %vm1928_vm10, %vm11114_vm6  ;;  %v1935_v58 = vor.u32 1.1754944e-38, %v1934_v11  ;;  %vm1943_vm11 = vweird.f32 %v8041_v2  ;;  %v1871_v46 = vsel %vm8148_vm0, %v7992_v62, %v8108_v43 }
 0x35a   :  { %v1939_v14 = vmul.f32 %v8105_v47, %v8041_v2  ;;  %v1925_v40 = vsub.f32 1.0, %v1924_v16  ;;  %v1912_v16 = vadd.f32 %v8038_v6, %v1911_v28  ;;  %v1949_v28 = vand.u32 2147483648, %v8041_v2 }
 0x35b   :  { %vm11115_vm4 = vweird.f32 %v8002_v0  ;;  %vm11116_vm10 = vweird.f32 %v7961_v31  ;;  %v11119_v11 = vand.u32 2147483647, %v7928_v15  ;;  %v1791_v62 = vmul.f32 %v7965_v57, %v1790_v1 }
 0x35c   :  { %v1926_v18 = vmul.f32 %v8070_v26, %v1925_v40  ;;  %v1940_v24 = vsub.f32 1.0, %v1939_v14  ;;  %v1916_v56 = vsel %vm8185_vm7, %v8038_v6, %v1912_v16  ;;  %vm8218_vm6 = vmor %vm11116_vm10, %vm11115_vm4  ;;  %vm11122_vm0 = vweird.f32 %v8105_v47 }
 0x35d   :  { %vm1945_vm7 = vmor %vm1943_vm11, %vm11122_vm0  ;;  %v1950_v6 = vor.u32 1.1754944e-38, %v1949_v28  ;;  %v1906_v31 = vsel %vm8089_vm12, %v8073_v48, %v1901_v35  ;;  %v1886_v16 = vsel %vm8218_vm6, %v8002_v0, %v1882_v10  ;;  %vm11123_vm4 = vweird.f32 %v7985_v45 }
 0x35e   :  { %v1927_v14 = vadd.f32 %v8070_v26, %v1926_v18  ;;  %v1941_v25 = vmul.f32 %v8105_v47, %v1940_v24  ;;  %v11111_v24 = vand.u32 2147483647, %v7937_v54  ;;  %v1822_v17 = vadd.f32 %v7975_v3, %v8068_v9 }
 0x35f   :  { %v1961_v10 = vmul.f32 %v1906_v31, %v7682_v36  ;;  %vm11127_vm11 = vweird.f32 %v7941_v27  ;;  %vm11128_vm12 = vweird.f32 %v7928_v15  ;;  %vm11133_vm0 = vweird.f32 %v7948_v55 }
 0x360   :  { %vm8197_vm13 = vcmp.eq.f32.partialorder %v11111_v24, 8.507059e+37  ;;  %v1931_v54 = vsel %vm1930_vm8, %v8070_v26, %v1927_v14  ;;  %v1942_v33 = vadd.f32 %v8105_v47, %v1941_v25  ;;  %vm1948_vm8 = vcmp.eq.f32.partialorder %v1947_v34, 8.507059e+37  ;;  %vm8265_vm6 = vmor %vm11128_vm12, %vm11127_vm11  ;;  %v11146_v34 = vld [vmem:[#allocation144_spill] sm:$0xff]  ;;  %v11147_v14 = vld [vmem:[#allocation145_spill] sm:$0xff] }
 0x361   :  { %v11113_v49 = vsel %vm8197_vm13, 4294967295, %v11112_v49  ;;  %vm8224_vm13 = vcmp.eq.f32.partialorder %v11119_v11, 8.507059e+37  ;;  %v1936_v2 = vsel %vm1933_vm1, %v1935_v58, %v1931_v54  ;;  %vm11124_vm1 = vweird.f32 %v7954_v8  ;;  %v184_v24 = vld [vmem:[%s10760_s6 + $0x8] sm:$0xff]  ;;  %v1148_v58 = vpop.xlane.xlu0 %1147  ;;  %v11153_v11 = vld [vmem:[#allocation132_spill] sm:$0xff] }
 0x362   :  { %v1963_v26 = vmul.f32 %v1936_v2, %v7673_v30  ;;  %v1946_v43 = vsel %vm1945_vm7, %v8105_v47, %v1942_v33  ;;  %vm8243_vm10 = vmor %vm11124_vm1, %vm11123_vm4  ;;  %v1921_v47 = vsel %vm8127_vm3, %v8094_v53, %v1916_v56  ;;  %v1876_v30 = vsel %vm8131_vm5, %v8045_v38, %v1871_v46  ;;  %v1078_v46 = vpop.xlane.xlu1 %1077 }
 0x363   :  { %v1951_v48 = vsel %vm1948_vm8, %v1950_v6, %v1946_v43  ;;  %v1856_v8 = vsel %vm8243_vm10, %v7985_v45, %v8115_v52  ;;  %v1792_v38 = vadd.f32 %v7965_v57, %v1791_v62  ;;  %vm1794_vm3 = vweird.f32 %v7965_v57 }
 0x364   :  { %1991 = vmatpush.msrb.mxu2 %v1963_v26  ;;  %v1964_v0 = vmul.f32 %v1951_v48, %v7675_v42  ;;  %v1891_v45 = vsel %vm8152_vm9, %v8054_v50, %v1886_v16  ;;  %v11131_v42 = vsel %vm8101_vm14, %v7971_v37, %v8058_v39  ;;  %vm11132_vm5 = vweird.f32 %v7975_v3 }
 0x365   :  { %v1846_v36 = vsel %vm8158_vm15, %v8019_v23, %v11131_v42  ;;  %vm8286_vm7 = vmor %vm11133_vm0, %vm11132_vm5  ;;  %v1781_v51 = vsel %vm8265_vm6, %v7941_v27, %v8006_v63  ;;  %v1799_v50 = vand.u32 2147483648, %v7935_v29  ;;  %v1962_v39 = vmul.f32 %v1921_v47, %v7684_v19 }
 0x366   :  { %2014 = vmatpush.msrb.mxu3 %v1964_v0  ;;  %1992 = vmatpush.msrb.mxu2 %v1961_v10  ;;  %v1959_v37 = vmul.f32 %v1876_v30, %v7710_v60  ;;  %v1826_v23 = vsel %vm8286_vm7, %v7975_v3, %v1822_v17  ;;  %v1797_v22 = vand.u32 2147483647, %v7935_v29  ;;  %v1861_v41 = vsel %vm8191_vm2, %v8021_v44, %v1856_v8  ;;  %v11157_v44 = vld [vmem:[#allocation134_spill] sm:$0xff] }
 0x367   :  { %vm11136_vm9 = vnez %v11088_v4  ;;  %vm11138_vm14 = vnez %v11113_v49  ;;  %v11139_v63 = vand.u32 2147483648, %v7948_v55  ;;  %v11140_v3 = vand.u32 2147483648, %v7928_v15  ;;  %v11144_v49 = vld [vmem:[#allocation143_spill] sm:$0xff]  ;;  %54 = vst [vmem:[%s10761_s13 + $0x18] sm:$0xff] %v11157_v44 }
 0x368   :  { %v11137_v27 = vsel %vm11136_vm9, %v7968_v5, %v8062_v21  ;;  %vm11141_vm15 = vweird.f32 %v7935_v29  ;;  %2015 = vmatpush.msrb.mxu3 %v1962_v39  ;;  %1993 = vmatpush.msrb.mxu2 %v1959_v37  ;;  %v1960_v21 = vmul.f32 %v1891_v45, %v7712_v12  ;;  %v1957_v5 = vmul.f32 %v1846_v36, %v11144_v49 }
 0x369   :  { %v1816_v19 = vsel %vm11138_vm14, %v7996_v61, %v11137_v27  ;;  %v1830_v52 = vor.u32 1.1754944e-38, %v11139_v63  ;;  %v1785_v20 = vor.u32 1.1754944e-38, %v11140_v3  ;;  %vm8320_vm2 = vmor %vm11141_vm15, %vm1794_vm3  ;;  %v11145_v61 = vand.u32 2147483647, %v7948_v55  ;;  %v11148_v55 = vld [vmem:[#allocation146_spill] sm:$0xff]  ;;  %v1075_v33 = vpop.xlane.xlu0 %1074  ;;  %v11154_v27 = vld [vmem:[#allocation141_spill] sm:$0xff] }
 0x36a   :  { %v1796_v15 = vsel %vm8320_vm2, %v7965_v57, %v1792_v38  ;;  %v1800_v40 = vor.u32 1.1754944e-38, %v1799_v50  ;;  %2016 = vmatpush.msrb.mxu3 %v1960_v21  ;;  %1994 = vmatpush.msrb.mxu2 %v1957_v5  ;;  %v1958_v28 = vmul.f32 %v1861_v41, %v11146_v34  ;;  %v1955_v25 = vmul.f32 %v1816_v19, %v11147_v14  ;;  %v183_v57 = vld [vmem:[%s10760_s6] sm:$0xff]  ;;  %v1151_v56 = vpop.xlane.xlu1 %1150  ;;  %v11156_v3 = vld [vmem:[#allocation133_spill] sm:$0xff] }
 0x36b   :  { %vm1828_vm8 = vcmp.eq.f32.partialorder %v11145_v61, 8.507059e+37  ;;  %v1786_v29 = vsel %vm8224_vm13, %v1785_v20, %v1781_v51  ;;  %vm1798_vm4 = vcmp.eq.f32.partialorder %v1797_v22, 8.507059e+37  ;;  %vm11149_vm13 = vcmask 392192   ;;  %51 = vst [vmem:[%s10761_s13] sm:$0xff] %v11154_v27  ;;  %v11155_v63 = vld [vmem:[#allocation142_spill] sm:$0xff] }
 0x36c   :  { %v1831_v4 = vsel %vm1828_vm8, %v1830_v52, %v1826_v23  ;;  %v1801_v35 = vsel %vm1798_vm4, %v1800_v40, %v1796_v15  ;;  %2017 = vmatpush.msrb.mxu3 %v1958_v28  ;;  %1995 = vmatpush.msrb.mxu2 %v1955_v25  ;;  %v1953_v59 = vmul.f32 %v1786_v29, %v7710_v60  ;;  %vm11150_vm1 = vmmov %vm11149_vm13  ;;  %v1081_v60 = vpop.xlane.xlu2 %1080  ;;  %vm10937_vm15 = vcmask 64512  }
 0x36d   :  { %v1956_v7 = vmul.f32 %v1831_v4, %v11148_v55  ;;  %v1954_v18 = vmul.f32 %v1801_v35, %v7712_v12  ;;  %vm11151_vm10 = vmmov %vm11150_vm1  ;;  %v8352_v62 = vmul.f32 %v11153_v11, %v1081_v60  ;;  %v1161_v6 = vmul.f32 %v1151_v56, %v11153_v11  ;;  %52 = vst [vmem:[%s10761_s13 + $0x8] sm:$0xff] %v11155_v63 }
 0x36e   :  { %1996 = vmatpush.msrb.mxu2 %v1953_v59  ;;  %vm11152_vm11 = vmmov %vm11150_vm1  ;;  %v1160_v31 = vmul.f32 %v1148_v58, %v11153_v11  ;;  %v8367_v48 = vmul.f32 %v11153_v11, %v1078_v46  ;;  %v8370_v0 = vmul.f32 %v11153_v11, %v1075_v33  ;;  %53 = vst [vmem:[%s10761_s13 + $0x10] sm:$0xff] %v11156_v3 }
 0x36f   :  { %2018 = vmatpush.msrb.mxu3 %v1956_v7  ;;  %5490 = vmatmul.msk.f32.vlgmr.msrb.gmra.mxu2 %vm11149_vm13, %v183_v57  ;;  %v1190_v43 = vmul.f32 %v8352_v62, %v8352_v62 }
 0x370   :  { %v1189_v42 = vmul.f32 %v8367_v48, %v8367_v48  ;;  %v1188_v53 = vmul.f32 %v8370_v0, %v8370_v0 }
 0x371   :  { %2019 = vmatpush.msrb.mxu3 %v1954_v18  ;;  %v1084_v13 = vpop.xlane.xlu0 %1083  ;;  %v1200_v8 = vsub.f32 %v1160_v31, %v1190_v43 }
 0x372   :  { %5492 = vmatmul.msk.f32.vlgmr.msrb.gmra.mxu3 %vm11150_vm1, %v183_v57  ;;  %v8349_v32 = vmul.f32 %v11153_v11, %v1084_v13  ;;  %v1145_v16 = vpop.xlane.xlu1 %1144 }
 0x373   :  { %v1159_v10 = vmul.f32 %v1145_v16, %v11153_v11  ;;  %v8376_v36 = vadd.f32 1e-05, %v1200_v8 }
 0x374   :  { %v1072_v54 = vpop.xlane.xlu2 %1071  ;;  %v1191_v26 = vmul.f32 %v8349_v32, %v8349_v32 }
 0x375   :  { %v8355_v2 = vmul.f32 %v11153_v11, %v1072_v54  ;;  %v1199_v51 = vsub.f32 %v1159_v10, %v1189_v42  ;;  %vm1298_vm9 = vweird.f32 %v8376_v36  ;;  %v187_v10 = vld [vmem:[%s10762_s8] sm:$0xff] }
 0x376   :  { %v1201_v47 = vsub.f32 %v1161_v6, %v1191_v26  ;;  %v11188_v26 = vld [vmem:[#allocation26_spill] sm:$0xff] }
 0x377   :  { %5491 = vmatmul.msk.f32.gmra.mxu2 %vm11151_vm10, %v184_v24  ;;  %v1187_v1 = vmul.f32 %v8355_v2, %v8355_v2  ;;  %v8381_v37 = vadd.f32 1e-05, %v1199_v51 }
 0x378   :  { %v1211_v45 = vadd.f32 1e-05, %v1201_v47 }
 0x379   :  { %v8418_v54 = vpop.permute.xlu0 %1972  ;;  %vm1288_vm4 = vweird.f32 %v8381_v37 }
 0x37a   :  { %5493 = vmatmul.msk.f32.gmra.mxu3 %vm11152_vm11, %v184_v24  ;;  %5945 = vrsqrt.f32 %v1211_v45  ;;  %vm1308_vm5 = vweird.f32 %v1211_v45  ;;  %11158 = vst [vmem:[#allocation143_spill] sm:$0xff] %v8418_v54 }
 0x37b   :  { %5947 = vrsqrt.f32 %v8376_v36 }
 0x37c   :  { %v1139_v12 = vpop.xlane.xlu2 %1138 }
 0x37d   :  { %v1157_v17 = vmul.f32 %v1139_v12, %v11153_v11  ;;  %v11159_v12 = vld [vmem:[#allocation130_spill] sm:$0xff] }
 0x37e   :  { %v1178_v13 = vsub.f32 %v11159_v12, %v8352_v62  ;;  %v11184_v12 = vld [vmem:[#allocation19_spill] sm:$0xff] }
 0x37f   :  { %v1197_v9 = vsub.f32 %v1157_v17, %v1187_v1  ;;  %v11162_v17 = vld [vmem:[#allocation138_spill] sm:$0xff] }
 0x380   :  { %v5946_v22 = vpop.eup %5945  ;;  %v1180_v47 = vsub.f32 %v11162_v17, %v8349_v32  ;;  %v11192_v17 = vld [vmem:[#allocation34_spill] sm:$0xff] }
 0x381   :  { %v1207_v50 = vadd.f32 1e-05, %v1197_v9  ;;  %v5948_v41 = vpop.eup %5947  ;;  %v1303_v19 = vmul.f32 %v5946_v22, %v1211_v45  ;;  %vm1309_vm12 = vweird.f32 %v5946_v22  ;;  %v11163_v9 = vld [vmem:[#allocation131_spill] sm:$0xff] }
 0x382   :  { %v1293_v20 = vmul.f32 %v5948_v41, %v8376_v36  ;;  %vm1299_vm0 = vweird.f32 %v5948_v41  ;;  %vm1310_vm7 = vmor %vm1308_vm5, %vm1309_vm12  ;;  %v1172_v36 = vsub.f32 %v11156_v3, %v8355_v2  ;;  %vm11169_vm12 = vcmask 392192  }
 0x383   :  { %5949 = vrsqrt.f32 %v1207_v50  ;;  %v1304_v5 = vmul.f32 %v5946_v22, %v1303_v19  ;;  %vm1268_vm6 = vweird.f32 %v1207_v50  ;;  %vm1300_vm2 = vmor %vm1298_vm9, %vm1299_vm0 }
 0x384   :  { %v1142_v30 = vpop.xlane.xlu2 %1141  ;;  %5951 = vrsqrt.f32 %v8381_v37  ;;  %v1294_v15 = vmul.f32 %v5948_v41, %v1293_v20 }
 0x385   :  { %v1158_v38 = vmul.f32 %v1142_v30, %v11153_v11  ;;  %v1305_v34 = vmul.f32 0.5, %v1304_v5 }
 0x386   :  { %v1295_v28 = vmul.f32 0.5, %v1294_v15 }
 0x387   :  { %v1198_v39 = vsub.f32 %v1158_v38, %v1188_v53  ;;  %v1306_v7 = vsub.f32 1.5, %v1305_v34  ;;  %v1179_v38 = vsub.f32 %v11163_v9, %v8352_v62  ;;  %v11164_v53 = vld [vmem:[#allocation137_spill] sm:$0xff]  ;;  %v11168_v34 = vld [vmem:[#allocation136_spill] sm:$0xff]  ;;  %v5501_v9 = vld [vmem:[%s10756_s2 + $0xe8] sm:$0xff] }
 0x388   :  { %v1296_v57 = vsub.f32 1.5, %v1295_v28  ;;  %v1181_v51 = vsub.f32 %v11164_v53, %v8349_v32  ;;  %v1175_v28 = vsub.f32 %v11168_v34, %v8370_v0  ;;  %v5502_v53 = vld [vmem:[%s10756_s2 + $0xf0] sm:$0xff]  ;;  %v5505_v34 = vld [vmem:[%s10756_s2 + $0x108] sm:$0xff] }
 0x389   :  { %v8383_v23 = vadd.f32 1e-05, %v1198_v39  ;;  %v5950_v52 = vpop.eup %5949  ;;  %v1307_v58 = vmul.f32 %v5946_v22, %v1306_v7  ;;  %v5497_v7 = vld [vmem:[%s10756_s2 + $0xc8] sm:$0xff] }
 0x38a   :  { %v8404_v21 = vpop.eup %5951  ;;  %v1263_v49 = vmul.f32 %v5950_v52, %v1207_v50  ;;  %vm1269_vm3 = vweird.f32 %v5950_v52  ;;  %v1297_v56 = vmul.f32 %v5948_v41, %v1296_v57  ;;  %v11173_v57 = vld [vmem:[#allocation6_spill] sm:$0xff] }
 0x38b   :  { %5953 = vrsqrt.f32 %v8383_v23  ;;  %v1283_v4 = vmul.f32 %v8404_v21, %v8381_v37  ;;  %vm8424_vm14 = vmor %vm1268_vm6, %vm1269_vm3  ;;  %v1311_v1 = vsel %vm1310_vm7, %v5946_v22, %v1307_v58  ;;  %vm1289_vm8 = vweird.f32 %v8404_v21  ;;  %v5498_v58 = vld [vmem:[%s10756_s2 + $0xd0] sm:$0xff] }
 0x38c   :  { %v1264_v29 = vmul.f32 %v5950_v52, %v1263_v49  ;;  %v1301_v45 = vsel %vm1300_vm2, %v5948_v41, %v1297_v56  ;;  %v8443_v39 = vmul.f32 %v1311_v1, %v1180_v47  ;;  %v1173_v41 = vsub.f32 %v11157_v44, %v8355_v2  ;;  %vm1290_vm1 = vmor %vm1288_vm4, %vm1289_vm8  ;;  %v11182_v56 = vld [vmem:[#allocation18_spill] sm:$0xff]  ;;  %v11193_v47 = vld [vmem:[#allocation31_spill] sm:$0xff] }
 0x38d   :  { %v1284_v14 = vmul.f32 %v8404_v21, %v1283_v4  ;;  %v8454_v32 = vmul.f32 %v1311_v1, %v1181_v51  ;;  %v8456_v19 = vmul.f32 %v1301_v45, %v1178_v13  ;;  %vm1278_vm10 = vweird.f32 %v8383_v23  ;;  %vm11171_vm6 = vmmov %vm11169_vm12  ;;  %v5499_v13 = vld [vmem:[%s10756_s2 + $0xd8] sm:$0xff]  ;;  %v11191_v1 = vld [vmem:[#allocation30_spill] sm:$0xff] }
 0x38e   :  { %v1265_v35 = vmul.f32 0.5, %v1264_v29  ;;  %v8467_v2 = vmul.f32 %v1301_v45, %v1179_v38  ;;  %vm11175_vm3 = vmmov %vm11171_vm6  ;;  %v11199_v38 = vld [vmem:[#allocation42_spill] sm:$0xff]  ;;  %v11201_v45 = vld [vmem:[#allocation43_spill] sm:$0xff] }
 0x38f   :  { %v1285_v18 = vmul.f32 0.5, %v1284_v14  ;;  %vm11177_vm5 = vmmov %vm11175_vm3  ;;  %v11205_v51 = vld [vmem:[#allocation50_spill] sm:$0xff] }
 0x390   :  { %v1266_v24 = vsub.f32 1.5, %v1265_v35  ;;  %v5496_v35 = vld [vmem:[%s10756_s2 + $0xc0] sm:$0xff]  ;;  %vm11181_vm0 = vmmov %vm11175_vm3 }
 0x391   :  { %v8406_v61 = vpop.eup %5953  ;;  %v1286_v46 = vsub.f32 1.5, %v1285_v18  ;;  %v11174_v18 = vld [vmem:[#allocation7_spill] sm:$0xff]  ;;  %vm11183_vm7 = vmmov %vm11181_vm0 }
 0x392   :  { %v1273_v40 = vmul.f32 %v8406_v61, %v8383_v23  ;;  %v1267_v31 = vmul.f32 %v5950_v52, %v1266_v24  ;;  %vm1279_vm13 = vweird.f32 %v8406_v61  ;;  %v11166_v23 = vld [vmem:[#allocation135_spill] sm:$0xff]  ;;  %v11176_v24 = vld [vmem:[#allocation10_spill] sm:$0xff]  ;;  %vm11187_vm9 = vmmov %vm11181_vm0 }
 0x393   :  { %v1287_v42 = vmul.f32 %v8404_v21, %v1286_v46  ;;  %vm1280_vm11 = vmor %vm1278_vm10, %vm1279_vm13  ;;  %v1174_v5 = vsub.f32 %v11166_v23, %v8370_v0  ;;  %v11170_v0 = vld [vmem:[#allocation2_spill] sm:$0xff] }
 0x394   :  { %v1274_v55 = vmul.f32 %v8406_v61, %v1273_v40  ;;  %v1271_v62 = vsel %vm8424_vm14, %v5950_v52, %v1267_v31  ;;  %v11165_v52 = vld [vmem:[#allocation139_spill] sm:$0xff]  ;;  %v11179_v46 = vld [vmem:[#allocation14_spill] sm:$0xff]  ;;  %vm11189_vm14 = vmmov %vm11181_vm0 }
 0x395   :  { %v1291_v37 = vsel %vm1290_vm1, %v8404_v21, %v1287_v42  ;;  %v1176_v20 = vsub.f32 %v11165_v52, %v8367_v48  ;;  %v8469_v49 = vmul.f32 %v1271_v62, %v1172_v36  ;;  %v11167_v21 = vld [vmem:[#allocation140_spill] sm:$0xff]  ;;  %v8480_v29 = vmul.f32 %v1271_v62, %v1173_v41  ;;  %v11186_v31 = vld [vmem:[#allocation23_spill] sm:$0xff]  ;;  %vm11194_vm2 = vmmov %vm11181_vm0 }
 0x396   :  { %v1275_v60 = vmul.f32 0.5, %v1274_v55  ;;  %v1177_v4 = vsub.f32 %v11167_v21, %v8367_v48  ;;  %v11172_v55 = vld [vmem:[#allocation3_spill] sm:$0xff]  ;;  %vm11196_vm8 = vmmov %vm11181_vm0  ;;  %v11203_v42 = vld [vmem:[#allocation46_spill] sm:$0xff] }
 0x397   :  { %v8482_v40 = vmul.f32 %v1291_v37, %v1176_v20  ;;  %vm11200_vm4 = vmmov %vm11181_vm0  ;;  %v11204_v36 = vld [vmem:[#allocation47_spill] sm:$0xff]  ;;  %v11209_v62 = vld [vmem:[#allocation54_spill] sm:$0xff]  ;;  %v8568_v20 = vpop.permute.xlu1 %2169 }
 0x398   :  { %v1276_v43 = vsub.f32 1.5, %v1275_v60  ;;  %v8488_v14 = vmul.f32 %v1291_v37, %v1177_v4  ;;  %v11178_v60 = vld [vmem:[#allocation11_spill] sm:$0xff]  ;;  %vm11202_vm13 = vmmov %vm11181_vm0  ;;  %v5503_v41 = vld [vmem:[%s10756_s2 + $0xf8] sm:$0xff] }
 0x399   :  { %vm11206_vm1 = vmmov %vm11181_vm0  ;;  %v11211_v37 = vld [vmem:[#allocation58_spill] sm:$0xff]  ;;  %v11213_v52 = vld [vmem:[#allocation59_spill] sm:$0xff] }
 0x39a   :  { %v1277_v22 = vmul.f32 %v8406_v61, %v1276_v43  ;;  %v11190_v43 = vld [vmem:[#allocation27_spill] sm:$0xff]  ;;  %vm11208_vm10 = vmmov %vm11181_vm0  ;;  %v11215_v23 = vld [vmem:[#allocation62_spill] sm:$0xff] }
 0x39b   :  { %v5504_v21 = vld [vmem:[%s10756_s2 + $0x100] sm:$0xff] }
 0x39c   :  { %v1281_v15 = vsel %vm1280_vm11, %v8406_v61, %v1277_v22  ;;  %v11210_v22 = vld [vmem:[#allocation55_spill] sm:$0xff]  ;;  %vm11212_vm11 = vmmov %vm11181_vm0 }
 0x39d   :  { %v8490_v61 = vmul.f32 %v1281_v15, %v1174_v5  ;;  %v8494_v48 = vmul.f32 %v1281_v15, %v1175_v28  ;;  %v11216_v5 = vld [vmem:[#allocation63_spill] sm:$0xff]  ;;  %v8573_v15 = vpop.permute.xlu0 %2159 }
 0x39f   :  { %v8580_v4 = vpop.permute.xlu1 %2154 }
 0x3a5   :  { %v8585_v28 = vpop.permute.xlu0 %2149 }
 0x3f2   :  { %v8413_v25 = vpop.f32.mrf.mxu2 }
 0x3f5   :  { %v8416_v59 = vpop.f32.mrf.mxu3 }
 0x3fa   :  { %v2001_v33 = vpop.f32.mrf.mxu2 }
 0x3fb   :  { %v2002_v6 = vadd.f32 %v2001_v33, %v8418_v54  ;;  %v11180_v33 = vld [vmem:[#allocation15_spill] sm:$0xff] }
 0x3fd   :  { %v2024_v16 = vpop.f32.mrf.mxu3  ;;  %v2027_v30 = vmax.f32 %v2002_v6, 0.0  ;;  %v11185_v6 = vld [vmem:[#allocation22_spill] sm:$0xff] }
 0x3fe   :  { %v2025_v8 = vadd.f32 %v2024_v16, %v8418_v54  ;;  %v5500_v16 = vld [vmem:[%s10756_s2 + $0xe0] sm:$0xff] }
 0x3ff   :  { %2048 = vmatpush.msra.mxu2 %v2027_v30  ;;  %v11195_v30 = vld [vmem:[#allocation35_spill] sm:$0xff] }
 0x400   :  { %v2028_v50 = vmax.f32 %v2025_v8, 0.0  ;;  %5494 = vmatmul.msk.f32.vlgmr.msra.gmra.mxu2 %vm10937_vm15, %v187_v10  ;;  %v11197_v8 = vld [vmem:[#allocation38_spill] sm:$0xff] }
 0x401   :  { %2218 = vmatpush.msrb.mxu2 %v8443_v39 }
 0x402   :  { %2068 = vmatpush.msra.mxu3 %v2028_v50  ;;  %v11207_v50 = vld [vmem:[#allocation51_spill] sm:$0xff] }
 0x403   :  { %5495 = vmatmul.msk.f32.vlgmr.msra.gmra.mxu3 %vm10937_vm15, %v187_v10  ;;  %2219 = vmatpush.msrb.mxu2 %v8456_v19  ;;  %v11198_v10 = vld [vmem:[#allocation39_spill] sm:$0xff] }
 0x404   :  { %2271 = vmatpush.msrb.mxu3 %v8454_v32 }
 0x405   :  { %2220 = vmatpush.msrb.mxu2 %v8469_v49 }
 0x406   :  { %2272 = vmatpush.msrb.mxu3 %v8467_v2 }
 0x407   :  { %2221 = vmatpush.msrb.mxu2 %v8482_v40 }
 0x408   :  { %2273 = vmatpush.msrb.mxu3 %v8480_v29 }
 0x409   :  { %2222 = vmatpush.msrb.mxu2 %v8490_v61 }
 0x40a   :  { %2274 = vmatpush.msrb.mxu3 %v8488_v14 }
 0x40b   :  { %2223 = vmatpush.msrb.mxu2 %v8469_v49 }
 0x40c   :  { %2275 = vmatpush.msrb.mxu3 %v8494_v48  ;;  %5520 = vmatmul.msk.f32.vlgmr.msrb.gmra.mxu2 %vm11169_vm12, %v5496_v35  ;;  %vm11214_vm12 = vmmov %vm11181_vm0 }
 0x40d   :  { %2833 = vmatpush.bf16.msra.mxu2 %v11170_v0  ;;  %v5506_v0 = vld [vmem:[%s10756_s2 + $0x110] sm:$0xff] }
 0x40e   :  { %2276 = vmatpush.msrb.mxu3 %v8480_v29 }
 0x40f   :  { %5532 = vmatmul.msk.f32.vlgmr.msrb.gmra.mxu3 %vm11171_vm6, %v5496_v35  ;;  %vm11217_vm6 = vmmov %vm11181_vm0  ;;  %v8589_v35 = vpop.permute.xlu1 %2139 }
 0x410   :  { %2847 = vmatpush.bf16.msra.mxu3 %v11172_v55  ;;  %v8595_v55 = vpop.permute.xlu0 %2134 }
 0x411   :  { %2834 = vmatpush.bf16.msra.mxu2 %v11173_v57 }
 0x414   :  { %2848 = vmatpush.bf16.msra.mxu3 %v11174_v18  ;;  %5521 = vmatmul.msk.f32.gmra.mxu2 %vm11175_vm3, %v5497_v7  ;;  %vm11218_vm3 = vmmov %vm11181_vm0 }
 0x415   :  { %2835 = vmatpush.bf16.msra.mxu2 %v11176_v24 }
 0x417   :  { %5533 = vmatmul.msk.f32.gmra.mxu3 %vm11177_vm5, %v5497_v7  ;;  %vm11219_vm5 = vmmov %vm11181_vm0  ;;  %v5507_v7 = vld [vmem:[%s10756_s2 + $0x118] sm:$0xff]  ;;  %v8601_v57 = vpop.permute.xlu1 %2467 }
 0x418   :  { %2849 = vmatpush.bf16.msra.mxu3 %v11178_v60  ;;  %v8605_v18 = vpop.permute.xlu0 %2124 }
 0x419   :  { %2836 = vmatpush.bf16.msra.mxu2 %v11179_v46 }
 0x41c   :  { %2850 = vmatpush.bf16.msra.mxu3 %v11180_v33  ;;  %5522 = vmatmul.msk.f32.gmra.mxu2 %vm11181_vm0, %v5498_v58 }
 0x41d   :  { %2837 = vmatpush.bf16.msra.mxu2 %v11182_v56 }
 0x41f   :  { %5534 = vmatmul.msk.f32.gmra.mxu3 %vm11183_vm7, %v5498_v58  ;;  %vm11220_vm7 = vmmov %vm11181_vm0  ;;  %v8607_v24 = vpop.permute.xlu1 %2119 }
 0x420   :  { %2851 = vmatpush.bf16.msra.mxu3 %v11184_v12  ;;  %v8609_v60 = vpop.permute.xlu0 %2457 }
 0x421   :  { %2838 = vmatpush.bf16.msra.mxu2 %v11185_v6 }
 0x424   :  { %2852 = vmatpush.bf16.msra.mxu3 %v11186_v31  ;;  %5523 = vmatmul.msk.f32.gmra.mxu2 %vm11187_vm9, %v5499_v13  ;;  %vm11221_vm9 = vmmov %vm11181_vm0 }
 0x425   :  { %2839 = vmatpush.bf16.msra.mxu2 %v11188_v26  ;;  %v2082_v26 = vld [vmem:[%s10763_s12] sm:$0xff] }
 0x427   :  { %5535 = vmatmul.msk.f32.gmra.mxu3 %vm11189_vm14, %v5499_v13  ;;  %vm11222_vm14 = vmmov %vm11181_vm0  ;;  %v8611_v58 = vpop.permute.xlu1 %2452 }
 0x428   :  { %2853 = vmatpush.bf16.msra.mxu3 %v11190_v43  ;;  %v8613_v46 = vpop.permute.xlu0 %2447 }
 0x429   :  { %2840 = vmatpush.bf16.msra.mxu2 %v11191_v1 }
 0x42c   :  { %2854 = vmatpush.bf16.msra.mxu3 %v11193_v47  ;;  %5524 = vmatmul.msk.f32.gmra.mxu2 %vm11194_vm2, %v5500_v16  ;;  %vm11223_vm2 = vmmov %vm11181_vm0 }
 0x42d   :  { %2889 = vmatpush.bf16.msrb.mxu2 %v11192_v17  ;;  %v2083_v17 = vld [vmem:[%s10763_s12 + $0x8] sm:$0xff] }
 0x42f   :  { %5536 = vmatmul.msk.f32.gmra.mxu3 %vm11196_vm8, %v5500_v16  ;;  %v8615_v33 = vpop.permute.xlu1 %1967  ;;  %vm11227_vm8 = vmmov %vm11181_vm0 }
 0x430   :  { %2903 = vmatpush.bf16.msrb.mxu3 %v11195_v30  ;;  %11224 = vst [vmem:[#allocation144_spill] sm:$0xff] %v8615_v33  ;;  %v1999_v56 = vadd.f32 %v8413_v25, %v8615_v33  ;;  %v2022_v13 = vadd.f32 %v8416_v59, %v8615_v33  ;;  %v8621_v31 = vpop.permute.xlu0 %2077 }
 0x431   :  { %2890 = vmatpush.bf16.msrb.mxu2 %v11197_v8  ;;  %11225 = vst [vmem:[#allocation145_spill] sm:$0xff] %v8621_v31 }
 0x434   :  { %2904 = vmatpush.bf16.msrb.mxu3 %v11198_v10  ;;  %5525 = vmatmul.msk.f32.gmra.mxu2 %vm11200_vm4, %v5501_v9  ;;  %vm11228_vm4 = vmmov %vm11181_vm0 }
 0x435   :  { %2891 = vmatpush.bf16.msrb.mxu2 %v11199_v38 }
 0x437   :  { %5537 = vmatmul.msk.f32.gmra.mxu3 %vm11202_vm13, %v5501_v9  ;;  %vm11229_vm13 = vmmov %vm11181_vm0 }
 0x438   :  { %2905 = vmatpush.bf16.msrb.mxu3 %v11201_v45 }
 0x439   :  { %2892 = vmatpush.bf16.msrb.mxu2 %v11203_v42 }
 0x43c   :  { %2906 = vmatpush.bf16.msrb.mxu3 %v11204_v36  ;;  %5526 = vmatmul.msk.f32.gmra.mxu2 %vm11206_vm1, %v5502_v53  ;;  %vm11230_vm1 = vmmov %vm11181_vm0 }
 0x43d   :  { %2893 = vmatpush.bf16.msrb.mxu2 %v11205_v51 }
 0x43f   :  { %5538 = vmatmul.msk.f32.gmra.mxu3 %vm11208_vm10, %v5502_v53  ;;  %vm11231_vm10 = vmmov %vm11181_vm0 }
 0x440   :  { %2907 = vmatpush.bf16.msrb.mxu3 %v11207_v50 }
 0x441   :  { %2894 = vmatpush.bf16.msrb.mxu2 %v11209_v62 }
 0x444   :  { %2908 = vmatpush.bf16.msrb.mxu3 %v11210_v22  ;;  %5527 = vmatmul.msk.f32.gmra.mxu2 %vm11212_vm11, %v5503_v41  ;;  %vm11232_vm11 = vmmov %vm11181_vm0 }
 0x445   :  { %2895 = vmatpush.bf16.msrb.mxu2 %v11211_v37 }
 0x447   :  { %5539 = vmatmul.msk.f32.gmra.mxu3 %vm11214_vm12, %v5503_v41  ;;  %vm11233_vm12 = vmmov %vm11181_vm0 }
 0x448   :  { %2909 = vmatpush.bf16.msrb.mxu3 %v11213_v52 }
 0x449   :  { %2896 = vmatpush.bf16.msrb.mxu2 %v11215_v23 }
 0x44c   :  { %2910 = vmatpush.bf16.msrb.mxu3 %v11216_v5  ;;  %5528 = vmatmul.msk.f32.gmra.mxu2 %vm11217_vm6, %v5504_v21  ;;  %vm11234_vm6 = vmmov %vm11181_vm0 }
 0x44f   :  { %5540 = vmatmul.msk.f32.gmra.mxu3 %vm11218_vm3, %v5504_v21  ;;  %vm11235_vm3 = vmmov %vm11181_vm0 }
 0x454   :  { %5529 = vmatmul.msk.f32.gmra.mxu2 %vm11219_vm5, %v5505_v34  ;;  %vm11236_vm5 = vmmov %vm11181_vm0 }
 0x457   :  { %5541 = vmatmul.msk.f32.gmra.mxu3 %vm11181_vm0, %v5505_v34 }
 0x45c   :  { %5530 = vmatmul.msk.f32.gmra.mxu2 %vm11220_vm7, %v5506_v0  ;;  %vm11237_vm7 = vmmov %vm11181_vm0 }
 0x45f   :  { %5542 = vmatmul.msk.f32.gmra.mxu3 %vm11221_vm9, %v5506_v0 }
 0x464   :  { %5531 = vmatmul.msk.f32.gmra.mxu2 %vm11222_vm14, %v5507_v7 }
 0x467   :  { %5543 = vmatmul.msk.f32.gmra.mxu3 %vm11223_vm2, %v5507_v7 }
 0x483   :  { %v2050_v12 = vpop.f32.mrf.mxu2 }
 0x484   :  { %v2073_v6 = vadd.f32 %v2050_v12, %v1999_v56 }
 0x486   :  { %v2070_v43 = vpop.f32.mrf.mxu3  ;;  %v2080_v16 = vadd.f32 %v8621_v31, %v2073_v6  ;;  %v2165_v6 = vpop.permute.xlu2 %2164 }
 0x487   :  { %v2074_v1 = vadd.f32 %v2070_v43, %v2022_v13 }
 0x488   :  { %v2084_v25 = vadd.f32 %v2082_v26, %v2080_v16 }
 0x489   :  { %v2081_v47 = vadd.f32 %v8621_v31, %v2074_v1 }
 0x48a   :  { %v2818_v30 = vmul.f32 0.1, %v2084_v25 }
 0x48b   :  { %v2085_v59 = vadd.f32 %v2083_v17, %v2081_v47 }
 0x48c   :  { %v8632_v8 = vadd.f32 %v11154_v27, %v2818_v30 }
 0x48d   :  { %v2819_v10 = vmul.f32 0.1, %v2085_v59 }
 0x48e   :  { %5574 = vst [vmem:[%s10761_s13 + $0x20] sm:$0xff] %v8632_v8 }
 0x48f   :  { %v8639_v9 = vadd.f32 %v11155_v63, %v2819_v10  ;;  %v8641_v38 = vpop.f32.mrf.mxu2 }
 0x491   :  { %11226 = vst [vmem:[#allocation146_spill] sm:$0xff] %v8639_v9  ;;  %v3057_v27 = vadd.f32 %v8639_v9, %v8632_v8 }
 0x492   :  { %5575 = vst [vmem:[%s10761_s13 + $0x28] sm:$0xff] %v8639_v9  ;;  %v8649_v45 = vpop.f32.mrf.mxu3 }
 0x493   :  { %3058 = vadd.xlane.f32.xlu2 %v3057_v27 }
 0x497   :  { %v8651_v42 = vpop.f32.mrf.mxu2 }
 0x49a   :  { %v8653_v36 = vpop.f32.mrf.mxu3 }
 0x49f   :  { %v8655_v53 = vpop.f32.mrf.mxu2 }
 0x4a2   :  { %v8657_v63 = vpop.f32.mrf.mxu3 }
 0x4a7   :  { %v8659_v51 = vpop.f32.mrf.mxu2 }
 0x4aa   :  { %v8661_v50 = vpop.f32.mrf.mxu3 }
 0x4af   :  { %v8663_v62 = vpop.f32.mrf.mxu2 }
 0x4b2   :  { %v8665_v22 = vpop.f32.mrf.mxu3 }
 0x4b7   :  { %v8667_v41 = vpop.f32.mrf.mxu2 }
 0x4ba   :  { %v8669_v37 = vpop.f32.mrf.mxu3 }
 0x4bf   :  { %v2243_v52 = vpop.f32.mrf.mxu2 }
 0x4c2   :  { %v2296_v23 = vpop.f32.mrf.mxu3 }
 0x4c7   :  { %v2246_v5 = vpop.f32.mrf.mxu2 }
 0x4c8   :  { %v2247_v9 = vadd.f32 %v2246_v5, %v8585_v28 }
 0x4ca   :  { %v2299_v21 = vpop.f32.mrf.mxu3 }
 0x4cf   :  { %v2249_v34 = vpop.f32.mrf.mxu2 }
 0x4d0   :  { %v2250_v59 = vadd.f32 %v2249_v34, %v8580_v4  ;;  %v2316_v34 = vmax.f32 %v2247_v9, 0.0  ;;  %v5547_v9 = vld [vmem:[%s10759_s4 + $0x78] sm:$0xff] }
 0x4d2   :  { %v2302_v0 = vpop.f32.mrf.mxu3 }
 0x4d7   :  { %v2252_v7 = vpop.f32.mrf.mxu2 }
 0x4d8   :  { %v2253_v17 = vadd.f32 %v2252_v7, %v8573_v15  ;;  %v2145_v7 = vpop.permute.xlu2 %2144 }
 0x4da   :  { %v2305_v56 = vpop.f32.mrf.mxu3  ;;  %v2320_v44 = vmax.f32 %v2253_v17, 0.0 }
 0x4db   :  { %v2306_v10 = vadd.f32 %v2305_v56, %v8573_v15  ;;  %v2297_v15 = vadd.f32 %v2296_v23, %v2145_v7  ;;  %v5549_v23 = vld [vmem:[%s10759_s4 + $0x88] sm:$0xff] }
 0x4df   :  { %v2255_v12 = vpop.f32.mrf.mxu2 }
 0x4e0   :  { %v2256_v43 = vadd.f32 %v2255_v12, %v2165_v6  ;;  %v2303_v12 = vadd.f32 %v2302_v0, %v8580_v4  ;;  %v2315_v4 = vmax.f32 %v2297_v15, 0.0 }
 0x4e2   :  { %v2308_v13 = vpop.f32.mrf.mxu3  ;;  %v2322_v27 = vmax.f32 %v2256_v43, 0.0  ;;  %v2319_v56 = vmax.f32 %v2303_v12, 0.0 }
 0x4e3   :  { %v2309_v25 = vadd.f32 %v2308_v13, %v2165_v6  ;;  %v2244_v13 = vadd.f32 %v2243_v52, %v2145_v7  ;;  %v2300_v6 = vadd.f32 %v2299_v21, %v8585_v28  ;;  %v5546_v28 = vld [vmem:[%s10759_s4 + $0x70] sm:$0xff]  ;;  %v5548_v52 = vld [vmem:[%s10759_s4 + $0x80] sm:$0xff]  ;;  %v2130_v21 = vpop.permute.xlu2 %2129 }
 0x4e5   :  { %v2314_v5 = vmax.f32 %v2244_v13, 0.0  ;;  %v2317_v43 = vmax.f32 %v2300_v6, 0.0  ;;  %v2282_v13 = vadd.f32 %v8653_v36, %v8607_v24 }
 0x4e7   :  { %v2258_v26 = vpop.f32.mrf.mxu2 }
 0x4e8   :  { %v2259_v16 = vadd.f32 %v2258_v26, %v8568_v20  ;;  %v2323_v26 = vmax.f32 %v2309_v25, 0.0 }
 0x4ea   :  { %v2311_v1 = vpop.f32.mrf.mxu3  ;;  %v2324_v47 = vmax.f32 %v2259_v16, 0.0  ;;  %v2321_v16 = vmax.f32 %v2306_v10, 0.0 }
 0x4eb   :  { %v2312_v30 = vadd.f32 %v2311_v1, %v8568_v20  ;;  %v2318_v20 = vmax.f32 %v2250_v59, 0.0  ;;  %v8709_v0 = vpop.permute.xlu2 %2462 }
 0x4ec   :  { %2361 = vmatpush.msrb.mxu0 %v2324_v47 }
 0x4ed   :  { %v2325_v11 = vmax.f32 %v2312_v30, 0.0 }
 0x4ee   :  { %2362 = vmatpush.msrb.mxu0 %v2322_v27 }
 0x4ef   :  { %2396 = vmatpush.msrb.mxu1 %v2325_v11  ;;  %v5544_v11 = vld [vmem:[%s10759_s4 + $0x60] sm:$0xff] }
 0x4f0   :  { %2363 = vmatpush.msrb.mxu0 %v2320_v44  ;;  %v5545_v44 = vld [vmem:[%s10759_s4 + $0x68] sm:$0xff] }
 0x4f1   :  { %2397 = vmatpush.msrb.mxu1 %v2323_v26  ;;  %v2229_v26 = vadd.f32 %v8651_v42, %v8607_v24 }
 0x4f2   :  { %2364 = vmatpush.msrb.mxu0 %v2318_v20 }
 0x4f3   :  { %2398 = vmatpush.msrb.mxu1 %v2321_v16  ;;  %v2115_v25 = vpop.permute.xlu2 %2114  ;;  %v2232_v16 = vadd.f32 %v8655_v53, %v8605_v18 }
 0x4f4   :  { %2365 = vmatpush.msrb.mxu0 %v2316_v34  ;;  %v2226_v47 = vadd.f32 %v8641_v38, %v2115_v25  ;;  %v2279_v59 = vadd.f32 %v8649_v45, %v2115_v25  ;;  %v2285_v45 = vadd.f32 %v8657_v63, %v8605_v18 }
 0x4f5   :  { %2399 = vmatpush.msrb.mxu1 %v2319_v56 }
 0x4f6   :  { %2366 = vmatpush.msrb.mxu0 %v2314_v5 }
 0x4f7   :  { %2400 = vmatpush.msrb.mxu1 %v2317_v43  ;;  %5550 = vmatmul.msk.f32.vlgmr.msrb.gmra.mxu0 %vm11227_vm8, %v5544_v11 }
 0x4f9   :  { %2401 = vmatpush.msrb.mxu1 %v2315_v4 }
 0x4fa   :  { %5556 = vmatmul.msk.f32.vlgmr.msrb.gmra.mxu1 %vm11228_vm4, %v5544_v11 }
 0x4fb   :  { %v2443_v7 = vpop.permute.xlu2 %2442 }
 0x4ff   :  { %5551 = vmatmul.msk.f32.gmra.mxu0 %vm11229_vm13, %v5545_v44 }
 0x502   :  { %5557 = vmatmul.msk.f32.gmra.mxu1 %vm11230_vm1, %v5545_v44 }
 0x507   :  { %5552 = vmatmul.msk.f32.gmra.mxu0 %vm11231_vm10, %v5546_v28 }
 0x50a   :  { %5558 = vmatmul.msk.f32.gmra.mxu1 %vm11232_vm11, %v5546_v28 }
 0x50f   :  { %5553 = vmatmul.msk.f32.gmra.mxu0 %vm11233_vm12, %v5547_v9 }
 0x512   :  { %5559 = vmatmul.msk.f32.gmra.mxu1 %vm11234_vm6, %v5547_v9  ;;  %v2235_v9 = vadd.f32 %v8659_v51, %v2130_v21 }
 0x517   :  { %5554 = vmatmul.msk.f32.gmra.mxu0 %vm11235_vm3, %v5548_v52 }
 0x51a   :  { %5560 = vmatmul.msk.f32.gmra.mxu1 %vm11236_vm5, %v5548_v52 }
 0x51f   :  { %5555 = vmatmul.msk.f32.gmra.mxu0 %vm11181_vm0, %v5549_v23 }
 0x522   :  { %5561 = vmatmul.msk.f32.gmra.mxu1 %vm11237_vm7, %v5549_v23 }
 0x574   :  { %v2368_v1 = vpop.f32.mrf.mxu0 }
 0x575   :  { %v2421_v10 = vadd.f32 %v2368_v1, %v2226_v47  ;;  %v2288_v1 = vadd.f32 %v8661_v50, %v2130_v21 }
 0x577   :  { %v2403_v17 = vpop.f32.mrf.mxu1  ;;  %v2470_v6 = vadd.f32 %v2443_v7, %v2421_v10 }
 0x578   :  { %v2422_v12 = vadd.f32 %v2403_v17, %v2279_v59 }
 0x579   :  { %v2482_v5 = vsub.f32 0.0, %v2470_v6 }
 0x57a   :  { %v2471_v15 = vadd.f32 %v2443_v7, %v2422_v12 }
 0x57b   :  { %v2494_v44 = vmul.f32 1.442695, %v2482_v5 }
 0x57c   :  { %v2371_v30 = vpop.f32.mrf.mxu0  ;;  %v2483_v11 = vsub.f32 0.0, %v2471_v15 }
 0x57d   :  { %v2423_v20 = vadd.f32 %v2371_v30, %v2229_v26  ;;  %5955 = vpow2.f32 %v2494_v44  ;;  %v2238_v26 = vadd.f32 %v8663_v62, %v8595_v55 }
 0x57e   :  { %v2496_v52 = vmul.f32 1.442695, %v2483_v11 }
 0x57f   :  { %v2406_v27 = vpop.f32.mrf.mxu1  ;;  %v2472_v43 = vadd.f32 %v8613_v46, %v2423_v20  ;;  %v2291_v20 = vadd.f32 %v8665_v22, %v8595_v55  ;;  %v2241_v22 = vadd.f32 %v8667_v41, %v8589_v35 }
 0x580   :  { %v2424_v38 = vadd.f32 %v2406_v27, %v2282_v13  ;;  %5957 = vpow2.f32 %v2496_v52 }
 0x581   :  { %v2484_v28 = vsub.f32 0.0, %v2472_v43 }
 0x582   :  { %v2473_v4 = vadd.f32 %v8613_v46, %v2424_v38 }
 0x583   :  { %v2498_v25 = vmul.f32 1.442695, %v2484_v28  ;;  %v5956_v7 = vpop.eup %5955 }
 0x584   :  { %v2374_v34 = vpop.f32.mrf.mxu0  ;;  %v2485_v23 = vsub.f32 0.0, %v2473_v4  ;;  %v8733_v38 = vadd.f32 1.0, %v5956_v7 }
 0x585   :  { %v2425_v56 = vadd.f32 %v2374_v34, %v2232_v16  ;;  %5959 = vpow2.f32 %v2498_v25 }
 0x586   :  { %v2500_v30 = vmul.f32 1.442695, %v2485_v23  ;;  %v5958_v6 = vpop.eup %5957 }
 0x587   :  { %v2409_v42 = vpop.f32.mrf.mxu1  ;;  %v2474_v36 = vadd.f32 %v8611_v58, %v2425_v56  ;;  %v8736_v56 = vadd.f32 1.0, %v5958_v6  ;;  %v2539_v6 = vand.u32 2147483647, %v8733_v38 }
 0x588   :  { %v2426_v24 = vadd.f32 %v2409_v42, %v2285_v45  ;;  %5961 = vpow2.f32 %v2500_v30 }
 0x589   :  { %v2486_v18 = vsub.f32 0.0, %v2474_v36 }
 0x58a   :  { %v2475_v53 = vadd.f32 %v8611_v58, %v2426_v24 }
 0x58b   :  { %v2502_v27 = vmul.f32 1.442695, %v2486_v18  ;;  %v5960_v45 = vpop.eup %5959 }
 0x58c   :  { %v2377_v63 = vpop.f32.mrf.mxu0  ;;  %v2487_v47 = vsub.f32 0.0, %v2475_v53  ;;  %v8743_v44 = vadd.f32 1.0, %v5960_v45 }
 0x58d   :  { %v2427_v17 = vadd.f32 %v2377_v63, %v2235_v9  ;;  %5963 = vpow2.f32 %v2502_v27 }
 0x58e   :  { %v2504_v12 = vmul.f32 1.442695, %v2487_v47  ;;  %v5962_v5 = vpop.eup %5961 }
 0x58f   :  { %v2412_v46 = vpop.f32.mrf.mxu1  ;;  %v2476_v59 = vadd.f32 %v8609_v60, %v2427_v17  ;;  %v8749_v41 = vadd.f32 1.0, %v5962_v5 }
 0x590   :  { %v2428_v10 = vadd.f32 %v2412_v46, %v2288_v1 }
 0x591   :  { %v2488_v58 = vsub.f32 0.0, %v2476_v59 }
 0x592   :  { %v2477_v51 = vadd.f32 %v8609_v60, %v2428_v10 }
 0x593   :  { %v2506_v50 = vmul.f32 1.442695, %v2488_v58  ;;  %v5964_v11 = vpop.eup %5963 }
 0x594   :  { %v2489_v21 = vsub.f32 0.0, %v2477_v51  ;;  %v2380_v13 = vpop.f32.mrf.mxu0  ;;  %v8754_v1 = vadd.f32 1.0, %v5964_v11 }
 0x595   :  { %5965 = vpow2.f32 %v2506_v50  ;;  %v2429_v15 = vadd.f32 %v2380_v13, %v2238_v26 }
 0x596   :  { %v2508_v16 = vmul.f32 1.442695, %v2489_v21  ;;  %5967 = vpow2.f32 %v2504_v12 }
 0x597   :  { %v2415_v60 = vpop.f32.mrf.mxu1  ;;  %v2478_v62 = vadd.f32 %v8709_v0, %v2429_v15 }
 0x598   :  { %5969 = vpow2.f32 %v2508_v16  ;;  %v2430_v34 = vadd.f32 %v2415_v60, %v2291_v20 }
 0x599   :  { %v2490_v43 = vsub.f32 0.0, %v2478_v62  ;;  %5971 = vrcp.f32 %v8733_v38 }
 0x59a   :  { %v2479_v42 = vadd.f32 %v8709_v0, %v2430_v34  ;;  %5973 = vrcp.f32 %v8736_v56  ;;  %v2294_v0 = vadd.f32 %v8669_v37, %v8589_v35 }
 0x59b   :  { %v5966_v55 = vpop.eup %5965  ;;  %v2510_v4 = vmul.f32 1.442695, %v2490_v43  ;;  %v2569_v43 = vand.u32 2147483647, %v8743_v44 }
 0x59c   :  { %v2491_v24 = vsub.f32 0.0, %v2479_v42  ;;  %v5968_v36 = vpop.eup %5967  ;;  %v8745_v28 = vadd.f32 1.0, %v5966_v55  ;;  %v2383_v53 = vpop.f32.mrf.mxu0 }
 0x59d   :  { %5975 = vpow2.f32 %v2510_v4  ;;  %v2431_v23 = vadd.f32 %v2383_v53, %v2241_v22  ;;  %v8758_v47 = vadd.f32 1.0, %v5968_v36  ;;  %v2571_v4 = vand.u32 2147483648, %v8743_v44 }
 0x59e   :  { %v5970_v9 = vpop.eup %5969  ;;  %v2512_v52 = vmul.f32 1.442695, %v2491_v24  ;;  %5977 = vrcp.f32 %v8745_v28  ;;  %vm2625_vm9 = vweird.f32 %v8745_v28 }
 0x59f   :  { %v8752_v18 = vadd.f32 1.0, %v5970_v9  ;;  %v2418_v63 = vpop.f32.mrf.mxu1  ;;  %v2480_v17 = vadd.f32 %v8601_v57, %v2431_v23  ;;  %v8760_v35 = vpop.eup %5971  ;;  %v2629_v9 = vand.u32 2147483647, %v8745_v28 }
 0x5a0   :  { %5979 = vpow2.f32 %v2512_v52  ;;  %v2432_v25 = vadd.f32 %v2418_v63, %v2294_v0  ;;  %v8764_v30 = vpop.eup %5973  ;;  %v8789_v15 = vmul.f32 %v8760_v35, %v8733_v38  ;;  %v2631_v0 = vand.u32 2147483648, %v8745_v28 }
 0x5a1   :  { %5981 = vrcp.f32 %v8743_v44  ;;  %v2492_v37 = vsub.f32 0.0, %v2480_v17  ;;  %v8800_v42 = vmul.f32 %v8764_v30, %v8736_v56  ;;  %vm2640_vm8 = vweird.f32 %v8752_v18 }
 0x5a2   :  { %5983 = vrcp.f32 %v8752_v18  ;;  %v2481_v46 = vadd.f32 %v8601_v57, %v2432_v25  ;;  %vm8846_vm10 = vcmp.eq.f32.partialorder %v2629_v9, 8.507059e+37  ;;  %v2646_v60 = vand.u32 2147483648, %v8752_v18 }
 0x5a3   :  { %5985 = vrcp.f32 %v8749_v41  ;;  %v5976_v59 = vpop.eup %5975  ;;  %v2514_v10 = vmul.f32 1.442695, %v2492_v37 }
 0x5a4   :  { %5987 = vrcp.f32 %v8754_v1  ;;  %v2493_v27 = vsub.f32 0.0, %v2481_v46  ;;  %v8768_v58 = vpop.eup %5977  ;;  %v8771_v51 = vadd.f32 1.0, %v5976_v59 }
 0x5a5   :  { %5989 = vrcp.f32 %v8758_v47  ;;  %v2621_v57 = vmul.f32 %v8768_v58, %v8745_v28  ;;  %vm2626_vm2 = vweird.f32 %v8768_v58 }
 0x5a6   :  { %v5980_v12 = vpop.eup %5979  ;;  %5991 = vpow2.f32 %v2514_v10  ;;  %v2516_v26 = vmul.f32 1.442695, %v2493_v27  ;;  %v2661_v45 = vand.u32 2147483648, %v8771_v51  ;;  %v2659_v53 = vand.u32 2147483647, %v8771_v51  ;;  %vm8842_vm1 = vmor %vm2625_vm9, %vm2626_vm2 }
 0x5a7   :  { %v8775_v50 = vpop.eup %5981  ;;  %5993 = vrcp.f32 %v8771_v51  ;;  %v8778_v21 = vadd.f32 1.0, %v5980_v12  ;;  %v2622_v13 = vsub.f32 1.0, %v2621_v57  ;;  %vm2655_vm14 = vweird.f32 %v8771_v51 }
 0x5a8   :  { %v8780_v7 = vpop.eup %5983  ;;  %5995 = vpow2.f32 %v2516_v26  ;;  %v2662_v37 = vor.u32 1.1754944e-38, %v2661_v45  ;;  %vm8831_vm4 = vcmp.eq.f32.partialorder %v2659_v53, 8.507059e+37  ;;  %v2644_v53 = vand.u32 2147483647, %v8752_v18 }
 0x5a9   :  { %v8784_v16 = vpop.eup %5985  ;;  %5997 = vrcp.f32 %v8778_v21  ;;  %v2623_v5 = vmul.f32 %v8768_v58, %v2622_v13  ;;  %v2676_v55 = vand.u32 2147483648, %v8778_v21  ;;  %v2636_v22 = vmul.f32 %v8780_v7, %v8752_v18 }
 0x5aa   :  { %v8793_v34 = vpop.eup %5987  ;;  %v2674_v46 = vand.u32 2147483647, %v8778_v21  ;;  %vm2670_vm13 = vweird.f32 %v8778_v21  ;;  %vm2641_vm12 = vweird.f32 %v8780_v7  ;;  %vm8901_vm2 = vcmp.eq.f32.partialorder %v2644_v53, 8.507059e+37 }
 0x5ab   :  { %v8802_v11 = vpop.eup %5989  ;;  %v2624_v63 = vadd.f32 %v8768_v58, %v2623_v5  ;;  %v8829_v27 = vor.u32 1.1754944e-38, %v2676_v55  ;;  %v2637_v12 = vsub.f32 1.0, %v2636_v22  ;;  %v2632_v55 = vor.u32 1.1754944e-38, %v2631_v0 }
 0x5ac   :  { %v5992_v36 = vpop.eup %5991  ;;  %vm8867_vm3 = vcmp.eq.f32.partialorder %v2674_v46, 8.507059e+37  ;;  %v2591_v46 = vmul.f32 %v8793_v34, %v8754_v1  ;;  %v2647_v53 = vor.u32 1.1754944e-38, %v2646_v60  ;;  %v2601_v57 = vand.u32 2147483648, %v8754_v1 }
 0x5ad   :  { %v8813_v52 = vpop.eup %5993  ;;  %v8815_v23 = vadd.f32 1.0, %v5992_v36  ;;  %v2628_v36 = vsel %vm8842_vm1, %v8768_v58, %v2624_v63  ;;  %v2638_v0 = vmul.f32 %v8780_v7, %v2637_v12 }
 0x5ae   :  { %v5996_v17 = vpop.eup %5995  ;;  %v2651_v25 = vmul.f32 %v8813_v52, %v8771_v51  ;;  %vm2656_vm11 = vweird.f32 %v8813_v52 }
 0x5af   :  { %v8824_v59 = vpop.eup %5997  ;;  %5999 = vrcp.f32 %v8815_v23  ;;  %v8827_v10 = vadd.f32 1.0, %v5996_v17  ;;  %v2691_v22 = vand.u32 2147483648, %v8815_v23  ;;  %v2689_v28 = vand.u32 2147483647, %v8815_v23  ;;  %vm8875_vm5 = vmor %vm2655_vm14, %vm2656_vm11 }
 0x5b0   :  { %v2652_v26 = vsub.f32 1.0, %v2651_v25  ;;  %v2666_v13 = vmul.f32 %v8824_v59, %v8778_v21  ;;  %vm2685_vm6 = vweird.f32 %v8815_v23  ;;  %vm2671_vm0 = vweird.f32 %v8824_v59  ;;  %vm8897_vm14 = vmor %vm2640_vm8, %vm2641_vm12 }
 0x5b1   :  { %6001 = vrcp.f32 %v8827_v10  ;;  %v2706_v25 = vand.u32 2147483648, %v8827_v10  ;;  %v2704_v58 = vand.u32 2147483647, %v8827_v10  ;;  %v2692_v24 = vor.u32 1.1754944e-38, %v2691_v22 }
 0x5b2   :  { %v2653_v17 = vmul.f32 %v8813_v52, %v2652_v26  ;;  %v2667_v9 = vsub.f32 1.0, %v2666_v13  ;;  %v2633_v13 = vsel %vm8846_vm10, %v2632_v55, %v2628_v36  ;;  %vm8884_vm7 = vcmp.eq.f32.partialorder %v2689_v28, 8.507059e+37  ;;  %vm8922_vm10 = vmor %vm2670_vm13, %vm2671_vm0 }
 0x5b3   :  { %vm2700_vm9 = vweird.f32 %v8827_v10  ;;  %v8906_v20 = vmul.f32 %v2633_v13, %v8469_v49  ;;  %vm8912_vm1 = vcmp.eq.f32.partialorder %v2704_v58, 8.507059e+37  ;;  %vm2596_vm11 = vweird.f32 %v8793_v34 }
 0x5b4   :  { %v2654_v63 = vadd.f32 %v8813_v52, %v2653_v17  ;;  %v2668_v45 = vmul.f32 %v8824_v59, %v2667_v9  ;;  %v2639_v17 = vadd.f32 %v8780_v7, %v2638_v0  ;;  %v2707_v0 = vor.u32 1.1754944e-38, %v2706_v25 }
 0x5b5   :  { %v6000_v12 = vpop.eup %5999  ;;  %v2599_v58 = vand.u32 2147483647, %v8754_v1  ;;  %vm2595_vm13 = vweird.f32 %v8754_v1  ;;  %v2614_v26 = vand.u32 2147483647, %v8758_v47 }
 0x5b6   :  { %v2681_v9 = vmul.f32 %v6000_v12, %v8815_v23  ;;  %v2658_v51 = vsel %vm8875_vm5, %v8813_v52, %v2654_v63  ;;  %v2669_v55 = vadd.f32 %v8824_v59, %v2668_v45  ;;  %v2643_v62 = vsel %vm8897_vm14, %v8780_v7, %v2639_v17  ;;  %vm8938_vm12 = vmor %vm2595_vm13, %vm2596_vm11 }
 0x5b7   :  { %v6002_v28 = vpop.eup %6001  ;;  %v2592_v52 = vsub.f32 1.0, %v2591_v46  ;;  %vm2686_vm8 = vweird.f32 %v6000_v12  ;;  %v2663_v25 = vsel %vm8831_vm4, %v2662_v37, %v2658_v51  ;;  %v2648_v37 = vsel %vm8901_vm2, %v2647_v53, %v2643_v62 }
 0x5b8   :  { %v2696_v18 = vmul.f32 %v6002_v28, %v8827_v10  ;;  %v2682_v63 = vsub.f32 1.0, %v2681_v9  ;;  %v2673_v60 = vsel %vm8922_vm10, %v8824_v59, %v2669_v55  ;;  %vm2701_vm4 = vweird.f32 %v6002_v28  ;;  %vm2687_vm5 = vmor %vm2685_vm6, %vm2686_vm8 }
 0x5b9   :  { %v2593_v7 = vmul.f32 %v8793_v34, %v2592_v52  ;;  %v2718_v22 = vmul.f32 %v2663_v25, %v8456_v19  ;;  %v2606_v59 = vmul.f32 %v8802_v11, %v8758_v47  ;;  %v2678_v55 = vsel %vm8867_vm3, %v8829_v27, %v2673_v60  ;;  %vm2702_vm3 = vmor %vm2700_vm9, %vm2701_vm4 }
 0x5ba   :  { %v2683_v17 = vmul.f32 %v6000_v12, %v2682_v63  ;;  %v2697_v46 = vsub.f32 1.0, %v2696_v18  ;;  %v2717_v1 = vmul.f32 %v2648_v37, %v8480_v29  ;;  %vm8954_vm0 = vcmp.eq.f32.partialorder %v2599_v58, 8.507059e+37 }
 0x5bb   :  { %v2594_v21 = vadd.f32 %v8793_v34, %v2593_v7  ;;  %vm2565_vm14 = vweird.f32 %v8743_v44  ;;  %vm2536_vm2 = vweird.f32 %v8760_v35  ;;  %v2607_v18 = vsub.f32 1.0, %v2606_v59 }
 0x5bc   :  { %v2684_v9 = vadd.f32 %v6000_v12, %v2683_v17  ;;  %v2698_v51 = vmul.f32 %v6002_v28, %v2697_v46  ;;  %vm2551_vm6 = vweird.f32 %v8764_v30  ;;  %v2616_v63 = vand.u32 2147483648, %v8758_v47 }
 0x5bd   :  { %v2598_v19 = vsel %vm8938_vm12, %v8793_v34, %v2594_v21  ;;  %v2602_v34 = vor.u32 1.1754944e-38, %v2601_v57  ;;  %v2561_v53 = vmul.f32 %v8775_v50, %v8743_v44  ;;  %vm2535_vm8 = vweird.f32 %v8733_v38 }
 0x5be   :  { %v2688_v23 = vsel %vm2687_vm5, %v6000_v12, %v2684_v9  ;;  %v2699_v62 = vadd.f32 %v6002_v28, %v2698_v51  ;;  %v2608_v13 = vmul.f32 %v8802_v11, %v2607_v18  ;;  %vm2611_vm10 = vweird.f32 %v8802_v11 }
 0x5bf   :  { %v2693_v27 = vsel %vm8884_vm7, %v2692_v24, %v2688_v23  ;;  %vm2550_vm7 = vweird.f32 %v8736_v56  ;;  %v2719_v10 = vmul.f32 %v2678_v55, %v8467_v2  ;;  %v2603_v5 = vsel %vm8954_vm0, %v2602_v34, %v2598_v19  ;;  %vm9011_vm0 = vmor %vm2535_vm8, %vm2536_vm2 }
 0x5c0   :  { %v2720_v12 = vmul.f32 %v2693_v27, %v8443_v39  ;;  %v2703_v25 = vsel %vm2702_vm3, %v6002_v28, %v2699_v62  ;;  %v2562_v7 = vsub.f32 1.0, %v2561_v53  ;;  %v2609_v39 = vadd.f32 %v8802_v11, %v2608_v13  ;;  %vm2552_vm2 = vmor %vm2550_vm7, %vm2551_vm6  ;;  %v11275_v13 = vld [vmem:[#allocation5_spill] sm:$0xff] }
 0x5c1   :  { %v2708_v24 = vsel %vm8912_vm1, %v2707_v0, %v2703_v25  ;;  %vm2610_vm9 = vweird.f32 %v8758_v47  ;;  %vm2615_vm11 = vcmp.eq.f32.partialorder %v2614_v26, 8.507059e+37  ;;  %v2617_v28 = vor.u32 1.1754944e-38, %v2616_v63  ;;  %v11274_v25 = vld [vmem:[#allocation4_spill] sm:$0xff] }
 0x5c2   :  { %2732 = vmatpush.msra.mxu0 %v2720_v12  ;;  %v2721_v58 = vmul.f32 %v2708_v24, %v8454_v32  ;;  %vm2612_vm4 = vmor %vm2610_vm9, %vm2611_vm10  ;;  %v2563_v17 = vmul.f32 %v8775_v50, %v2562_v7  ;;  %vm2566_vm1 = vweird.f32 %v8775_v50  ;;  %v2576_v2 = vmul.f32 %v8784_v16, %v8749_v41  ;;  %v6125_v12 = vld [vmem:[%s10762_s8] sm:$0xff]  ;;  %v11276_v24 = vld [vmem:[#allocation8_spill] sm:$0xff] }
 0x5c3   :  { %v2714_v0 = vmul.f32 %v2603_v5, %v8482_v40  ;;  %v2613_v32 = vsel %vm2612_vm4, %v8802_v11, %v2609_v39  ;;  %v2532_v45 = vsub.f32 1.0, %v8789_v15  ;;  %v2547_v47 = vsub.f32 1.0, %v8800_v42  ;;  %vm2567_vm12 = vmor %vm2565_vm14, %vm2566_vm1  ;;  %v11278_v5 = vld [vmem:[#allocation12_spill] sm:$0xff]  ;;  %v11279_v7 = vld [vmem:[#allocation13_spill] sm:$0xff] }
 0x5c4   :  { %2755 = vmatpush.msra.mxu1 %v2721_v58  ;;  %2733 = vmatpush.msra.mxu0 %v2718_v22  ;;  %v2618_v46 = vsel %vm2615_vm11, %v2617_v28, %v2613_v32  ;;  %v2564_v60 = vadd.f32 %v8775_v50, %v2563_v17  ;;  %vm2570_vm13 = vcmp.eq.f32.partialorder %v2569_v43, 8.507059e+37  ;;  %v2577_v37 = vsub.f32 1.0, %v2576_v2  ;;  %v11280_v58 = vld [vmem:[#allocation16_spill] sm:$0xff]  ;;  %v11281_v39 = vld [vmem:[#allocation17_spill] sm:$0xff] }
 0x5c5   :  { %v2572_v40 = vor.u32 1.1754944e-38, %v2571_v4  ;;  %v2586_v15 = vand.u32 2147483648, %v8749_v41  ;;  %v2533_v42 = vmul.f32 %v8760_v35, %v2532_v45  ;;  %v2548_v11 = vmul.f32 %v8764_v30, %v2547_v47  ;;  %v11282_v28 = vld [vmem:[#allocation20_spill] sm:$0xff]  ;;  %v11283_v17 = vld [vmem:[#allocation21_spill] sm:$0xff] }
 0x5c6   :  { %2756 = vmatpush.msra.mxu1 %v2719_v10  ;;  %2734 = vmatpush.msra.mxu0 %v8906_v20  ;;  %v2715_v21 = vmul.f32 %v2618_v46, %v8488_v14  ;;  %v2568_v43 = vsel %vm2567_vm12, %v8775_v50, %v2564_v60  ;;  %v2578_v57 = vmul.f32 %v8784_v16, %v2577_v37  ;;  %vm2581_vm5 = vweird.f32 %v8784_v16  ;;  %v11277_v10 = vld [vmem:[#allocation9_spill] sm:$0xff]  ;;  %v11284_v2 = vld [vmem:[#allocation24_spill] sm:$0xff] }
 0x5c7   :  { %v2573_v20 = vsel %vm2570_vm13, %v2572_v40, %v2568_v43  ;;  %v2534_v44 = vadd.f32 %v8760_v35, %v2533_v42  ;;  %vm9017_vm14 = vcmp.eq.f32.partialorder %v2539_v6, 8.507059e+37  ;;  %v2549_v50 = vadd.f32 %v8764_v30, %v2548_v11  ;;  %v11286_v32 = vld [vmem:[#allocation28_spill] sm:$0xff]  ;;  %v11287_v45 = vld [vmem:[#allocation29_spill] sm:$0xff] }
 0x5c8   :  { %2757 = vmatpush.msra.mxu1 %v2717_v1  ;;  %2735 = vmatpush.msra.mxu0 %v2714_v0  ;;  %v2712_v9 = vmul.f32 %v2573_v20, %v8490_v61  ;;  %v2579_v51 = vadd.f32 %v8784_v16, %v2578_v57  ;;  %vm2580_vm3 = vweird.f32 %v8749_v41  ;;  %v11266_v22 = vand.u32 2147483648, %v8733_v38  ;;  %v11285_v0 = vld [vmem:[#allocation25_spill] sm:$0xff]  ;;  %v11288_v47 = vld [vmem:[#allocation32_spill] sm:$0xff] }
 0x5c9   :  { %vm2582_vm8 = vmor %vm2580_vm3, %vm2581_vm5  ;;  %v2587_v6 = vor.u32 1.1754944e-38, %v2586_v15  ;;  %v2538_v59 = vsel %vm9011_vm0, %v8760_v35, %v2534_v44  ;;  %v2553_v61 = vsel %vm2552_vm2, %v8764_v30, %v2549_v50  ;;  %v11267_v55 = vand.u32 2147483648, %v8736_v56  ;;  %v11289_v46 = vld [vmem:[#allocation36_spill] sm:$0xff]  ;;  %v11290_v60 = vld [vmem:[#allocation33_spill] sm:$0xff] }
 0x5ca   :  { %v2542_v52 = vor.u32 1.1754944e-38, %v11266_v22  ;;  %2758 = vmatpush.msra.mxu1 %v2715_v21  ;;  %2736 = vmatpush.msra.mxu0 %v2712_v9  ;;  %v2583_v38 = vsel %vm2582_vm8, %v8784_v16, %v2579_v51  ;;  %v11268_v19 = vand.u32 2147483647, %v8749_v41  ;;  %v11269_v23 = vand.u32 2147483647, %v8736_v56  ;;  %v6123_v41 = vld [vmem:[%s10760_s6] sm:$0xff] }
 0x5cb   :  { %v2557_v1 = vor.u32 1.1754944e-38, %v11267_v55  ;;  %vm11270_vm7 = vcmask 392192   ;;  %v11291_v37 = vld [vmem:[#allocation37_spill] sm:$0xff]  ;;  %v11292_v40 = vld [vmem:[#allocation40_spill] sm:$0xff] }
 0x5cc   :  { %vm2585_vm10 = vcmp.eq.f32.partialorder %v11268_v19, 8.507059e+37  ;;  %v2543_v36 = vsel %vm9017_vm14, %v2542_v52, %v2538_v59  ;;  %vm2555_vm6 = vcmp.eq.f32.partialorder %v11269_v23, 8.507059e+37  ;;  %vm11271_vm9 = vmmov %vm11270_vm7  ;;  %v11293_v15 = vld [vmem:[#allocation41_spill] sm:$0xff]  ;;  %v11294_v42 = vld [vmem:[#allocation44_spill] sm:$0xff] }
 0x5cd   :  { %v2588_v62 = vsel %vm2585_vm10, %v2587_v6, %v2583_v38  ;;  %v2710_v35 = vmul.f32 %v2543_v36, %v8469_v49  ;;  %v2558_v18 = vsel %vm2555_vm6, %v2557_v1, %v2553_v61  ;;  %v6124_v49 = vld [vmem:[%s10760_s6 + $0x8] sm:$0xff]  ;;  %vm11272_vm11 = vmmov %vm11270_vm7  ;;  %v11295_v11 = vld [vmem:[#allocation45_spill] sm:$0xff] }
 0x5ce   :  { %v2713_v30 = vmul.f32 %v2588_v62, %v8494_v48  ;;  %v2711_v26 = vmul.f32 %v2558_v18, %v8480_v29  ;;  %vm11273_vm4 = vmmov %vm11270_vm7  ;;  %v11296_v21 = vld [vmem:[#allocation48_spill] sm:$0xff]  ;;  %v11297_v43 = vld [vmem:[#allocation49_spill] sm:$0xff] }
 0x5cf   :  { %2737 = vmatpush.msra.mxu0 %v2710_v35  ;;  %v11298_v57 = vld [vmem:[#allocation52_spill] sm:$0xff]  ;;  %v11299_v20 = vld [vmem:[#allocation53_spill] sm:$0xff] }
 0x5d0   :  { %2759 = vmatpush.msra.mxu1 %v2713_v30  ;;  %5568 = vmatmul.msk.f32.vlgmr.msra.gmra.mxu0 %vm11270_vm7, %v6123_v41  ;;  %v11300_v44 = vld [vmem:[#allocation56_spill] sm:$0xff]  ;;  %v11301_v4 = vld [vmem:[#allocation57_spill] sm:$0xff] }
 0x5d1   :  { %v11302_v14 = vld [vmem:[#allocation60_spill] sm:$0xff]  ;;  %v11303_v50 = vld [vmem:[#allocation61_spill] sm:$0xff] }
 0x5d2   :  { %2760 = vmatpush.msra.mxu1 %v2711_v26  ;;  %v11304_v9 = vld [vmem:[#allocation64_spill] sm:$0xff]  ;;  %v11305_v51 = vld [vmem:[#allocation65_spill] sm:$0xff] }
 0x5d3   :  { %5570 = vmatmul.msk.f32.vlgmr.msra.gmra.mxu1 %vm11271_vm9, %v6123_v41  ;;  %v2814_v61 = vld [vmem:[%s10763_s12 + $0x10] sm:$0xff]  ;;  %v2815_v36 = vld [vmem:[%s10763_s12 + $0x18] sm:$0xff]  ;;  %v11306_v41 = vld [vmem:[#allocation134_spill] sm:$0xff] }
 0x5d8   :  { %5569 = vmatmul.msk.f32.gmra.mxu0 %vm11272_vm11, %v6124_v49 }
 0x5db   :  { %5571 = vmatmul.msk.f32.gmra.mxu1 %vm11273_vm4, %v6124_v49 }
 0x64d   :  { %v2739_v48 = vpop.f32.mrf.mxu0 }
 0x64e   :  { %v2740_v22 = vadd.f32 %v2739_v48, %v8615_v33 }
 0x650   :  { %v2762_v56 = vpop.f32.mrf.mxu1 }
 0x651   :  { %v2763_v59 = vadd.f32 %v2762_v56, %v8615_v33  ;;  %v11308_v56 = vld [vmem:[#allocation66_spill] sm:$0xff] }
 0x655   :  { %v2742_v29 = vpop.f32.mrf.mxu0 }
 0x656   :  { %v2743_v16 = vadd.f32 %v2742_v29, %v8418_v54  ;;  %v11310_v29 = vld [vmem:[#allocation67_spill] sm:$0xff] }
 0x658   :  { %v2768_v27 = vmax.f32 %v2743_v16, 0.0  ;;  %v2765_v34 = vpop.f32.mrf.mxu1  ;;  %v11311_v16 = vld [vmem:[#allocation69_spill] sm:$0xff] }
 0x659   :  { %v2766_v63 = vadd.f32 %v2765_v34, %v8418_v54  ;;  %v11313_v34 = vld [vmem:[#allocation72_spill] sm:$0xff] }
 0x65a   :  { %2785 = vmatpush.msrb.mxu0 %v2768_v27  ;;  %v11312_v27 = vld [vmem:[#allocation70_spill] sm:$0xff] }
 0x65b   :  { %v2769_v53 = vmax.f32 %v2766_v63, 0.0  ;;  %5572 = vmatmul.msk.f32.vlgmr.msrb.gmra.mxu0 %vm10937_vm15, %v6125_v12  ;;  %v11314_v63 = vld [vmem:[#allocation71_spill] sm:$0xff] }
 0x65c   :  { %2861 = vmatpush.bf16.msra.mxu0 %v11274_v25  ;;  %v11317_v25 = vld [vmem:[#allocation76_spill] sm:$0xff] }
 0x65d   :  { %2805 = vmatpush.msrb.mxu1 %v2769_v53  ;;  %v11315_v53 = vld [vmem:[#allocation73_spill] sm:$0xff] }
 0x65e   :  { %5573 = vmatmul.msk.f32.vlgmr.msrb.gmra.mxu1 %vm10937_vm15, %v6125_v12  ;;  %v11316_v12 = vld [vmem:[#allocation74_spill] sm:$0xff] }
 0x65f   :  { %2875 = vmatpush.bf16.msra.mxu1 %v11275_v13  ;;  %v11318_v13 = vld [vmem:[#allocation75_spill] sm:$0xff] }
 0x660   :  { %2862 = vmatpush.bf16.msra.mxu0 %v11276_v24  ;;  %v11319_v24 = vld [vmem:[#allocation77_spill] sm:$0xff] }
 0x663   :  { %2876 = vmatpush.bf16.msra.mxu1 %v11277_v10  ;;  %v11320_v10 = vld [vmem:[#allocation78_spill] sm:$0xff] }
 0x664   :  { %2863 = vmatpush.bf16.msra.mxu0 %v11278_v5  ;;  %v11321_v5 = vld [vmem:[#allocation80_spill] sm:$0xff] }
 0x667   :  { %2877 = vmatpush.bf16.msra.mxu1 %v11279_v7  ;;  %v11322_v7 = vld [vmem:[#allocation79_spill] sm:$0xff] }
 0x668   :  { %2864 = vmatpush.bf16.msra.mxu0 %v11280_v58  ;;  %v11323_v58 = vld [vmem:[#allocation81_spill] sm:$0xff] }
 0x66b   :  { %2878 = vmatpush.bf16.msra.mxu1 %v11281_v39  ;;  %v11324_v39 = vld [vmem:[#allocation82_spill] sm:$0xff] }
 0x66c   :  { %2865 = vmatpush.bf16.msra.mxu0 %v11282_v28  ;;  %v11325_v28 = vld [vmem:[#allocation84_spill] sm:$0xff] }
 0x66f   :  { %2879 = vmatpush.bf16.msra.mxu1 %v11283_v17  ;;  %v11326_v17 = vld [vmem:[#allocation83_spill] sm:$0xff] }
 0x670   :  { %2866 = vmatpush.bf16.msra.mxu0 %v11284_v2  ;;  %v11327_v2 = vld [vmem:[#allocation85_spill] sm:$0xff] }
 0x673   :  { %2880 = vmatpush.bf16.msra.mxu1 %v11285_v0  ;;  %v11328_v0 = vld [vmem:[#allocation86_spill] sm:$0xff] }
 0x674   :  { %2867 = vmatpush.bf16.msra.mxu0 %v11286_v32  ;;  %v11329_v32 = vld [vmem:[#allocation88_spill] sm:$0xff] }
 0x677   :  { %2881 = vmatpush.bf16.msra.mxu1 %v11287_v45  ;;  %v11330_v45 = vld [vmem:[#allocation87_spill] sm:$0xff] }
 0x678   :  { %2868 = vmatpush.bf16.msra.mxu0 %v11288_v47  ;;  %v11331_v47 = vld [vmem:[#allocation89_spill] sm:$0xff] }
 0x67b   :  { %2882 = vmatpush.bf16.msra.mxu1 %v11290_v60  ;;  %v11333_v60 = vld [vmem:[#allocation92_spill] sm:$0xff] }
 0x67c   :  { %2917 = vmatpush.bf16.msrb.mxu0 %v11289_v46  ;;  %v11332_v46 = vld [vmem:[#allocation90_spill] sm:$0xff] }
 0x67f   :  { %2931 = vmatpush.bf16.msrb.mxu1 %v11291_v37  ;;  %v11334_v37 = vld [vmem:[#allocation91_spill] sm:$0xff] }
 0x680   :  { %2918 = vmatpush.bf16.msrb.mxu0 %v11292_v40  ;;  %v11335_v40 = vld [vmem:[#allocation93_spill] sm:$0xff] }
 0x683   :  { %2932 = vmatpush.bf16.msrb.mxu1 %v11293_v15  ;;  %v11336_v15 = vld [vmem:[#allocation94_spill] sm:$0xff] }
 0x684   :  { %2919 = vmatpush.bf16.msrb.mxu0 %v11294_v42  ;;  %v11337_v42 = vld [vmem:[#allocation96_spill] sm:$0xff] }
 0x687   :  { %2933 = vmatpush.bf16.msrb.mxu1 %v11295_v11  ;;  %v11338_v11 = vld [vmem:[#allocation98_spill] sm:$0xff] }
 0x688   :  { %2920 = vmatpush.bf16.msrb.mxu0 %v11296_v21  ;;  %v11339_v21 = vld [vmem:[#allocation100_spill] sm:$0xff] }
 0x68b   :  { %2934 = vmatpush.bf16.msrb.mxu1 %v11297_v43  ;;  %v11340_v43 = vld [vmem:[#allocation95_spill] sm:$0xff] }
 0x68c   :  { %2921 = vmatpush.bf16.msrb.mxu0 %v11298_v57  ;;  %v11341_v57 = vld [vmem:[#allocation97_spill] sm:$0xff] }
 0x68f   :  { %2935 = vmatpush.bf16.msrb.mxu1 %v11299_v20  ;;  %v11342_v20 = vld [vmem:[#allocation99_spill] sm:$0xff] }
 0x690   :  { %2922 = vmatpush.bf16.msrb.mxu0 %v11300_v44  ;;  %v11343_v44 = vld [vmem:[#allocation101_spill] sm:$0xff] }
 0x693   :  { %2936 = vmatpush.bf16.msrb.mxu1 %v11301_v4  ;;  %v11344_v4 = vld [vmem:[#allocation102_spill] sm:$0xff] }
 0x694   :  { %2923 = vmatpush.bf16.msrb.mxu0 %v11302_v14  ;;  %v11345_v14 = vld [vmem:[#allocation104_spill] sm:$0xff] }
 0x697   :  { %2937 = vmatpush.bf16.msrb.mxu1 %v11303_v50  ;;  %v11346_v50 = vld [vmem:[#allocation103_spill] sm:$0xff] }
 0x698   :  { %2924 = vmatpush.bf16.msrb.mxu0 %v11304_v9  ;;  %v11347_v9 = vld [vmem:[#allocation105_spill] sm:$0xff] }
 0x69b   :  { %2938 = vmatpush.bf16.msrb.mxu1 %v11305_v51  ;;  %v11348_v51 = vld [vmem:[#allocation106_spill] sm:$0xff] }
 0x6d8   :  { %v2787_v52 = vpop.f32.mrf.mxu0 }
 0x6d9   :  { %v2810_v6 = vadd.f32 %v2787_v52, %v2740_v22  ;;  %v11349_v22 = vld [vmem:[#allocation108_spill] sm:$0xff]  ;;  %v11350_v52 = vld [vmem:[#allocation107_spill] sm:$0xff] }
 0x6db   :  { %v2812_v55 = vadd.f32 %v2810_v6, %v8621_v31  ;;  %v2807_v1 = vpop.f32.mrf.mxu1  ;;  %v11351_v6 = vld [vmem:[#allocation109_spill] sm:$0xff] }
 0x6dc   :  { %v2811_v38 = vadd.f32 %v2807_v1, %v2763_v59  ;;  %v11352_v59 = vld [vmem:[#allocation110_spill] sm:$0xff]  ;;  %v11355_v1 = vld [vmem:[#allocation113_spill] sm:$0xff] }
 0x6dd   :  { %v2816_v19 = vadd.f32 %v2814_v61, %v2812_v55  ;;  %v11353_v61 = vld [vmem:[#allocation112_spill] sm:$0xff]  ;;  %v11354_v55 = vld [vmem:[#allocation111_spill] sm:$0xff] }
 0x6de   :  { %v2813_v23 = vadd.f32 %v2811_v38, %v8621_v31  ;;  %v11356_v38 = vld [vmem:[#allocation114_spill] sm:$0xff] }
 0x6df   :  { %v2820_v62 = vmul.f32 0.1, %v2816_v19  ;;  %v11357_v19 = vld [vmem:[#allocation116_spill] sm:$0xff] }
 0x6e0   :  { %v2817_v35 = vadd.f32 %v2815_v36, %v2813_v23  ;;  %v11358_v36 = vld [vmem:[#allocation115_spill] sm:$0xff]  ;;  %v11359_v23 = vld [vmem:[#allocation117_spill] sm:$0xff] }
 0x6e1   :  { %v9107_v18 = vadd.f32 %v11156_v3, %v2820_v62  ;;  %v11307_v3 = vld [vmem:[#allocation146_spill] sm:$0xff] }
 0x6e2   :  { %v2821_v30 = vmul.f32 0.1, %v2817_v35  ;;  %v11360_v62 = vld [vmem:[#allocation118_spill] sm:$0xff]  ;;  %v11361_v35 = vld [vmem:[#allocation120_spill] sm:$0xff] }
 0x6e3   :  { %5576 = vst [vmem:[%s10761_s13 + $0x30] sm:$0xff] %v9107_v18  ;;  %v9115_v26 = vpack.c.bf16 %v9107_v18, %v8632_v8  ;;  %v11309_v8 = vld [vmem:[#allocation68_spill] sm:$0xff] }
 0x6e4   :  { %v9118_v49 = vadd.f32 %v11306_v41, %v2821_v30  ;;  %v11362_v30 = vld [vmem:[#allocation119_spill] sm:$0xff]  ;;  %v11363_v41 = vld [vmem:[#allocation121_spill] sm:$0xff] }
 0x6e5   :  { %2841 = vmatmul.bf16.vlgmr.msra.gmra.mxu2 %v9115_v26  ;;  %2869 = vmatmul.bf16.vlgmr.msra.gmra.mxu0 %v9115_v26 }
 0x6e6   :  { %5577 = vst [vmem:[%s10761_s13 + $0x38] sm:$0xff] %v9118_v49  ;;  %v9128_v48 = vpack.c.bf16 %v9118_v49, %v11307_v3  ;;  %2945 = vmatpush.bf16.msra.mxu2 %v11308_v56  ;;  %2973 = vmatpush.bf16.msra.mxu0 %v11309_v8  ;;  %v11364_v3 = vld [vmem:[#allocation122_spill] sm:$0xff]  ;;  %v11365_v56 = vld [vmem:[#allocation124_spill] sm:$0xff]  ;;  %v11366_v8 = vld [vmem:[#allocation123_spill] sm:$0xff] }
 0x6e8   :  { %2855 = vmatmul.bf16.vlgmr.msra.gmra.mxu3 %v9128_v48  ;;  %2883 = vmatmul.bf16.vlgmr.msra.gmra.mxu1 %v9128_v48 }
 0x6e9   :  { %2959 = vmatpush.bf16.msra.mxu3 %v11310_v29  ;;  %2987 = vmatpush.bf16.msra.mxu1 %v11311_v16  ;;  %v11367_v29 = vld [vmem:[#allocation125_spill] sm:$0xff]  ;;  %v11368_v16 = vld [vmem:[#allocation126_spill] sm:$0xff] }
 0x6ea   :  { %2946 = vmatpush.bf16.msra.mxu2 %v11312_v27  ;;  %2974 = vmatpush.bf16.msra.mxu0 %v11313_v34  ;;  %v11369_v27 = vld [vmem:[#allocation128_spill] sm:$0xff]  ;;  %v11370_v34 = vld [vmem:[#allocation127_spill] sm:$0xff] }
 0x6ed   :  { %2960 = vmatpush.bf16.msra.mxu3 %v11314_v63  ;;  %2988 = vmatpush.bf16.msra.mxu1 %v11315_v53  ;;  %v11371_v63 = vld [vmem:[#allocation129_spill] sm:$0xff] }
 0x6ee   :  { %2947 = vmatpush.bf16.msra.mxu2 %v11316_v12  ;;  %2975 = vmatpush.bf16.msra.mxu0 %v11317_v25 }
 0x6f1   :  { %2961 = vmatpush.bf16.msra.mxu3 %v11318_v13  ;;  %2989 = vmatpush.bf16.msra.mxu1 %v11319_v24 }
 0x6f2   :  { %2948 = vmatpush.bf16.msra.mxu2 %v11320_v10  ;;  %2976 = vmatpush.bf16.msra.mxu0 %v11321_v5 }
 0x6f5   :  { %2962 = vmatpush.bf16.msra.mxu3 %v11322_v7  ;;  %2990 = vmatpush.bf16.msra.mxu1 %v11323_v58 }
 0x6f6   :  { %2897 = vmatmul.bf16.vlgmr.msrb.gmra.mxu2 %v9115_v26  ;;  %2925 = vmatmul.bf16.vlgmr.msrb.gmra.mxu0 %v9115_v26 }
 0x6f7   :  { %2949 = vmatpush.bf16.msra.mxu2 %v11324_v39  ;;  %2977 = vmatpush.bf16.msra.mxu0 %v11325_v28 }
 0x6f8   :  { %2911 = vmatmul.bf16.vlgmr.msrb.gmra.mxu3 %v9128_v48  ;;  %2939 = vmatmul.bf16.vlgmr.msrb.gmra.mxu1 %v9128_v48 }
 0x6f9   :  { %2963 = vmatpush.bf16.msra.mxu3 %v11326_v17  ;;  %2991 = vmatpush.bf16.msra.mxu1 %v11327_v2 }
 0x6fb   :  { %2950 = vmatpush.bf16.msra.mxu2 %v11328_v0  ;;  %2978 = vmatpush.bf16.msra.mxu0 %v11329_v32 }
 0x6fd   :  { %2964 = vmatpush.bf16.msra.mxu3 %v11330_v45  ;;  %2992 = vmatpush.bf16.msra.mxu1 %v11331_v47 }
 0x6ff   :  { %2951 = vmatpush.bf16.msra.mxu2 %v11332_v46  ;;  %2979 = vmatpush.bf16.msra.mxu0 %v11333_v60 }
 0x701   :  { %2965 = vmatpush.bf16.msra.mxu3 %v11334_v37  ;;  %2993 = vmatpush.bf16.msra.mxu1 %v11335_v40 }
 0x703   :  { %2952 = vmatpush.bf16.msra.mxu2 %v11336_v15  ;;  %2980 = vmatpush.bf16.msra.mxu0 %v11337_v42 }
 0x705   :  { %2966 = vmatpush.bf16.msra.mxu3 %v11340_v43  ;;  %2994 = vmatpush.bf16.msra.mxu1 %v11341_v57 }
 0x706   :  { %2953 = vmatmul.bf16.vlgmr.msra.gmra.mxu2 %v9115_v26  ;;  %2981 = vmatmul.bf16.vlgmr.msra.gmra.mxu0 %v9115_v26 }
 0x707   :  { %3001 = vmatpush.bf16.msrb.mxu2 %v11338_v11  ;;  %3029 = vmatpush.bf16.msrb.mxu0 %v11339_v21 }
 0x708   :  { %2967 = vmatmul.bf16.vlgmr.msra.gmra.mxu3 %v9128_v48  ;;  %2995 = vmatmul.bf16.vlgmr.msra.gmra.mxu1 %v9128_v48 }
 0x709   :  { %3015 = vmatpush.bf16.msrb.mxu3 %v11342_v20  ;;  %3043 = vmatpush.bf16.msrb.mxu1 %v11343_v44 }
 0x70b   :  { %3002 = vmatpush.bf16.msrb.mxu2 %v11344_v4  ;;  %3030 = vmatpush.bf16.msrb.mxu0 %v11345_v14 }
 0x70d   :  { %3016 = vmatpush.bf16.msrb.mxu3 %v11346_v50  ;;  %3044 = vmatpush.bf16.msrb.mxu1 %v11347_v9 }
 0x70f   :  { %3003 = vmatpush.bf16.msrb.mxu2 %v11348_v51  ;;  %3031 = vmatpush.bf16.msrb.mxu0 %v11349_v22 }
 0x711   :  { %3017 = vmatpush.bf16.msrb.mxu3 %v11350_v52  ;;  %3045 = vmatpush.bf16.msrb.mxu1 %v11351_v6 }
 0x713   :  { %3004 = vmatpush.bf16.msrb.mxu2 %v11352_v59  ;;  %3032 = vmatpush.bf16.msrb.mxu0 %v11353_v61 }
 0x715   :  { %3018 = vmatpush.bf16.msrb.mxu3 %v11354_v55  ;;  %3046 = vmatpush.bf16.msrb.mxu1 %v11355_v1 }
 0x717   :  { %3005 = vmatpush.bf16.msrb.mxu2 %v11356_v38  ;;  %3033 = vmatpush.bf16.msrb.mxu0 %v11357_v19 }
 0x719   :  { %3019 = vmatpush.bf16.msrb.mxu3 %v11358_v36  ;;  %3047 = vmatpush.bf16.msrb.mxu1 %v11359_v23 }
 0x71b   :  { %3006 = vmatpush.bf16.msrb.mxu2 %v11360_v62  ;;  %3034 = vmatpush.bf16.msrb.mxu0 %v11361_v35  ;;  %v9265_v62 = vld [vmem:[%s10761_s13 + $0x20] sm:$0xff] }
 0x71c   :  { %v3097_v35 = vmul.f32 %v9265_v62, %v9265_v62 }
 0x71d   :  { %3020 = vmatpush.bf16.msrb.mxu3 %v11362_v30  ;;  %3048 = vmatpush.bf16.msrb.mxu1 %v11363_v41  ;;  %v9272_v30 = vld [vmem:[%s10761_s13 + $0x28] sm:$0xff] }
 0x71e   :  { %v3098_v41 = vmul.f32 %v9272_v30, %v9272_v30 }
 0x71f   :  { %3007 = vmatpush.bf16.msrb.mxu2 %v11364_v3  ;;  %3035 = vmatpush.bf16.msrb.mxu0 %v11365_v56 }
 0x720   :  { %v3117_v56 = vadd.f32 %v3098_v41, %v3097_v35  ;;  %v3059_v41 = vpop.xlane.xlu2 %3058 }
 0x721   :  { %3021 = vmatpush.bf16.msrb.mxu3 %v11366_v8  ;;  %3049 = vmatpush.bf16.msrb.mxu1 %v11367_v29 }
 0x723   :  { %3008 = vmatpush.bf16.msrb.mxu2 %v11368_v16  ;;  %3036 = vmatpush.bf16.msrb.mxu0 %v11369_v27  ;;  %v5601_v16 = vld [vmem:[%s10754_s3 + $0xb8] sm:$0xff] }
 0x725   :  { %3022 = vmatpush.bf16.msrb.mxu3 %v11370_v34  ;;  %3050 = vmatpush.bf16.msrb.mxu1 %v11371_v63 }
 0x726   :  { %3009 = vmatmul.bf16.vlgmr.msrb.gmra.mxu2 %v9115_v26  ;;  %3037 = vmatmul.bf16.vlgmr.msrb.gmra.mxu0 %v9115_v26 }
 0x728   :  { %3023 = vmatmul.bf16.vlgmr.msrb.gmra.mxu3 %v9128_v48  ;;  %3051 = vmatmul.bf16.vlgmr.msrb.gmra.mxu1 %v9128_v48 }
 0x762   :  { %v2870_v53 = vpop.f32.mrf.mxu0 }
 0x765   :  { %v2884_v12 = vpop.f32.mrf.mxu1 }
 0x766   :  { %v9244_v50 = vadd.f32 %v2884_v12, %v2870_v53  ;;  %v5597_v53 = vld [vmem:[%s10754_s3 + $0x98] sm:$0xff]  ;;  %v5594_v12 = vld [vmem:[%s10754_s3 + $0x80] sm:$0xff] }
 0x768   :  { %v2842_v25 = vpop.f32.mrf.mxu2  ;;  %v3100_v34 = vmul.f32 %v9244_v50, %v9244_v50 }
 0x76a   :  { %v9208_v13 = vpop.f32.mrf.mxu0 }
 0x76b   :  { %v2856_v24 = vpop.f32.mrf.mxu3 }
 0x76c   :  { %v9242_v14 = vadd.f32 %v2856_v24, %v2842_v25  ;;  %v5600_v25 = vld [vmem:[%s10754_s3 + $0xb0] sm:$0xff] }
 0x76d   :  { %v9210_v10 = vpop.f32.mrf.mxu1  ;;  %v5592_v24 = vld [vmem:[%s10754_s3 + $0x70] sm:$0xff] }
 0x76e   :  { %v3060_v9 = vadd.f32 %v9244_v50, %v9242_v14  ;;  %v3099_v27 = vmul.f32 %v9242_v14, %v9242_v14  ;;  %v9360_v35 = vadd.f32 %v9210_v10, %v9208_v13 }
 0x770   :  { %v9212_v5 = vpop.f32.mrf.mxu2  ;;  %v3120_v63 = vadd.f32 %v3100_v34, %v3099_v27  ;;  %11376 = vst [vmem:[#allocation130_spill] sm:$0xff] %v9360_v35 }
 0x773   :  { %v9214_v7 = vpop.f32.mrf.mxu3  ;;  %v2926_v58 = vpop.f32.mrf.mxu0 }
 0x775   :  { %v2940_v39 = vpop.f32.mrf.mxu1 }
 0x776   :  { %v9218_v2 = vadd.f32 %v2940_v39, %v2926_v58  ;;  %v5598_v58 = vld [vmem:[%s10754_s3 + $0xa0] sm:$0xff]  ;;  %v5599_v39 = vld [vmem:[%s10754_s3 + $0xa8] sm:$0xff] }
 0x778   :  { %v3102_v8 = vmul.f32 %v9218_v2, %v9218_v2 }
 0x779   :  { %v2898_v28 = vpop.f32.mrf.mxu2 }
 0x77b   :  { %v2912_v26 = vpop.f32.mrf.mxu3  ;;  %v9216_v17 = vpop.f32.mrf.mxu0 }
 0x77c   :  { %v9220_v48 = vadd.f32 %v2912_v26, %v2898_v28  ;;  %v5647_v28 = vld [vmem:[%s10755_s5 + $0x48] sm:$0xff] }
 0x77d   :  { %v9222_v0 = vpop.f32.mrf.mxu1  ;;  %v5595_v26 = vld [vmem:[%s10754_s3 + $0x88] sm:$0xff] }
 0x77e   :  { %v3063_v32 = vadd.f32 %v9218_v2, %v9220_v48  ;;  %v3101_v3 = vmul.f32 %v9220_v48, %v9220_v48 }
 0x780   :  { %3064 = vadd.xlane.f32.xlu0 %v3063_v32  ;;  %v3123_v29 = vadd.f32 %v3102_v8, %v3101_v3  ;;  %v5596_v32 = vld [vmem:[%s10754_s3 + $0x90] sm:$0xff] }
 0x781   :  { %v9226_v45 = vpop.f32.mrf.mxu2 }
 0x783   :  { %v9228_v47 = vpop.f32.mrf.mxu3  ;;  %v2982_v46 = vpop.f32.mrf.mxu0 }
 0x784   :  { %v9373_v10 = vadd.f32 %v9228_v47, %v9226_v45 }
 0x785   :  { %v2996_v60 = vpop.f32.mrf.mxu1 }
 0x786   :  { %v9230_v15 = vadd.f32 %v2996_v60, %v2982_v46  ;;  %v5645_v46 = vld [vmem:[%s10755_s5 + $0x38] sm:$0xff]  ;;  %11378 = vst [vmem:[#allocation131_spill] sm:$0xff] %v9373_v10 }
 0x787   :  { %v5649_v60 = vld [vmem:[%s10755_s5 + $0x58] sm:$0xff] }
 0x788   :  { %v3104_v44 = vmul.f32 %v9230_v15, %v9230_v15 }
 0x789   :  { %v2954_v37 = vpop.f32.mrf.mxu2 }
 0x78b   :  { %v2968_v40 = vpop.f32.mrf.mxu3  ;;  %v2984_v11 = vpop.f32.mrf.mxu0 }
 0x78c   :  { %v9232_v42 = vadd.f32 %v2968_v40, %v2954_v37  ;;  %v5593_v37 = vld [vmem:[%s10754_s3 + $0x78] sm:$0xff]  ;;  %v5591_v40 = vld [vmem:[%s10754_s3 + $0x68] sm:$0xff] }
 0x78d   :  { %v2998_v21 = vpop.f32.mrf.mxu1 }
 0x78e   :  { %v9234_v43 = vadd.f32 %v2998_v21, %v2984_v11  ;;  %v3066_v57 = vadd.f32 %v9230_v15, %v9232_v42  ;;  %v3103_v20 = vmul.f32 %v9232_v42, %v9232_v42  ;;  %v5648_v11 = vld [vmem:[%s10755_s5 + $0x50] sm:$0xff]  ;;  %v5646_v21 = vld [vmem:[%s10755_s5 + $0x40] sm:$0xff] }
 0x790   :  { %11372 = vst [vmem:[#allocation141_spill] sm:$0xff] %v9234_v43  ;;  %3067 = vadd.xlane.f32.xlu1 %v3066_v57  ;;  %v3126_v4 = vadd.f32 %v3104_v44, %v3103_v20  ;;  %v5590_v57 = vld [vmem:[%s10754_s3 + $0x60] sm:$0xff]  ;;  %v5644_v20 = vld [vmem:[%s10755_s5 + $0x30] sm:$0xff] }
 0x791   :  { %v9248_v51 = vpop.f32.mrf.mxu2 }
 0x793   :  { %v9250_v22 = vpop.f32.mrf.mxu3 }
 0x798   :  { %3127 = vadd.xlane.f32.xlu1 %v3126_v4  ;;  %v9340_v4 = vadd.f32 %v9250_v22, %v9248_v51  ;;  %v9356_v22 = vadd.f32 %v9214_v7, %v9212_v5 }
 0x79a   :  { %11373 = vst [vmem:[#allocation142_spill] sm:$0xff] %v9340_v4 }
 0x79b   :  { %11375 = vst [vmem:[#allocation133_spill] sm:$0xff] %v9356_v22 }
 0x7a0   :  { %3061 = vadd.xlane.f32.xlu1 %v3060_v9  ;;  %v3081_v9 = vadd.f32 %v9234_v43, %v9340_v4 }
 0x7a3   :  { %v3038_v52 = vpop.f32.mrf.mxu0 }
 0x7a5   :  { %v3052_v6 = vpop.f32.mrf.mxu1 }
 0x7a6   :  { %v9252_v59 = vadd.f32 %v3052_v6, %v3038_v52  ;;  %v3113_v52 = vmul.f32 %v9340_v4, %v9340_v4 }
 0x7a8   :  { %v3106_v36 = vmul.f32 %v9252_v59, %v9252_v59 }
 0x7a9   :  { %v3010_v61 = vpop.f32.mrf.mxu2 }
 0x7ab   :  { %v3024_v55 = vpop.f32.mrf.mxu3  ;;  %v3040_v5 = vpop.f32.mrf.mxu0 }
 0x7ac   :  { %v9254_v1 = vadd.f32 %v3024_v55, %v3010_v61  ;;  %v11374_v61 = vld [vmem:[#allocation132_spill] sm:$0xff] }
 0x7ad   :  { %v3054_v7 = vpop.f32.mrf.mxu1 }
 0x7ae   :  { %v3069_v38 = vadd.f32 %v9252_v59, %v9254_v1  ;;  %v3105_v19 = vmul.f32 %v9254_v1, %v9254_v1 }
 0x7b0   :  { %3070 = vadd.xlane.f32.xlu2 %v3069_v38  ;;  %v3129_v23 = vadd.f32 %v3106_v36, %v3105_v19  ;;  %v3114_v38 = vmul.f32 %v9234_v43, %v9234_v43 }
 0x7b2   :  { %3130 = vadd.xlane.f32.xlu0 %v3129_v23  ;;  %v3141_v36 = vadd.f32 %v3114_v38, %v3113_v52 }
 0x7b3   :  { %v3026_v27 = vpop.f32.mrf.mxu3 }
 0x7b8   :  { %3118 = vadd.xlane.f32.xlu2 %v3117_v56  ;;  %v3075_v56 = vadd.f32 %v9360_v35, %v9356_v22 }
 0x7b9   :  { %3410 = vperm.xlu1 %5882, %v5601_v16   ;;  %v3012_v16 = vpop.f32.mrf.mxu2 }
 0x7ba   :  { %3124 = vadd.xlane.f32.xlu0 %v3123_v29  ;;  %v3072_v29 = vadd.f32 %v9118_v49, %v9107_v18  ;;  %v9369_v13 = vadd.f32 %v3026_v27, %v3012_v16  ;;  %v3111_v27 = vmul.f32 %v9373_v10, %v9373_v10 }
 0x7bc   :  { %11377 = vst [vmem:[#allocation138_spill] sm:$0xff] %v9369_v13 }
 0x7c0   :  { %3121 = vadd.xlane.f32.xlu2 %v3120_v63  ;;  %v9375_v63 = vadd.f32 %v3054_v7, %v3040_v5 }
 0x7c1   :  { %3390 = vperm.xlu1 %5882, %v5597_v53  }
 0x7c2   :  { %11379 = vst [vmem:[#allocation137_spill] sm:$0xff] %v9375_v63  ;;  %v3084_v45 = vadd.f32 %v9375_v63, %v9369_v13 }
 0x7c9   :  { %3375 = vperm.xlu1 %5882, %v5594_v12   ;;  %v9382_v12 = vadd.f32 %v9222_v0, %v9216_v17 }
 0x7cb   :  { %11380 = vst [vmem:[#allocation139_spill] sm:$0xff] %v9382_v12  ;;  %v3078_v47 = vadd.f32 %v9382_v12, %v9373_v10 }
 0x7ce   :  { %3405 = vperm.xlu0 %5884, %v5600_v25  }
 0x7d1   :  { %3365 = vperm.xlu1 %5882, %v5592_v24  }
 0x7d6   :  { %3395 = vperm.xlu0 %5884, %v5598_v58  }
 0x7d8   :  { %3400 = vperm.xlu2 %5883, %v5599_v39  }
 0x7d9   :  { %3698 = vperm.xlu1 %5882, %v5647_v28   ;;  %v9394_v28 = vmul.f32 %v3059_v41, %v11374_v61 }
 0x7de   :  { %3380 = vperm.xlu0 %5884, %v5595_v26  }
 0x7e0   :  { %3385 = vperm.xlu2 %5883, %v5596_v32  }
 0x7e1   :  { %3688 = vperm.xlu1 %5882, %v5645_v46   ;;  %v3107_v46 = vmul.f32 %v9107_v18, %v9107_v18  ;;  %v3116_v18 = vmul.f32 %v9375_v63, %v9375_v63 }
 0x7e6   :  { %3708 = vperm.xlu0 %5884, %v5649_v60   ;;  %v3108_v60 = vmul.f32 %v9118_v49, %v9118_v49 }
 0x7e8   :  { %3370 = vperm.xlu2 %5883, %v5593_v37  }
 0x7ee   :  { %3360 = vperm.xlu0 %5884, %v5591_v40   ;;  %v3115_v40 = vmul.f32 %v9369_v13, %v9369_v13 }
 0x7f0   :  { %3703 = vperm.xlu2 %5883, %v5648_v11   ;;  %v3177_v11 = vmul.f32 %v9394_v28, %v9394_v28  ;;  %v3144_v38 = vadd.f32 %v3116_v18, %v3115_v40 }
 0x7f3   :  { %v3065_v8 = vpop.xlane.xlu0 %3064 }
 0x7f4   :  { %v9399_v0 = vmul.f32 %v3065_v8, %v11374_v61  ;;  %v3109_v8 = vmul.f32 %v9356_v22, %v9356_v22 }
 0x7f6   :  { %3693 = vperm.xlu0 %5884, %v5646_v21   ;;  %v3179_v49 = vmul.f32 %v9399_v0, %v9399_v0 }
 0x7f8   :  { %3355 = vperm.xlu2 %5883, %v5590_v57  }
 0x800   :  { %3683 = vperm.xlu2 %5883, %v5644_v20  }
 0x803   :  { %v3068_v44 = vpop.xlane.xlu1 %3067 }
 0x804   :  { %v9347_v55 = vmul.f32 %v3068_v44, %v11374_v61 }
 0x806   :  { %v3180_v51 = vmul.f32 %v9347_v55, %v9347_v55 }
 0x80b   :  { %3082 = vadd.xlane.f32.xlu1 %v3081_v9  ;;  %v3128_v6 = vpop.xlane.xlu1 %3127 }
 0x80c   :  { %v3150_v19 = vmul.f32 %v3128_v6, %v11374_v61  ;;  %v3132_v6 = vadd.f32 %v3108_v60, %v3107_v46 }
 0x80e   :  { %v3190_v23 = vsub.f32 %v3150_v19, %v3180_v51 }
 0x810   :  { %v9362_v3 = vadd.f32 1e-05, %v3190_v23 }
 0x812   :  { %6003 = vrsqrt.f32 %v9362_v3  ;;  %vm3243_vm12 = vweird.f32 %v9362_v3 }
 0x813   :  { %3142 = vadd.xlane.f32.xlu1 %v3141_v36  ;;  %v3062_v20 = vpop.xlane.xlu1 %3061 }
 0x814   :  { %v9417_v19 = vmul.f32 %v3062_v20, %v11374_v61 }
 0x816   :  { %v3178_v5 = vmul.f32 %v9417_v19, %v9417_v19 }
 0x818   :  { %v9384_v24 = vpop.eup %6003 }
 0x819   :  { %v3238_v17 = vmul.f32 %v9384_v24, %v9362_v3  ;;  %vm3244_vm1 = vweird.f32 %v9384_v24 }
 0x81a   :  { %vm3245_vm0 = vmor %vm3243_vm12, %vm3244_vm1  ;;  %vm11381_vm1 = vcmask 392192  }
 0x81b   :  { %3076 = vadd.xlane.f32.xlu1 %v3075_v56  ;;  %v3239_v57 = vmul.f32 %v9384_v24, %v3238_v17  ;;  %vm11383_vm12 = vmmov %vm11381_vm1 }
 0x81d   :  { %v3240_v23 = vmul.f32 0.5, %v3239_v57 }
 0x820   :  { %3073 = vadd.xlane.f32.xlu0 %v3072_v29 }
 0x823   :  { %v3071_v34 = vpop.xlane.xlu2 %3070 }
 0x824   :  { %v9378_v53 = vmul.f32 %v3071_v34, %v11374_v61  ;;  %v3110_v34 = vmul.f32 %v9360_v35, %v9360_v35 }
 0x825   :  { %v3131_v25 = vpop.xlane.xlu0 %3130 }
 0x826   :  { %v3151_v58 = vmul.f32 %v3131_v25, %v11374_v61  ;;  %v3181_v39 = vmul.f32 %v9378_v53, %v9378_v53  ;;  %v5681_v25 = vld [vmem:[%s10754_s3 + $0x178] sm:$0xff] }
 0x828   :  { %v3191_v26 = vsub.f32 %v3151_v58, %v3181_v39  ;;  %3085 = vadd.xlane.f32.xlu0 %v3084_v45  ;;  %v3241_v58 = vsub.f32 1.5, %v3240_v23  ;;  %v3112_v45 = vmul.f32 %v9382_v12, %v9382_v12  ;;  %v3164_v23 = vsub.f32 %v9230_v15, %v9347_v55 }
 0x829   :  { %3079 = vadd.xlane.f32.xlu2 %v3078_v47 }
 0x82a   :  { %v3201_v32 = vadd.f32 1e-05, %v3191_v26  ;;  %v3135_v26 = vadd.f32 %v3110_v34, %v3109_v8  ;;  %v3138_v46 = vadd.f32 %v3112_v45, %v3111_v27  ;;  %v3158_v27 = vsub.f32 %v9272_v30, %v9394_v28 }
 0x82b   :  { %v3119_v37 = vpop.xlane.xlu2 %3118  ;;  %v3161_v34 = vsub.f32 %v9220_v48, %v9399_v0 }
 0x82c   :  { %6005 = vrsqrt.f32 %v3201_v32  ;;  %v3147_v21 = vmul.f32 %v3119_v37, %v11374_v61  ;;  %vm3253_vm5 = vweird.f32 %v3201_v32 }
 0x82d   :  { %v3125_v44 = vpop.xlane.xlu0 %3124 }
 0x82e   :  { %v3187_v9 = vsub.f32 %v3147_v21, %v3177_v11  ;;  %v3149_v52 = vmul.f32 %v3125_v44, %v11374_v61  ;;  %v3242_v21 = vmul.f32 %v9384_v24, %v3241_v58 }
 0x830   :  { %v9419_v36 = vadd.f32 1e-05, %v3187_v9  ;;  %v3189_v51 = vsub.f32 %v3149_v52, %v3179_v49  ;;  %3133 = vadd.xlane.f32.xlu0 %v3132_v6  ;;  %v3165_v9 = vsub.f32 %v9254_v1, %v9378_v53  ;;  %v3166_v49 = vsub.f32 %v9252_v59, %v9378_v53  ;;  %v5677_v52 = vld [vmem:[%s10754_s3 + $0x158] sm:$0xff] }
 0x831   :  { %3145 = vadd.xlane.f32.xlu2 %v3144_v38 }
 0x832   :  { %v6006_v41 = vpop.eup %6005  ;;  %6007 = vrsqrt.f32 %v9419_v36  ;;  %v9422_v56 = vadd.f32 1e-05, %v3189_v51  ;;  %v3163_v51 = vsub.f32 %v9232_v42, %v9347_v55  ;;  %vm3213_vm2 = vweird.f32 %v9419_v36 }
 0x833   :  { %v3248_v29 = vmul.f32 %v6006_v41, %v3201_v32  ;;  %v3122_v16 = vpop.xlane.xlu2 %3121  ;;  %vm3254_vm13 = vweird.f32 %v6006_v41  ;;  %v3246_v32 = vsel %vm3245_vm0, %v9384_v24, %v3242_v21  ;;  %v5676_v21 = vld [vmem:[%s10754_s3 + $0x150] sm:$0xff]  ;;  %vm11385_vm0 = vmmov %vm11381_vm1 }
 0x834   :  { %6009 = vrsqrt.f32 %v9422_v56  ;;  %v3148_v7 = vmul.f32 %v3122_v16, %v11374_v61  ;;  %4143 = vperm.xlu1 %5882, %v5681_v25   ;;  %vm3255_vm14 = vmor %vm3253_vm5, %vm3254_vm13  ;;  %v9466_v24 = vmul.f32 %v3246_v32, %v3163_v51  ;;  %v9468_v42 = vmul.f32 %v3246_v32, %v3164_v23  ;;  %v5726_v32 = vld [vmem:[%s10755_s5 + $0xa0] sm:$0xff]  ;;  %v5583_v51 = vld [vmem:[%s10756_s2 + $0x88] sm:$0xff] }
 0x835   :  { %v3249_v39 = vmul.f32 %v6006_v41, %v3248_v29  ;;  %v3157_v16 = vsub.f32 %v9265_v62, %v9394_v28  ;;  %vm3233_vm6 = vweird.f32 %v9422_v56  ;;  %v3162_v62 = vsub.f32 %v9218_v2, %v9399_v0  ;;  %v5674_v28 = vld [vmem:[%s10754_s3 + $0x140] sm:$0xff]  ;;  %v5679_v0 = vld [vmem:[%s10754_s3 + $0x168] sm:$0xff]  ;;  %vm11382_vm13 = vmmov %vm11381_vm1 }
 0x836   :  { %v3188_v47 = vsub.f32 %v3148_v7, %v3178_v5  ;;  %vm11384_vm5 = vmmov %vm11381_vm1  ;;  %v5724_v23 = vld [vmem:[%s10755_s5 + $0x90] sm:$0xff] }
 0x837   :  { %v3250_v17 = vmul.f32 0.5, %v3249_v39 }
 0x838   :  { %v6008_v60 = vpop.eup %6007  ;;  %v9439_v37 = vadd.f32 1e-05, %v3188_v47  ;;  %3136 = vadd.xlane.f32.xlu0 %v3135_v26  ;;  %v3159_v47 = vsub.f32 %v9242_v14, %v9417_v19  ;;  %v3160_v26 = vsub.f32 %v9244_v50, %v9417_v19  ;;  %v5578_v14 = vld [vmem:[%s10756_s2 + $0x60] sm:$0xff]  ;;  %v5680_v50 = vld [vmem:[%s10754_s3 + $0x170] sm:$0xff] }
 0x839   :  { %v3251_v40 = vsub.f32 1.5, %v3250_v17  ;;  %v3208_v11 = vmul.f32 %v6008_v60, %v9419_v36  ;;  %3139 = vadd.xlane.f32.xlu2 %v3138_v46  ;;  %vm3214_vm3 = vweird.f32 %v6008_v60  ;;  %v5678_v19 = vld [vmem:[%s10754_s3 + $0x160] sm:$0xff] }
 0x83a   :  { %v6010_v57 = vpop.eup %6009  ;;  %6011 = vrsqrt.f32 %v9439_v37  ;;  %vm3215_vm10 = vmor %vm3213_vm2, %vm3214_vm3  ;;  %vm3223_vm11 = vweird.f32 %v9439_v37 }
 0x83b   :  { %v3252_v20 = vmul.f32 %v6006_v41, %v3251_v40  ;;  %v3209_v44 = vmul.f32 %v6008_v60, %v3208_v11  ;;  %v3228_v18 = vmul.f32 %v6010_v57, %v9422_v56  ;;  %vm3234_vm8 = vweird.f32 %v6010_v57  ;;  %v5727_v40 = vld [vmem:[%s10755_s5 + $0xa8] sm:$0xff]  ;;  %vm11387_vm3 = vmmov %vm11385_vm0 }
 0x83c   :  { %4123 = vperm.xlu1 %5882, %v5677_v52   ;;  %vm3235_vm7 = vmor %vm3233_vm6, %vm3234_vm8  ;;  %v5579_v11 = vld [vmem:[%s10756_s2 + $0x68] sm:$0xff]  ;;  %v5728_v52 = vld [vmem:[%s10755_s5 + $0xb0] sm:$0xff] }
 0x83d   :  { %v3210_v3 = vmul.f32 0.5, %v3209_v44  ;;  %v3229_v6 = vmul.f32 %v6010_v57, %v3228_v18  ;;  %v3256_v38 = vsel %vm3255_vm14, %v6006_v41, %v3252_v20  ;;  %v5725_v20 = vld [vmem:[%s10755_s5 + $0x98] sm:$0xff]  ;;  %v5580_v44 = vld [vmem:[%s10756_s2 + $0x70] sm:$0xff]  ;;  %vm11386_vm14 = vmmov %vm11385_vm0 }
 0x83e   :  { %v9459_v1 = vmul.f32 %v3256_v38, %v3165_v9  ;;  %v9461_v8 = vmul.f32 %v3256_v38, %v3166_v49  ;;  %v5673_v18 = vld [vmem:[%s10754_s3 + $0x138] sm:$0xff]  ;;  %vm11388_vm2 = vmmov %vm11385_vm0  ;;  %v5670_v38 = vld [vmem:[%s10754_s3 + $0x120] sm:$0xff] }
 0x83f   :  { %v3211_v59 = vsub.f32 1.5, %v3210_v3  ;;  %v3230_v53 = vmul.f32 0.5, %v3229_v6  ;;  %v5729_v9 = vld [vmem:[%s10755_s5 + $0xb8] sm:$0xff]  ;;  %v5671_v3 = vld [vmem:[%s10754_s3 + $0x128] sm:$0xff]  ;;  %v5582_v6 = vld [vmem:[%s10756_s2 + $0x80] sm:$0xff] }
 0x840   :  { %v6012_v29 = vpop.eup %6011  ;;  %3459 = vmatpush.msra.mxu2 %v9459_v1  ;;  %3512 = vmatpush.msra.mxu3 %v9461_v8  ;;  %v5581_v49 = vld [vmem:[%s10756_s2 + $0x78] sm:$0xff]  ;;  %vm11389_vm8 = vmmov %vm11385_vm0 }
 0x841   :  { %v3212_v15 = vmul.f32 %v6008_v60, %v3211_v59  ;;  %v3231_v55 = vsub.f32 1.5, %v3230_v53  ;;  %v3218_v41 = vmul.f32 %v6012_v29, %v9439_v37  ;;  %vm3224_vm9 = vweird.f32 %v6012_v29  ;;  %v5672_v37 = vld [vmem:[%s10754_s3 + $0x130] sm:$0xff]  ;;  %vm11391_vm6 = vmmov %vm11385_vm0  ;;  %v4806_v59 = vld [vmem:[%s10764_s11] sm:$0x7] }
 0x842   :  { %3460 = vmatpush.msra.mxu2 %v9466_v24  ;;  %3513 = vmatpush.msra.mxu3 %v9468_v42  ;;  %vm3225_vm4 = vmor %vm3223_vm11, %vm3224_vm9  ;;  %v5584_v53 = vld [vmem:[%s10756_s2 + $0x90] sm:$0xff] }
 0x843   :  { %v3219_v36 = vmul.f32 %v6012_v29, %v3218_v41  ;;  %v3216_v5 = vsel %vm3215_vm10, %v6008_v60, %v3212_v15  ;;  %v3232_v7 = vmul.f32 %v6010_v57, %v3231_v55  ;;  %vm11390_vm10 = vmmov %vm11385_vm0  ;;  %v5586_v15 = vld [vmem:[%s10756_s2 + $0xa0] sm:$0xff]  ;;  %v5587_v55 = vld [vmem:[%s10756_s2 + $0xa8] sm:$0xff] }
 0x844   :  { %v9483_v25 = vmul.f32 %v3216_v5, %v3157_v16  ;;  %v9485_v30 = vmul.f32 %v3216_v5, %v3158_v27  ;;  %4108 = vperm.xlu1 %5882, %v5674_v28   ;;  %vm11393_vm9 = vmmov %vm11385_vm0  ;;  %v5588_v41 = vld [vmem:[%s10756_s2 + $0xb0] sm:$0xff]  ;;  %v5589_v16 = vld [vmem:[%s10756_s2 + $0xb8] sm:$0xff] }
 0x845   :  { %v3220_v58 = vmul.f32 0.5, %v3219_v36  ;;  %v3236_v56 = vsel %vm3235_vm7, %v6010_v57, %v3232_v7  ;;  %v5675_v57 = vld [vmem:[%s10754_s3 + $0x148] sm:$0xff]  ;;  %vm11392_vm7 = vmmov %vm11385_vm0 }
 0x846   :  { %3461 = vmatpush.msra.mxu2 %v9483_v25  ;;  %3514 = vmatpush.msra.mxu3 %v9485_v30  ;;  %v9492_v39 = vmul.f32 %v3236_v56, %v3161_v34  ;;  %v9494_v48 = vmul.f32 %v3236_v56, %v3162_v62  ;;  %vm11394_vm11 = vmmov %vm11385_vm0 }
 0x847   :  { %v3221_v2 = vsub.f32 1.5, %v3220_v58 }
 0x848   :  { %3462 = vmatpush.msra.mxu2 %v9492_v39  ;;  %3515 = vmatpush.msra.mxu3 %v9494_v48 }
 0x849   :  { %v3222_v45 = vmul.f32 %v6012_v29, %v3221_v2 }
 0x84b   :  { %v3226_v17 = vsel %vm3225_vm4, %v6012_v29, %v3222_v45  ;;  %v5585_v29 = vld [vmem:[%s10756_s2 + $0x98] sm:$0xff]  ;;  %vm11395_vm4 = vmmov %vm11385_vm0 }
 0x84c   :  { %4133 = vperm.xlu0 %5884, %v5679_v0   ;;  %v9506_v46 = vmul.f32 %v3226_v17, %v3159_v47  ;;  %v9508_v60 = vmul.f32 %v3226_v17, %v3160_v26  ;;  %4098 = vperm.xlu1 %5882, %v5672_v37  }
 0x84e   :  { %3463 = vmatpush.msra.mxu2 %v9506_v46  ;;  %3516 = vmatpush.msra.mxu3 %v9508_v60 }
 0x850   :  { %3464 = vmatpush.msra.mxu2 %v9483_v25  ;;  %3517 = vmatpush.msra.mxu3 %v9485_v30 }
 0x851   :  { %5602 = vmatmul.msk.f32.vlgmr.msra.gmra.mxu2 %vm11381_vm1, %v5578_v14  ;;  %5614 = vmatmul.msk.f32.vlgmr.msra.gmra.mxu3 %vm11382_vm13, %v5578_v14  ;;  %vm11396_vm1 = vmmov %vm11385_vm0 }
 0x852   :  { %4138 = vperm.xlu2 %5883, %v5680_v50   ;;  %vm11397_vm13 = vmmov %vm11385_vm0 }
 0x854   :  { %4128 = vperm.xlu0 %5884, %v5678_v19   ;;  %4431 = vperm.xlu1 %5882, %v5727_v40  }
 0x859   :  { %5603 = vmatmul.msk.f32.gmra.mxu2 %vm11383_vm12, %v5579_v11  ;;  %5615 = vmatmul.msk.f32.gmra.mxu3 %vm11384_vm5, %v5579_v11  ;;  %vm11398_vm12 = vmmov %vm11385_vm0 }
 0x85a   :  { %4118 = vperm.xlu2 %5883, %v5676_v21   ;;  %vm11399_vm5 = vmmov %vm11385_vm0 }
 0x85c   :  { %4113 = vperm.xlu0 %5884, %v5675_v57   ;;  %4421 = vperm.xlu1 %5882, %v5725_v20   ;;  %v3406_v57 = vpop.permute.xlu0 %3405  ;;  %v3411_v20 = vpop.permute.xlu1 %3410 }
 0x861   :  { %5604 = vmatmul.msk.f32.gmra.mxu2 %vm11385_vm0, %v5580_v44  ;;  %5616 = vmatmul.msk.f32.gmra.mxu3 %vm11386_vm14, %v5580_v44  ;;  %vm11400_vm14 = vmmov %vm11385_vm0  ;;  %v3401_v44 = vpop.permute.xlu2 %3400 }
 0x862   :  { %4103 = vperm.xlu2 %5883, %v5673_v18  }
 0x864   :  { %4441 = vperm.xlu0 %5884, %v5729_v9  }
 0x869   :  { %5605 = vmatmul.msk.f32.gmra.mxu2 %vm11387_vm3, %v5581_v49  ;;  %5617 = vmatmul.msk.f32.gmra.mxu3 %vm11388_vm2, %v5581_v49  ;;  %vm11401_vm3 = vmmov %vm11385_vm0 }
 0x86a   :  { %4436 = vperm.xlu2 %5883, %v5728_v52   ;;  %vm11402_vm2 = vmmov %vm11385_vm0 }
 0x86c   :  { %4093 = vperm.xlu0 %5884, %v5671_v3  }
 0x871   :  { %5606 = vmatmul.msk.f32.gmra.mxu2 %vm11389_vm8, %v5582_v6  ;;  %5618 = vmatmul.msk.f32.gmra.mxu3 %vm11390_vm10, %v5582_v6  ;;  %vm11403_vm8 = vmmov %vm11385_vm0 }
 0x872   :  { %4088 = vperm.xlu2 %5883, %v5670_v38   ;;  %vm11404_vm10 = vmmov %vm11385_vm0 }
 0x874   :  { %4426 = vperm.xlu0 %5884, %v5726_v32  }
 0x879   :  { %5607 = vmatmul.msk.f32.gmra.mxu2 %vm11391_vm6, %v5583_v51  ;;  %5619 = vmatmul.msk.f32.gmra.mxu3 %vm11392_vm7, %v5583_v51  ;;  %vm11405_vm6 = vmmov %vm11385_vm0 }
 0x87a   :  { %4416 = vperm.xlu2 %5883, %v5724_v23   ;;  %vm11406_vm7 = vmmov %vm11385_vm0 }
 0x87c   :  { %4809 = vperm.xlu0 %5884, %v4806_v59   ;;  %v3396_v59 = vpop.permute.xlu0 %3395 }
 0x881   :  { %5608 = vmatmul.msk.f32.gmra.mxu2 %vm11393_vm9, %v5584_v53  ;;  %5620 = vmatmul.msk.f32.gmra.mxu3 %vm11394_vm11, %v5584_v53  ;;  %vm11407_vm9 = vmmov %vm11385_vm0 }
 0x882   :  { %vm11408_vm11 = vmmov %vm11385_vm0 }
 0x889   :  { %5609 = vmatmul.msk.f32.gmra.mxu2 %vm11395_vm4, %v5585_v29  ;;  %5621 = vmatmul.msk.f32.gmra.mxu3 %vm11396_vm1, %v5585_v29  ;;  %vm11409_vm4 = vmmov %vm11385_vm0 }
 0x88a   :  { %vm11410_vm1 = vmmov %vm11385_vm0 }
 0x891   :  { %5610 = vmatmul.msk.f32.gmra.mxu2 %vm11397_vm13, %v5586_v15  ;;  %5622 = vmatmul.msk.f32.gmra.mxu3 %vm11398_vm12, %v5586_v15  ;;  %vm11411_vm13 = vmmov %vm11385_vm0 }
 0x892   :  { %vm11412_vm12 = vmmov %vm11385_vm0 }
 0x899   :  { %5611 = vmatmul.msk.f32.gmra.mxu2 %vm11399_vm5, %v5587_v55  ;;  %5623 = vmatmul.msk.f32.gmra.mxu3 %vm11385_vm0, %v5587_v55  ;;  %vm11413_vm5 = vmmov %vm11385_vm0 }
 0x8a1   :  { %5612 = vmatmul.msk.f32.gmra.mxu2 %vm11400_vm14, %v5588_v41  ;;  %5624 = vmatmul.msk.f32.gmra.mxu3 %vm11401_vm3, %v5588_v41  ;;  %v3391_v41 = vpop.permute.xlu1 %3390  ;;  %vm11414_vm14 = vmmov %vm11385_vm0 }
 0x8a9   :  { %5613 = vmatmul.msk.f32.gmra.mxu2 %vm11402_vm2, %v5589_v16  ;;  %5625 = vmatmul.msk.f32.gmra.mxu3 %vm11403_vm8, %v5589_v16 }
 0x8d4   :  { %v9619_v27 = vpop.f32.mrf.mxu2  ;;  %v9621_v36 = vpop.f32.mrf.mxu3 }
 0x8dc   :  { %v9623_v5 = vpop.f32.mrf.mxu2  ;;  %v9625_v7 = vpop.f32.mrf.mxu3 }
 0x8e4   :  { %v9627_v34 = vpop.f32.mrf.mxu2  ;;  %v9629_v62 = vpop.f32.mrf.mxu3 }
 0x8ec   :  { %v9631_v28 = vpop.f32.mrf.mxu2  ;;  %v9633_v58 = vpop.f32.mrf.mxu3 }
 0x8f4   :  { %v9635_v56 = vpop.f32.mrf.mxu2  ;;  %v9637_v2 = vpop.f32.mrf.mxu3 }
 0x8fc   :  { %v9639_v0 = vpop.f32.mrf.mxu2  ;;  %v9641_v45 = vpop.f32.mrf.mxu3 }
 0x904   :  { %v3484_v47 = vpop.f32.mrf.mxu2  ;;  %v3537_v26 = vpop.f32.mrf.mxu3 }
 0x90c   :  { %v3487_v17 = vpop.f32.mrf.mxu2  ;;  %v3540_v37 = vpop.f32.mrf.mxu3 }
 0x90d   :  { %v3488_v16 = vadd.f32 %v3487_v17, %v3391_v41  ;;  %v3541_v31 = vadd.f32 %v3540_v37, %v3391_v41  ;;  %v5626_v17 = vld [vmem:[%s10759_s4 + $0x30] sm:$0xff] }
 0x914   :  { %v3490_v14 = vpop.f32.mrf.mxu2  ;;  %v3543_v50 = vpop.f32.mrf.mxu3 }
 0x915   :  { %v3491_v53 = vadd.f32 %v3490_v14, %v3396_v59  ;;  %v3544_v29 = vadd.f32 %v3543_v50, %v3396_v59  ;;  %v3557_v14 = vmax.f32 %v3488_v16, 0.0  ;;  %v3558_v50 = vmax.f32 %v3541_v31, 0.0  ;;  %v5628_v31 = vld [vmem:[%s10759_s4 + $0x40] sm:$0xff] }
 0x91c   :  { %v3493_v19 = vpop.f32.mrf.mxu2  ;;  %v3546_v40 = vpop.f32.mrf.mxu3 }
 0x91d   :  { %v3494_v38 = vadd.f32 %v3493_v19, %v3401_v44  ;;  %v3547_v32 = vadd.f32 %v3546_v40, %v3401_v44  ;;  %v3559_v40 = vmax.f32 %v3491_v53, 0.0 }
 0x91f   :  { %v3561_v33 = vmax.f32 %v3494_v38, 0.0  ;;  %v3562_v35 = vmax.f32 %v3547_v32, 0.0 }
 0x924   :  { %v3496_v11 = vpop.f32.mrf.mxu2  ;;  %v3549_v21 = vpop.f32.mrf.mxu3 }
 0x925   :  { %v3497_v49 = vadd.f32 %v3496_v11, %v3406_v57  ;;  %v3550_v52 = vadd.f32 %v3549_v21, %v3406_v57  ;;  %v3386_v11 = vpop.permute.xlu2 %3385  ;;  %v3560_v57 = vmax.f32 %v3544_v29, 0.0 }
 0x926   :  { %v3485_v21 = vadd.f32 %v3484_v47, %v3386_v11  ;;  %v3538_v19 = vadd.f32 %v3537_v26, %v3386_v11  ;;  %v5630_v47 = vld [vmem:[%s10759_s4 + $0x50] sm:$0xff]  ;;  %v5631_v26 = vld [vmem:[%s10759_s4 + $0x58] sm:$0xff] }
 0x927   :  { %v3563_v15 = vmax.f32 %v3497_v49, 0.0  ;;  %v3564_v55 = vmax.f32 %v3550_v52, 0.0 }
 0x928   :  { %v3556_v44 = vmax.f32 %v3538_v19, 0.0 }
 0x92c   :  { %v3499_v18 = vpop.f32.mrf.mxu2  ;;  %v3552_v9 = vpop.f32.mrf.mxu3 }
 0x92d   :  { %v3500_v3 = vadd.f32 %v3499_v18, %v3411_v20  ;;  %v3553_v6 = vadd.f32 %v3552_v9, %v3411_v20  ;;  %v3555_v20 = vmax.f32 %v3485_v21, 0.0  ;;  %v3371_v37 = vpop.permute.xlu2 %3370  ;;  %v3376_v18 = vpop.permute.xlu1 %3375 }
 0x92e   :  { %v9673_v9 = vpop.permute.xlu0 %3380 }
 0x92f   :  { %v3565_v51 = vmax.f32 %v3500_v3, 0.0  ;;  %v3566_v23 = vmax.f32 %v3553_v6, 0.0 }
 0x931   :  { %3602 = vmatpush.msra.mxu0 %v3565_v51  ;;  %3637 = vmatpush.msra.mxu1 %v3566_v23 }
 0x933   :  { %3603 = vmatpush.msra.mxu0 %v3563_v15  ;;  %3638 = vmatpush.msra.mxu1 %v3564_v55 }
 0x935   :  { %3604 = vmatpush.msra.mxu0 %v3561_v33  ;;  %3639 = vmatpush.msra.mxu1 %v3562_v35  ;;  %v5627_v33 = vld [vmem:[%s10759_s4 + $0x38] sm:$0xff]  ;;  %v5629_v35 = vld [vmem:[%s10759_s4 + $0x48] sm:$0xff]  ;;  %v9675_v49 = vpop.permute.xlu2 %3703  ;;  %v3366_v52 = vpop.permute.xlu1 %3365 }
 0x936   :  { %v9677_v3 = vpop.permute.xlu0 %3708 }
 0x937   :  { %3605 = vmatpush.msra.mxu0 %v3559_v40  ;;  %3640 = vmatpush.msra.mxu1 %v3560_v57  ;;  %v3473_v57 = vadd.f32 %v9627_v34, %v3366_v52  ;;  %v3476_v34 = vadd.f32 %v9631_v28, %v3371_v37 }
 0x939   :  { %3606 = vmatpush.msra.mxu0 %v3557_v14  ;;  %3641 = vmatpush.msra.mxu1 %v3558_v50 }
 0x93b   :  { %3607 = vmatpush.msra.mxu0 %v3555_v20  ;;  %3642 = vmatpush.msra.mxu1 %v3556_v44 }
 0x93c   :  { %5632 = vmatmul.msk.f32.vlgmr.msra.gmra.mxu0 %vm11404_vm10, %v5626_v17  ;;  %5638 = vmatmul.msk.f32.vlgmr.msra.gmra.mxu1 %vm11405_vm6, %v5626_v17 }
 0x93d   :  { %v3356_v32 = vpop.permute.xlu2 %3355  ;;  %v3699_v23 = vpop.permute.xlu1 %3698 }
 0x93e   :  { %v3467_v51 = vadd.f32 %v9619_v27, %v3356_v32  ;;  %v3361_v15 = vpop.permute.xlu0 %3360  ;;  %v3520_v55 = vadd.f32 %v9621_v36, %v3356_v32  ;;  %v3526_v27 = vadd.f32 %v9629_v62, %v3366_v52 }
 0x93f   :  { %v3470_v11 = vadd.f32 %v9623_v5, %v3361_v15  ;;  %v3523_v19 = vadd.f32 %v9625_v7, %v3361_v15 }
 0x944   :  { %5633 = vmatmul.msk.f32.gmra.mxu0 %vm11406_vm7, %v5627_v33  ;;  %5639 = vmatmul.msk.f32.gmra.mxu1 %vm11407_vm9, %v5627_v33 }
 0x945   :  { %v3684_v41 = vpop.permute.xlu2 %3683  ;;  %v3689_v33 = vpop.permute.xlu1 %3688 }
 0x94c   :  { %5634 = vmatmul.msk.f32.gmra.mxu0 %vm11408_vm11, %v5628_v31  ;;  %5640 = vmatmul.msk.f32.gmra.mxu1 %vm11409_vm4, %v5628_v31 }
 0x954   :  { %5635 = vmatmul.msk.f32.gmra.mxu0 %vm11410_vm1, %v5629_v35  ;;  %5641 = vmatmul.msk.f32.gmra.mxu1 %vm11411_vm13, %v5629_v35 }
 0x95c   :  { %5636 = vmatmul.msk.f32.gmra.mxu0 %vm11412_vm12, %v5630_v47  ;;  %5642 = vmatmul.msk.f32.gmra.mxu1 %vm11413_vm5, %v5630_v47  ;;  %v3694_v47 = vpop.permute.xlu0 %3693 }
 0x964   :  { %5637 = vmatmul.msk.f32.gmra.mxu0 %vm11385_vm0, %v5631_v26  ;;  %5643 = vmatmul.msk.f32.gmra.mxu1 %vm11414_vm14, %v5631_v26 }
 0x9b9   :  { %v3609_v6 = vpop.f32.mrf.mxu0  ;;  %v3644_v38 = vpop.f32.mrf.mxu1 }
 0x9ba   :  { %v3662_v59 = vadd.f32 %v3609_v6, %v3467_v51  ;;  %v3663_v16 = vadd.f32 %v3644_v38, %v3520_v55  ;;  %v3529_v51 = vadd.f32 %v9633_v58, %v3371_v37  ;;  %v3479_v58 = vadd.f32 %v9635_v56, %v3376_v18 }
 0x9bc   :  { %v3711_v21 = vadd.f32 %v3684_v41, %v3662_v59  ;;  %v3712_v14 = vadd.f32 %v3684_v41, %v3663_v16 }
 0x9be   :  { %v3723_v20 = vsub.f32 0.0, %v3711_v21  ;;  %v3724_v26 = vsub.f32 0.0, %v3712_v14 }
 0x9c0   :  { %v3735_v6 = vmul.f32 1.442695, %v3723_v20  ;;  %v3737_v59 = vmul.f32 1.442695, %v3724_v26 }
 0x9c1   :  { %v3612_v53 = vpop.f32.mrf.mxu0  ;;  %v3647_v29 = vpop.f32.mrf.mxu1 }
 0x9c2   :  { %v3664_v40 = vadd.f32 %v3612_v53, %v3470_v11  ;;  %v3665_v50 = vadd.f32 %v3647_v29, %v3523_v19  ;;  %6013 = vpow2.f32 %v3735_v6 }
 0x9c3   :  { %6015 = vpow2.f32 %v3737_v59 }
 0x9c4   :  { %v3713_v36 = vadd.f32 %v3689_v33, %v3664_v40  ;;  %v3714_v5 = vadd.f32 %v3689_v33, %v3665_v50  ;;  %v3532_v50 = vadd.f32 %v9637_v2, %v3376_v18 }
 0x9c6   :  { %v3725_v7 = vsub.f32 0.0, %v3713_v36  ;;  %v3726_v62 = vsub.f32 0.0, %v3714_v5 }
 0x9c8   :  { %v3739_v41 = vmul.f32 1.442695, %v3725_v7  ;;  %v3741_v11 = vmul.f32 1.442695, %v3726_v62  ;;  %v6014_v28 = vpop.eup %6013  ;;  %v3482_v7 = vadd.f32 %v9639_v0, %v9673_v9 }
 0x9c9   :  { %v3615_v44 = vpop.f32.mrf.mxu0  ;;  %v3650_v17 = vpop.f32.mrf.mxu1 }
 0x9ca   :  { %v3666_v31 = vadd.f32 %v3615_v44, %v3473_v57  ;;  %v3667_v35 = vadd.f32 %v3650_v17, %v3526_v27  ;;  %6017 = vpow2.f32 %v3739_v41  ;;  %v6016_v33 = vpop.eup %6015 }
 0x9cb   :  { %6019 = vpow2.f32 %v3741_v11  ;;  %v9693_v2 = vadd.f32 1.0, %v6016_v33 }
 0x9cc   :  { %v3715_v38 = vadd.f32 %v3694_v47, %v3666_v31  ;;  %v3716_v32 = vadd.f32 %v3694_v47, %v3667_v35  ;;  %v9689_v31 = vadd.f32 1.0, %v6014_v28 }
 0x9ce   :  { %v3727_v52 = vsub.f32 0.0, %v3715_v38  ;;  %v3728_v16 = vsub.f32 0.0, %v3716_v32  ;;  %v3535_v32 = vadd.f32 %v9641_v45, %v9673_v9 }
 0x9d0   :  { %v3743_v40 = vmul.f32 1.442695, %v3727_v52  ;;  %v3745_v37 = vmul.f32 1.442695, %v3728_v16  ;;  %v6018_v47 = vpop.eup %6017 }
 0x9d1   :  { %v3618_v53 = vpop.f32.mrf.mxu0  ;;  %v3653_v29 = vpop.f32.mrf.mxu1 }
 0x9d2   :  { %v3668_v15 = vadd.f32 %v3618_v53, %v3476_v34  ;;  %v3669_v55 = vadd.f32 %v3653_v29, %v3529_v51  ;;  %6021 = vpow2.f32 %v3743_v40  ;;  %v6020_v18 = vpop.eup %6019 }
 0x9d3   :  { %v9705_v41 = vadd.f32 1.0, %v6020_v18 }
 0x9d4   :  { %v3717_v21 = vadd.f32 %v3699_v23, %v3668_v15  ;;  %v3718_v19 = vadd.f32 %v3699_v23, %v3669_v55 }
 0x9d6   :  { %v3729_v57 = vsub.f32 0.0, %v3717_v21  ;;  %v3730_v14 = vsub.f32 0.0, %v3718_v19 }
 0x9d8   :  { %v3747_v27 = vmul.f32 1.442695, %v3729_v57  ;;  %v3749_v20 = vmul.f32 1.442695, %v3730_v14  ;;  %v6022_v6 = vpop.eup %6021  ;;  %v3782_v57 = vand.u32 2147483648, %v9689_v31 }
 0x9d9   :  { %v3621_v44 = vpop.f32.mrf.mxu0  ;;  %v3656_v17 = vpop.f32.mrf.mxu1  ;;  %v9712_v9 = vadd.f32 1.0, %v6022_v6 }
 0x9da   :  { %6023 = vpow2.f32 %v3747_v27  ;;  %v3670_v23 = vadd.f32 %v3621_v44, %v3479_v58  ;;  %v3671_v36 = vadd.f32 %v3656_v17, %v3532_v50 }
 0x9db   :  { %6025 = vpow2.f32 %v3745_v37 }
 0x9dc   :  { %6027 = vpow2.f32 %v3749_v20  ;;  %v3719_v56 = vadd.f32 %v9675_v49, %v3670_v23  ;;  %v3720_v35 = vadd.f32 %v9675_v49, %v3671_v36  ;;  %v9701_v49 = vadd.f32 1.0, %v6018_v47 }
 0x9dd   :  { %6029 = vrcp.f32 %v9689_v31  ;;  %v9736_v23 = vor.u32 1.1754944e-38, %v3782_v57 }
 0x9de   :  { %v3731_v26 = vsub.f32 0.0, %v3719_v56  ;;  %v3732_v5 = vsub.f32 0.0, %v3720_v35  ;;  %6031 = vrcp.f32 %v9693_v2  ;;  %v3812_v20 = vand.u32 2147483648, %v9701_v49 }
 0x9e0   :  { %v6024_v38 = vpop.eup %6023  ;;  %v3751_v34 = vmul.f32 1.442695, %v3731_v26  ;;  %v3753_v51 = vmul.f32 1.442695, %v3732_v5 }
 0x9e1   :  { %v6026_v59 = vpop.eup %6025  ;;  %v9703_v62 = vadd.f32 1.0, %v6024_v38  ;;  %v3624_v52 = vpop.f32.mrf.mxu0 }
 0x9e2   :  { %v3659_v53 = vpop.f32.mrf.mxu1  ;;  %v6028_v29 = vpop.eup %6027  ;;  %6033 = vpow2.f32 %v3751_v34  ;;  %v3672_v15 = vadd.f32 %v3624_v52, %v3482_v7  ;;  %v9717_v21 = vadd.f32 1.0, %v6026_v59 }
 0x9e3   :  { %v3673_v55 = vadd.f32 %v3659_v53, %v3535_v32  ;;  %6035 = vrcp.f32 %v9703_v62  ;;  %v9708_v0 = vadd.f32 1.0, %v6028_v29  ;;  %v9710_v45 = vpop.eup %6029  ;;  %v9755_v32 = vor.u32 1.1754944e-38, %v3812_v20 }
 0x9e4   :  { %6037 = vpow2.f32 %v3753_v51  ;;  %v3721_v16 = vadd.f32 %v9677_v3, %v3672_v15  ;;  %v9721_v14 = vpop.eup %6031  ;;  %v3772_v28 = vmul.f32 %v9710_v45, %v9689_v31  ;;  %v3870_v29 = vand.u32 2147483647, %v9703_v62 }
 0x9e5   :  { %v3722_v11 = vadd.f32 %v9677_v3, %v3673_v55  ;;  %6039 = vrcp.f32 %v9701_v49  ;;  %v9740_v36 = vmul.f32 %v9721_v14, %v9693_v2  ;;  %vm3866_vm3 = vweird.f32 %v9703_v62 }
 0x9e6   :  { %6041 = vrcp.f32 %v9708_v0  ;;  %v3733_v19 = vsub.f32 0.0, %v3721_v16  ;;  %v3773_v47 = vsub.f32 1.0, %v3772_v28  ;;  %vm9794_vm10 = vcmp.eq.f32.partialorder %v3870_v29, 8.507059e+37 }
 0x9e7   :  { %v3734_v40 = vsub.f32 0.0, %v3722_v11  ;;  %6043 = vrcp.f32 %v9705_v41  ;;  %vm3881_vm7 = vweird.f32 %v9708_v0  ;;  %v11447_v54 = vsub.f32 1.0, %v9740_v36 }
 0x9e8   :  { %v6034_v58 = vpop.eup %6033  ;;  %6045 = vrcp.f32 %v9712_v9  ;;  %v3755_v3 = vmul.f32 1.442695, %v3733_v19 }
 0x9e9   :  { %v3757_v37 = vmul.f32 1.442695, %v3734_v40  ;;  %v9727_v50 = vpop.eup %6035  ;;  %6047 = vrcp.f32 %v9717_v21  ;;  %v9730_v27 = vadd.f32 1.0, %v6034_v58  ;;  %v9775_v40 = vmul.f32 %v9710_v45, %v3773_v47 }
 0x9ea   :  { %v6038_v17 = vpop.eup %6037  ;;  %6049 = vpow2.f32 %v3755_v3  ;;  %v3862_v33 = vmul.f32 %v9727_v50, %v9703_v62  ;;  %v3872_v58 = vand.u32 2147483648, %v9703_v62  ;;  %vm3867_vm8 = vweird.f32 %v9727_v50 }
 0x9eb   :  { %v9742_v56 = vpop.eup %6039  ;;  %6051 = vrcp.f32 %v9730_v27  ;;  %v9745_v35 = vadd.f32 1.0, %v6038_v17  ;;  %v3902_v52 = vand.u32 2147483648, %v9730_v27  ;;  %v3900_v16 = vand.u32 2147483647, %v9730_v27  ;;  %vm9818_vm11 = vmor %vm3866_vm3, %vm3867_vm8 }
 0x9ec   :  { %v9748_v26 = vpop.eup %6041  ;;  %6053 = vpow2.f32 %v3757_v37  ;;  %v3863_v5 = vsub.f32 1.0, %v3862_v33  ;;  %v9772_v19 = vmul.f32 %v9742_v56, %v9701_v49  ;;  %vm3896_vm2 = vweird.f32 %v9730_v27 }
 0x9ed   :  { %v9752_v7 = vpop.eup %6043  ;;  %6055 = vrcp.f32 %v9745_v35  ;;  %v3877_v11 = vmul.f32 %v9748_v26, %v9708_v0  ;;  %v3917_v28 = vand.u32 2147483648, %v9745_v35  ;;  %v3915_v18 = vand.u32 2147483647, %v9745_v35 }
 0x9ee   :  { %v9759_v59 = vpop.eup %6045  ;;  %v3864_v53 = vmul.f32 %v9727_v50, %v3863_v5  ;;  %v9782_v3 = vmul.f32 %v9752_v7, %v9705_v41  ;;  %v3903_v5 = vor.u32 1.1754944e-38, %v3902_v52  ;;  %vm9803_vm6 = vcmp.eq.f32.partialorder %v3900_v16, 8.507059e+37 }
 0x9ef   :  { %v9765_v55 = vpop.eup %6047  ;;  %v3878_v51 = vsub.f32 1.0, %v3877_v11  ;;  %v3885_v52 = vand.u32 2147483647, %v9708_v0  ;;  %vm3911_vm9 = vweird.f32 %v9745_v35  ;;  %v9812_v44 = vor.u32 1.1754944e-38, %v3917_v28 }
 0x9f0   :  { %v6050_v57 = vpop.eup %6049  ;;  %v3865_v17 = vadd.f32 %v9727_v50, %v3864_v53  ;;  %v3873_v11 = vor.u32 1.1754944e-38, %v3872_v58  ;;  %v3887_v28 = vand.u32 2147483648, %v9708_v0  ;;  %vm3882_vm1 = vweird.f32 %v9748_v26 }
 0x9f1   :  { %v9784_v37 = vpop.eup %6051  ;;  %v9786_v20 = vadd.f32 1.0, %v6050_v57  ;;  %v3879_v58 = vmul.f32 %v9748_v26, %v3878_v51  ;;  %vm9834_vm13 = vcmp.eq.f32.partialorder %v3885_v52, 8.507059e+37  ;;  %vm9842_vm5 = vcmp.eq.f32.partialorder %v3915_v18, 8.507059e+37 }
 0x9f2   :  { %v6054_v33 = vpop.eup %6053  ;;  %v3892_v47 = vmul.f32 %v9784_v37, %v9730_v27  ;;  %vm3897_vm4 = vweird.f32 %v9784_v37  ;;  %v3832_v18 = vmul.f32 %v9759_v59, %v9712_v9  ;;  %v3855_v53 = vand.u32 2147483647, %v9717_v21 }
 0x9f3   :  { %v9798_v34 = vpop.eup %6055  ;;  %6057 = vrcp.f32 %v9786_v20  ;;  %v9801_v57 = vadd.f32 1.0, %v6054_v33  ;;  %v3932_v33 = vand.u32 2147483648, %v9786_v20  ;;  %v3930_v6 = vand.u32 2147483647, %v9786_v20  ;;  %vm9850_vm0 = vmor %vm3896_vm2, %vm3897_vm4 }
 0x9f4   :  { %v3893_v15 = vsub.f32 1.0, %v3892_v47  ;;  %v3907_v29 = vmul.f32 %v9798_v34, %v9745_v35  ;;  %v3869_v47 = vsel %vm9818_vm11, %v9727_v50, %v3865_v17  ;;  %vm3926_vm12 = vweird.f32 %v9786_v20  ;;  %vm9883_vm11 = vmor %vm3881_vm7, %vm3882_vm1 }
 0x9f5   :  { %6059 = vrcp.f32 %v9801_v57  ;;  %v3947_v22 = vand.u32 2147483648, %v9801_v57  ;;  %v3945_v50 = vand.u32 2147483647, %v9801_v57  ;;  %v3874_v51 = vsel %vm9794_vm10, %v3873_v11, %v3869_v47 }
 0x9f6   :  { %v3894_v12 = vmul.f32 %v9784_v37, %v3893_v15  ;;  %v3908_v62 = vsub.f32 1.0, %v3907_v29  ;;  %v3933_v52 = vor.u32 1.1754944e-38, %v3932_v33  ;;  %vm3912_vm14 = vweird.f32 %v9798_v34 }
 0x9f7   :  { %vm9859_vm3 = vcmp.eq.f32.partialorder %v3930_v6, 8.507059e+37  ;;  %vm3941_vm8 = vweird.f32 %v9801_v57  ;;  %v3888_v33 = vor.u32 1.1754944e-38, %v3887_v28  ;;  %v9869_v43 = vmul.f32 %v3874_v51, %v9483_v25  ;;  %vm9893_vm15 = vmor %vm3911_vm9, %vm3912_vm14 }
 0x9f8   :  { %v3895_v17 = vadd.f32 %v9784_v37, %v3894_v12  ;;  %v3909_v15 = vmul.f32 %v9798_v34, %v3908_v62  ;;  %v3880_v12 = vadd.f32 %v9748_v26, %v3879_v58  ;;  %v3948_v58 = vor.u32 1.1754944e-38, %v3947_v22 }
 0x9f9   :  { %v6058_v16 = vpop.eup %6057  ;;  %v3833_v13 = vsub.f32 1.0, %v3832_v18  ;;  %vm3836_vm2 = vweird.f32 %v9712_v9  ;;  %vm9873_vm10 = vcmp.eq.f32.partialorder %v3945_v50, 8.507059e+37  ;;  %vm3777_vm4 = vweird.f32 %v9710_v45 }
 0x9fa   :  { %v3922_v62 = vmul.f32 %v6058_v16, %v9786_v20  ;;  %v3899_v27 = vsel %vm9850_vm0, %v9784_v37, %v3895_v17  ;;  %v3910_v11 = vadd.f32 %v9798_v34, %v3909_v15  ;;  %v3840_v37 = vand.u32 2147483647, %v9712_v9 }
 0x9fb   :  { %v6060_v47 = vpop.eup %6059  ;;  %v3904_v63 = vsel %vm9803_vm6, %v3903_v5, %v3899_v27  ;;  %vm3927_vm0 = vweird.f32 %v6058_v16  ;;  %v3884_v0 = vsel %vm9883_vm11, %v9748_v26, %v3880_v12  ;;  %v3834_v5 = vmul.f32 %v9759_v59, %v3833_v13 }
 0x9fc   :  { %v3923_v6 = vsub.f32 1.0, %v3922_v62  ;;  %v3937_v4 = vmul.f32 %v6060_v47, %v9801_v57  ;;  %vm3837_vm6 = vweird.f32 %v9759_v59  ;;  %vm3942_vm1 = vweird.f32 %v6060_v47  ;;  %vm3928_vm11 = vmor %vm3926_vm12, %vm3927_vm0 }
 0x9fd   :  { %v3914_v35 = vsel %vm9893_vm15, %v9798_v34, %v3910_v11  ;;  %vm3776_vm9 = vweird.f32 %v9689_v31  ;;  %v3959_v17 = vmul.f32 %v3904_v63, %v9466_v24  ;;  %v3835_v26 = vadd.f32 %v9759_v59, %v3834_v5  ;;  %vm9920_vm15 = vmor %vm3836_vm2, %vm3837_vm6 }
 0x9fe   :  { %v3938_v28 = vsub.f32 1.0, %v3937_v4  ;;  %v3924_v50 = vmul.f32 %v6058_v16, %v3923_v6  ;;  %v3842_v13 = vand.u32 2147483648, %v9712_v9  ;;  %v3847_v15 = vmul.f32 %v9765_v55, %v9717_v21 }
 0x9ff   :  { %v3889_v34 = vsel %vm9834_vm13, %v3888_v33, %v3884_v0  ;;  %vm9924_vm14 = vcmp.eq.f32.partialorder %v3840_v37, 8.507059e+37  ;;  %vm3791_vm7 = vweird.f32 %v9693_v2  ;;  %v3919_v10 = vsel %vm9842_vm5, %v9812_v44, %v3914_v35  ;;  %vm3943_vm5 = vmor %vm3941_vm8, %vm3942_vm1 }
 0xa00   :  { %v3925_v4 = vadd.f32 %v6058_v16, %v3924_v50  ;;  %v3939_v51 = vmul.f32 %v6060_v47, %v3938_v28  ;;  %v3839_v9 = vsel %vm9920_vm15, %v9759_v59, %v3835_v26  ;;  %v3843_v18 = vor.u32 1.1754944e-38, %v3842_v13 }
 0xa01   :  { %v3848_v62 = vsub.f32 1.0, %v3847_v15  ;;  %v11439_v27 = vand.u32 2147483647, %v9701_v49  ;;  %vm3821_vm2 = vweird.f32 %v9705_v41  ;;  %v3857_v6 = vand.u32 2147483648, %v9717_v21 }
 0xa02   :  { %v3929_v20 = vsel %vm3928_vm11, %v6058_v16, %v3925_v4  ;;  %v3940_v33 = vadd.f32 %v6060_v47, %v3939_v51  ;;  %v3803_v44 = vsub.f32 1.0, %v9772_v19  ;;  %v11442_v29 = vand.u32 2147483647, %v9689_v31 }
 0xa03   :  { %vm9940_vm13 = vcmp.eq.f32.partialorder %v11439_v27, 8.507059e+37  ;;  %v3934_v63 = vsel %vm9859_vm3, %v3933_v52, %v3929_v20  ;;  %v3849_v16 = vmul.f32 %v9765_v55, %v3848_v62  ;;  %vm3851_vm0 = vweird.f32 %v9717_v21 }
 0xa04   :  { %vm9949_vm12 = vcmp.eq.f32.partialorder %v11442_v29, 8.507059e+37  ;;  %vm3852_vm6 = vweird.f32 %v9765_v55  ;;  %v3961_v19 = vmul.f32 %v3934_v63, %v9459_v1  ;;  %v3944_v22 = vsel %vm3943_vm5, %v6060_v47, %v3940_v33 }
 0xa05   :  { %v3844_v37 = vsel %vm9924_vm14, %v3843_v18, %v3839_v9  ;;  %v3949_v52 = vsel %vm9873_vm10, %v3948_v58, %v3944_v22  ;;  %v3850_v57 = vadd.f32 %v9765_v55, %v3849_v16  ;;  %v3804_v38 = vmul.f32 %v9742_v56, %v3803_v44  ;;  %vm9971_vm3 = vmor %vm3851_vm0, %vm3852_vm6 }
 0xa06   :  { %v3818_v0 = vsub.f32 1.0, %v9782_v3  ;;  %3973 = vmatpush.msrb.mxu0 %v3961_v19  ;;  %v3962_v5 = vmul.f32 %v3949_v52, %v9461_v8  ;;  %v3858_v47 = vor.u32 1.1754944e-38, %v3857_v6  ;;  %v3775_v21 = vadd.f32 %v9710_v45, %v9775_v40  ;;  %vm9990_vm10 = vmor %vm3776_vm9, %vm3777_vm4 }
 0xa07   :  { %v3789_v58 = vmul.f32 %v9721_v14, %v11447_v54  ;;  %v3854_v28 = vsel %vm9971_vm3, %v9765_v55, %v3850_v57  ;;  %v3805_v3 = vadd.f32 %v9742_v56, %v3804_v38  ;;  %vm3822_vm8 = vweird.f32 %v9752_v7 }
 0xa08   :  { %v3819_v8 = vmul.f32 %v9752_v7, %v3818_v0  ;;  %3996 = vmatpush.msrb.mxu1 %v3962_v5  ;;  %3974 = vmatpush.msrb.mxu0 %v3959_v17  ;;  %v3960_v36 = vmul.f32 %v3919_v10, %v9468_v42  ;;  %vm3856_vm1 = vcmp.eq.f32.partialorder %v3855_v53, 8.507059e+37  ;;  %vm11450_vm14 = vweird.f32 %v9742_v56  ;;  %vm3823_vm5 = vmor %vm3821_vm2, %vm3822_vm8 }
 0xa09   :  { %vm11451_vm11 = vweird.f32 %v9701_v49  ;;  %v3779_v55 = vsel %vm9990_vm10, %v9710_v45, %v3775_v21  ;;  %v3790_v31 = vadd.f32 %v9721_v14, %v3789_v58  ;;  %v3958_v50 = vmul.f32 %v3889_v34, %v9485_v30 }
 0xa0a   :  { %vm3808_vm15 = vmor %vm11451_vm11, %vm11450_vm14  ;;  %v3859_v35 = vsel %vm3856_vm1, %v3858_v47, %v3854_v28  ;;  %v3820_v17 = vadd.f32 %v9752_v7, %v3819_v8  ;;  %vm11452_vm4 = vweird.f32 %v9721_v14  ;;  %3997 = vmatpush.msrb.mxu1 %v3960_v36  ;;  %3975 = vmatpush.msrb.mxu0 %v9869_v43  ;;  %v3955_v49 = vmul.f32 %v3844_v37, %v9492_v39 }
 0xa0b   :  { %v3809_v26 = vsel %vm3808_vm15, %v9742_v56, %v3805_v3  ;;  %vm10010_vm9 = vmor %vm3791_vm7, %vm11452_vm4  ;;  %v11455_v56 = vand.u32 2147483648, %v9705_v41  ;;  %v11456_v39 = vand.u32 2147483647, %v9705_v41  ;;  %v11457_v4 = vand.u32 2147483648, %v9693_v2 }
 0xa0c   :  { %v3814_v45 = vsel %vm9940_vm13, %v9755_v32, %v3809_v26  ;;  %v3794_v15 = vsel %vm10010_vm9, %v9721_v14, %v3790_v31  ;;  %v3824_v43 = vsel %vm3823_vm5, %v9752_v7, %v3820_v17  ;;  %v3784_v32 = vsel %vm9949_vm12, %v9736_v23, %v3779_v55  ;;  %3998 = vmatpush.msrb.mxu1 %v3958_v50 }
 0xa0d   :  { %v3828_v13 = vor.u32 1.1754944e-38, %v11455_v56  ;;  %vm3826_vm7 = vcmp.eq.f32.partialorder %v11456_v39, 8.507059e+37  ;;  %v3798_v51 = vor.u32 1.1754944e-38, %v11457_v4  ;;  %3976 = vmatpush.msrb.mxu0 %v3955_v49  ;;  %v3956_v34 = vmul.f32 %v3859_v35, %v9494_v48  ;;  %v6130_v48 = vld [vmem:[%s10760_s6] sm:$0xff] }
 0xa0e   :  { %v3953_v24 = vmul.f32 %v3814_v45, %v9506_v46  ;;  %v11458_v14 = vand.u32 2147483647, %v9693_v2  ;;  %v3951_v23 = vmul.f32 %v3784_v32, %v9483_v25  ;;  %vm11459_vm2 = vcmask 392192   ;;  %v6131_v46 = vld [vmem:[%s10760_s6 + $0x8] sm:$0xff]  ;;  %v3074_v25 = vpop.xlane.xlu0 %3073 }
 0xa0f   :  { %v3829_v12 = vsel %vm3826_vm7, %v3828_v13, %v3824_v43  ;;  %3999 = vmatpush.msrb.mxu1 %v3956_v34  ;;  %vm11460_vm12 = vmmov %vm11459_vm2  ;;  %v10062_v6 = vmul.f32 %v3074_v25, %v11374_v61  ;;  %v11463_v25 = vld [vmem:[#allocation143_spill] sm:$0xff] }
 0xa10   :  { %vm3796_vm13 = vcmp.eq.f32.partialorder %v11458_v14, 8.507059e+37  ;;  %3977 = vmatpush.msrb.mxu0 %v3953_v24  ;;  %v3954_v41 = vmul.f32 %v3829_v12, %v9508_v60  ;;  %vm11461_vm0 = vmmov %vm11459_vm2  ;;  %v3083_v60 = vpop.xlane.xlu1 %3082 }
 0xa11   :  { %v3799_v7 = vsel %vm3796_vm13, %v3798_v51, %v3794_v15  ;;  %vm11462_vm6 = vmmov %vm11461_vm0  ;;  %v10057_v11 = vmul.f32 %v3083_v60, %v11374_v61  ;;  %v3182_v57 = vmul.f32 %v10062_v6, %v10062_v6  ;;  %vm11468_vm13 = vcmask 64512  }
 0xa12   :  { %4000 = vmatpush.msrb.mxu1 %v3954_v41  ;;  %3978 = vmatpush.msrb.mxu0 %v3951_v23  ;;  %v3952_v10 = vmul.f32 %v3799_v7, %v9485_v30  ;;  %v3080_v30 = vpop.xlane.xlu2 %3079 }
 0xa13   :  { %5650 = vmatmul.msk.f32.vlgmr.msrb.gmra.mxu0 %vm11459_vm2, %v6130_v48  ;;  %v3185_v63 = vmul.f32 %v10057_v11, %v10057_v11  ;;  %v10069_v16 = vmul.f32 %v3080_v30, %v11374_v61 }
 0xa14   :  { %4001 = vmatpush.msrb.mxu1 %v3952_v10 }
 0xa15   :  { %5652 = vmatmul.msk.f32.vlgmr.msrb.gmra.mxu1 %vm11460_vm12, %v6130_v48  ;;  %v3184_v47 = vmul.f32 %v10069_v16, %v10069_v16 }
 0xa16   :  { %v3086_v2 = vpop.xlane.xlu0 %3085 }
 0xa17   :  { %v10054_v27 = vmul.f32 %v3086_v2, %v11374_v61 }
 0xa18   :  { %v3143_v9 = vpop.xlane.xlu1 %3142 }
 0xa19   :  { %v3155_v33 = vmul.f32 %v3143_v9, %v11374_v61  ;;  %v3186_v44 = vmul.f32 %v10054_v27, %v10054_v27 }
 0xa1a   :  { %v3146_v18 = vpop.xlane.xlu2 %3145 }
 0xa1b   :  { %5651 = vmatmul.msk.f32.gmra.mxu0 %vm11461_vm0, %v6131_v46  ;;  %v3156_v20 = vmul.f32 %v3146_v18, %v11374_v61  ;;  %v3195_v53 = vsub.f32 %v3155_v33, %v3185_v63  ;;  %v11465_v33 = vld [vmem:[#allocation138_spill] sm:$0xff] }
 0xa1d   :  { %5653 = vmatmul.msk.f32.gmra.mxu1 %vm11462_vm6, %v6131_v46  ;;  %v3196_v22 = vsub.f32 %v3156_v20, %v3186_v44  ;;  %v3205_v21 = vadd.f32 1e-05, %v3195_v53  ;;  %v3175_v44 = vsub.f32 %v11465_v33, %v10054_v27  ;;  %v11467_v53 = vld [vmem:[#allocation137_spill] sm:$0xff]  ;;  %vm11469_vm6 = vmmov %vm11468_vm13 }
 0xa1e   :  { %v3134_v62 = vpop.xlane.xlu0 %3133 }
 0xa1f   :  { %v3152_v19 = vmul.f32 %v3134_v62, %v11374_v61  ;;  %v3206_v5 = vadd.f32 1e-05, %v3196_v22  ;;  %vm3293_vm1 = vweird.f32 %v3205_v21  ;;  %v11464_v62 = vld [vmem:[#allocation142_spill] sm:$0xff]  ;;  %v11466_v22 = vld [vmem:[#allocation141_spill] sm:$0xff] }
 0xa20   :  { %v3077_v29 = vpop.xlane.xlu1 %3076  ;;  %v3173_v20 = vsub.f32 %v11464_v62, %v10057_v11 }
 0xa21   :  { %v10073_v52 = vmul.f32 %v3077_v29, %v11374_v61  ;;  %v3192_v0 = vsub.f32 %v3152_v19, %v3182_v57  ;;  %6061 = vrsqrt.f32 %v3206_v5  ;;  %vm3303_vm8 = vweird.f32 %v3206_v5 }
 0xa22   :  { %v3140_v59 = vpop.xlane.xlu2 %3139  ;;  %6063 = vrsqrt.f32 %v3205_v21  ;;  %v3176_v57 = vsub.f32 %v11467_v53, %v10054_v27  ;;  %v6133_v27 = vld [vmem:[%s10761_s13 + $0x30] sm:$0xff] }
 0xa23   :  { %v3154_v38 = vmul.f32 %v3140_v59, %v11374_v61  ;;  %v3183_v54 = vmul.f32 %v10073_v52, %v10073_v52  ;;  %v3202_v28 = vadd.f32 1e-05, %v3192_v0 }
 0xa25   :  { %v3194_v58 = vsub.f32 %v3154_v38, %v3184_v47  ;;  %6065 = vrsqrt.f32 %v3202_v28  ;;  %vm3263_vm4 = vweird.f32 %v3202_v28  ;;  %v3167_v47 = vsub.f32 %v6133_v27, %v10062_v6 }
 0xa26   :  { %v3137_v37 = vpop.xlane.xlu0 %3136 }
 0xa27   :  { %v3153_v1 = vmul.f32 %v3137_v37, %v11374_v61  ;;  %v10083_v8 = vadd.f32 1e-05, %v3194_v58  ;;  %v6062_v36 = vpop.eup %6061  ;;  %v3174_v37 = vsub.f32 %v11466_v22, %v10057_v11  ;;  %v6134_v58 = vld [vmem:[%s10761_s13 + $0x38] sm:$0xff] }
 0xa28   :  { %v6064_v61 = vpop.eup %6063  ;;  %v3298_v55 = vmul.f32 %v6062_v36, %v3206_v5  ;;  %vm3304_vm3 = vweird.f32 %v6062_v36  ;;  %v6132_v5 = vld [vmem:[%s10762_s8] sm:$0xff] }
 0xa29   :  { %v3193_v3 = vsub.f32 %v3153_v1, %v3183_v54  ;;  %6067 = vrsqrt.f32 %v10083_v8  ;;  %v3288_v50 = vmul.f32 %v6064_v61, %v3205_v21  ;;  %vm3294_vm10 = vweird.f32 %v6064_v61  ;;  %vm3305_vm14 = vmor %vm3303_vm8, %vm3304_vm3 }
 0xa2a   :  { %v3299_v17 = vmul.f32 %v6062_v36, %v3298_v55  ;;  %vm3295_vm15 = vmor %vm3293_vm1, %vm3294_vm10  ;;  %vm3283_vm7 = vweird.f32 %v10083_v8  ;;  %vm11474_vm8 = vcmask 392192  }
 0xa2b   :  { %v10085_v40 = vadd.f32 1e-05, %v3193_v3  ;;  %v6066_v31 = vpop.eup %6065  ;;  %v3289_v49 = vmul.f32 %v6064_v61, %v3288_v50  ;;  %v11472_v50 = vld [vmem:[#allocation139_spill] sm:$0xff]  ;;  %vm11475_vm10 = vmmov %vm11474_vm8 }
 0xa2c   :  { %v3258_v26 = vmul.f32 %v6066_v31, %v3202_v28  ;;  %v3300_v13 = vmul.f32 0.5, %v3299_v17  ;;  %vm3264_vm11 = vweird.f32 %v6066_v31  ;;  %v3168_v28 = vsub.f32 %v6134_v58, %v10062_v6  ;;  %v11471_v6 = vld [vmem:[#allocation133_spill] sm:$0xff]  ;;  %vm11476_vm1 = vmmov %vm11474_vm8 }
 0xa2d   :  { %6069 = vrsqrt.f32 %v10085_v40  ;;  %v3290_v43 = vmul.f32 0.5, %v3289_v49  ;;  %vm3265_vm5 = vmor %vm3263_vm4, %vm3264_vm11  ;;  %vm3273_vm0 = vweird.f32 %v10085_v40  ;;  %v11473_v49 = vld [vmem:[#allocation130_spill] sm:$0xff] }
 0xa2e   :  { %v3259_v56 = vmul.f32 %v6066_v31, %v3258_v26  ;;  %v3301_v51 = vsub.f32 1.5, %v3300_v13  ;;  %v5658_v13 = vld [vmem:[%s10756_s2 + $0x120] sm:$0xff]  ;;  %vm11478_vm11 = vmmov %vm11476_vm1 }
 0xa2f   :  { %v10089_v35 = vpop.eup %6067  ;;  %v3291_v12 = vsub.f32 1.5, %v3290_v43  ;;  %v5661_v43 = vld [vmem:[%s10756_s2 + $0x138] sm:$0xff]  ;;  %vm11480_vm4 = vmmov %vm11476_vm1 }
 0xa30   :  { %v3278_v45 = vmul.f32 %v10089_v35, %v10083_v8  ;;  %v3260_v4 = vmul.f32 0.5, %v3259_v56  ;;  %v3302_v41 = vmul.f32 %v6062_v36, %v3301_v51  ;;  %vm3284_vm9 = vweird.f32 %v10089_v35  ;;  %v11470_v8 = vld [vmem:[#allocation131_spill] sm:$0xff]  ;;  %v5664_v51 = vld [vmem:[%s10756_s2 + $0x150] sm:$0xff] }
 0xa31   :  { %v3292_v46 = vmul.f32 %v6064_v61, %v3291_v12  ;;  %vm3285_vm12 = vmor %vm3283_vm7, %vm3284_vm9  ;;  %v5666_v12 = vld [vmem:[%s10756_s2 + $0x160] sm:$0xff] }
 0xa32   :  { %v3279_v39 = vmul.f32 %v10089_v35, %v3278_v45  ;;  %v3261_v7 = vsub.f32 1.5, %v3260_v4  ;;  %v3306_v18 = vsel %vm3305_vm14, %v6062_v36, %v3302_v41  ;;  %v3171_v36 = vsub.f32 %v11470_v8, %v10069_v16  ;;  %vm11477_vm14 = vmmov %vm11476_vm1  ;;  %v5663_v4 = vld [vmem:[%s10756_s2 + $0x148] sm:$0xff]  ;;  %v5669_v41 = vld [vmem:[%s10756_s2 + $0x178] sm:$0xff] }
 0xa33   :  { %v10091_v42 = vpop.eup %6069  ;;  %v3296_v63 = vsel %vm3295_vm15, %v6064_v61, %v3292_v46  ;;  %v10116_v0 = vmul.f32 %v3306_v18, %v3175_v44  ;;  %v10130_v21 = vmul.f32 %v3306_v18, %v3176_v57  ;;  %v3170_v45 = vsub.f32 %v11473_v49, %v10073_v52  ;;  %vm11479_vm15 = vmmov %vm11476_vm1 }
 0xa34   :  { %v3268_v15 = vmul.f32 %v10091_v42, %v10085_v40  ;;  %v3280_v14 = vmul.f32 0.5, %v3279_v39  ;;  %v3262_v30 = vmul.f32 %v6066_v31, %v3261_v7  ;;  %vm3274_vm2 = vweird.f32 %v10091_v42  ;;  %vm11481_vm9 = vmmov %vm11476_vm1  ;;  %v5662_v39 = vld [vmem:[%s10756_s2 + $0x140] sm:$0xff]  ;;  %v5668_v7 = vld [vmem:[%s10756_s2 + $0x170] sm:$0xff] }
 0xa35   :  { %v10132_v54 = vmul.f32 %v3296_v63, %v3173_v20  ;;  %v10147_v61 = vmul.f32 %v3296_v63, %v3174_v37  ;;  %vm3275_vm3 = vmor %vm3273_vm0, %vm3274_vm2  ;;  %v3169_v40 = vsub.f32 %v11471_v6, %v10073_v52  ;;  %v5659_v52 = vld [vmem:[%s10756_s2 + $0x128] sm:$0xff] }
 0xa36   :  { %v3269_v34 = vmul.f32 %v10091_v42, %v3268_v15  ;;  %v3281_v10 = vsub.f32 1.5, %v3280_v14  ;;  %v3266_v1 = vsel %vm3265_vm5, %v6066_v31, %v3262_v30  ;;  %v5660_v15 = vld [vmem:[%s10756_s2 + $0x130] sm:$0xff]  ;;  %vm11482_vm5 = vmmov %vm11476_vm1  ;;  %v5667_v14 = vld [vmem:[%s10756_s2 + $0x168] sm:$0xff] }
 0xa37   :  { %v10149_v55 = vmul.f32 %v3266_v1, %v3167_v47  ;;  %v10160_v26 = vmul.f32 %v3266_v1, %v3168_v28  ;;  %vm11483_vm7 = vmmov %vm11476_vm1  ;;  %v5656_v30 = vld [vmem:[%s10763_s12 + $0x20] sm:$0xff]  ;;  %v5657_v20 = vld [vmem:[%s10763_s12 + $0x28] sm:$0xff] }
 0xa38   :  { %v3270_v23 = vmul.f32 0.5, %v3269_v34  ;;  %v3282_v19 = vmul.f32 %v10089_v35, %v3281_v10  ;;  %vm11485_vm2 = vmmov %vm11476_vm1  ;;  %v5665_v34 = vld [vmem:[%s10756_s2 + $0x158] sm:$0xff] }
 0xa39   :  { %vm11487_vm0 = vmmov %vm11476_vm1 }
 0xa3a   :  { %v3271_v2 = vsub.f32 1.5, %v3270_v23  ;;  %v3286_v3 = vsel %vm3285_vm12, %v10089_v35, %v3282_v19  ;;  %v3172_v35 = vsub.f32 %v11472_v50, %v10069_v16  ;;  %vm11486_vm12 = vmmov %vm11476_vm1  ;;  %v11498_v23 = vld [vmem:[#allocation144_spill] sm:$0xff]  ;;  %v6136_v19 = vld [vmem:[%s10761_s13 + $0x28] sm:$0xff] }
 0xa3b   :  { %v10162_v17 = vmul.f32 %v3286_v3, %v3171_v36 }
 0xa3c   :  { %v3272_v11 = vmul.f32 %v10091_v42, %v3271_v2  ;;  %v10168_v56 = vmul.f32 %v3286_v3, %v3172_v35 }
 0xa3e   :  { %v3276_v31 = vsel %vm3275_vm3, %v10091_v42, %v3272_v11  ;;  %vm11489_vm3 = vmmov %vm11487_vm0 }
 0xa3f   :  { %v10170_v42 = vmul.f32 %v3276_v31, %v3169_v40  ;;  %v10174_v16 = vmul.f32 %v3276_v31, %v3170_v45 }
 0xa90   :  { %v10098_v32 = vpop.f32.mrf.mxu0 }
 0xa91   :  { %v3981_v10 = vadd.f32 %v10098_v32, %v11498_v23 }
 0xa92   :  { %v10101_v24 = vpop.f32.mrf.mxu1 }
 0xa93   :  { %v4004_v46 = vadd.f32 %v10101_v24, %v11498_v23  ;;  %v6135_v24 = vld [vmem:[%s10761_s13 + $0x20] sm:$0xff] }
 0xa98   :  { %v3983_v48 = vpop.f32.mrf.mxu0 }
 0xa99   :  { %v3984_v60 = vadd.f32 %v3983_v48, %v11463_v25 }
 0xa9a   :  { %v4006_v9 = vpop.f32.mrf.mxu1 }
 0xa9b   :  { %v4009_v29 = vmax.f32 %v3984_v60, 0.0  ;;  %v4007_v59 = vadd.f32 %v4006_v9, %v11463_v25  ;;  %v11499_v9 = vld [vmem:[#allocation145_spill] sm:$0xff] }
 0xa9d   :  { %v4010_v38 = vmax.f32 %v4007_v59, 0.0  ;;  %4026 = vmatpush.msra.mxu0 %v4009_v29 }
 0xa9e   :  { %5654 = vmatmul.msk.f32.vlgmr.msra.gmra.mxu0 %vm11468_vm13, %v6132_v5  ;;  %vm11484_vm13 = vmmov %vm11476_vm1 }
 0xa9f   :  { %4046 = vmatpush.msra.mxu1 %v4010_v38  ;;  %4192 = vmatpush.msrb.mxu0 %v10116_v0 }
 0xaa0   :  { %5655 = vmatmul.msk.f32.vlgmr.msra.gmra.mxu1 %vm11469_vm6, %v6132_v5  ;;  %vm11488_vm6 = vmmov %vm11487_vm0 }
 0xaa1   :  { %4245 = vmatpush.msrb.mxu1 %v10130_v21  ;;  %4193 = vmatpush.msrb.mxu0 %v10132_v54 }
 0xaa3   :  { %4246 = vmatpush.msrb.mxu1 %v10147_v61  ;;  %4194 = vmatpush.msrb.mxu0 %v10149_v55 }
 0xaa5   :  { %4247 = vmatpush.msrb.mxu1 %v10160_v26  ;;  %4195 = vmatpush.msrb.mxu0 %v10162_v17 }
 0xaa7   :  { %4248 = vmatpush.msrb.mxu1 %v10168_v56  ;;  %4196 = vmatpush.msrb.mxu0 %v10170_v42 }
 0xaa9   :  { %4249 = vmatpush.msrb.mxu1 %v10174_v16  ;;  %4197 = vmatpush.msrb.mxu0 %v10149_v55 }
 0xaaa   :  { %5682 = vmatmul.msk.f32.vlgmr.msrb.gmra.mxu0 %vm11474_vm8, %v5658_v13  ;;  %vm11490_vm8 = vmmov %vm11487_vm0 }
 0xaab   :  { %4250 = vmatpush.msrb.mxu1 %v10160_v26 }
 0xaac   :  { %5694 = vmatmul.msk.f32.vlgmr.msrb.gmra.mxu1 %vm11475_vm10, %v5658_v13  ;;  %vm11491_vm10 = vmmov %vm11487_vm0  ;;  %v4134_v13 = vpop.permute.xlu0 %4133 }
 0xab2   :  { %5683 = vmatmul.msk.f32.gmra.mxu0 %vm11476_vm1, %v5659_v52  ;;  %vm11492_vm1 = vmmov %vm11487_vm0 }
 0xab4   :  { %5695 = vmatmul.msk.f32.gmra.mxu1 %vm11477_vm14, %v5659_v52  ;;  %vm11493_vm14 = vmmov %vm11487_vm0 }
 0xaba   :  { %5684 = vmatmul.msk.f32.gmra.mxu0 %vm11478_vm11, %v5660_v15  ;;  %vm11494_vm11 = vmmov %vm11487_vm0 }
 0xabc   :  { %5696 = vmatmul.msk.f32.gmra.mxu1 %vm11479_vm15, %v5660_v15  ;;  %vm11495_vm15 = vmmov %vm11487_vm0  ;;  %v4144_v15 = vpop.permute.xlu1 %4143 }
 0xac2   :  { %5685 = vmatmul.msk.f32.gmra.mxu0 %vm11480_vm4, %v5661_v43  ;;  %vm11496_vm4 = vmmov %vm11487_vm0 }
 0xac4   :  { %5697 = vmatmul.msk.f32.gmra.mxu1 %vm11481_vm9, %v5661_v43  ;;  %vm11497_vm9 = vmmov %vm11487_vm0  ;;  %v4139_v43 = vpop.permute.xlu2 %4138 }
 0xaca   :  { %5686 = vmatmul.msk.f32.gmra.mxu0 %vm11482_vm5, %v5662_v39  ;;  %vm11502_vm5 = vmmov %vm11487_vm0 }
 0xacc   :  { %5698 = vmatmul.msk.f32.gmra.mxu1 %vm11483_vm7, %v5662_v39  ;;  %vm11503_vm7 = vmmov %vm11487_vm0 }
 0xad2   :  { %5687 = vmatmul.msk.f32.gmra.mxu0 %vm11484_vm13, %v5663_v4  ;;  %vm11504_vm13 = vmmov %vm11487_vm0 }
 0xad4   :  { %5699 = vmatmul.msk.f32.gmra.mxu1 %vm11485_vm2, %v5663_v4  ;;  %vm11505_vm2 = vmmov %vm11487_vm0 }
 0xada   :  { %5688 = vmatmul.msk.f32.gmra.mxu0 %vm11486_vm12, %v5664_v51  ;;  %vm11506_vm12 = vmmov %vm11487_vm0 }
 0xadc   :  { %5700 = vmatmul.msk.f32.gmra.mxu1 %vm11487_vm0, %v5664_v51 }
 0xae2   :  { %5689 = vmatmul.msk.f32.gmra.mxu0 %vm11488_vm6, %v5665_v34  ;;  %vm11507_vm6 = vmmov %vm11487_vm0 }
 0xae4   :  { %5701 = vmatmul.msk.f32.gmra.mxu1 %vm11489_vm3, %v5665_v34  ;;  %vm11508_vm3 = vmmov %vm11487_vm0 }
 0xaea   :  { %5690 = vmatmul.msk.f32.gmra.mxu0 %vm11490_vm8, %v5666_v12  ;;  %vm11509_vm8 = vmmov %vm11487_vm0 }
 0xaec   :  { %5702 = vmatmul.msk.f32.gmra.mxu1 %vm11491_vm10, %v5666_v12  ;;  %vm11510_vm10 = vmmov %vm11487_vm0 }
 0xaf2   :  { %5691 = vmatmul.msk.f32.gmra.mxu0 %vm11492_vm1, %v5667_v14  ;;  %vm11511_vm1 = vmmov %vm11487_vm0 }
 0xaf4   :  { %5703 = vmatmul.msk.f32.gmra.mxu1 %vm11493_vm14, %v5667_v14  ;;  %vm11512_vm14 = vmmov %vm11487_vm0 }
 0xafa   :  { %5692 = vmatmul.msk.f32.gmra.mxu0 %vm11494_vm11, %v5668_v7 }
 0xafc   :  { %5704 = vmatmul.msk.f32.gmra.mxu1 %vm11495_vm15, %v5668_v7 }
 0xb02   :  { %5693 = vmatmul.msk.f32.gmra.mxu0 %vm11496_vm4, %v5669_v41 }
 0xb04   :  { %5705 = vmatmul.msk.f32.gmra.mxu1 %vm11497_vm9, %v5669_v41 }
 0xb1b   :  { %v4028_v48 = vpop.f32.mrf.mxu0 }
 0xb1c   :  { %v4051_v60 = vadd.f32 %v4028_v48, %v3981_v10  ;;  %v4129_v10 = vpop.permute.xlu0 %4128 }
 0xb1d   :  { %v4048_v2 = vpop.f32.mrf.mxu1 }
 0xb1e   :  { %v4053_v18 = vadd.f32 %v4051_v60, %v11499_v9  ;;  %v4052_v62 = vadd.f32 %v4048_v2, %v4004_v46  ;;  %v4124_v2 = vpop.permute.xlu1 %4123 }
 0xb20   :  { %v4058_v33 = vadd.f32 %v5656_v30, %v4053_v18  ;;  %v4054_v32 = vadd.f32 %v4052_v62, %v11499_v9 }
 0xb22   :  { %v4792_v44 = vmul.f32 0.1, %v4058_v33  ;;  %v4059_v29 = vadd.f32 %v5657_v20, %v4054_v32  ;;  %v4119_v32 = vpop.permute.xlu2 %4118 }
 0xb24   :  { %v10254_v59 = vadd.f32 %v6135_v24, %v4792_v44  ;;  %v4793_v63 = vmul.f32 0.1, %v4059_v29 }
 0xb26   :  { %11500 = vst [vmem:[#allocation135_spill] sm:$0xff] %v10254_v59  ;;  %v10263_v22 = vadd.f32 %v6136_v19, %v4793_v63 }
 0xb27   :  { %5738 = vst [vmem:[%s10761_s13 + $0x40] sm:$0xff] %v10254_v59  ;;  %v10265_v37 = vpop.f32.mrf.mxu0 }
 0xb28   :  { %11501 = vst [vmem:[#allocation140_spill] sm:$0xff] %v10263_v22 }
 0xb29   :  { %5739 = vst [vmem:[%s10761_s13 + $0x48] sm:$0xff] %v10263_v22  ;;  %v10271_v53 = vpop.f32.mrf.mxu1 }
 0xb2f   :  { %v10273_v57 = vpop.f32.mrf.mxu0 }
 0xb31   :  { %v10275_v38 = vpop.f32.mrf.mxu1 }
 0xb37   :  { %v10277_v5 = vpop.f32.mrf.mxu0 }
 0xb39   :  { %v10279_v1 = vpop.f32.mrf.mxu1 }
 0xb3f   :  { %v10281_v11 = vpop.f32.mrf.mxu0 }
 0xb41   :  { %v10283_v27 = vpop.f32.mrf.mxu1 }
 0xb47   :  { %v10285_v47 = vpop.f32.mrf.mxu0 }
 0xb49   :  { %v10287_v58 = vpop.f32.mrf.mxu1 }
 0xb4f   :  { %v10289_v28 = vpop.f32.mrf.mxu0 }
 0xb51   :  { %v10291_v3 = vpop.f32.mrf.mxu1 }
 0xb57   :  { %v4217_v8 = vpop.f32.mrf.mxu0 }
 0xb58   :  { %v4218_v44 = vadd.f32 %v4217_v8, %v4119_v32  ;;  %v5707_v8 = vld [vmem:[%s10759_s4 + $0x98] sm:$0xff] }
 0xb59   :  { %v4270_v36 = vpop.f32.mrf.mxu1 }
 0xb5a   :  { %v4271_v19 = vadd.f32 %v4270_v36, %v4119_v32  ;;  %v5708_v36 = vld [vmem:[%s10759_s4 + $0xa0] sm:$0xff] }
 0xb5f   :  { %v4220_v6 = vpop.f32.mrf.mxu0 }
 0xb60   :  { %v4221_v18 = vadd.f32 %v4220_v6, %v4124_v2  ;;  %v5706_v6 = vld [vmem:[%s10759_s4 + $0x90] sm:$0xff] }
 0xb61   :  { %v4273_v40 = vpop.f32.mrf.mxu1 }
 0xb62   :  { %v4274_v29 = vadd.f32 %v4273_v40, %v4124_v2  ;;  %v5709_v40 = vld [vmem:[%s10759_s4 + $0xa8] sm:$0xff] }
 0xb67   :  { %v4223_v31 = vpop.f32.mrf.mxu0 }
 0xb68   :  { %v4224_v48 = vadd.f32 %v4223_v31, %v4129_v10  ;;  %v4290_v31 = vmax.f32 %v4221_v18, 0.0 }
 0xb69   :  { %v4276_v50 = vpop.f32.mrf.mxu1 }
 0xb6a   :  { %v4277_v62 = vadd.f32 %v4276_v50, %v4129_v10  ;;  %v4292_v24 = vmax.f32 %v4224_v48, 0.0  ;;  %v4289_v50 = vmax.f32 %v4271_v19, 0.0 }
 0xb6f   :  { %v4226_v35 = vpop.f32.mrf.mxu0 }
 0xb70   :  { %v4227_v12 = vadd.f32 %v4226_v35, %v4134_v13  ;;  %v4293_v35 = vmax.f32 %v4277_v62, 0.0 }
 0xb71   :  { %v4279_v49 = vpop.f32.mrf.mxu1 }
 0xb72   :  { %v4280_v46 = vadd.f32 %v4279_v49, %v4134_v13  ;;  %v4294_v20 = vmax.f32 %v4227_v12, 0.0  ;;  %v4288_v49 = vmax.f32 %v4218_v44, 0.0  ;;  %v5710_v13 = vld [vmem:[%s10759_s4 + $0xb0] sm:$0xff] }
 0xb74   :  { %v4295_v63 = vmax.f32 %v4280_v46, 0.0 }
 0xb77   :  { %v4229_v45 = vpop.f32.mrf.mxu0 }
 0xb78   :  { %v4230_v4 = vadd.f32 %v4229_v45, %v4139_v43  ;;  %v4291_v45 = vmax.f32 %v4274_v29, 0.0 }
 0xb79   :  { %v4282_v52 = vpop.f32.mrf.mxu1 }
 0xb7a   :  { %v4283_v14 = vadd.f32 %v4282_v52, %v4139_v43  ;;  %v4296_v60 = vmax.f32 %v4230_v4, 0.0  ;;  %v5711_v52 = vld [vmem:[%s10759_s4 + $0xb8] sm:$0xff]  ;;  %v10323_v43 = vpop.permute.xlu1 %4108 }
 0xb7c   :  { %v4297_v33 = vmax.f32 %v4283_v14, 0.0 }
 0xb7f   :  { %v4232_v39 = vpop.f32.mrf.mxu0 }
 0xb80   :  { %v4233_v51 = vadd.f32 %v4232_v39, %v4144_v15  ;;  %v10325_v39 = vpop.permute.xlu0 %4113 }
 0xb81   :  { %v4285_v34 = vpop.f32.mrf.mxu1 }
 0xb82   :  { %v4298_v7 = vmax.f32 %v4233_v51, 0.0  ;;  %v4286_v41 = vadd.f32 %v4285_v34, %v4144_v15  ;;  %v4104_v15 = vpop.permute.xlu2 %4103  ;;  %v4099_v51 = vpop.permute.xlu1 %4098 }
 0xb83   :  { %v4206_v29 = vadd.f32 %v10277_v5, %v4099_v51  ;;  %v4209_v5 = vadd.f32 %v10281_v11, %v4104_v15 }
 0xb84   :  { %v4299_v30 = vmax.f32 %v4286_v41, 0.0  ;;  %4335 = vmatpush.msrb.mxu2 %v4298_v7 }
 0xb86   :  { %4370 = vmatpush.msrb.mxu3 %v4299_v30  ;;  %4336 = vmatpush.msrb.mxu2 %v4296_v60 }
 0xb88   :  { %4371 = vmatpush.msrb.mxu3 %v4297_v33  ;;  %4337 = vmatpush.msrb.mxu2 %v4294_v20  ;;  %v10329_v34 = vpop.permute.xlu0 %4441 }
 0xb8a   :  { %4372 = vmatpush.msrb.mxu3 %v4295_v63  ;;  %4338 = vmatpush.msrb.mxu2 %v4292_v24  ;;  %v10327_v4 = vpop.permute.xlu2 %4436  ;;  %v4432_v10 = vpop.permute.xlu1 %4431 }
 0xb8c   :  { %4373 = vmatpush.msrb.mxu3 %v4293_v35  ;;  %4339 = vmatpush.msrb.mxu2 %v4290_v31  ;;  %v4259_v35 = vadd.f32 %v10279_v1, %v4099_v51  ;;  %v4262_v1 = vadd.f32 %v10283_v27, %v4104_v15  ;;  %v4265_v15 = vadd.f32 %v10287_v58, %v10323_v43 }
 0xb8e   :  { %4374 = vmatpush.msrb.mxu3 %v4291_v45  ;;  %4340 = vmatpush.msrb.mxu2 %v4288_v49 }
 0xb8f   :  { %5712 = vmatmul.msk.f32.vlgmr.msrb.gmra.mxu2 %vm11502_vm5, %v5706_v6 }
 0xb90   :  { %4375 = vmatpush.msrb.mxu3 %v4289_v50  ;;  %v4094_v60 = vpop.permute.xlu0 %4093 }
 0xb91   :  { %5718 = vmatmul.msk.f32.vlgmr.msrb.gmra.mxu3 %vm11503_vm7, %v5706_v6  ;;  %v4203_v20 = vadd.f32 %v10273_v57, %v4094_v60  ;;  %v4256_v32 = vadd.f32 %v10275_v38, %v4094_v60 }
 0xb92   :  { %v4089_v14 = vpop.permute.xlu2 %4088  ;;  %v4422_v31 = vpop.permute.xlu1 %4421 }
 0xb93   :  { %v4200_v41 = vadd.f32 %v10265_v37, %v4089_v14  ;;  %v4253_v30 = vadd.f32 %v10271_v53, %v4089_v14 }
 0xb97   :  { %5713 = vmatmul.msk.f32.gmra.mxu2 %vm11504_vm13, %v5707_v8 }
 0xb98   :  { %v4427_v6 = vpop.permute.xlu0 %4426 }
 0xb99   :  { %5719 = vmatmul.msk.f32.gmra.mxu3 %vm11505_vm2, %v5707_v8 }
 0xb9a   :  { %v4417_v18 = vpop.permute.xlu2 %4416 }
 0xb9f   :  { %5714 = vmatmul.msk.f32.gmra.mxu2 %vm11506_vm12, %v5708_v36 }
 0xba1   :  { %5720 = vmatmul.msk.f32.gmra.mxu3 %vm11487_vm0, %v5708_v36 }
 0xba7   :  { %5715 = vmatmul.msk.f32.gmra.mxu2 %vm11507_vm6, %v5709_v40 }
 0xba9   :  { %5721 = vmatmul.msk.f32.gmra.mxu3 %vm11508_vm3, %v5709_v40 }
 0xbaf   :  { %5716 = vmatmul.msk.f32.gmra.mxu2 %vm11509_vm8, %v5710_v13 }
 0xbb1   :  { %5722 = vmatmul.msk.f32.gmra.mxu3 %vm11510_vm10, %v5710_v13 }
 0xbb7   :  { %5717 = vmatmul.msk.f32.gmra.mxu2 %vm11511_vm1, %v5711_v52 }
 0xbb9   :  { %5723 = vmatmul.msk.f32.gmra.mxu3 %vm11512_vm14, %v5711_v52 }
 0xc12   :  { %v4342_v12 = vpop.f32.mrf.mxu2 }
 0xc13   :  { %v4395_v48 = vadd.f32 %v4342_v12, %v4200_v41 }
 0xc14   :  { %v4377_v7 = vpop.f32.mrf.mxu3 }
 0xc15   :  { %v4396_v62 = vadd.f32 %v4377_v7, %v4253_v30  ;;  %v4444_v33 = vadd.f32 %v4417_v18, %v4395_v48 }
 0xc17   :  { %v4445_v24 = vadd.f32 %v4417_v18, %v4396_v62  ;;  %v4456_v37 = vsub.f32 0.0, %v4444_v33 }
 0xc19   :  { %v4457_v50 = vsub.f32 0.0, %v4445_v24  ;;  %v4468_v36 = vmul.f32 1.442695, %v4456_v37 }
 0xc1a   :  { %v4345_v46 = vpop.f32.mrf.mxu2 }
 0xc1b   :  { %v4397_v44 = vadd.f32 %v4345_v46, %v4203_v20  ;;  %v4470_v52 = vmul.f32 1.442695, %v4457_v50  ;;  %6071 = vpow2.f32 %v4468_v36  ;;  %v4215_v50 = vadd.f32 %v10289_v28, %v10325_v39 }
 0xc1c   :  { %v4380_v2 = vpop.f32.mrf.mxu3 }
 0xc1d   :  { %v4398_v63 = vadd.f32 %v4380_v2, %v4256_v32  ;;  %v4446_v53 = vadd.f32 %v4422_v31, %v4397_v44  ;;  %6073 = vpow2.f32 %v4470_v52  ;;  %v4212_v32 = vadd.f32 %v10285_v47, %v10323_v43 }
 0xc1e   :  { %v4268_v52 = vadd.f32 %v10291_v3, %v10325_v39 }
 0xc1f   :  { %v4447_v8 = vadd.f32 %v4422_v31, %v4398_v63  ;;  %v4458_v38 = vsub.f32 0.0, %v4446_v53 }
 0xc21   :  { %v4459_v12 = vsub.f32 0.0, %v4447_v8  ;;  %v4472_v41 = vmul.f32 1.442695, %v4458_v38  ;;  %v6072_v33 = vpop.eup %6071 }
 0xc22   :  { %v4348_v19 = vpop.f32.mrf.mxu2  ;;  %v10343_v63 = vadd.f32 1.0, %v6072_v33 }
 0xc23   :  { %v4399_v49 = vadd.f32 %v4348_v19, %v4206_v29  ;;  %v4474_v60 = vmul.f32 1.442695, %v4459_v12  ;;  %6075 = vpow2.f32 %v4472_v41  ;;  %v6074_v24 = vpop.eup %6073 }
 0xc24   :  { %v4383_v45 = vpop.f32.mrf.mxu3 }
 0xc25   :  { %v4400_v57 = vadd.f32 %v4383_v45, %v4259_v35  ;;  %v4448_v40 = vadd.f32 %v4427_v6, %v4399_v49  ;;  %6077 = vpow2.f32 %v4474_v60  ;;  %v10346_v49 = vadd.f32 1.0, %v6074_v24 }
 0xc27   :  { %v4449_v13 = vadd.f32 %v4427_v6, %v4400_v57  ;;  %v4460_v14 = vsub.f32 0.0, %v4448_v40 }
 0xc29   :  { %v4461_v48 = vsub.f32 0.0, %v4449_v13  ;;  %v4476_v18 = vmul.f32 1.442695, %v4460_v14  ;;  %v6076_v35 = vpop.eup %6075 }
 0xc2a   :  { %v4351_v7 = vpop.f32.mrf.mxu2  ;;  %v10353_v40 = vadd.f32 1.0, %v6076_v35 }
 0xc2b   :  { %v4401_v51 = vadd.f32 %v4351_v7, %v4209_v5  ;;  %v4478_v11 = vmul.f32 1.442695, %v4461_v48  ;;  %6079 = vpow2.f32 %v4476_v18  ;;  %v6078_v53 = vpop.eup %6077 }
 0xc2c   :  { %v4386_v46 = vpop.f32.mrf.mxu3  ;;  %v10359_v14 = vadd.f32 1.0, %v6078_v53 }
 0xc2d   :  { %v4450_v30 = vadd.f32 %v4432_v10, %v4401_v51  ;;  %v4402_v2 = vadd.f32 %v4386_v46, %v4262_v1 }
 0xc2f   :  { %v4462_v62 = vsub.f32 0.0, %v4450_v30  ;;  %v4451_v20 = vadd.f32 %v4432_v10, %v4402_v2  ;;  %v4515_v2 = vand.u32 2147483648, %v10343_v63 }
 0xc31   :  { %v4480_v44 = vmul.f32 1.442695, %v4462_v62  ;;  %v4463_v27 = vsub.f32 0.0, %v4451_v20  ;;  %v6080_v45 = vpop.eup %6079 }
 0xc32   :  { %v4354_v29 = vpop.f32.mrf.mxu2  ;;  %v10366_v51 = vadd.f32 1.0, %v6080_v45 }
 0xc33   :  { %6081 = vpow2.f32 %v4480_v44  ;;  %v4482_v37 = vmul.f32 1.442695, %v4463_v27  ;;  %v4403_v10 = vadd.f32 %v4354_v29, %v4212_v32 }
 0xc34   :  { %6083 = vpow2.f32 %v4478_v11  ;;  %v4389_v19 = vpop.f32.mrf.mxu3 }
 0xc35   :  { %6085 = vpow2.f32 %v4482_v37  ;;  %v4452_v31 = vadd.f32 %v10327_v4, %v4403_v10  ;;  %v4404_v47 = vadd.f32 %v4389_v19, %v4265_v15  ;;  %v10399_v19 = vor.u32 1.1754944e-38, %v4515_v2 }
 0xc36   :  { %6087 = vrcp.f32 %v10343_v63 }
 0xc37   :  { %v4464_v58 = vsub.f32 0.0, %v4452_v31  ;;  %v4453_v43 = vadd.f32 %v10327_v4, %v4404_v47  ;;  %6089 = vrcp.f32 %v10346_v49 }
 0xc39   :  { %v6082_v6 = vpop.eup %6081  ;;  %v4484_v8 = vmul.f32 1.442695, %v4464_v58  ;;  %v4465_v57 = vsub.f32 0.0, %v4453_v43 }
 0xc3a   :  { %v6084_v36 = vpop.eup %6083  ;;  %v10355_v38 = vadd.f32 1.0, %v6082_v6  ;;  %v4357_v13 = vpop.f32.mrf.mxu2 }
 0xc3b   :  { %v6086_v5 = vpop.eup %6085  ;;  %6091 = vpow2.f32 %v4484_v8  ;;  %v4486_v4 = vmul.f32 1.442695, %v4465_v57  ;;  %v4405_v12 = vadd.f32 %v4357_v13, %v4215_v50  ;;  %v10370_v3 = vadd.f32 1.0, %v6084_v36 }
 0xc3c   :  { %6093 = vrcp.f32 %v10355_v38  ;;  %v10362_v28 = vadd.f32 1.0, %v6086_v5  ;;  %v4392_v7 = vpop.f32.mrf.mxu3  ;;  %v10364_v1 = vpop.eup %6087  ;;  %vm4599_vm11 = vweird.f32 %v10355_v38 }
 0xc3d   :  { %6095 = vpow2.f32 %v4486_v4  ;;  %v4454_v41 = vadd.f32 %v10329_v34, %v4405_v12  ;;  %v4406_v48 = vadd.f32 %v4392_v7, %v4268_v52  ;;  %v10374_v60 = vpop.eup %6089  ;;  %v4505_v30 = vmul.f32 %v10364_v1, %v10343_v63 }
 0xc3e   :  { %6097 = vrcp.f32 %v10353_v40  ;;  %v10392_v29 = vmul.f32 %v10374_v60, %v10346_v49  ;;  %vm4614_vm5 = vweird.f32 %v10362_v28  ;;  %v4618_v53 = vand.u32 2147483647, %v10362_v28 }
 0xc3f   :  { %6099 = vrcp.f32 %v10362_v28  ;;  %v4466_v39 = vsub.f32 0.0, %v4454_v41  ;;  %v4455_v46 = vadd.f32 %v10329_v34, %v4406_v48  ;;  %v4545_v34 = vand.u32 2147483648, %v10353_v40 }
 0xc40   :  { %6101 = vrcp.f32 %v10359_v14  ;;  %v4506_v10 = vsub.f32 1.0, %v4505_v30  ;;  %v4603_v48 = vand.u32 2147483647, %v10355_v38  ;;  %v4620_v13 = vand.u32 2147483648, %v10362_v28 }
 0xc41   :  { %v6092_v18 = vpop.eup %6091  ;;  %6103 = vrcp.f32 %v10366_v51  ;;  %v4488_v62 = vmul.f32 1.442695, %v4466_v39  ;;  %v4467_v20 = vsub.f32 0.0, %v4455_v46  ;;  %v10409_v45 = vor.u32 1.1754944e-38, %v4545_v34 }
 0xc42   :  { %v10381_v33 = vpop.eup %6093  ;;  %6105 = vrcp.f32 %v10370_v3  ;;  %v10384_v11 = vadd.f32 1.0, %v6092_v18  ;;  %v10425_v7 = vmul.f32 %v10364_v1, %v4506_v10  ;;  %v4605_v39 = vand.u32 2147483648, %v10355_v38 }
 0xc43   :  { %v6096_v44 = vpop.eup %6095  ;;  %6107 = vpow2.f32 %v4488_v62  ;;  %v4490_v27 = vmul.f32 1.442695, %v4467_v20  ;;  %v4595_v15 = vmul.f32 %v10381_v33, %v10355_v38  ;;  %vm4600_vm15 = vweird.f32 %v10381_v33 }
 0xc44   :  { %v10394_v24 = vpop.eup %6097  ;;  %6109 = vrcp.f32 %v10384_v11  ;;  %v10397_v37 = vadd.f32 1.0, %v6096_v44  ;;  %v4635_v8 = vand.u32 2147483648, %v10384_v11  ;;  %v4633_v52 = vand.u32 2147483647, %v10384_v11  ;;  %vm10467_vm13 = vmor %vm4599_vm11, %vm4600_vm15 }
 0xc45   :  { %v10401_v31 = vpop.eup %6099  ;;  %6111 = vpow2.f32 %v4490_v27  ;;  %v4596_v47 = vsub.f32 1.0, %v4595_v15  ;;  %v10431_v46 = vmul.f32 %v10394_v24, %v10353_v40  ;;  %vm4629_vm4 = vweird.f32 %v10384_v11 }
 0xc46   :  { %v10405_v58 = vpop.eup %6101  ;;  %6113 = vrcp.f32 %v10397_v37  ;;  %v4650_v4 = vand.u32 2147483648, %v10397_v37  ;;  %v4610_v12 = vmul.f32 %v10401_v31, %v10362_v28  ;;  %v4636_v44 = vor.u32 1.1754944e-38, %v4635_v8 }
 0xc47   :  { %v10412_v50 = vpop.eup %6103  ;;  %v4597_v57 = vmul.f32 %v10381_v33, %v4596_v47  ;;  %v10435_v30 = vmul.f32 %v10405_v58, %v10359_v14  ;;  %v4648_v27 = vand.u32 2147483647, %v10397_v37  ;;  %vm10453_vm9 = vcmp.eq.f32.partialorder %v4633_v52, 8.507059e+37 }
 0xc48   :  { %v10418_v5 = vpop.eup %6105  ;;  %vm4644_vm7 = vweird.f32 %v10397_v37  ;;  %vm10471_vm2 = vcmp.eq.f32.partialorder %v4603_v48, 8.507059e+37  ;;  %vm4615_vm0 = vweird.f32 %v10401_v31  ;;  %vm10518_vm11 = vcmp.eq.f32.partialorder %v4618_v53, 8.507059e+37 }
 0xc49   :  { %v6108_v41 = vpop.eup %6107  ;;  %v4598_v62 = vadd.f32 %v10381_v33, %v4597_v57  ;;  %v10457_v57 = vor.u32 1.1754944e-38, %v4650_v4  ;;  %vm10492_vm3 = vcmp.eq.f32.partialorder %v4648_v27, 8.507059e+37  ;;  %v4565_v27 = vmul.f32 %v10412_v50, %v10366_v51 }
 0xc4a   :  { %v10437_v2 = vpop.eup %6109  ;;  %v10439_v18 = vadd.f32 1.0, %v6108_v41  ;;  %v4611_v41 = vsub.f32 1.0, %v4610_v12  ;;  %v4606_v12 = vor.u32 1.1754944e-38, %v4605_v39  ;;  %vm4510_vm15 = vweird.f32 %v10364_v1 }
 0xc4b   :  { %v6112_v20 = vpop.eup %6111  ;;  %v4625_v34 = vmul.f32 %v10437_v2, %v10384_v11  ;;  %vm4630_vm12 = vweird.f32 %v10437_v2  ;;  %v4566_v23 = vsub.f32 1.0, %v4565_v27  ;;  %v11537_v27 = vand.u32 2147483647, %v10353_v40 }
 0xc4c   :  { %v10448_v15 = vpop.eup %6113  ;;  %6115 = vrcp.f32 %v10439_v18  ;;  %v10451_v10 = vadd.f32 1.0, %v6112_v20  ;;  %v4665_v20 = vand.u32 2147483648, %v10439_v18  ;;  %v4663_v38 = vand.u32 2147483647, %v10439_v18  ;;  %vm10500_vm8 = vmor %vm4629_vm4, %vm4630_vm12 }
 0xc4d   :  { %v4626_v35 = vsub.f32 1.0, %v4625_v34  ;;  %v4640_v8 = vmul.f32 %v10448_v15, %v10397_v37  ;;  %v4602_v34 = vsel %vm10467_vm13, %v10381_v33, %v4598_v62  ;;  %v4612_v39 = vmul.f32 %v10401_v31, %v4611_v41  ;;  %vm10537_vm13 = vmor %vm4614_vm5, %vm4615_vm0 }
 0xc4e   :  { %6117 = vrcp.f32 %v10451_v10  ;;  %v4680_v36 = vand.u32 2147483648, %v10451_v10  ;;  %vm4659_vm6 = vweird.f32 %v10439_v18  ;;  %v4678_v33 = vand.u32 2147483647, %v10451_v10 }
 0xc4f   :  { %v4627_v6 = vmul.f32 %v10437_v2, %v4626_v35  ;;  %v4641_v48 = vsub.f32 1.0, %v4640_v8  ;;  %v4607_v8 = vsel %vm10471_vm2, %v4606_v12, %v4602_v34  ;;  %v4666_v32 = vor.u32 1.1754944e-38, %v4665_v20 }
 0xc50   :  { %vm4645_vm10 = vweird.f32 %v10448_v15  ;;  %vm10509_vm1 = vcmp.eq.f32.partialorder %v4663_v38, 8.507059e+37  ;;  %vm4674_vm14 = vweird.f32 %v10451_v10  ;;  %v10523_v9 = vmul.f32 %v4607_v8, %v10149_v55 }
 0xc51   :  { %v4628_v62 = vadd.f32 %v10437_v2, %v4627_v6  ;;  %v4642_v52 = vmul.f32 %v10448_v15, %v4641_v48  ;;  %v4613_v6 = vadd.f32 %v10401_v31, %v4612_v39  ;;  %v4681_v39 = vor.u32 1.1754944e-38, %v4680_v36  ;;  %vm10546_vm12 = vmor %vm4644_vm7, %vm4645_vm10 }
 0xc52   :  { %v6116_v41 = vpop.eup %6115  ;;  %v4621_v38 = vor.u32 1.1754944e-38, %v4620_v13  ;;  %vm10527_vm4 = vcmp.eq.f32.partialorder %v4678_v33, 8.507059e+37  ;;  %vm4569_vm2 = vweird.f32 %v10366_v51  ;;  %v4567_v28 = vmul.f32 %v10412_v50, %v4566_v23 }
 0xc53   :  { %v4655_v48 = vmul.f32 %v6116_v41, %v10439_v18  ;;  %v4632_v11 = vsel %vm10500_vm8, %v10437_v2, %v4628_v62  ;;  %v4643_v12 = vadd.f32 %v10448_v15, %v4642_v52  ;;  %v4617_v2 = vsel %vm10537_vm13, %v10401_v31, %v4613_v6 }
 0xc54   :  { %v6118_v34 = vpop.eup %6117  ;;  %v4637_v53 = vsel %vm10453_vm9, %v4636_v44, %v4632_v11  ;;  %vm4570_vm9 = vweird.f32 %v10412_v50  ;;  %v4573_v44 = vand.u32 2147483647, %v10366_v51  ;;  %vm4540_vm5 = vweird.f32 %v10394_v24 }
 0xc55   :  { %v4656_v22 = vsub.f32 1.0, %v4655_v48  ;;  %v4670_v59 = vmul.f32 %v6118_v34, %v10451_v10  ;;  %vm4509_vm0 = vweird.f32 %v10343_v63  ;;  %vm4660_vm7 = vweird.f32 %v6116_v41  ;;  %vm10571_vm13 = vmor %vm4569_vm2, %vm4570_vm9  ;;  %v6139_v48 = vld [vmem:[%s10762_s8] sm:$0xff] }
 0xc56   :  { %v4647_v33 = vsel %vm10546_vm12, %v10448_v15, %v4643_v12  ;;  %vm4675_vm8 = vweird.f32 %v6118_v34  ;;  %v4692_v31 = vmul.f32 %v4637_v53, %v10132_v54  ;;  %v4568_v23 = vadd.f32 %v10412_v50, %v4567_v28  ;;  %vm4661_vm12 = vmor %vm4659_vm6, %vm4660_vm7 }
 0xc57   :  { %v4671_v47 = vsub.f32 1.0, %v4670_v59  ;;  %v4657_v37 = vmul.f32 %v6116_v41, %v4656_v22  ;;  %v4575_v62 = vand.u32 2147483648, %v10366_v51  ;;  %vm4539_vm10 = vweird.f32 %v10353_v40  ;;  %vm4676_vm7 = vmor %vm4674_vm14, %vm4675_vm8 }
 0xc58   :  { %v4622_v59 = vsel %vm10518_vm11, %v4621_v38, %v4617_v2  ;;  %v4580_v54 = vmul.f32 %v10418_v5, %v10370_v3  ;;  %v4652_v15 = vsel %vm10492_vm3, %v10457_v57, %v4647_v33  ;;  %v4572_v6 = vsel %vm10571_vm13, %v10412_v50, %v4568_v23 }
 0xc59   :  { %v4658_v52 = vadd.f32 %v6116_v41, %v4657_v37  ;;  %v4672_v8 = vmul.f32 %v6118_v34, %v4671_v47  ;;  %vm10585_vm11 = vcmp.eq.f32.partialorder %v4573_v44, 8.507059e+37  ;;  %vm4584_vm2 = vweird.f32 %v10370_v3 }
 0xc5a   :  { %vm10592_vm9 = vcmp.eq.f32.partialorder %v11537_v27, 8.507059e+37  ;;  %vm4554_vm6 = vweird.f32 %v10359_v14  ;;  %v4581_v35 = vsub.f32 1.0, %v4580_v54  ;;  %v4590_v11 = vand.u32 2147483648, %v10370_v3  ;;  %v6137_v54 = vld [vmem:[%s10760_s6] sm:$0xff] }
 0xc5b   :  { %v4662_v18 = vsel %vm4661_vm12, %v6116_v41, %v4658_v52  ;;  %v4673_v57 = vadd.f32 %v6118_v34, %v4672_v8  ;;  %v11540_v50 = vand.u32 2147483647, %v10343_v63  ;;  %v4576_v38 = vor.u32 1.1754944e-38, %v4575_v62 }
 0xc5c   :  { %v4667_v20 = vsel %vm10509_vm1, %v4666_v32, %v4662_v18  ;;  %vm4585_vm13 = vweird.f32 %v10418_v5  ;;  %v4536_v41 = vsub.f32 1.0, %v10431_v46  ;;  %vm4524_vm12 = vweird.f32 %v10346_v49  ;;  %vm10629_vm1 = vmor %vm4509_vm0, %vm4510_vm15  ;;  %v11555_v18 = vld [vmem:[#allocation135_spill] sm:$0xff] }
 0xc5d   :  { %vm10600_vm3 = vcmp.eq.f32.partialorder %v11540_v50, 8.507059e+37  ;;  %v4694_v53 = vmul.f32 %v4667_v20, %v10116_v0  ;;  %v4677_v36 = vsel %vm4676_vm7, %v6118_v34, %v4673_v57  ;;  %v4582_v13 = vmul.f32 %v10418_v5, %v4581_v35  ;;  %vm4586_vm14 = vmor %vm4584_vm2, %vm4585_vm13  ;;  %v11557_v57 = vld [vmem:[#allocation140_spill] sm:$0xff]  ;;  %v4805_v35 = vld [vmem:[%s10765_s10] sm:$0x7] }
 0xc5e   :  { %v4588_v2 = vand.u32 2147483647, %v10370_v3  ;;  %v4682_v32 = vsel %vm10527_vm4, %v4681_v39, %v4677_v36  ;;  %v4577_v10 = vsel %vm10585_vm11, %v4576_v38, %v4572_v6  ;;  %v4537_v4 = vmul.f32 %v10394_v24, %v4536_v41  ;;  %vm4541_vm0 = vmor %vm4539_vm10, %vm4540_vm5  ;;  %v5736_v38 = vld [vmem:[%s10763_s12 + $0x30] sm:$0xff]  ;;  %v4810_v39 = vpop.permute.xlu0 %4809 }
 0xc5f   :  { %v4551_v28 = vsub.f32 1.0, %v10435_v30  ;;  %4706 = vmatpush.msra.mxu2 %v4694_v53  ;;  %v4695_v46 = vmul.f32 %v4682_v32, %v10130_v21  ;;  %v4583_v0 = vadd.f32 %v10418_v5, %v4582_v13  ;;  %v4591_v34 = vor.u32 1.1754944e-38, %v4590_v11  ;;  %v11561_v53 = vld [vmem:[#allocation145_spill] sm:$0xff] }
 0xc60   :  { %v4508_v44 = vadd.f32 %v10364_v1, %v10425_v7  ;;  %v4538_v21 = vadd.f32 %v10394_v24, %v4537_v4  ;;  %vm4555_vm4 = vweird.f32 %v10405_v58  ;;  %v11545_v7 = vsub.f32 1.0, %v10392_v29 }
 0xc61   :  { %v4552_v30 = vmul.f32 %v10405_v58, %v4551_v28  ;;  %4729 = vmatpush.msra.mxu3 %v4695_v46  ;;  %4707 = vmatpush.msra.mxu2 %v4692_v31  ;;  %v4693_v63 = vmul.f32 %v4652_v15, %v10147_v61  ;;  %v4587_v47 = vsel %vm4586_vm14, %v10418_v5, %v4583_v0  ;;  %vm4589_vm15 = vcmp.eq.f32.partialorder %v4588_v2, 8.507059e+37  ;;  %vm4556_vm5 = vmor %vm4554_vm6, %vm4555_vm4  ;;  %v5737_v2 = vld [vmem:[%s10763_s12 + $0x38] sm:$0xff]  ;;  %v6140_v0 = vld [vmem:[%s10761_s13 + $0x30] sm:$0xff] }
 0xc62   :  { %v4522_v43 = vmul.f32 %v10374_v60, %v11545_v7  ;;  %v4512_v3 = vsel %vm10629_vm1, %v10364_v1, %v4508_v44  ;;  %v4592_v37 = vsel %vm4589_vm15, %v4591_v34, %v4587_v47  ;;  %v4542_v29 = vsel %vm4541_vm0, %v10394_v24, %v4538_v21 }
 0xc63   :  { %v4553_v33 = vadd.f32 %v10405_v58, %v4552_v30  ;;  %vm4525_vm8 = vweird.f32 %v10374_v60  ;;  %4730 = vmatpush.msra.mxu3 %v4693_v63  ;;  %4708 = vmatpush.msra.mxu2 %v10523_v9  ;;  %v4691_v61 = vmul.f32 %v4622_v59, %v10160_v26  ;;  %v4688_v5 = vmul.f32 %v4577_v10, %v10162_v17  ;;  %v6141_v30 = vld [vmem:[%s10761_s13 + $0x38] sm:$0xff] }
 0xc64   :  { %v4547_v40 = vsel %vm10592_vm9, %v10409_v45, %v4542_v29  ;;  %v11546_v1 = vand.u32 2147483648, %v10359_v14  ;;  %v11547_v9 = vand.u32 2147483647, %v10359_v14  ;;  %v4517_v17 = vsel %vm10600_vm3, %v10399_v19, %v4512_v3  ;;  %vm4526_vm11 = vmor %vm4524_vm12, %vm4525_vm8 }
 0xc65   :  { %v4557_v31 = vsel %vm4556_vm5, %v10405_v58, %v4553_v33  ;;  %v4523_v23 = vadd.f32 %v10374_v60, %v4522_v43  ;;  %4731 = vmatpush.msra.mxu3 %v4691_v61  ;;  %4709 = vmatpush.msra.mxu2 %v4688_v5  ;;  %v4689_v45 = vmul.f32 %v4592_v37, %v10168_v56  ;;  %v11548_v14 = vand.u32 2147483648, %v10346_v49 }
 0xc66   :  { %v4561_v24 = vor.u32 1.1754944e-38, %v11546_v1  ;;  %vm4559_vm10 = vcmp.eq.f32.partialorder %v11547_v9, 8.507059e+37  ;;  %v4686_v62 = vmul.f32 %v4547_v40, %v10170_v42  ;;  %v11549_v19 = vand.u32 2147483647, %v10346_v49 }
 0xc67   :  { %v4531_v58 = vor.u32 1.1754944e-38, %v11548_v14  ;;  %v4527_v8 = vsel %vm4526_vm11, %v10374_v60, %v4523_v23  ;;  %4732 = vmatpush.msra.mxu3 %v4689_v45  ;;  %v4684_v42 = vmul.f32 %v4517_v17, %v10149_v55  ;;  %vm11550_vm9 = vcmask 392192  }
 0xc68   :  { %v4562_v52 = vsel %vm4559_vm10, %v4561_v24, %v4557_v31  ;;  %vm4529_vm2 = vcmp.eq.f32.partialorder %v11549_v19, 8.507059e+37  ;;  %4710 = vmatpush.msra.mxu2 %v4686_v62  ;;  %vm11551_vm6 = vmmov %vm11550_vm9  ;;  %vm11554_vm13 = vcmask 64512   ;;  %vm4858_vm4 = vcmask 1043456  }
 0xc69   :  { %v4687_v56 = vmul.f32 %v4562_v52, %v10174_v16  ;;  %v4532_v59 = vsel %vm4529_vm2, %v4531_v58, %v4527_v8  ;;  %v6138_v16 = vld [vmem:[%s10760_s6 + $0x8] sm:$0xff]  ;;  %vm11552_vm3 = vmmov %vm11551_vm6 }
 0xc6a   :  { %4711 = vmatpush.msra.mxu2 %v4684_v42  ;;  %v4685_v22 = vmul.f32 %v4532_v59, %v10160_v26  ;;  %vm11553_vm7 = vmmov %vm11552_vm3 }
 0xc6b   :  { %4733 = vmatpush.msra.mxu3 %v4687_v56  ;;  %5730 = vmatmul.msk.f32.vlgmr.msra.gmra.mxu2 %vm11550_vm9, %v6137_v54  ;;  %vm11556_vm12 = vmmov %vm11554_vm13 }
 0xc6c   :  { %vm11558_vm1 = vmmov %vm11556_vm12 }
 0xc6d   :  { %4734 = vmatpush.msra.mxu3 %v4685_v22  ;;  %vm11559_vm14 = vmmov %vm11558_vm1 }
 0xc6e   :  { %5732 = vmatmul.msk.f32.vlgmr.msra.gmra.mxu3 %vm11551_vm6, %v6137_v54  ;;  %vm11562_vm15 = vmmov %vm11558_vm1 }
 0xc6f   :  { %vm11563_vm0 = vmmov %vm11558_vm1 }
 0xc73   :  { %5731 = vmatmul.msk.f32.gmra.mxu2 %vm11552_vm3, %v6138_v16 }
 0xc76   :  { %5733 = vmatmul.msk.f32.gmra.mxu3 %vm11553_vm7, %v6138_v16 }
 0xcee   :  { %v4713_v55 = vpop.f32.mrf.mxu2 }
 0xcf1   :  { %v4736_v49 = vpop.f32.mrf.mxu3 }
 0xcf6   :  { %v4716_v26 = vpop.f32.mrf.mxu2 }
 0xcf7   :  { %v4717_v60 = vadd.f32 %v4716_v26, %v11463_v25 }
 0xcf9   :  { %v4739_v15 = vpop.f32.mrf.mxu3  ;;  %v4742_v6 = vmax.f32 %v4717_v60, 0.0 }
 0xcfa   :  { %v4740_v51 = vadd.f32 %v4739_v15, %v11463_v25  ;;  %v11560_v25 = vld [vmem:[#allocation144_spill] sm:$0xff] }
 0xcfb   :  { %4759 = vmatpush.msrb.mxu2 %v4742_v6  ;;  %v4714_v11 = vadd.f32 %v4713_v55, %v11560_v25  ;;  %v4737_v12 = vadd.f32 %v4736_v49, %v11560_v25 }
 0xcfc   :  { %v4743_v27 = vmax.f32 %v4740_v51, 0.0  ;;  %5734 = vmatmul.msk.f32.vlgmr.msrb.gmra.mxu2 %vm11554_vm13, %v6139_v48 }
 0xcfd   :  { %4830 = vmatpush.msra.mxu2 %v11555_v18 }
 0xcfe   :  { %4779 = vmatpush.msrb.mxu3 %v4743_v27 }
 0xcff   :  { %5735 = vmatmul.msk.f32.vlgmr.msrb.gmra.mxu3 %vm11556_vm12, %v6139_v48 }
 0xd00   :  { %4850 = vmatpush.msra.mxu3 %v11557_v57 }
 0xd04   :  { %5742 = vmatmul.msk.f32.vlgmr.msra.gmra.mxu2 %vm11558_vm1, %v4805_v35 }
 0xd07   :  { %5743 = vmatmul.msk.f32.vlgmr.msra.gmra.mxu3 %vm11559_vm14, %v4805_v35 }
 0xd7f   :  { %v4761_v50 = vpop.f32.mrf.mxu2 }
 0xd80   :  { %v4784_v20 = vadd.f32 %v4761_v50, %v4714_v11 }
 0xd82   :  { %v4781_v41 = vpop.f32.mrf.mxu3  ;;  %v4786_v36 = vadd.f32 %v4784_v20, %v11561_v53 }
 0xd83   :  { %v4785_v13 = vadd.f32 %v4781_v41, %v4737_v12 }
 0xd84   :  { %v4790_v32 = vadd.f32 %v5736_v38, %v4786_v36 }
 0xd85   :  { %v4787_v10 = vadd.f32 %v4785_v13, %v11561_v53 }
 0xd86   :  { %v4794_v4 = vmul.f32 0.1, %v4790_v32 }
 0xd87   :  { %v4791_v28 = vadd.f32 %v5737_v2, %v4787_v10  ;;  %v4832_v46 = vpop.f32.mrf.mxu2 }
 0xd88   :  { %v4798_v34 = vadd.f32 %v6140_v0, %v4794_v4  ;;  %v4833_v43 = vadd.f32 %v4832_v46, %v4810_v39 }
 0xd89   :  { %v4795_v44 = vmul.f32 0.1, %v4791_v28 }
 0xd8a   :  { %v4852_v21 = vpop.f32.mrf.mxu3  ;;  %5740 = vst [vmem:[%s10761_s13 + $0x50] sm:$0xff] %v4798_v34  ;;  %4887 = vmatpush.msrb.mxu2 %v4798_v34  ;;  %v5744_v37 = vclamps-f32 %v4833_v43, 1.0 }
 0xd8b   :  { %v4799_v7 = vadd.f32 %v6141_v30, %v4795_v44  ;;  %v4853_v63 = vadd.f32 %v4852_v21, %v4810_v39  ;;  %5746 = vmatmul.msk.f32.vlgmr.msrb.gmra.mxu2 %vm11562_vm15, %v4805_v35 }
 0xd8d   :  { %5741 = vst [vmem:[%s10761_s13 + $0x58] sm:$0xff] %v4799_v7  ;;  %v4857_v47 = vrot.slane %v4853_v63, 4  ;;  %v5745_v3 = vclamps-f32 %v4853_v63, 1.0  ;;  %4907 = vmatpush.msrb.mxu3 %v4799_v7 }
 0xd8e   :  { %5747 = vmatmul.msk.f32.vlgmr.msrb.gmra.mxu3 %vm11563_vm0, %v4805_v35 }
 0xd8f   :  { %v4859_v29 = vsel %vm4858_vm4, %v4833_v43, %v4857_v47  ;;  %v4868_v33 = vrot.slane %v5745_v3, 4 }
 0xd90   :  { %4861 = vst [vmem:[%s10766_s15] sm:$0x77] %v4859_v29 }
 0xd91   :  { %v4869_v61 = vsel %vm4858_vm4, %v5744_v37, %v4868_v33 }
 0xd92   :  { %4871 = vst [vmem:[%s10767_s14] sm:$0x77] %v4869_v61 }
 0xe0e   :  { %v4889_v5 = vpop.f32.mrf.mxu2 }
 0xe0f   :  { %v4890_v1 = vadd.f32 %v4889_v5, %v4810_v39 }
 0xe11   :  { %v4909_v40 = vpop.f32.mrf.mxu3  ;;  %v5749_v17 = vclamps-f32 %v4890_v1, 1.0 }
 0xe12   :  { %v4910_v24 = vadd.f32 %v4909_v40, %v4810_v39 }
 0xe14   :  { %v4914_v31 = vrot.slane %v4910_v24, 4  ;;  %v5750_v9 = vclamps-f32 %v4910_v24, 1.0 }
 0xe16   :  { %v4915_v23 = vsel %vm4858_vm4, %v4890_v1, %v4914_v31  ;;  %v4925_v45 = vrot.slane %v5750_v9, 4 }
 0xe17   :  { %5748 = vst [vmem:[%s10766_s15 + $0x8] sm:$0x77] %v4915_v23 }
 0xe18   :  { %v4926_v62 = vsel %vm4858_vm4, %v5749_v17, %v4925_v45 }
 0xe19   :  { %5751 = vst [vmem:[%s10767_s14 + $0x8] sm:$0x77] %v4926_v62 }

</bundles_post_ra>
